<compile_context>
chip_gen: v6e
topology: v6e:2x2x1
jax: 0.10.0
libtpu: 0.0.40
codegen_flags: <defaults>
</compile_context>

<pallas_src>
import functools

import jax
import jax.numpy as jnp
from jax.experimental import pallas as pl
from jax.experimental.pallas import tpu as pltpu

EPS = 1e-5          # nn.BatchNorm2d default eps
NEG_SLOPE = 0.01    # nn.LeakyReLU / F.leaky_relu default negative_slope


def _leaky_relu(v):
    return jnp.where(v >= 0, v, NEG_SLOPE * v)


def resblock_kernel(x_ref, w1_ref, w2_ref, p_ref, o_ref, acc_ref, act_ref,
                    *, N, H, W, K, P, CP, NHW, PAD, CH):
    """Whole ResBlock forward, VMEM-resident, convs as tap-decomposed bf16 MXU matmuls."""
    inv_nhw = 1.0 / float(NHW)
    NCH = NHW // CH

    def _aligned(idx):
        # Sublane-alignment hint for dynamic row offsets (PAD and CH are multiples of 8).
        return pl.multiple_of(idx, 8) if CH % 8 == 0 else idx

    def _tap_mask(oh, ow):
        # Per-tap validity mask rebuilt from iotas each tap (cheap VPU work) instead of held
        # live across the whole kernel, to keep vreg pressure bounded.
        m = None
        if oh != 0:
            hh = jax.lax.broadcasted_iota(jnp.int32, (N, H, W, CP), 1).reshape(NHW, CP)
            m = (hh >= -oh) if oh < 0 else (hh < H - oh)
        if ow != 0:
            ww = jax.lax.broadcasted_iota(jnp.int32, (N, H, W, CP), 2).reshape(NHW, CP)
            mw = (ww >= -ow) if ow < 0 else (ww < W - ow)
            m = mw if m is None else (m & mw)
        return m

    # act halo rows are only ever read at masked positions; zero them once anyway (cheap).
    act_ref[0:PAD, :] = jnp.zeros((PAD, CP), jnp.float32)
    act_ref[PAD + NHW:PAD + NHW + PAD, :] = jnp.zeros((PAD, CP), jnp.float32)

    def conv_accum(src_ref, w_ref):
        """KxK conv as K*K tap-decomposed (NHW, CP) @ (CP, CP) bf16 matmuls accumulated into
        the f32 acc_ref scratch.  No im2col materialization; every load/store is a full-lane
        (CP-wide) slab; the (0,0) tap runs first so it initializes acc (no zero fill)."""
        taps = [(0, 0)] + [(oh, ow)
                           for oh in range(-P, P + 1) for ow in range(-P, P + 1)
                           if not (oh == 0 and ow == 0)]
        for idx, (oh, ow) in enumerate(taps):
            tap = (oh + P) * K + (ow + P)
            d = oh * W + ow
            # Static shifted read out of the halo-padded source slab (never OOB since PAD >= W+1).
            slab = src_ref[PAD + d:PAD + d + NHW, :]
            m = _tap_mask(oh, ow)
            if m is not None:
                slab = jnp.where(m, slab, 0.0)
            contrib = jnp.dot(slab.astype(jnp.bfloat16), w_ref[tap],
                              preferred_element_type=jnp.float32)
            if idx == 0:
                acc_ref[...] = contrib
            else:
                acc_ref[...] += contrib

    def bn_scale_shift(gamma_row, beta_row):
        """Training-mode BatchNorm folded to one per-channel scale/shift.  Chunked f32
        sum / sum-of-squares (single pass, biased variance) so the full activation never has
        to live in vregs.  Conv bias omitted: the batch-mean subtraction cancels it exactly."""
        def body(i, carry):
            s, ss = carry
            blk = acc_ref[pl.ds(_aligned(i * CH), CH), :]
            return (s + jnp.sum(blk, axis=0, keepdims=True),
                    ss + jnp.sum(blk * blk, axis=0, keepdims=True))
        z = jnp.zeros((1, CP), jnp.float32)
        s, ss = jax.lax.fori_loop(0, NCH, body, (z, z))
        mu = s * inv_nhw
        var = ss * inv_nhw - mu * mu                       # f32 throughout
        scale = p_ref[gamma_row:gamma_row + 1, :] * jax.lax.rsqrt(var + EPS)
        shift = p_ref[beta_row:beta_row + 1, :] - mu * scale
        return scale, shift

    # ---- stage 1: conv1 -> BN1 -> LeakyReLU (activations stay lane-dense in act_ref) ----
    conv_accum(x_ref, w1_ref)
    scale1, shift1 = bn_scale_shift(0, 1)

    @pl.loop(0, NCH)
    def _(i):
        y = acc_ref[pl.ds(_aligned(i * CH), CH), :] * scale1 + shift1
        act_ref[pl.ds(_aligned(PAD + i * CH), CH), :] = _leaky_relu(y)

    # ---- stage 2: conv2 -> BN2 -> residual add -> LeakyReLU ----
    conv_accum(act_ref, w2_ref)
    scale2, shift2 = bn_scale_shift(2, 3)

    @pl.loop(0, NCH)
    def _(i):
        y = acc_ref[pl.ds(_aligned(i * CH), CH), :] * scale2 + shift2
        res = x_ref[pl.ds(_aligned(PAD + i * CH), CH), :]
        o_ref[pl.ds(_aligned(i * CH), CH), :] = _leaky_relu(res + y)


def _pack_weight(w, C, K, CP):
    """OIHW conv weight -> (K*K, CP, CP) bf16 per-tap matrices with Wtap[cin, cout]."""
    wt = jnp.transpose(w, (2, 3, 1, 0)).reshape(K * K, C, C)          # (K*K, Cin, Cout)
    wt = jnp.pad(wt, ((0, 0), (0, CP - C), (0, CP - C)))
    return wt.astype(jnp.bfloat16)


def _pick_chunk(nrows, cap=4096):
    """Largest divisor of nrows <= cap, preferring sublane-aligned (multiple-of-8) chunks."""
    if nrows <= cap:
        return nrows
    divs = [d for d in range(1, cap + 1) if nrows % d == 0]
    aligned = [d for d in divs if d % 8 == 0]
    return max(aligned) if aligned else max(divs)


def _derive_vmem_limit(working_set_bytes):
    """Scoped-VMEM limit derived from the actual working set, capped by the physical VMEM of
    the current generation (128 MiB v5e/v6e, 64 MiB per core on v7x)."""
    try:
        cap = int(pltpu.get_tpu_info().vmem_capacity_bytes)
    except Exception:
        cap = 64 * 1024 * 1024          # conservative fallback (v7x per-core)
    want = int(working_set_bytes) + (8 << 20)     # headroom for Mosaic-internal scratch
    return int(min(max(want, 16 << 20), int(cap * 0.85)))


def resblock_pallas(x, params, *, kernel_size=3, padding=1, stride=1):
    # Conv biases are intentionally unused: training-mode BN's mean subtraction cancels them.
    w1, b1, g1, be1, w2, b2, g2, be2 = params
    N, C, H, W = x.shape
    K, P = kernel_size, padding
    assert stride == 1 and K == 2 * P + 1, "residual add needs a shape-preserving conv"
    assert W % 8 == 0, "W must be a multiple of 8 (sublane width) for copy-free row merges"
    CP = ((C + 127) // 128) * 128       # channels padded to the 128-lane width (lane-dense)
    NHW = N * H * W
    PAD = ((W + 1 + 7) // 8) * 8        # halo rows (>= W+1) so shifted tap reads never go OOB
    CH = _pick_chunk(NHW)               # row-chunk for BN stats / epilogue passes

    # Layout plumbing stays in the wrapper: NCHW -> lane-dense (N*H*W, CP) rows + zero halos.
    xl = jnp.transpose(x, (0, 2, 3, 1)).astype(jnp.float32)
    xl = jnp.pad(xl, ((0, 0), (0, 0), (0, 0), (0, CP - C))).reshape(NHW, CP)
    xl = jnp.pad(xl, ((PAD, PAD), (0, 0)))

    w1m = _pack_weight(w1, C, K, CP)
    w2m = _pack_weight(w2, C, K, CP)
    padc = lambda v: jnp.pad(v.astype(jnp.float32), (0, CP - C))
    pmat = jnp.stack([padc(g1), padc(be1), padc(g2), padc(be2)])      # (4, CP) f32

    work_bytes = (xl.size * 4 + w1m.size * 2 + w2m.size * 2 + pmat.size * 4
                  + NHW * CP * 4                       # output slab
                  + NHW * CP * 4                       # conv accumulator scratch
                  + (NHW + 2 * PAD) * CP * 4)          # stage-1 activation scratch

    kern = functools.partial(resblock_kernel, N=N, H=H, W=W, K=K, P=P, CP=CP,
                             NHW=NHW, PAD=PAD, CH=CH)
    vmem = pl.BlockSpec(memory_space=pltpu.MemorySpace.VMEM)

    out2d = pl.pallas_call(
        kern,
        out_shape=jax.ShapeDtypeStruct((NHW, CP), jnp.float32),       # lane-dense output slab
        in_specs=[vmem, vmem, vmem, vmem],
        out_specs=vmem,
        scratch_shapes=[
            pltpu.VMEM((NHW, CP), jnp.float32),             # conv accumulator (both stages)
            pltpu.VMEM((NHW + 2 * PAD, CP), jnp.float32),   # stage-1 activations (+ halos)
        ],
        compiler_params=pltpu.CompilerParams(
            vmem_limit_bytes=_derive_vmem_limit(work_bytes)),
    )(xl, w1m, w2m, pmat)

    # lane-dense (N*H*W, CP) -> NCHW, dropping the padded channels.
    out = out2d.reshape(N, H, W, CP)[:, :, :, :C]
    return jnp.transpose(out, (0, 3, 1, 2))


def resblock_ref(x, params):
    """Pure-JAX reference for validation (faithful to the PyTorch module, incl. conv bias)."""
    w1, b1, g1, be1, w2, b2, g2, be2 = params

    def conv(v, w, b):
        out = jax.lax.conv_general_dilated(
            v, w, window_strides=(1, 1), padding=((1, 1), (1, 1)),
            dimension_numbers=('NCHW', 'OIHW', 'NCHW'),
            precision=jax.lax.Precision.HIGHEST)
        return out + b[None, :, None, None]

    def bn(v, g, be):
        mu = jnp.mean(v, axis=(0, 2, 3), keepdims=True)
        var = jnp.mean((v - mu) ** 2, axis=(0, 2, 3), keepdims=True)
        return (v - mu) * jax.lax.rsqrt(var + EPS) * g[None, :, None, None] + be[None, :, None, None]

    y = _leaky_relu(bn(conv(x, w1, b1), g1, be1))
    y = bn(conv(y, w2, b2), g2, be2)
    return _leaky_relu(x + y)


if __name__ == "__main__":
    N, C, H, W, K = 2, 4, 16, 16, 3

    key = jax.random.PRNGKey(0)
    ks = jax.random.split(key, 9)
    x = jax.random.normal(ks[0], (N, C, H, W), jnp.float32)
    # Deterministic synthetic parameters (shapes follow nn.Conv2d(C,C,3) / nn.BatchNorm2d(C)).
    w1 = 0.1 * jax.random.normal(ks[1], (C, C, K, K), jnp.float32)
    b1 = 0.1 * jax.random.normal(ks[2], (C,), jnp.float32)
    g1 = 1.0 + 0.1 * jax.random.normal(ks[3], (C,), jnp.float32)
    be1 = 0.1 * jax.random.normal(ks[4], (C,), jnp.float32)
    w2 = 0.1 * jax.random.normal(ks[5], (C, C, K, K), jnp.float32)
    b2 = 0.1 * jax.random.normal(ks[6], (C,), jnp.float32)
    g2 = 1.0 + 0.1 * jax.random.normal(ks[7], (C,), jnp.float32)
    be2 = 0.1 * jax.random.normal(ks[8], (C,), jnp.float32)
    params = (w1, b1, g1, be1, w2, b2, g2, be2)

    out = resblock_pallas(x, params)
    out = jax.block_until_ready(out)

    ref = resblock_ref(x, params)
    assert out.shape == ref.shape == (N, C, H, W)
    # Tolerance reflects the bf16 MXU operands requested by the perf review (two bf16-operand
    # convs, each followed by a variance normalization); accumulation and BN stats are f32.
    max_err = float(jnp.max(jnp.abs(out - ref)))
    if max_err > 3e-2:
        raise AssertionError(f"Pallas ResBlock mismatch vs reference, max abs err = {max_err}")
    print("KERNEL_OK")
</pallas_src>

<mosaic_0001>
module attributes {stable_mosaic.version = 11 : i64} {
  func.func @resblock_kernel(%arg0: memref<560x128xf32, #tpu.memory_space<vmem>>, %arg1: memref<9x128x128xbf16, #tpu.memory_space<vmem>>, %arg2: memref<9x128x128xbf16, #tpu.memory_space<vmem>>, %arg3: memref<4x128xf32, #tpu.memory_space<vmem>>, %arg4: memref<512x128xf32, #tpu.memory_space<vmem>>, %arg5: memref<512x128xf32, #tpu.memory_space<vmem>>, %arg6: memref<560x128xf32, #tpu.memory_space<vmem>>) attributes {dimension_semantics = [], scalar_prefetch = 0 : i64, scratch_operands = 2 : i64, tpu.core_type = #tpu.core_type<tc>} {
    %cst = arith.constant 0.000000e+00 : f32
    %0 = vector.broadcast %cst : f32 to vector<24x128xf32>
    %c0 = arith.constant 0 : index
    %c0_0 = arith.constant 0 : index
    %1 = vector.load %arg6[%c0, %c0_0] : memref<560x128xf32, #tpu.memory_space<vmem>>, vector<24x128xf32>
    tpu.vector_store %arg6[%c0, %c0_0], %0 {strides = array<i32>} : memref<560x128xf32, #tpu.memory_space<vmem>>, vector<24x128xf32>,
    %cst_1 = arith.constant 0.000000e+00 : f32
    %2 = vector.broadcast %cst_1 : f32 to vector<24x128xf32>
    %c536 = arith.constant 536 : index
    %c0_2 = arith.constant 0 : index
    %3 = vector.load %arg6[%c536, %c0_2] : memref<560x128xf32, #tpu.memory_space<vmem>>, vector<24x128xf32>
    tpu.vector_store %arg6[%c536, %c0_2], %2 {strides = array<i32>} : memref<560x128xf32, #tpu.memory_space<vmem>>, vector<24x128xf32>,
    %c24 = arith.constant 24 : index
    %c0_3 = arith.constant 0 : index
    %4 = vector.load %arg0[%c24, %c0_3] : memref<560x128xf32, #tpu.memory_space<vmem>>, vector<512x128xf32>
    %5 = arith.truncf %4 : vector<512x128xf32> to vector<512x128xbf16>
    %c4 = arith.constant 4 : index
    %c0_4 = arith.constant 0 : index
    %c0_5 = arith.constant 0 : index
    %6 = vector.load %arg1[%c4, %c0_4, %c0_5] : memref<9x128x128xbf16, #tpu.memory_space<vmem>>, vector<1x128x128xbf16>
    %7 = vector.shape_cast %6 : vector<1x128x128xbf16> to vector<128x128xbf16>
    %cst_6 = arith.constant dense<0.000000e+00> : vector<512x128xf32>
    %8 = tpu.matmul %5, %7, %cst_6 {dimension_numbers = #tpu.dot_dimension_numbers<[1], [0], [0], [1], [0, 0, 1, 1], [], []>} : vector<512x128xbf16>, vector<128x128xbf16>, vector<512x128xf32> -> vector<512x128xf32>
    %c0_7 = arith.constant 0 : index
    %c0_8 = arith.constant 0 : index
    %9 = vector.load %arg5[%c0_7, %c0_8] : memref<512x128xf32, #tpu.memory_space<vmem>>, vector<512x128xf32>
    tpu.vector_store %arg5[%c0_7, %c0_8], %8 {strides = array<i32>} : memref<512x128xf32, #tpu.memory_space<vmem>>, vector<512x128xf32>,
    %c7 = arith.constant 7 : index
    %c0_9 = arith.constant 0 : index
    %10 = vector.load %arg0[%c7, %c0_9] : memref<560x128xf32, #tpu.memory_space<vmem>>, vector<512x128xf32>
    %11 = tpu.iota {dimensions = array<i32: 1>} : vector<2x16x16x128xi32>
    %12 = vector.shape_cast %11 : vector<2x16x16x128xi32> to vector<512x128xi32>
    %c1_i32 = arith.constant 1 : i32
    %13 = vector.broadcast %c1_i32 : i32 to vector<512x128xi32>
    %14 = arith.cmpi sge, %12, %13 : vector<512x128xi32>
    %15 = tpu.iota {dimensions = array<i32: 2>} : vector<2x16x16x128xi32>
    %16 = vector.shape_cast %15 : vector<2x16x16x128xi32> to vector<512x128xi32>
    %c1_i32_10 = arith.constant 1 : i32
    %17 = vector.broadcast %c1_i32_10 : i32 to vector<512x128xi32>
    %18 = arith.cmpi sge, %16, %17 : vector<512x128xi32>
    %19 = arith.andi %14, %18 : vector<512x128xi1>
    %cst_11 = arith.constant 0.000000e+00 : f32
    %20 = vector.broadcast %cst_11 : f32 to vector<512x128xf32>
    %21 = arith.select %19, %10, %20 : vector<512x128xi1>, vector<512x128xf32>
    %22 = arith.truncf %21 : vector<512x128xf32> to vector<512x128xbf16>
    %c0_12 = arith.constant 0 : index
    %c0_13 = arith.constant 0 : index
    %c0_14 = arith.constant 0 : index
    %23 = vector.load %arg1[%c0_12, %c0_13, %c0_14] : memref<9x128x128xbf16, #tpu.memory_space<vmem>>, vector<1x128x128xbf16>
    %24 = vector.shape_cast %23 : vector<1x128x128xbf16> to vector<128x128xbf16>
    %cst_15 = arith.constant dense<0.000000e+00> : vector<512x128xf32>
    %25 = tpu.matmul %22, %24, %cst_15 {dimension_numbers = #tpu.dot_dimension_numbers<[1], [0], [0], [1], [0, 0, 1, 1], [], []>} : vector<512x128xbf16>, vector<128x128xbf16>, vector<512x128xf32> -> vector<512x128xf32>
    %c0_16 = arith.constant 0 : index
    %c0_17 = arith.constant 0 : index
    %26 = vector.load %arg5[%c0_16, %c0_17] : memref<512x128xf32, #tpu.memory_space<vmem>>, vector<512x128xf32>
    %27 = arith.addf %26, %25 : vector<512x128xf32>
    %c0_18 = arith.constant 0 : index
    %c0_19 = arith.constant 0 : index
    %28 = vector.load %arg5[%c0_18, %c0_19] : memref<512x128xf32, #tpu.memory_space<vmem>>, vector<512x128xf32>
    tpu.vector_store %arg5[%c0_18, %c0_19], %27 {strides = array<i32>} : memref<512x128xf32, #tpu.memory_space<vmem>>, vector<512x128xf32>,
    %c8 = arith.constant 8 : index
    %c0_20 = arith.constant 0 : index
    %29 = vector.load %arg0[%c8, %c0_20] : memref<560x128xf32, #tpu.memory_space<vmem>>, vector<512x128xf32>
    %30 = tpu.iota {dimensions = array<i32: 1>} : vector<2x16x16x128xi32>
    %31 = vector.shape_cast %30 : vector<2x16x16x128xi32> to vector<512x128xi32>
    %c1_i32_21 = arith.constant 1 : i32
    %32 = vector.broadcast %c1_i32_21 : i32 to vector<512x128xi32>
    %33 = arith.cmpi sge, %31, %32 : vector<512x128xi32>
    %cst_22 = arith.constant 0.000000e+00 : f32
    %34 = vector.broadcast %cst_22 : f32 to vector<512x128xf32>
    %35 = arith.select %33, %29, %34 : vector<512x128xi1>, vector<512x128xf32>
    %36 = arith.truncf %35 : vector<512x128xf32> to vector<512x128xbf16>
    %c1 = arith.constant 1 : index
    %c0_23 = arith.constant 0 : index
    %c0_24 = arith.constant 0 : index
    %37 = vector.load %arg1[%c1, %c0_23, %c0_24] : memref<9x128x128xbf16, #tpu.memory_space<vmem>>, vector<1x128x128xbf16>
    %38 = vector.shape_cast %37 : vector<1x128x128xbf16> to vector<128x128xbf16>
    %cst_25 = arith.constant dense<0.000000e+00> : vector<512x128xf32>
    %39 = tpu.matmul %36, %38, %cst_25 {dimension_numbers = #tpu.dot_dimension_numbers<[1], [0], [0], [1], [0, 0, 1, 1], [], []>} : vector<512x128xbf16>, vector<128x128xbf16>, vector<512x128xf32> -> vector<512x128xf32>
    %c0_26 = arith.constant 0 : index
    %c0_27 = arith.constant 0 : index
    %40 = vector.load %arg5[%c0_26, %c0_27] : memref<512x128xf32, #tpu.memory_space<vmem>>, vector<512x128xf32>
    %41 = arith.addf %40, %39 : vector<512x128xf32>
    %c0_28 = arith.constant 0 : index
    %c0_29 = arith.constant 0 : index
    %42 = vector.load %arg5[%c0_28, %c0_29] : memref<512x128xf32, #tpu.memory_space<vmem>>, vector<512x128xf32>
    tpu.vector_store %arg5[%c0_28, %c0_29], %41 {strides = array<i32>} : memref<512x128xf32, #tpu.memory_space<vmem>>, vector<512x128xf32>,
    %c9 = arith.constant 9 : index
    %c0_30 = arith.constant 0 : index
    %43 = vector.load %arg0[%c9, %c0_30] : memref<560x128xf32, #tpu.memory_space<vmem>>, vector<512x128xf32>
    %44 = tpu.iota {dimensions = array<i32: 1>} : vector<2x16x16x128xi32>
    %45 = vector.shape_cast %44 : vector<2x16x16x128xi32> to vector<512x128xi32>
    %c1_i32_31 = arith.constant 1 : i32
    %46 = vector.broadcast %c1_i32_31 : i32 to vector<512x128xi32>
    %47 = arith.cmpi sge, %45, %46 : vector<512x128xi32>
    %48 = tpu.iota {dimensions = array<i32: 2>} : vector<2x16x16x128xi32>
    %49 = vector.shape_cast %48 : vector<2x16x16x128xi32> to vector<512x128xi32>
    %c15_i32 = arith.constant 15 : i32
    %50 = vector.broadcast %c15_i32 : i32 to vector<512x128xi32>
    %51 = arith.cmpi slt, %49, %50 : vector<512x128xi32>
    %52 = arith.andi %47, %51 : vector<512x128xi1>
    %cst_32 = arith.constant 0.000000e+00 : f32
    %53 = vector.broadcast %cst_32 : f32 to vector<512x128xf32>
    %54 = arith.select %52, %43, %53 : vector<512x128xi1>, vector<512x128xf32>
    %55 = arith.truncf %54 : vector<512x128xf32> to vector<512x128xbf16>
    %c2 = arith.constant 2 : index
    %c0_33 = arith.constant 0 : index
    %c0_34 = arith.constant 0 : index
    %56 = vector.load %arg1[%c2, %c0_33, %c0_34] : memref<9x128x128xbf16, #tpu.memory_space<vmem>>, vector<1x128x128xbf16>
    %57 = vector.shape_cast %56 : vector<1x128x128xbf16> to vector<128x128xbf16>
    %cst_35 = arith.constant dense<0.000000e+00> : vector<512x128xf32>
    %58 = tpu.matmul %55, %57, %cst_35 {dimension_numbers = #tpu.dot_dimension_numbers<[1], [0], [0], [1], [0, 0, 1, 1], [], []>} : vector<512x128xbf16>, vector<128x128xbf16>, vector<512x128xf32> -> vector<512x128xf32>
    %c0_36 = arith.constant 0 : index
    %c0_37 = arith.constant 0 : index
    %59 = vector.load %arg5[%c0_36, %c0_37] : memref<512x128xf32, #tpu.memory_space<vmem>>, vector<512x128xf32>
    %60 = arith.addf %59, %58 : vector<512x128xf32>
    %c0_38 = arith.constant 0 : index
    %c0_39 = arith.constant 0 : index
    %61 = vector.load %arg5[%c0_38, %c0_39] : memref<512x128xf32, #tpu.memory_space<vmem>>, vector<512x128xf32>
    tpu.vector_store %arg5[%c0_38, %c0_39], %60 {strides = array<i32>} : memref<512x128xf32, #tpu.memory_space<vmem>>, vector<512x128xf32>,
    %c23 = arith.constant 23 : index
    %c0_40 = arith.constant 0 : index
    %62 = vector.load %arg0[%c23, %c0_40] : memref<560x128xf32, #tpu.memory_space<vmem>>, vector<512x128xf32>
    %63 = tpu.iota {dimensions = array<i32: 2>} : vector<2x16x16x128xi32>
    %64 = vector.shape_cast %63 : vector<2x16x16x128xi32> to vector<512x128xi32>
    %c1_i32_41 = arith.constant 1 : i32
    %65 = vector.broadcast %c1_i32_41 : i32 to vector<512x128xi32>
    %66 = arith.cmpi sge, %64, %65 : vector<512x128xi32>
    %cst_42 = arith.constant 0.000000e+00 : f32
    %67 = vector.broadcast %cst_42 : f32 to vector<512x128xf32>
    %68 = arith.select %66, %62, %67 : vector<512x128xi1>, vector<512x128xf32>
    %69 = arith.truncf %68 : vector<512x128xf32> to vector<512x128xbf16>
    %c3 = arith.constant 3 : index
    %c0_43 = arith.constant 0 : index
    %c0_44 = arith.constant 0 : index
    %70 = vector.load %arg1[%c3, %c0_43, %c0_44] : memref<9x128x128xbf16, #tpu.memory_space<vmem>>, vector<1x128x128xbf16>
    %71 = vector.shape_cast %70 : vector<1x128x128xbf16> to vector<128x128xbf16>
    %cst_45 = arith.constant dense<0.000000e+00> : vector<512x128xf32>
    %72 = tpu.matmul %69, %71, %cst_45 {dimension_numbers = #tpu.dot_dimension_numbers<[1], [0], [0], [1], [0, 0, 1, 1], [], []>} : vector<512x128xbf16>, vector<128x128xbf16>, vector<512x128xf32> -> vector<512x128xf32>
    %c0_46 = arith.constant 0 : index
    %c0_47 = arith.constant 0 : index
    %73 = vector.load %arg5[%c0_46, %c0_47] : memref<512x128xf32, #tpu.memory_space<vmem>>, vector<512x128xf32>
    %74 = arith.addf %73, %72 : vector<512x128xf32>
    %c0_48 = arith.constant 0 : index
    %c0_49 = arith.constant 0 : index
    %75 = vector.load %arg5[%c0_48, %c0_49] : memref<512x128xf32, #tpu.memory_space<vmem>>, vector<512x128xf32>
    tpu.vector_store %arg5[%c0_48, %c0_49], %74 {strides = array<i32>} : memref<512x128xf32, #tpu.memory_space<vmem>>, vector<512x128xf32>,
    %c25 = arith.constant 25 : index
    %c0_50 = arith.constant 0 : index
    %76 = vector.load %arg0[%c25, %c0_50] : memref<560x128xf32, #tpu.memory_space<vmem>>, vector<512x128xf32>
    %77 = tpu.iota {dimensions = array<i32: 2>} : vector<2x16x16x128xi32>
    %78 = vector.shape_cast %77 : vector<2x16x16x128xi32> to vector<512x128xi32>
    %c15_i32_51 = arith.constant 15 : i32
    %79 = vector.broadcast %c15_i32_51 : i32 to vector<512x128xi32>
    %80 = arith.cmpi slt, %78, %79 : vector<512x128xi32>
    %cst_52 = arith.constant 0.000000e+00 : f32
    %81 = vector.broadcast %cst_52 : f32 to vector<512x128xf32>
    %82 = arith.select %80, %76, %81 : vector<512x128xi1>, vector<512x128xf32>
    %83 = arith.truncf %82 : vector<512x128xf32> to vector<512x128xbf16>
    %c5 = arith.constant 5 : index
    %c0_53 = arith.constant 0 : index
    %c0_54 = arith.constant 0 : index
    %84 = vector.load %arg1[%c5, %c0_53, %c0_54] : memref<9x128x128xbf16, #tpu.memory_space<vmem>>, vector<1x128x128xbf16>
    %85 = vector.shape_cast %84 : vector<1x128x128xbf16> to vector<128x128xbf16>
    %cst_55 = arith.constant dense<0.000000e+00> : vector<512x128xf32>
    %86 = tpu.matmul %83, %85, %cst_55 {dimension_numbers = #tpu.dot_dimension_numbers<[1], [0], [0], [1], [0, 0, 1, 1], [], []>} : vector<512x128xbf16>, vector<128x128xbf16>, vector<512x128xf32> -> vector<512x128xf32>
    %c0_56 = arith.constant 0 : index
    %c0_57 = arith.constant 0 : index
    %87 = vector.load %arg5[%c0_56, %c0_57] : memref<512x128xf32, #tpu.memory_space<vmem>>, vector<512x128xf32>
    %88 = arith.addf %87, %86 : vector<512x128xf32>
    %c0_58 = arith.constant 0 : index
    %c0_59 = arith.constant 0 : index
    %89 = vector.load %arg5[%c0_58, %c0_59] : memref<512x128xf32, #tpu.memory_space<vmem>>, vector<512x128xf32>
    tpu.vector_store %arg5[%c0_58, %c0_59], %88 {strides = array<i32>} : memref<512x128xf32, #tpu.memory_space<vmem>>, vector<512x128xf32>,
    %c39 = arith.constant 39 : index
    %c0_60 = arith.constant 0 : index
    %90 = vector.load %arg0[%c39, %c0_60] : memref<560x128xf32, #tpu.memory_space<vmem>>, vector<512x128xf32>
    %91 = tpu.iota {dimensions = array<i32: 1>} : vector<2x16x16x128xi32>
    %92 = vector.shape_cast %91 : vector<2x16x16x128xi32> to vector<512x128xi32>
    %c15_i32_61 = arith.constant 15 : i32
    %93 = vector.broadcast %c15_i32_61 : i32 to vector<512x128xi32>
    %94 = arith.cmpi slt, %92, %93 : vector<512x128xi32>
    %95 = tpu.iota {dimensions = array<i32: 2>} : vector<2x16x16x128xi32>
    %96 = vector.shape_cast %95 : vector<2x16x16x128xi32> to vector<512x128xi32>
    %c1_i32_62 = arith.constant 1 : i32
    %97 = vector.broadcast %c1_i32_62 : i32 to vector<512x128xi32>
    %98 = arith.cmpi sge, %96, %97 : vector<512x128xi32>
    %99 = arith.andi %94, %98 : vector<512x128xi1>
    %cst_63 = arith.constant 0.000000e+00 : f32
    %100 = vector.broadcast %cst_63 : f32 to vector<512x128xf32>
    %101 = arith.select %99, %90, %100 : vector<512x128xi1>, vector<512x128xf32>
    %102 = arith.truncf %101 : vector<512x128xf32> to vector<512x128xbf16>
    %c6 = arith.constant 6 : index
    %c0_64 = arith.constant 0 : index
    %c0_65 = arith.constant 0 : index
    %103 = vector.load %arg1[%c6, %c0_64, %c0_65] : memref<9x128x128xbf16, #tpu.memory_space<vmem>>, vector<1x128x128xbf16>
    %104 = vector.shape_cast %103 : vector<1x128x128xbf16> to vector<128x128xbf16>
    %cst_66 = arith.constant dense<0.000000e+00> : vector<512x128xf32>
    %105 = tpu.matmul %102, %104, %cst_66 {dimension_numbers = #tpu.dot_dimension_numbers<[1], [0], [0], [1], [0, 0, 1, 1], [], []>} : vector<512x128xbf16>, vector<128x128xbf16>, vector<512x128xf32> -> vector<512x128xf32>
    %c0_67 = arith.constant 0 : index
    %c0_68 = arith.constant 0 : index
    %106 = vector.load %arg5[%c0_67, %c0_68] : memref<512x128xf32, #tpu.memory_space<vmem>>, vector<512x128xf32>
    %107 = arith.addf %106, %105 : vector<512x128xf32>
    %c0_69 = arith.constant 0 : index
    %c0_70 = arith.constant 0 : index
    %108 = vector.load %arg5[%c0_69, %c0_70] : memref<512x128xf32, #tpu.memory_space<vmem>>, vector<512x128xf32>
    tpu.vector_store %arg5[%c0_69, %c0_70], %107 {strides = array<i32>} : memref<512x128xf32, #tpu.memory_space<vmem>>, vector<512x128xf32>,
    %c40 = arith.constant 40 : index
    %c0_71 = arith.constant 0 : index
    %109 = vector.load %arg0[%c40, %c0_71] : memref<560x128xf32, #tpu.memory_space<vmem>>, vector<512x128xf32>
    %110 = tpu.iota {dimensions = array<i32: 1>} : vector<2x16x16x128xi32>
    %111 = vector.shape_cast %110 : vector<2x16x16x128xi32> to vector<512x128xi32>
    %c15_i32_72 = arith.constant 15 : i32
    %112 = vector.broadcast %c15_i32_72 : i32 to vector<512x128xi32>
    %113 = arith.cmpi slt, %111, %112 : vector<512x128xi32>
    %cst_73 = arith.constant 0.000000e+00 : f32
    %114 = vector.broadcast %cst_73 : f32 to vector<512x128xf32>
    %115 = arith.select %113, %109, %114 : vector<512x128xi1>, vector<512x128xf32>
    %116 = arith.truncf %115 : vector<512x128xf32> to vector<512x128xbf16>
    %c7_74 = arith.constant 7 : index
    %c0_75 = arith.constant 0 : index
    %c0_76 = arith.constant 0 : index
    %117 = vector.load %arg1[%c7_74, %c0_75, %c0_76] : memref<9x128x128xbf16, #tpu.memory_space<vmem>>, vector<1x128x128xbf16>
    %118 = vector.shape_cast %117 : vector<1x128x128xbf16> to vector<128x128xbf16>
    %cst_77 = arith.constant dense<0.000000e+00> : vector<512x128xf32>
    %119 = tpu.matmul %116, %118, %cst_77 {dimension_numbers = #tpu.dot_dimension_numbers<[1], [0], [0], [1], [0, 0, 1, 1], [], []>} : vector<512x128xbf16>, vector<128x128xbf16>, vector<512x128xf32> -> vector<512x128xf32>
    %c0_78 = arith.constant 0 : index
    %c0_79 = arith.constant 0 : index
    %120 = vector.load %arg5[%c0_78, %c0_79] : memref<512x128xf32, #tpu.memory_space<vmem>>, vector<512x128xf32>
    %121 = arith.addf %120, %119 : vector<512x128xf32>
    %c0_80 = arith.constant 0 : index
    %c0_81 = arith.constant 0 : index
    %122 = vector.load %arg5[%c0_80, %c0_81] : memref<512x128xf32, #tpu.memory_space<vmem>>, vector<512x128xf32>
    tpu.vector_store %arg5[%c0_80, %c0_81], %121 {strides = array<i32>} : memref<512x128xf32, #tpu.memory_space<vmem>>, vector<512x128xf32>,
    %c41 = arith.constant 41 : index
    %c0_82 = arith.constant 0 : index
    %123 = vector.load %arg0[%c41, %c0_82] : memref<560x128xf32, #tpu.memory_space<vmem>>, vector<512x128xf32>
    %124 = tpu.iota {dimensions = array<i32: 1>} : vector<2x16x16x128xi32>
    %125 = vector.shape_cast %124 : vector<2x16x16x128xi32> to vector<512x128xi32>
    %c15_i32_83 = arith.constant 15 : i32
    %126 = vector.broadcast %c15_i32_83 : i32 to vector<512x128xi32>
    %127 = arith.cmpi slt, %125, %126 : vector<512x128xi32>
    %128 = tpu.iota {dimensions = array<i32: 2>} : vector<2x16x16x128xi32>
    %129 = vector.shape_cast %128 : vector<2x16x16x128xi32> to vector<512x128xi32>
    %c15_i32_84 = arith.constant 15 : i32
    %130 = vector.broadcast %c15_i32_84 : i32 to vector<512x128xi32>
    %131 = arith.cmpi slt, %129, %130 : vector<512x128xi32>
    %132 = arith.andi %127, %131 : vector<512x128xi1>
    %cst_85 = arith.constant 0.000000e+00 : f32
    %133 = vector.broadcast %cst_85 : f32 to vector<512x128xf32>
    %134 = arith.select %132, %123, %133 : vector<512x128xi1>, vector<512x128xf32>
    %135 = arith.truncf %134 : vector<512x128xf32> to vector<512x128xbf16>
    %c8_86 = arith.constant 8 : index
    %c0_87 = arith.constant 0 : index
    %c0_88 = arith.constant 0 : index
    %136 = vector.load %arg1[%c8_86, %c0_87, %c0_88] : memref<9x128x128xbf16, #tpu.memory_space<vmem>>, vector<1x128x128xbf16>
    %137 = vector.shape_cast %136 : vector<1x128x128xbf16> to vector<128x128xbf16>
    %cst_89 = arith.constant dense<0.000000e+00> : vector<512x128xf32>
    %138 = tpu.matmul %135, %137, %cst_89 {dimension_numbers = #tpu.dot_dimension_numbers<[1], [0], [0], [1], [0, 0, 1, 1], [], []>} : vector<512x128xbf16>, vector<128x128xbf16>, vector<512x128xf32> -> vector<512x128xf32>
    %c0_90 = arith.constant 0 : index
    %c0_91 = arith.constant 0 : index
    %139 = vector.load %arg5[%c0_90, %c0_91] : memref<512x128xf32, #tpu.memory_space<vmem>>, vector<512x128xf32>
    %140 = arith.addf %139, %138 : vector<512x128xf32>
    %c0_92 = arith.constant 0 : index
    %c0_93 = arith.constant 0 : index
    %141 = vector.load %arg5[%c0_92, %c0_93] : memref<512x128xf32, #tpu.memory_space<vmem>>, vector<512x128xf32>
    tpu.vector_store %arg5[%c0_92, %c0_93], %140 {strides = array<i32>} : memref<512x128xf32, #tpu.memory_space<vmem>>, vector<512x128xf32>,
    %cst_94 = arith.constant 0.000000e+00 : f32
    %142 = vector.broadcast %cst_94 : f32 to vector<1x128xf32>
    %c0_i32 = arith.constant 0 : i32
    %c512_i32 = arith.constant 512 : i32
    %143 = arith.muli %c0_i32, %c512_i32 : i32
    %144 = tpu.assume_multiple %143, 8 : i32
    %145 = arith.index_cast %144 : i32 to index
    %c0_95 = arith.constant 0 : index
    %146 = vector.load %arg5[%145, %c0_95] : memref<512x128xf32, #tpu.memory_space<vmem>>, vector<512x128xf32>
    %cst_96 = arith.constant dense<0.000000e+00> : vector<128xf32>
    %147 = vector.multi_reduction <add>, %146, %cst_96 [0] : vector<512x128xf32> to vector<128xf32>
    %148 = vector.shape_cast %147 : vector<128xf32> to vector<1x128xf32>
    %149 = arith.addf %142, %148 : vector<1x128xf32>
    %150 = arith.mulf %146, %146 : vector<512x128xf32>
    %cst_97 = arith.constant dense<0.000000e+00> : vector<128xf32>
    %151 = vector.multi_reduction <add>, %150, %cst_97 [0] : vector<512x128xf32> to vector<128xf32>
    %152 = vector.shape_cast %151 : vector<128xf32> to vector<1x128xf32>
    %153 = arith.addf %142, %152 : vector<1x128xf32>
    %c1_i32_98 = arith.constant 1 : i32
    %cst_99 = arith.constant 0.001953125 : f32
    %154 = vector.broadcast %cst_99 : f32 to vector<1x128xf32>
    %155 = arith.mulf %149, %154 : vector<1x128xf32>
    %cst_100 = arith.constant 0.001953125 : f32
    %156 = vector.broadcast %cst_100 : f32 to vector<1x128xf32>
    %157 = arith.mulf %153, %156 : vector<1x128xf32>
    %158 = arith.mulf %155, %155 : vector<1x128xf32>
    %159 = arith.subf %157, %158 : vector<1x128xf32>
    %c0_101 = arith.constant 0 : index
    %c0_102 = arith.constant 0 : index
    %160 = vector.load %arg3[%c0_101, %c0_102] : memref<4x128xf32, #tpu.memory_space<vmem>>, vector<1x128xf32>
    %cst_103 = arith.constant 9.99999974E-6 : f32
    %161 = vector.broadcast %cst_103 : f32 to vector<1x128xf32>
    %162 = arith.addf %159, %161 : vector<1x128xf32>
    %163 = math.rsqrt %162 : vector<1x128xf32>
    %164 = arith.mulf %160, %163 : vector<1x128xf32>
    %c1_104 = arith.constant 1 : index
    %c0_105 = arith.constant 0 : index
    %165 = vector.load %arg3[%c1_104, %c0_105] : memref<4x128xf32, #tpu.memory_space<vmem>>, vector<1x128xf32>
    %166 = arith.mulf %155, %164 : vector<1x128xf32>
    %167 = arith.subf %165, %166 : vector<1x128xf32>
    %c0_i32_106 = arith.constant 0 : i32
    %c1_i32_107 = arith.constant 1 : i32
    %168 = arith.muli %c0_i32_106, %c1_i32_107 : i32
    %c0_i32_108 = arith.constant 0 : i32
    %169 = arith.addi %c0_i32_108, %168 : i32
    %c512_i32_109 = arith.constant 512 : i32
    %170 = arith.muli %169, %c512_i32_109 : i32
    %171 = tpu.assume_multiple %170, 8 : i32
    %172 = arith.index_cast %171 : i32 to index
    %c0_110 = arith.constant 0 : index
    %173 = vector.load %arg5[%172, %c0_110] : memref<512x128xf32, #tpu.memory_space<vmem>>, vector<512x128xf32>
    %174 = vector.broadcast %164 : vector<1x128xf32> to vector<512x128xf32>
    %175 = arith.mulf %173, %174 : vector<512x128xf32>
    %176 = vector.broadcast %167 : vector<1x128xf32> to vector<512x128xf32>
    %177 = arith.addf %175, %176 : vector<512x128xf32>
    %cst_111 = arith.constant 0.000000e+00 : f32
    %178 = vector.broadcast %cst_111 : f32 to vector<512x128xf32>
    %179 = arith.cmpf oge, %177, %178 : vector<512x128xf32>
    %cst_112 = arith.constant 0.00999999977 : f32
    %180 = vector.broadcast %cst_112 : f32 to vector<512x128xf32>
    %181 = arith.mulf %180, %177 : vector<512x128xf32>
    %182 = arith.select %179, %177, %181 : vector<512x128xi1>, vector<512x128xf32>
    %c512_i32_113 = arith.constant 512 : i32
    %183 = arith.muli %169, %c512_i32_113 : i32
    %c24_i32 = arith.constant 24 : i32
    %184 = arith.addi %c24_i32, %183 : i32
    %185 = tpu.assume_multiple %184, 8 : i32
    %186 = arith.index_cast %185 : i32 to index
    %c0_114 = arith.constant 0 : index
    %187 = vector.load %arg6[%186, %c0_114] : memref<560x128xf32, #tpu.memory_space<vmem>>, vector<512x128xf32>
    tpu.vector_store %arg6[%186, %c0_114], %182 {strides = array<i32>} : memref<560x128xf32, #tpu.memory_space<vmem>>, vector<512x128xf32>,
    %c1_i32_115 = arith.constant 1 : i32
    %c24_116 = arith.constant 24 : index
    %c0_117 = arith.constant 0 : index
    %188 = vector.load %arg6[%c24_116, %c0_117] : memref<560x128xf32, #tpu.memory_space<vmem>>, vector<512x128xf32>
    %189 = arith.truncf %188 : vector<512x128xf32> to vector<512x128xbf16>
    %c4_118 = arith.constant 4 : index
    %c0_119 = arith.constant 0 : index
    %c0_120 = arith.constant 0 : index
    %190 = vector.load %arg2[%c4_118, %c0_119, %c0_120] : memref<9x128x128xbf16, #tpu.memory_space<vmem>>, vector<1x128x128xbf16>
    %191 = vector.shape_cast %190 : vector<1x128x128xbf16> to vector<128x128xbf16>
    %cst_121 = arith.constant dense<0.000000e+00> : vector<512x128xf32>
    %192 = tpu.matmul %189, %191, %cst_121 {dimension_numbers = #tpu.dot_dimension_numbers<[1], [0], [0], [1], [0, 0, 1, 1], [], []>} : vector<512x128xbf16>, vector<128x128xbf16>, vector<512x128xf32> -> vector<512x128xf32>
    %c0_122 = arith.constant 0 : index
    %c0_123 = arith.constant 0 : index
    %193 = vector.load %arg5[%c0_122, %c0_123] : memref<512x128xf32, #tpu.memory_space<vmem>>, vector<512x128xf32>
    tpu.vector_store %arg5[%c0_122, %c0_123], %192 {strides = array<i32>} : memref<512x128xf32, #tpu.memory_space<vmem>>, vector<512x128xf32>,
    %c7_124 = arith.constant 7 : index
    %c0_125 = arith.constant 0 : index
    %194 = vector.load %arg6[%c7_124, %c0_125] : memref<560x128xf32, #tpu.memory_space<vmem>>, vector<512x128xf32>
    %195 = tpu.iota {dimensions = array<i32: 1>} : vector<2x16x16x128xi32>
    %196 = vector.shape_cast %195 : vector<2x16x16x128xi32> to vector<512x128xi32>
    %c1_i32_126 = arith.constant 1 : i32
    %197 = vector.broadcast %c1_i32_126 : i32 to vector<512x128xi32>
    %198 = arith.cmpi sge, %196, %197 : vector<512x128xi32>
    %199 = tpu.iota {dimensions = array<i32: 2>} : vector<2x16x16x128xi32>
    %200 = vector.shape_cast %199 : vector<2x16x16x128xi32> to vector<512x128xi32>
    %c1_i32_127 = arith.constant 1 : i32
    %201 = vector.broadcast %c1_i32_127 : i32 to vector<512x128xi32>
    %202 = arith.cmpi sge, %200, %201 : vector<512x128xi32>
    %203 = arith.andi %198, %202 : vector<512x128xi1>
    %cst_128 = arith.constant 0.000000e+00 : f32
    %204 = vector.broadcast %cst_128 : f32 to vector<512x128xf32>
    %205 = arith.select %203, %194, %204 : vector<512x128xi1>, vector<512x128xf32>
    %206 = arith.truncf %205 : vector<512x128xf32> to vector<512x128xbf16>
    %c0_129 = arith.constant 0 : index
    %c0_130 = arith.constant 0 : index
    %c0_131 = arith.constant 0 : index
    %207 = vector.load %arg2[%c0_129, %c0_130, %c0_131] : memref<9x128x128xbf16, #tpu.memory_space<vmem>>, vector<1x128x128xbf16>
    %208 = vector.shape_cast %207 : vector<1x128x128xbf16> to vector<128x128xbf16>
    %cst_132 = arith.constant dense<0.000000e+00> : vector<512x128xf32>
    %209 = tpu.matmul %206, %208, %cst_132 {dimension_numbers = #tpu.dot_dimension_numbers<[1], [0], [0], [1], [0, 0, 1, 1], [], []>} : vector<512x128xbf16>, vector<128x128xbf16>, vector<512x128xf32> -> vector<512x128xf32>
    %c0_133 = arith.constant 0 : index
    %c0_134 = arith.constant 0 : index
    %210 = vector.load %arg5[%c0_133, %c0_134] : memref<512x128xf32, #tpu.memory_space<vmem>>, vector<512x128xf32>
    %211 = arith.addf %210, %209 : vector<512x128xf32>
    %c0_135 = arith.constant 0 : index
    %c0_136 = arith.constant 0 : index
    %212 = vector.load %arg5[%c0_135, %c0_136] : memref<512x128xf32, #tpu.memory_space<vmem>>, vector<512x128xf32>
    tpu.vector_store %arg5[%c0_135, %c0_136], %211 {strides = array<i32>} : memref<512x128xf32, #tpu.memory_space<vmem>>, vector<512x128xf32>,
    %c8_137 = arith.constant 8 : index
    %c0_138 = arith.constant 0 : index
    %213 = vector.load %arg6[%c8_137, %c0_138] : memref<560x128xf32, #tpu.memory_space<vmem>>, vector<512x128xf32>
    %214 = tpu.iota {dimensions = array<i32: 1>} : vector<2x16x16x128xi32>
    %215 = vector.shape_cast %214 : vector<2x16x16x128xi32> to vector<512x128xi32>
    %c1_i32_139 = arith.constant 1 : i32
    %216 = vector.broadcast %c1_i32_139 : i32 to vector<512x128xi32>
    %217 = arith.cmpi sge, %215, %216 : vector<512x128xi32>
    %cst_140 = arith.constant 0.000000e+00 : f32
    %218 = vector.broadcast %cst_140 : f32 to vector<512x128xf32>
    %219 = arith.select %217, %213, %218 : vector<512x128xi1>, vector<512x128xf32>
    %220 = arith.truncf %219 : vector<512x128xf32> to vector<512x128xbf16>
    %c1_141 = arith.constant 1 : index
    %c0_142 = arith.constant 0 : index
    %c0_143 = arith.constant 0 : index
    %221 = vector.load %arg2[%c1_141, %c0_142, %c0_143] : memref<9x128x128xbf16, #tpu.memory_space<vmem>>, vector<1x128x128xbf16>
    %222 = vector.shape_cast %221 : vector<1x128x128xbf16> to vector<128x128xbf16>
    %cst_144 = arith.constant dense<0.000000e+00> : vector<512x128xf32>
    %223 = tpu.matmul %220, %222, %cst_144 {dimension_numbers = #tpu.dot_dimension_numbers<[1], [0], [0], [1], [0, 0, 1, 1], [], []>} : vector<512x128xbf16>, vector<128x128xbf16>, vector<512x128xf32> -> vector<512x128xf32>
    %c0_145 = arith.constant 0 : index
    %c0_146 = arith.constant 0 : index
    %224 = vector.load %arg5[%c0_145, %c0_146] : memref<512x128xf32, #tpu.memory_space<vmem>>, vector<512x128xf32>
    %225 = arith.addf %224, %223 : vector<512x128xf32>
    %c0_147 = arith.constant 0 : index
    %c0_148 = arith.constant 0 : index
    %226 = vector.load %arg5[%c0_147, %c0_148] : memref<512x128xf32, #tpu.memory_space<vmem>>, vector<512x128xf32>
    tpu.vector_store %arg5[%c0_147, %c0_148], %225 {strides = array<i32>} : memref<512x128xf32, #tpu.memory_space<vmem>>, vector<512x128xf32>,
    %c9_149 = arith.constant 9 : index
    %c0_150 = arith.constant 0 : index
    %227 = vector.load %arg6[%c9_149, %c0_150] : memref<560x128xf32, #tpu.memory_space<vmem>>, vector<512x128xf32>
    %228 = tpu.iota {dimensions = array<i32: 1>} : vector<2x16x16x128xi32>
    %229 = vector.shape_cast %228 : vector<2x16x16x128xi32> to vector<512x128xi32>
    %c1_i32_151 = arith.constant 1 : i32
    %230 = vector.broadcast %c1_i32_151 : i32 to vector<512x128xi32>
    %231 = arith.cmpi sge, %229, %230 : vector<512x128xi32>
    %232 = tpu.iota {dimensions = array<i32: 2>} : vector<2x16x16x128xi32>
    %233 = vector.shape_cast %232 : vector<2x16x16x128xi32> to vector<512x128xi32>
    %c15_i32_152 = arith.constant 15 : i32
    %234 = vector.broadcast %c15_i32_152 : i32 to vector<512x128xi32>
    %235 = arith.cmpi slt, %233, %234 : vector<512x128xi32>
    %236 = arith.andi %231, %235 : vector<512x128xi1>
    %cst_153 = arith.constant 0.000000e+00 : f32
    %237 = vector.broadcast %cst_153 : f32 to vector<512x128xf32>
    %238 = arith.select %236, %227, %237 : vector<512x128xi1>, vector<512x128xf32>
    %239 = arith.truncf %238 : vector<512x128xf32> to vector<512x128xbf16>
    %c2_154 = arith.constant 2 : index
    %c0_155 = arith.constant 0 : index
    %c0_156 = arith.constant 0 : index
    %240 = vector.load %arg2[%c2_154, %c0_155, %c0_156] : memref<9x128x128xbf16, #tpu.memory_space<vmem>>, vector<1x128x128xbf16>
    %241 = vector.shape_cast %240 : vector<1x128x128xbf16> to vector<128x128xbf16>
    %cst_157 = arith.constant dense<0.000000e+00> : vector<512x128xf32>
    %242 = tpu.matmul %239, %241, %cst_157 {dimension_numbers = #tpu.dot_dimension_numbers<[1], [0], [0], [1], [0, 0, 1, 1], [], []>} : vector<512x128xbf16>, vector<128x128xbf16>, vector<512x128xf32> -> vector<512x128xf32>
    %c0_158 = arith.constant 0 : index
    %c0_159 = arith.constant 0 : index
    %243 = vector.load %arg5[%c0_158, %c0_159] : memref<512x128xf32, #tpu.memory_space<vmem>>, vector<512x128xf32>
    %244 = arith.addf %243, %242 : vector<512x128xf32>
    %c0_160 = arith.constant 0 : index
    %c0_161 = arith.constant 0 : index
    %245 = vector.load %arg5[%c0_160, %c0_161] : memref<512x128xf32, #tpu.memory_space<vmem>>, vector<512x128xf32>
    tpu.vector_store %arg5[%c0_160, %c0_161], %244 {strides = array<i32>} : memref<512x128xf32, #tpu.memory_space<vmem>>, vector<512x128xf32>,
    %c23_162 = arith.constant 23 : index
    %c0_163 = arith.constant 0 : index
    %246 = vector.load %arg6[%c23_162, %c0_163] : memref<560x128xf32, #tpu.memory_space<vmem>>, vector<512x128xf32>
    %247 = tpu.iota {dimensions = array<i32: 2>} : vector<2x16x16x128xi32>
    %248 = vector.shape_cast %247 : vector<2x16x16x128xi32> to vector<512x128xi32>
    %c1_i32_164 = arith.constant 1 : i32
    %249 = vector.broadcast %c1_i32_164 : i32 to vector<512x128xi32>
    %250 = arith.cmpi sge, %248, %249 : vector<512x128xi32>
    %cst_165 = arith.constant 0.000000e+00 : f32
    %251 = vector.broadcast %cst_165 : f32 to vector<512x128xf32>
    %252 = arith.select %250, %246, %251 : vector<512x128xi1>, vector<512x128xf32>
    %253 = arith.truncf %252 : vector<512x128xf32> to vector<512x128xbf16>
    %c3_166 = arith.constant 3 : index
    %c0_167 = arith.constant 0 : index
    %c0_168 = arith.constant 0 : index
    %254 = vector.load %arg2[%c3_166, %c0_167, %c0_168] : memref<9x128x128xbf16, #tpu.memory_space<vmem>>, vector<1x128x128xbf16>
    %255 = vector.shape_cast %254 : vector<1x128x128xbf16> to vector<128x128xbf16>
    %cst_169 = arith.constant dense<0.000000e+00> : vector<512x128xf32>
    %256 = tpu.matmul %253, %255, %cst_169 {dimension_numbers = #tpu.dot_dimension_numbers<[1], [0], [0], [1], [0, 0, 1, 1], [], []>} : vector<512x128xbf16>, vector<128x128xbf16>, vector<512x128xf32> -> vector<512x128xf32>
    %c0_170 = arith.constant 0 : index
    %c0_171 = arith.constant 0 : index
    %257 = vector.load %arg5[%c0_170, %c0_171] : memref<512x128xf32, #tpu.memory_space<vmem>>, vector<512x128xf32>
    %258 = arith.addf %257, %256 : vector<512x128xf32>
    %c0_172 = arith.constant 0 : index
    %c0_173 = arith.constant 0 : index
    %259 = vector.load %arg5[%c0_172, %c0_173] : memref<512x128xf32, #tpu.memory_space<vmem>>, vector<512x128xf32>
    tpu.vector_store %arg5[%c0_172, %c0_173], %258 {strides = array<i32>} : memref<512x128xf32, #tpu.memory_space<vmem>>, vector<512x128xf32>,
    %c25_174 = arith.constant 25 : index
    %c0_175 = arith.constant 0 : index
    %260 = vector.load %arg6[%c25_174, %c0_175] : memref<560x128xf32, #tpu.memory_space<vmem>>, vector<512x128xf32>
    %261 = tpu.iota {dimensions = array<i32: 2>} : vector<2x16x16x128xi32>
    %262 = vector.shape_cast %261 : vector<2x16x16x128xi32> to vector<512x128xi32>
    %c15_i32_176 = arith.constant 15 : i32
    %263 = vector.broadcast %c15_i32_176 : i32 to vector<512x128xi32>
    %264 = arith.cmpi slt, %262, %263 : vector<512x128xi32>
    %cst_177 = arith.constant 0.000000e+00 : f32
    %265 = vector.broadcast %cst_177 : f32 to vector<512x128xf32>
    %266 = arith.select %264, %260, %265 : vector<512x128xi1>, vector<512x128xf32>
    %267 = arith.truncf %266 : vector<512x128xf32> to vector<512x128xbf16>
    %c5_178 = arith.constant 5 : index
    %c0_179 = arith.constant 0 : index
    %c0_180 = arith.constant 0 : index
    %268 = vector.load %arg2[%c5_178, %c0_179, %c0_180] : memref<9x128x128xbf16, #tpu.memory_space<vmem>>, vector<1x128x128xbf16>
    %269 = vector.shape_cast %268 : vector<1x128x128xbf16> to vector<128x128xbf16>
    %cst_181 = arith.constant dense<0.000000e+00> : vector<512x128xf32>
    %270 = tpu.matmul %267, %269, %cst_181 {dimension_numbers = #tpu.dot_dimension_numbers<[1], [0], [0], [1], [0, 0, 1, 1], [], []>} : vector<512x128xbf16>, vector<128x128xbf16>, vector<512x128xf32> -> vector<512x128xf32>
    %c0_182 = arith.constant 0 : index
    %c0_183 = arith.constant 0 : index
    %271 = vector.load %arg5[%c0_182, %c0_183] : memref<512x128xf32, #tpu.memory_space<vmem>>, vector<512x128xf32>
    %272 = arith.addf %271, %270 : vector<512x128xf32>
    %c0_184 = arith.constant 0 : index
    %c0_185 = arith.constant 0 : index
    %273 = vector.load %arg5[%c0_184, %c0_185] : memref<512x128xf32, #tpu.memory_space<vmem>>, vector<512x128xf32>
    tpu.vector_store %arg5[%c0_184, %c0_185], %272 {strides = array<i32>} : memref<512x128xf32, #tpu.memory_space<vmem>>, vector<512x128xf32>,
    %c39_186 = arith.constant 39 : index
    %c0_187 = arith.constant 0 : index
    %274 = vector.load %arg6[%c39_186, %c0_187] : memref<560x128xf32, #tpu.memory_space<vmem>>, vector<512x128xf32>
    %275 = tpu.iota {dimensions = array<i32: 1>} : vector<2x16x16x128xi32>
    %276 = vector.shape_cast %275 : vector<2x16x16x128xi32> to vector<512x128xi32>
    %c15_i32_188 = arith.constant 15 : i32
    %277 = vector.broadcast %c15_i32_188 : i32 to vector<512x128xi32>
    %278 = arith.cmpi slt, %276, %277 : vector<512x128xi32>
    %279 = tpu.iota {dimensions = array<i32: 2>} : vector<2x16x16x128xi32>
    %280 = vector.shape_cast %279 : vector<2x16x16x128xi32> to vector<512x128xi32>
    %c1_i32_189 = arith.constant 1 : i32
    %281 = vector.broadcast %c1_i32_189 : i32 to vector<512x128xi32>
    %282 = arith.cmpi sge, %280, %281 : vector<512x128xi32>
    %283 = arith.andi %278, %282 : vector<512x128xi1>
    %cst_190 = arith.constant 0.000000e+00 : f32
    %284 = vector.broadcast %cst_190 : f32 to vector<512x128xf32>
    %285 = arith.select %283, %274, %284 : vector<512x128xi1>, vector<512x128xf32>
    %286 = arith.truncf %285 : vector<512x128xf32> to vector<512x128xbf16>
    %c6_191 = arith.constant 6 : index
    %c0_192 = arith.constant 0 : index
    %c0_193 = arith.constant 0 : index
    %287 = vector.load %arg2[%c6_191, %c0_192, %c0_193] : memref<9x128x128xbf16, #tpu.memory_space<vmem>>, vector<1x128x128xbf16>
    %288 = vector.shape_cast %287 : vector<1x128x128xbf16> to vector<128x128xbf16>
    %cst_194 = arith.constant dense<0.000000e+00> : vector<512x128xf32>
    %289 = tpu.matmul %286, %288, %cst_194 {dimension_numbers = #tpu.dot_dimension_numbers<[1], [0], [0], [1], [0, 0, 1, 1], [], []>} : vector<512x128xbf16>, vector<128x128xbf16>, vector<512x128xf32> -> vector<512x128xf32>
    %c0_195 = arith.constant 0 : index
    %c0_196 = arith.constant 0 : index
    %290 = vector.load %arg5[%c0_195, %c0_196] : memref<512x128xf32, #tpu.memory_space<vmem>>, vector<512x128xf32>
    %291 = arith.addf %290, %289 : vector<512x128xf32>
    %c0_197 = arith.constant 0 : index
    %c0_198 = arith.constant 0 : index
    %292 = vector.load %arg5[%c0_197, %c0_198] : memref<512x128xf32, #tpu.memory_space<vmem>>, vector<512x128xf32>
    tpu.vector_store %arg5[%c0_197, %c0_198], %291 {strides = array<i32>} : memref<512x128xf32, #tpu.memory_space<vmem>>, vector<512x128xf32>,
    %c40_199 = arith.constant 40 : index
    %c0_200 = arith.constant 0 : index
    %293 = vector.load %arg6[%c40_199, %c0_200] : memref<560x128xf32, #tpu.memory_space<vmem>>, vector<512x128xf32>
    %294 = tpu.iota {dimensions = array<i32: 1>} : vector<2x16x16x128xi32>
    %295 = vector.shape_cast %294 : vector<2x16x16x128xi32> to vector<512x128xi32>
    %c15_i32_201 = arith.constant 15 : i32
    %296 = vector.broadcast %c15_i32_201 : i32 to vector<512x128xi32>
    %297 = arith.cmpi slt, %295, %296 : vector<512x128xi32>
    %cst_202 = arith.constant 0.000000e+00 : f32
    %298 = vector.broadcast %cst_202 : f32 to vector<512x128xf32>
    %299 = arith.select %297, %293, %298 : vector<512x128xi1>, vector<512x128xf32>
    %300 = arith.truncf %299 : vector<512x128xf32> to vector<512x128xbf16>
    %c7_203 = arith.constant 7 : index
    %c0_204 = arith.constant 0 : index
    %c0_205 = arith.constant 0 : index
    %301 = vector.load %arg2[%c7_203, %c0_204, %c0_205] : memref<9x128x128xbf16, #tpu.memory_space<vmem>>, vector<1x128x128xbf16>
    %302 = vector.shape_cast %301 : vector<1x128x128xbf16> to vector<128x128xbf16>
    %cst_206 = arith.constant dense<0.000000e+00> : vector<512x128xf32>
    %303 = tpu.matmul %300, %302, %cst_206 {dimension_numbers = #tpu.dot_dimension_numbers<[1], [0], [0], [1], [0, 0, 1, 1], [], []>} : vector<512x128xbf16>, vector<128x128xbf16>, vector<512x128xf32> -> vector<512x128xf32>
    %c0_207 = arith.constant 0 : index
    %c0_208 = arith.constant 0 : index
    %304 = vector.load %arg5[%c0_207, %c0_208] : memref<512x128xf32, #tpu.memory_space<vmem>>, vector<512x128xf32>
    %305 = arith.addf %304, %303 : vector<512x128xf32>
    %c0_209 = arith.constant 0 : index
    %c0_210 = arith.constant 0 : index
    %306 = vector.load %arg5[%c0_209, %c0_210] : memref<512x128xf32, #tpu.memory_space<vmem>>, vector<512x128xf32>
    tpu.vector_store %arg5[%c0_209, %c0_210], %305 {strides = array<i32>} : memref<512x128xf32, #tpu.memory_space<vmem>>, vector<512x128xf32>,
    %c41_211 = arith.constant 41 : index
    %c0_212 = arith.constant 0 : index
    %307 = vector.load %arg6[%c41_211, %c0_212] : memref<560x128xf32, #tpu.memory_space<vmem>>, vector<512x128xf32>
    %308 = tpu.iota {dimensions = array<i32: 1>} : vector<2x16x16x128xi32>
    %309 = vector.shape_cast %308 : vector<2x16x16x128xi32> to vector<512x128xi32>
    %c15_i32_213 = arith.constant 15 : i32
    %310 = vector.broadcast %c15_i32_213 : i32 to vector<512x128xi32>
    %311 = arith.cmpi slt, %309, %310 : vector<512x128xi32>
    %312 = tpu.iota {dimensions = array<i32: 2>} : vector<2x16x16x128xi32>
    %313 = vector.shape_cast %312 : vector<2x16x16x128xi32> to vector<512x128xi32>
    %c15_i32_214 = arith.constant 15 : i32
    %314 = vector.broadcast %c15_i32_214 : i32 to vector<512x128xi32>
    %315 = arith.cmpi slt, %313, %314 : vector<512x128xi32>
    %316 = arith.andi %311, %315 : vector<512x128xi1>
    %cst_215 = arith.constant 0.000000e+00 : f32
    %317 = vector.broadcast %cst_215 : f32 to vector<512x128xf32>
    %318 = arith.select %316, %307, %317 : vector<512x128xi1>, vector<512x128xf32>
    %319 = arith.truncf %318 : vector<512x128xf32> to vector<512x128xbf16>
    %c8_216 = arith.constant 8 : index
    %c0_217 = arith.constant 0 : index
    %c0_218 = arith.constant 0 : index
    %320 = vector.load %arg2[%c8_216, %c0_217, %c0_218] : memref<9x128x128xbf16, #tpu.memory_space<vmem>>, vector<1x128x128xbf16>
    %321 = vector.shape_cast %320 : vector<1x128x128xbf16> to vector<128x128xbf16>
    %cst_219 = arith.constant dense<0.000000e+00> : vector<512x128xf32>
    %322 = tpu.matmul %319, %321, %cst_219 {dimension_numbers = #tpu.dot_dimension_numbers<[1], [0], [0], [1], [0, 0, 1, 1], [], []>} : vector<512x128xbf16>, vector<128x128xbf16>, vector<512x128xf32> -> vector<512x128xf32>
    %c0_220 = arith.constant 0 : index
    %c0_221 = arith.constant 0 : index
    %323 = vector.load %arg5[%c0_220, %c0_221] : memref<512x128xf32, #tpu.memory_space<vmem>>, vector<512x128xf32>
    %324 = arith.addf %323, %322 : vector<512x128xf32>
    %c0_222 = arith.constant 0 : index
    %c0_223 = arith.constant 0 : index
    %325 = vector.load %arg5[%c0_222, %c0_223] : memref<512x128xf32, #tpu.memory_space<vmem>>, vector<512x128xf32>
    tpu.vector_store %arg5[%c0_222, %c0_223], %324 {strides = array<i32>} : memref<512x128xf32, #tpu.memory_space<vmem>>, vector<512x128xf32>,
    %cst_224 = arith.constant 0.000000e+00 : f32
    %326 = vector.broadcast %cst_224 : f32 to vector<1x128xf32>
    %c0_i32_225 = arith.constant 0 : i32
    %c512_i32_226 = arith.constant 512 : i32
    %327 = arith.muli %c0_i32_225, %c512_i32_226 : i32
    %328 = tpu.assume_multiple %327, 8 : i32
    %329 = arith.index_cast %328 : i32 to index
    %c0_227 = arith.constant 0 : index
    %330 = vector.load %arg5[%329, %c0_227] : memref<512x128xf32, #tpu.memory_space<vmem>>, vector<512x128xf32>
    %cst_228 = arith.constant dense<0.000000e+00> : vector<128xf32>
    %331 = vector.multi_reduction <add>, %330, %cst_228 [0] : vector<512x128xf32> to vector<128xf32>
    %332 = vector.shape_cast %331 : vector<128xf32> to vector<1x128xf32>
    %333 = arith.addf %326, %332 : vector<1x128xf32>
    %334 = arith.mulf %330, %330 : vector<512x128xf32>
    %cst_229 = arith.constant dense<0.000000e+00> : vector<128xf32>
    %335 = vector.multi_reduction <add>, %334, %cst_229 [0] : vector<512x128xf32> to vector<128xf32>
    %336 = vector.shape_cast %335 : vector<128xf32> to vector<1x128xf32>
    %337 = arith.addf %326, %336 : vector<1x128xf32>
    %c1_i32_230 = arith.constant 1 : i32
    %cst_231 = arith.constant 0.001953125 : f32
    %338 = vector.broadcast %cst_231 : f32 to vector<1x128xf32>
    %339 = arith.mulf %333, %338 : vector<1x128xf32>
    %cst_232 = arith.constant 0.001953125 : f32
    %340 = vector.broadcast %cst_232 : f32 to vector<1x128xf32>
    %341 = arith.mulf %337, %340 : vector<1x128xf32>
    %342 = arith.mulf %339, %339 : vector<1x128xf32>
    %343 = arith.subf %341, %342 : vector<1x128xf32>
    %c2_233 = arith.constant 2 : index
    %c0_234 = arith.constant 0 : index
    %344 = vector.load %arg3[%c2_233, %c0_234] : memref<4x128xf32, #tpu.memory_space<vmem>>, vector<1x128xf32>
    %cst_235 = arith.constant 9.99999974E-6 : f32
    %345 = vector.broadcast %cst_235 : f32 to vector<1x128xf32>
    %346 = arith.addf %343, %345 : vector<1x128xf32>
    %347 = math.rsqrt %346 : vector<1x128xf32>
    %348 = arith.mulf %344, %347 : vector<1x128xf32>
    %c3_236 = arith.constant 3 : index
    %c0_237 = arith.constant 0 : index
    %349 = vector.load %arg3[%c3_236, %c0_237] : memref<4x128xf32, #tpu.memory_space<vmem>>, vector<1x128xf32>
    %350 = arith.mulf %339, %348 : vector<1x128xf32>
    %351 = arith.subf %349, %350 : vector<1x128xf32>
    %c0_i32_238 = arith.constant 0 : i32
    %c1_i32_239 = arith.constant 1 : i32
    %352 = arith.muli %c0_i32_238, %c1_i32_239 : i32
    %c0_i32_240 = arith.constant 0 : i32
    %353 = arith.addi %c0_i32_240, %352 : i32
    %c512_i32_241 = arith.constant 512 : i32
    %354 = arith.muli %353, %c512_i32_241 : i32
    %355 = tpu.assume_multiple %354, 8 : i32
    %356 = arith.index_cast %355 : i32 to index
    %c0_242 = arith.constant 0 : index
    %357 = vector.load %arg5[%356, %c0_242] : memref<512x128xf32, #tpu.memory_space<vmem>>, vector<512x128xf32>
    %358 = vector.broadcast %348 : vector<1x128xf32> to vector<512x128xf32>
    %359 = arith.mulf %357, %358 : vector<512x128xf32>
    %360 = vector.broadcast %351 : vector<1x128xf32> to vector<512x128xf32>
    %361 = arith.addf %359, %360 : vector<512x128xf32>
    %c512_i32_243 = arith.constant 512 : i32
    %362 = arith.muli %353, %c512_i32_243 : i32
    %c24_i32_244 = arith.constant 24 : i32
    %363 = arith.addi %c24_i32_244, %362 : i32
    %364 = tpu.assume_multiple %363, 8 : i32
    %365 = arith.index_cast %364 : i32 to index
    %c0_245 = arith.constant 0 : index
    %366 = vector.load %arg0[%365, %c0_245] : memref<560x128xf32, #tpu.memory_space<vmem>>, vector<512x128xf32>
    %367 = arith.addf %366, %361 : vector<512x128xf32>
    %cst_246 = arith.constant 0.000000e+00 : f32
    %368 = vector.broadcast %cst_246 : f32 to vector<512x128xf32>
    %369 = arith.cmpf oge, %367, %368 : vector<512x128xf32>
    %cst_247 = arith.constant 0.00999999977 : f32
    %370 = vector.broadcast %cst_247 : f32 to vector<512x128xf32>
    %371 = arith.mulf %370, %367 : vector<512x128xf32>
    %372 = arith.select %369, %367, %371 : vector<512x128xi1>, vector<512x128xf32>
    %c512_i32_248 = arith.constant 512 : i32
    %373 = arith.muli %353, %c512_i32_248 : i32
    %374 = tpu.assume_multiple %373, 8 : i32
    %375 = arith.index_cast %374 : i32 to index
    %c0_249 = arith.constant 0 : index
    %376 = vector.load %arg4[%375, %c0_249] : memref<512x128xf32, #tpu.memory_space<vmem>>, vector<512x128xf32>
    tpu.vector_store %arg4[%375, %c0_249], %372 {strides = array<i32>} : memref<512x128xf32, #tpu.memory_space<vmem>>, vector<512x128xf32>,
    %c1_i32_250 = arith.constant 1 : i32
    return
  }
}

</mosaic_0001>

<bundles_post_ra>
// kernel: tpu_custom_call.1
= control target key start
LH: loop header
LB: loop body
LE: loop exit
PB: predicated region body
PF: predicated region fallthrough
CT: control target
= control target key end

     0   :  { %9 = vsyncpa [#allocation5], 0  ;;  %s23481_s0 = inlined_call_operand.hbm [shape: f32[560,128], index: 0, kind: input, shape index: {}]   ;;  %s23482_s1 = inlined_call_operand.hbm [shape: bf16[9,128,128], index: 1, kind: input, shape index: {}]   ;;  %s23483_s2 = inlined_call_operand.hbm [shape: bf16[9,128,128], index: 2, kind: input, shape index: {}]   ;;  %s23484_s3 = inlined_call_operand.vmem [shape: f32[4,128], index: 3, kind: input, shape index: {}]   ;;  %s23485_s4 = inlined_call_operand.hbm [shape: f32[512,128], index: 4, kind: output, shape index: {}]  }
   0x1   :  { %10 = vsyncpa [#allocation8], 0 }
   0x2   :  { %11 = vsyncpa [#allocation6], 0  ;;  %s17179_s15 = smov [#allocation7]  }
   0x3   :  { %s29_s16 = sshll.u32 %s17179_s15, 4  ;;  %s30_s16 = int_to_ptr.vmem [resolvable:$true] %s29_s16 }
   0x4   :  { %s17101_s17 = scalar_lea.vmem %s30_s16, 9216  ;;  %p17106_p1 = scmp.lt.s32.totalorder %s30_s16, %s30_s16 }
   0x5   :  { %p17102_p0 = scmp.ne.s32.totalorder %s30_s16, %s17101_s17  ;;  %p17107_p2 = scmp.lt.s32.totalorder %s17101_s17, %s17101_s17 }
   0x7   :  { %p17108_p3 = por %p17107_p2, %p17106_p1 }
   0x9   :  { %p17109_p4 = pnand %p17108_p3, %p17102_p0 }
   0xb   :  { %17112 = shalt.err (!%p17109_p4)
}
   0xc   :  { %s17180_s18 = smov 64   ;;  %s17181_s19 = smov 4  }
   0xd   :  { %35 = dma.hbm_to_vmem [thread:$0]  %s23482_s1, 9216, %s30_s16, [#allocation8], %s17180_s18, %s17180_s18, %s17181_s19  }
   0xe   :  { %s17182_s22 = smov [#allocation4]  }
   0xf   :  { %s17_s23 = sshll.u32 %s17182_s22, 4  ;;  %s18_s23 = int_to_ptr.vmem [resolvable:$true] %s17_s23 }
  0x10   :  { %s17121_s24 = scalar_lea.vmem %s18_s23, 8960  ;;  %p17126_p6 = scmp.lt.s32.totalorder %s18_s23, %s18_s23 }
  0x11   :  { %p17122_p5 = scmp.ne.s32.totalorder %s18_s23, %s17121_s24  ;;  %p17127_p7 = scmp.lt.s32.totalorder %s17121_s24, %s17121_s24 }
  0x13   :  { %p17128_p8 = por %p17127_p7, %p17126_p6 }
  0x15   :  { %p17129_p9 = pnand %p17128_p8, %p17122_p5 }
  0x17   :  { %17132 = shalt.err (!%p17129_p9)
}
  0x18   :  { %s17183_s25 = smov 128   ;;  %s17184_s26 = smov 8  }
  0x19   :  { %23 = dma.hbm_to_vmem [thread:$0]  %s23481_s0, 8960, %s18_s23, [#allocation5], %s17183_s25, %s17183_s25, %s17184_s26  }
  0x1a   :  { %s17185_s1 = smov [#allocation9]  }
  0x1b   :  { %s41_s29 = sshll.u32 %s17185_s1, 4  ;;  %s42_s29 = int_to_ptr.vmem [resolvable:$true] %s41_s29 }
  0x1c   :  { %s17141_s30 = scalar_lea.vmem %s42_s29, 9216  ;;  %p17146_p11 = scmp.lt.s32.totalorder %s42_s29, %s42_s29 }
  0x1d   :  { %p17142_p10 = scmp.ne.s32.totalorder %s42_s29, %s17141_s30  ;;  %p17147_p12 = scmp.lt.s32.totalorder %s17141_s30, %s17141_s30 }
  0x1f   :  { %p17148_p13 = por %p17147_p12, %p17146_p11 }
  0x21   :  { %p17149_p0 = pnand %p17148_p13, %p17142_p10 }
  0x23   :  { %17152 = shalt.err (!%p17149_p0)
}
  0x24   :  { %47 = dma.hbm_to_vmem [thread:$0]  %s23483_s2, 9216, %s42_s29, [#allocation8], %s17180_s18, %s17180_s18, %s17181_s19  }
  0x25   :  { %17173 = dma.done.wait [#allocation5], 8960  }
  0x26   :  { %17174 = vsyncadd [#allocation5], 4294958336 }
  0x27   :  { %17175 = dma.done.wait [#allocation8], 18432  }
  0x28   :  { %17176 = vsyncadd [#allocation8], 4294948864  ;;  %v23486_v0 = vmov 0.0|0.0   ;;  %v16945_v1 = vld [vmem:[#allocation7 + $0x138] sm:$0xff]   ;;  %v16947_v3 = vld [vmem:[#allocation7 + $0x130] sm:$0xff]   ;;  %v640_v18 = vlaneseq  ;;  %vm17187_vm1 = vmmov 1  }
  0x29   :  { %15590 = vmatprep.mubr.bf16.mxu1 %v23486_v0  ;;  %v16946_v2 = vld [vmem:[#allocation7 + $0x38] sm:$0xff]   ;;  %15494 = vmatprep.subr.bf16.mxu0 %v16945_v1  ;;  %v16948_v4 = vld [vmem:[#allocation7 + $0x30] sm:$0xff]   ;;  %v16949_v5 = vld [vmem:[#allocation7 + $0x128] sm:$0xff]   ;;  %v23638_v33 = vmov 0 }
  0x2a   :  { %15574 = vmatprep.subr.bf16.mxu1 %v16946_v2  ;;  %15495 = vmatpush3.bf16.msra.mxu0 %v16945_v1  ;;  %v16950_v6 = vld [vmem:[#allocation7 + $0x28] sm:$0xff]   ;;  %v16951_v7 = vld [vmem:[#allocation7 + $0x120] sm:$0xff]   ;;  %v16953_v9 = vld [vmem:[#allocation7 + $0x118] sm:$0xff]   ;;  %v17231_v21 = vshrl.u32 %v640_v18, 7 }
  0x2b   :  { %15575 = vmatpush3.bf16.msra.mxu1 %v16946_v2  ;;  %15496 = vmatprep.subr.bf16.mxu0 %v16947_v3  ;;  %v16952_v8 = vld [vmem:[#allocation7 + $0x20] sm:$0xff]   ;;  %v16954_v10 = vld [vmem:[#allocation7 + $0x18] sm:$0xff]   ;;  %v16955_v11 = vld [vmem:[#allocation7 + $0x110] sm:$0xff]  }
  0x2c   :  { %15576 = vmatprep.subr.bf16.mxu1 %v16948_v4  ;;  %v66_v12 = vld [vmem:[#allocation4 + $0x18] sm:$0xff]  ;;  %v67_v13 = vld [vmem:[#allocation4 + $0x20] sm:$0xff]  ;;  %v16959_v19 = vld [vmem:[#allocation7 + $0x100] sm:$0xff]   ;;  %23637 = vst [vmem:[#allocation14_spill] sm:$0xff] %v17231_v21  ;;  %vm643_vm0 = vcmp.ge.s32.totalorder %v17231_v21, 1 }
  0x2d   :  { %v16956_v14 = vld [vmem:[#allocation7 + $0x10] sm:$0xff]   ;;  %v17228_v15 = vpack.c.bf16 %v67_v13, %v66_v12  ;;  %v16957_v16 = vld [vmem:[#allocation7 + $0x108] sm:$0xff]   ;;  %v16960_v20 = vld [vmem:[#allocation7] sm:$0xff]  }
  0x2e   :  { %15497 = vmatpush3.bf16.msra.mxu0 %v16947_v3  ;;  %v16958_v17 = vld [vmem:[#allocation7 + $0x8] sm:$0xff]   ;;  %v68_v22 = vld [vmem:[#allocation4 + $0x28] sm:$0xff]  ;;  %v69_v23 = vld [vmem:[#allocation4 + $0x30] sm:$0xff] }
  0x2f   :  { %15577 = vmatpush3.bf16.msra.mxu1 %v16948_v4  ;;  %15498 = vmatprep.subr.bf16.mxu0 %v16949_v5  ;;  %v580_v24 = vld [vmem:[#allocation4 + $0x17] sm:$0xff]  ;;  %v581_v25 = vld [vmem:[#allocation4 + $0x1f] sm:$0xff]  ;;  %v16961_v26 = vld [vmem:[#allocation7 + $0x78] sm:$0xff]   ;;  %v17234_v31 = vpack.c.bf16 %v69_v23, %v68_v22 }
  0x30   :  { %15578 = vmatprep.subr.bf16.mxu1 %v16950_v6  ;;  %15510 = vmatprep.mubr.bf16.mxu0 %v17228_v15  ;;  %v70_v27 = vld [vmem:[#allocation4 + $0x38] sm:$0xff]  ;;  %v71_v28 = vld [vmem:[#allocation4 + $0x40] sm:$0xff]  ;;  %v583_v30 = vld [vmem:[#allocation4 + $0x2f] sm:$0xff]  ;;  %v13543_v32 = vpack.c.bf16 %v581_v25, %v580_v24 }
  0x31   :  { %v582_v29 = vld [vmem:[#allocation4 + $0x27] sm:$0xff]  ;;  %vm17237_vm2 = vmpackc.low %vm17187_vm1, %vm643_vm0  ;;  %v17241_v34 = vpack.c.bf16 %v71_v28, %v70_v27  ;;  %v73_v38 = vld [vmem:[#allocation4 + $0x50] sm:$0xff] }
  0x32   :  { %15499 = vmatpush3.bf16.msra.mxu0 %v16949_v5  ;;  %v23639_v33 = vsel %vm17237_vm2, 4294967295, %v23638_v33  ;;  %v13546_v35 = vpack.c.bf16 %v583_v30, %v582_v29  ;;  %v16962_v36 = vld [vmem:[#allocation7 + $0x70] sm:$0xff]   ;;  %v72_v37 = vld [vmem:[#allocation4 + $0x48] sm:$0xff]  ;;  %v584_v39 = vld [vmem:[#allocation4 + $0x37] sm:$0xff] }
  0x33   :  { %15579 = vmatpush3.bf16.msra.mxu1 %v16950_v6  ;;  %15500 = vmatprep.subr.bf16.mxu0 %v16951_v7  ;;  %23640 = vst [vmem:[#allocation15_spill] sm:$0xff] %v23639_v33  ;;  %v585_v40 = vld [vmem:[#allocation4 + $0x3f] sm:$0xff]  ;;  %v586_v43 = vld [vmem:[#allocation4 + $0x47] sm:$0xff]  ;;  %v587_v45 = vld [vmem:[#allocation4 + $0x4f] sm:$0xff]  ;;  %v17249_v46 = vpack.c.bf16 %v73_v38, %v72_v37 }
  0x34   :  { %15580 = vmatprep.subr.bf16.mxu1 %v16952_v8  ;;  %v74_v41 = vld [vmem:[#allocation4 + $0x58] sm:$0xff]  ;;  %v75_v42 = vld [vmem:[#allocation4 + $0x60] sm:$0xff]  ;;  %v13549_v47 = vpack.c.bf16 %v585_v40, %v584_v39  ;;  %v13552_v49 = vpack.c.bf16 %v587_v45, %v586_v43  ;;  %v16964_v50 = vld [vmem:[#allocation7 + $0x60] sm:$0xff]  }
  0x35   :  { %v16963_v44 = vld [vmem:[#allocation7 + $0x68] sm:$0xff]   ;;  %v17251_v48 = vpack.c.bf16 %v75_v42, %v74_v41  ;;  %v76_v51 = vld [vmem:[#allocation4 + $0x68] sm:$0xff]  ;;  %v77_v52 = vld [vmem:[#allocation4 + $0x70] sm:$0xff] }
  0x36   :  { %15501 = vmatpush3.bf16.msra.mxu0 %v16951_v7  ;;  %v588_v53 = vld [vmem:[#allocation4 + $0x57] sm:$0xff]  ;;  %v589_v54 = vld [vmem:[#allocation4 + $0x5f] sm:$0xff]  ;;  %v590_v57 = vld [vmem:[#allocation4 + $0x67] sm:$0xff]  ;;  %v17259_v60 = vpack.c.bf16 %v77_v52, %v76_v51 }
  0x37   :  { %15581 = vmatpush3.bf16.msra.mxu1 %v16952_v8  ;;  %15502 = vmatprep.subr.bf16.mxu0 %v16953_v9  ;;  %v78_v55 = vld [vmem:[#allocation4 + $0x78] sm:$0xff]  ;;  %v79_v56 = vld [vmem:[#allocation4 + $0x80] sm:$0xff]  ;;  %v591_v58 = vld [vmem:[#allocation4 + $0x6f] sm:$0xff]  ;;  %v13555_v61 = vpack.c.bf16 %v589_v54, %v588_v53 }
  0x38   :  { %15582 = vmatprep.subr.bf16.mxu1 %v16954_v10  ;;  %v16965_v59 = vld [vmem:[#allocation7 + $0x58] sm:$0xff]   ;;  %v17261_v62 = vpack.c.bf16 %v79_v56, %v78_v55  ;;  %v13558_v63 = vpack.c.bf16 %v591_v58, %v590_v57  ;;  %v16966_v1 = vld [vmem:[#allocation7 + $0x50] sm:$0xff]   ;;  %v81_v3 = vld [vmem:[#allocation4 + $0x90] sm:$0xff] }
  0x39   :  { %v80_v2 = vld [vmem:[#allocation4 + $0x88] sm:$0xff]  ;;  %v592_v4 = vld [vmem:[#allocation4 + $0x77] sm:$0xff]  ;;  %v593_v5 = vld [vmem:[#allocation4 + $0x7f] sm:$0xff] }
  0x3a   :  { %15503 = vmatpush3.bf16.msra.mxu0 %v16953_v9  ;;  %v82_v6 = vld [vmem:[#allocation4 + $0x98] sm:$0xff]  ;;  %v83_v7 = vld [vmem:[#allocation4 + $0xa0] sm:$0xff]  ;;  %v595_v9 = vld [vmem:[#allocation4 + $0x8f] sm:$0xff] }
  0x3b   :  { %15583 = vmatpush3.bf16.msra.mxu1 %v16954_v10  ;;  %15504 = vmatprep.subr.bf16.mxu0 %v16955_v11  ;;  %v594_v8 = vld [vmem:[#allocation4 + $0x87] sm:$0xff]  ;;  %v17269_v10 = vpack.c.bf16 %v81_v3, %v80_v2  ;;  %v17271_v12 = vpack.c.bf16 %v83_v7, %v82_v6  ;;  %v85_v18 = vld [vmem:[#allocation4 + $0xb0] sm:$0xff]  ;;  %v86_v23 = vld [vmem:[#allocation4 + $0xb8] sm:$0xff] }
  0x3c   :  { %15584 = vmatprep.subr.bf16.mxu1 %v16956_v14  ;;  %v13564_v13 = vpack.c.bf16 %v595_v9, %v594_v8  ;;  %v16969_v22 = vld [vmem:[#allocation7 + $0xb0] sm:$0xff]   ;;  %v600_v37 = vld [vmem:[#allocation4 + $0xb7] sm:$0xff]  ;;  %v16973_v51 = vld [vmem:[#allocation7 + $0x98] sm:$0xff]  }
  0x3d   :  { %v87_v24 = vld [vmem:[#allocation4 + $0xc0] sm:$0xff]  ;;  %v16972_v39 = vld [vmem:[#allocation7 + $0x40] sm:$0xff]   ;;  %v90_v41 = vld [vmem:[#allocation4 + $0xd8] sm:$0xff] }
  0x3e   :  { %15505 = vmatpush3.bf16.msra.mxu0 %v16955_v11  ;;  %v13561_v11 = vpack.c.bf16 %v593_v5, %v592_v4  ;;  %v598_v25 = vld [vmem:[#allocation4 + $0xa7] sm:$0xff]  ;;  %v17281_v29 = vpack.c.bf16 %v87_v24, %v86_v23  ;;  %v601_v38 = vld [vmem:[#allocation4 + $0xbf] sm:$0xff]  ;;  %v16971_v40 = vld [vmem:[#allocation7 + $0xa0] sm:$0xff]  }
  0x3f   :  { %15585 = vmatpush3.bf16.msra.mxu1 %v16956_v14  ;;  %15506 = vmatprep.subr.bf16.mxu0 %v16957_v16  ;;  %v16967_v14 = vld [vmem:[#allocation7 + $0x48] sm:$0xff]   ;;  %v91_v42 = vld [vmem:[#allocation4 + $0xe0] sm:$0xff]  ;;  %v92_v52 = vld [vmem:[#allocation4 + $0xe8] sm:$0xff] }
  0x40   :  { %15586 = vmatprep.subr.bf16.mxu1 %v16958_v17  ;;  %v602_v43 = vld [vmem:[#allocation4 + $0xc7] sm:$0xff]  ;;  %v93_v53 = vld [vmem:[#allocation4 + $0xf0] sm:$0xff]  ;;  %v605_v56 = vld [vmem:[#allocation4 + $0xdf] sm:$0xff] }
  0x41   :  { %v17294_v54 = vld [vmem:[#allocation7 + $0xf8] sm:$0xff]   ;;  %v604_v55 = vld [vmem:[#allocation4 + $0xd7] sm:$0xff]  ;;  %v16974_v57 = vld [vmem:[#allocation7 + $0x90] sm:$0xff]  }
  0x42   :  { %15507 = vmatpush3.bf16.msra.mxu0 %v16957_v16  ;;  %v16968_v16 = vld [vmem:[#allocation7 + $0xb8] sm:$0xff]   ;;  %v94_v58 = vld [vmem:[#allocation4 + $0xf8] sm:$0xff]  ;;  %v13579_v2 = vpack.c.bf16 %v605_v56, %v604_v55  ;;  %v97_v7 = vld [vmem:[#allocation4 + $0x110] sm:$0xff] }
  0x43   :  { %15587 = vmatpush3.bf16.msra.mxu1 %v16958_v17  ;;  %15508 = vmatprep.subr.bf16.mxu0 %v16959_v19  ;;  %v84_v17 = vld [vmem:[#allocation4 + $0xa8] sm:$0xff]  ;;  %v16975_v5 = vld [vmem:[#allocation7 + $0x88] sm:$0xff]   ;;  %v109_v55 = vld [vmem:[#allocation4 + $0x170] sm:$0xff] }
  0x44   :  { %15588 = vmatprep.subr.bf16.mxu1 %v16960_v20  ;;  %v17279_v27 = vpack.c.bf16 %v85_v18, %v84_v17  ;;  %v96_v6 = vld [vmem:[#allocation4 + $0x108] sm:$0xff]  ;;  %v608_v8 = vld [vmem:[#allocation4 + $0xf7] sm:$0xff]  ;;  %v609_v9 = vld [vmem:[#allocation4 + $0xff] sm:$0xff] }
  0x45   :  { %v13585_v17 = vpack.c.bf16 %v609_v9, %v608_v8  ;;  %v611_v23 = vld [vmem:[#allocation4 + $0x11f] sm:$0xff]  ;;  %v618_v56 = vld [vmem:[#allocation4 + $0x157] sm:$0xff] }
  0x46   :  { %15509 = vmatpush3.bf16.msra.mxu0 %v16959_v19  ;;  %v596_v19 = vld [vmem:[#allocation4 + $0x97] sm:$0xff] }
  0x47   :  { %15589 = vmatpush3.bf16.msra.mxu1 %v16960_v20  ;;  %15654 = vmatprep.subr.bf16.mxu0 %v16961_v26  ;;  %v597_v20 = vld [vmem:[#allocation4 + $0x9f] sm:$0xff]  ;;  %v113_v8 = vld [vmem:[#allocation4 + $0x190] sm:$0xff] }
  0x48   :  { %15734 = vmatprep.subr.bf16.mxu1 %v16968_v16  ;;  %v13567_v28 = vpack.c.bf16 %v597_v20, %v596_v19  ;;  %v100_v19 = vld [vmem:[#allocation4 + $0x128] sm:$0xff]  ;;  %v101_v20 = vld [vmem:[#allocation4 + $0x130] sm:$0xff]  ;;  %v102_v24 = vld [vmem:[#allocation4 + $0x138] sm:$0xff] }
  0x49   :  { %15511 = vmatmul.mubr.bf16.vlgmr.msra.gmra.mxu0 %v17234_v31  ;;  %v622_v9 = vld [vmem:[#allocation4 + $0x177] sm:$0xff] }
  0x4a   :  { %15591 = vmatmul.mubr.msk.bf16.vlgmr.msra.gmra.mxu1 %vm17237_vm2, %v13543_v32  ;;  %15655 = vmatpush3.bf16.msra.mxu0 %v16961_v26  ;;  %v599_v26 = vld [vmem:[#allocation4 + $0xaf] sm:$0xff]  ;;  %v16970_v32 = vld [vmem:[#allocation7 + $0xa8] sm:$0xff]  }
  0x4b   :  { %15514 = vmatprep.mubr.bf16.mxu0 %v17241_v34  ;;  %15594 = vmatprep.mubr.msk.bf16.mxu1 %vm17237_vm2, %v13546_v35  ;;  %v13570_v30 = vpack.c.bf16 %v599_v26, %v598_v25  ;;  %v88_v35 = vld [vmem:[#allocation4 + $0xc8] sm:$0xff]  ;;  %v103_v25 = vld [vmem:[#allocation4 + $0x140] sm:$0xff] }
  0x4c   :  { %15656 = vmatprep.subr.bf16.mxu0 %v16962_v36  ;;  %15735 = vmatpush3.bf16.msra.mxu1 %v16968_v16  ;;  %v145_v16 = vpack.c.bf16 %v97_v7, %v96_v6  ;;  %v612_v26 = vld [vmem:[#allocation4 + $0x127] sm:$0xff] }
  0x4d   :  { %15736 = vmatprep.subr.bf16.mxu1 %v16969_v22  ;;  %v112_v7 = vld [vmem:[#allocation4 + $0x188] sm:$0xff] }
  0x4e   :  { %15657 = vmatpush3.bf16.msra.mxu0 %v16962_v36  ;;  %v89_v36 = vld [vmem:[#allocation4 + $0xd0] sm:$0xff] }
  0x4f   :  { %15658 = vmatprep.subr.bf16.mxu0 %v16963_v44  ;;  %v17289_v45 = vpack.c.bf16 %v89_v36, %v88_v35  ;;  %v17320_v35 = vpack.c.bf16 %v103_v25, %v102_v24  ;;  %v116_v24 = vld [vmem:[#allocation4 + $0x1a8] sm:$0xff]  ;;  %v117_v25 = vld [vmem:[#allocation4 + $0x1b0] sm:$0xff] }
  0x50   :  { %15737 = vmatpush3.bf16.msra.mxu1 %v16969_v22  ;;  %v610_v22 = vld [vmem:[#allocation4 + $0x117] sm:$0xff] }
  0x51   :  { %15515 = vmatmul.mubr.bf16.gmra.mxu0 %v17249_v46  ;;  %15738 = vmatprep.subr.bf16.mxu1 %v16970_v32 }
  0x52   :  { %15595 = vmatmul.mubr.msk.bf16.gmra.mxu1 %vm17237_vm2, %v13549_v47  ;;  %15518 = vmatprep.mubr.bf16.mxu0 %v17251_v48  ;;  %v13573_v47 = vpack.c.bf16 %v601_v38, %v600_v37  ;;  %v104_v37 = vld [vmem:[#allocation4 + $0x148] sm:$0xff]  ;;  %v105_v38 = vld [vmem:[#allocation4 + $0x150] sm:$0xff] }
  0x53   :  { %15598 = vmatprep.mubr.msk.bf16.mxu1 %vm17237_vm2, %v13552_v49  ;;  %15659 = vmatpush3.bf16.msra.mxu0 %v16963_v44  ;;  %v603_v44 = vld [vmem:[#allocation4 + $0xcf] sm:$0xff]  ;;  %v17291_v49 = vpack.c.bf16 %v91_v42, %v90_v41  ;;  %v106_v41 = vld [vmem:[#allocation4 + $0x158] sm:$0xff]  ;;  %v107_v42 = vld [vmem:[#allocation4 + $0x160] sm:$0xff] }
  0x54   :  { %15660 = vmatprep.subr.bf16.mxu0 %v16964_v50  ;;  %15739 = vmatpush3.bf16.msra.mxu1 %v16970_v32  ;;  %v13588_v32 = vpack.c.bf16 %v611_v23, %v610_v22 }
  0x55   :  { %15740 = vmatprep.subr.bf16.mxu1 %v16971_v40 }
  0x57   :  { %15661 = vmatpush3.bf16.msra.mxu0 %v16964_v50  ;;  %v13576_v50 = vpack.c.bf16 %v603_v44, %v602_v43  ;;  %v616_v43 = vld [vmem:[#allocation4 + $0x147] sm:$0xff]  ;;  %v617_v44 = vld [vmem:[#allocation4 + $0x14f] sm:$0xff] }
  0x58   :  { %15662 = vmatprep.subr.bf16.mxu0 %v16965_v59  ;;  %15741 = vmatpush3.bf16.msra.mxu1 %v16971_v40  ;;  %v615_v40 = vld [vmem:[#allocation4 + $0x13f] sm:$0xff] }
  0x59   :  { %15519 = vmatmul.mubr.bf16.gmra.mxu0 %v17259_v60  ;;  %15742 = vmatprep.subr.bf16.mxu1 %v16973_v51 }
  0x5a   :  { %15599 = vmatmul.mubr.msk.bf16.gmra.mxu1 %vm17237_vm2, %v13555_v61  ;;  %15522 = vmatprep.mubr.bf16.mxu0 %v17261_v62  ;;  %v606_v61 = vld [vmem:[#allocation4 + $0xe7] sm:$0xff] }
  0x5b   :  { %15602 = vmatprep.mubr.msk.bf16.mxu1 %vm17237_vm2, %v13558_v63  ;;  %15663 = vmatpush3.bf16.msra.mxu0 %v16965_v59  ;;  %v95_v59 = vld [vmem:[#allocation4 + $0x100] sm:$0xff]  ;;  %v607_v63 = vld [vmem:[#allocation4 + $0xef] sm:$0xff] }
  0x5c   :  { %15664 = vmatprep.subr.bf16.mxu0 %v16966_v1  ;;  %15743 = vmatpush3.bf16.msra.mxu1 %v16973_v51  ;;  %v17304_v3 = vpack.c.bf16 %v95_v59, %v94_v58  ;;  %v13582_v4 = vpack.c.bf16 %v607_v63, %v606_v61  ;;  %v17330_v51 = vpack.c.bf16 %v107_v42, %v106_v41  ;;  %v110_v58 = vld [vmem:[#allocation4 + $0x178] sm:$0xff]  ;;  %v111_v59 = vld [vmem:[#allocation4 + $0x180] sm:$0xff]  ;;  %v621_v63 = vld [vmem:[#allocation4 + $0x16f] sm:$0xff] }
  0x5d   :  { %15744 = vmatprep.subr.bf16.mxu1 %v16974_v57  ;;  %v620_v61 = vld [vmem:[#allocation4 + $0x167] sm:$0xff] }
  0x5e   :  { %v13603_v6 = vpack.c.bf16 %v621_v63, %v620_v61 }
  0x5f   :  { %15665 = vmatpush3.bf16.msra.mxu0 %v16966_v1  ;;  %v17302_v1 = vpack.c.bf16 %v93_v53, %v92_v52  ;;  %v13597_v52 = vpack.c.bf16 %v617_v44, %v616_v43  ;;  %v108_v53 = vld [vmem:[#allocation4 + $0x168] sm:$0xff]  ;;  %v121_v44 = vld [vmem:[#allocation4 + $0x1d0] sm:$0xff] }
  0x60   :  { %15666 = vmatprep.subr.bf16.mxu0 %v16967_v14  ;;  %15745 = vmatpush3.bf16.msra.mxu1 %v16974_v57  ;;  %v619_v57 = vld [vmem:[#allocation4 + $0x15f] sm:$0xff]  ;;  %v120_v43 = vld [vmem:[#allocation4 + $0x1c8] sm:$0xff] }
  0x61   :  { %15523 = vmatmul.mubr.bf16.gmra.mxu0 %v17269_v10  ;;  %15746 = vmatprep.subr.bf16.mxu1 %v16975_v5 }
  0x62   :  { %15603 = vmatmul.mubr.msk.bf16.gmra.mxu1 %vm17237_vm2, %v13561_v11  ;;  %15526 = vmatprep.mubr.bf16.mxu0 %v17271_v12  ;;  %v98_v11 = vld [vmem:[#allocation4 + $0x118] sm:$0xff] }
  0x63   :  { %15606 = vmatprep.mubr.msk.bf16.mxu1 %vm17237_vm2, %v13564_v13  ;;  %15667 = vmatpush3.bf16.msra.mxu0 %v16967_v14  ;;  %v16976_v13 = vld [vmem:[#allocation7 + $0x80] sm:$0xff]   ;;  %v99_v14 = vld [vmem:[#allocation4 + $0x120] sm:$0xff] }
  0x64   :  { %15668 = vmatprep.subr.bf16.mxu0 %v16972_v39  ;;  %15747 = vmatpush3.bf16.msra.mxu1 %v16975_v5  ;;  %v17312_v18 = vpack.c.bf16 %v99_v14, %v98_v11  ;;  %v17340_v5 = vpack.c.bf16 %v111_v59, %v110_v58  ;;  %v623_v11 = vld [vmem:[#allocation4 + $0x17f] sm:$0xff]  ;;  %v633_v58 = vld [vmem:[#allocation4 + $0x1cf] sm:$0xff]  ;;  %v17368_v59 = vpack.c.bf16 %v121_v44, %v120_v43 }
  0x65   :  { %15748 = vmatprep.subr.bf16.mxu1 %v16976_v13  ;;  %v115_v14 = vld [vmem:[#allocation4 + $0x1a0] sm:$0xff]  ;;  %v1919_v43 = vld [vmem:[#allocation4 + $0x29] sm:$0xff]  ;;  %v1920_v44 = vld [vmem:[#allocation4 + $0x31] sm:$0xff] }
  0x67   :  { %15669 = vmatpush3.bf16.msra.mxu0 %v16972_v39  ;;  %v614_v39 = vld [vmem:[#allocation4 + $0x137] sm:$0xff] }
  0x68   :  { %15814 = vmatprep.subr.bf16.mxu0 %v17294_v54  ;;  %15749 = vmatpush3.bf16.msra.mxu1 %v16976_v13  ;;  %v114_v13 = vld [vmem:[#allocation4 + $0x198] sm:$0xff] }
  0x69   :  { %15527 = vmatmul.mubr.bf16.gmra.mxu0 %v17279_v27  ;;  %v17350_v22 = vpack.c.bf16 %v115_v14, %v114_v13  ;;  %v127_v13 = vld [vmem:[#allocation4 + $0x200] sm:$0xff] }
  0x6a   :  { %15607 = vmatmul.mubr.msk.bf16.gmra.mxu1 %vm17237_vm2, %v13567_v28  ;;  %15530 = vmatprep.mubr.bf16.mxu0 %v17281_v29  ;;  %v613_v28 = vld [vmem:[#allocation4 + $0x12f] sm:$0xff]  ;;  %v636_v14 = vld [vmem:[#allocation4 + $0x1e7] sm:$0xff] }
  0x6b   :  { %15610 = vmatprep.mubr.msk.bf16.mxu1 %vm17237_vm2, %v13570_v30  ;;  %v17318_v30 = vpack.c.bf16 %v101_v20, %v100_v19  ;;  %v13591_v36 = vpack.c.bf16 %v613_v28, %v612_v26  ;;  %v17348_v19 = vpack.c.bf16 %v113_v8, %v112_v7  ;;  %v13606_v20 = vpack.c.bf16 %v623_v11, %v622_v9  ;;  %v626_v26 = vld [vmem:[#allocation4 + $0x197] sm:$0xff]  ;;  %v627_v28 = vld [vmem:[#allocation4 + $0x19f] sm:$0xff] }
  0x6c   :  { %v125_v7 = vld [vmem:[#allocation4 + $0x1f0] sm:$0xff]  ;;  %v635_v9 = vld [vmem:[#allocation4 + $0x1df] sm:$0xff] }
  0x6d   :  { %v634_v8 = vld [vmem:[#allocation4 + $0x1d7] sm:$0xff] }
  0x6e   :  { %v126_v11 = vld [vmem:[#allocation4 + $0x1f8] sm:$0xff] }
  0x71   :  { %15531 = vmatmul.mubr.bf16.gmra.mxu0 %v17289_v45 }
  0x72   :  { %15611 = vmatmul.mubr.msk.bf16.gmra.mxu1 %vm17237_vm2, %v13573_v47  ;;  %15534 = vmatprep.mubr.bf16.mxu0 %v17291_v49  ;;  %v17328_v47 = vpack.c.bf16 %v105_v38, %v104_v37  ;;  %v628_v37 = vld [vmem:[#allocation4 + $0x1a7] sm:$0xff]  ;;  %v629_v38 = vld [vmem:[#allocation4 + $0x1af] sm:$0xff] }
  0x73   :  { %15614 = vmatprep.mubr.msk.bf16.mxu1 %vm17237_vm2, %v13576_v50  ;;  %v13594_v50 = vpack.c.bf16 %v615_v40, %v614_v39  ;;  %v17358_v39 = vpack.c.bf16 %v117_v25, %v116_v24  ;;  %v13612_v40 = vpack.c.bf16 %v627_v28, %v626_v26  ;;  %v13615_v42 = vpack.c.bf16 %v629_v38, %v628_v37  ;;  %v128_v25 = vld [vmem:[#allocation4 + $0x208] sm:$0xff]  ;;  %v129_v26 = vld [vmem:[#allocation4 + $0x210] sm:$0xff] }
  0x74   :  { %v638_v28 = vld [vmem:[#allocation4 + $0x1f7] sm:$0xff]  ;;  %v642_v38 = vadd.s32 8, %v17231_v21 }
  0x76   :  { %vm1978_vm3 = vcmp.lt.s32.totalorder %v642_v38, 15 }
  0x77   :  { %vm17394_vm4 = vmpackc.low %vm1978_vm3, %vm17187_vm1 }
  0x79   :  { %15535 = vmatmul.mubr.bf16.gmra.mxu0 %v17302_v1 }
  0x7a   :  { %15615 = vmatmul.mubr.msk.bf16.gmra.mxu1 %vm17237_vm2, %v13579_v2  ;;  %15538 = vmatprep.mubr.bf16.mxu0 %v17304_v3  ;;  %v17338_v2 = vpack.c.bf16 %v109_v55, %v108_v53  ;;  %v122_v53 = vld [vmem:[#allocation4 + $0x1d8] sm:$0xff]  ;;  %v123_v55 = vld [vmem:[#allocation4 + $0x1e0] sm:$0xff] }
  0x7b   :  { %15618 = vmatprep.mubr.msk.bf16.mxu1 %vm17237_vm2, %v13582_v4  ;;  %v13600_v4 = vpack.c.bf16 %v619_v57, %v618_v56  ;;  %v632_v56 = vld [vmem:[#allocation4 + $0x1c7] sm:$0xff]  ;;  %v17370_v63 = vpack.c.bf16 %v123_v55, %v122_v53  ;;  %v17400_v53 = vpack.c.bf16 %v1920_v44, %v1919_v43  ;;  %v1933_v43 = vld [vmem:[#allocation4 + $0x99] sm:$0xff] }
  0x7c   :  { %v16984_v57 = vld [vmem:[#allocation7 + $0x178] sm:$0xff]   ;;  %v16978_v55 = vld [vmem:[#allocation7 + $0xf0] sm:$0xff]  }
  0x7d   :  { %15894 = vmatprep.subr.bf16.mxu1 %v16984_v57  ;;  %v1934_v44 = vld [vmem:[#allocation4 + $0xa1] sm:$0xff] }
  0x81   :  { %15539 = vmatmul.mubr.bf16.gmra.mxu0 %v145_v16  ;;  %v624_v16 = vld [vmem:[#allocation4 + $0x187] sm:$0xff] }
  0x82   :  { %15619 = vmatmul.mubr.msk.bf16.gmra.mxu1 %vm17237_vm2, %v13585_v17  ;;  %15542 = vmatprep.mubr.bf16.mxu0 %v17312_v18  ;;  %v625_v17 = vld [vmem:[#allocation4 + $0x18f] sm:$0xff] }
  0x83   :  { %15622 = vmatprep.mubr.bf16.mxu1 %v23486_v0  ;;  %v13609_v23 = vpack.c.bf16 %v625_v17, %v624_v16  ;;  %v637_v16 = vld [vmem:[#allocation4 + $0x1ef] sm:$0xff] }
  0x84   :  { %v13627_v24 = vpack.c.bf16 %v637_v16, %v636_v14  ;;  %v1928_v14 = vld [vmem:[#allocation4 + $0x71] sm:$0xff]  ;;  %v16981_v16 = vld [vmem:[#allocation7 + $0xd8] sm:$0xff]  }
  0x89   :  { %15543 = vmatmul.mubr.bf16.gmra.mxu0 %v17318_v30 }
  0x8a   :  { %15623 = vmatmul.mubr.msk.bf16.gmra.mxu1 %vm17237_vm2, %v13588_v32  ;;  %15546 = vmatprep.mubr.bf16.mxu0 %v17320_v35  ;;  %v118_v32 = vld [vmem:[#allocation4 + $0x1b8] sm:$0xff] }
  0x8b   :  { %15626 = vmatprep.mubr.msk.bf16.mxu1 %vm17237_vm2, %v13591_v36  ;;  %v119_v36 = vld [vmem:[#allocation4 + $0x1c0] sm:$0xff] }
  0x8c   :  { %v17360_v41 = vpack.c.bf16 %v119_v36, %v118_v32  ;;  %v639_v32 = vld [vmem:[#allocation4 + $0x1ff] sm:$0xff]  ;;  %v161_v36 = vpack.c.bf16 %v129_v26, %v128_v25 }
  0x8d   :  { %v13630_v37 = vpack.c.bf16 %v639_v32, %v638_v28  ;;  %v16982_v25 = vld [vmem:[#allocation7 + $0xd0] sm:$0xff]   ;;  %v1931_v32 = vld [vmem:[#allocation4 + $0x89] sm:$0xff] }
  0x8e   :  { %v1929_v26 = vld [vmem:[#allocation4 + $0x79] sm:$0xff]  ;;  %v1930_v28 = vld [vmem:[#allocation4 + $0x81] sm:$0xff] }
  0x8f   :  { %v17435_v38 = vpack.c.bf16 %v1930_v28, %v1929_v26 }
  0x91   :  { %15547 = vmatmul.mubr.bf16.gmra.mxu0 %v17328_v47 }
  0x92   :  { %15627 = vmatmul.mubr.msk.bf16.gmra.mxu1 %vm17237_vm2, %v13594_v50  ;;  %15550 = vmatprep.mubr.bf16.mxu0 %v17330_v51  ;;  %v630_v50 = vld [vmem:[#allocation4 + $0x1b7] sm:$0xff] }
  0x93   :  { %15630 = vmatprep.mubr.msk.bf16.mxu1 %vm17237_vm2, %v13597_v52  ;;  %v631_v52 = vld [vmem:[#allocation4 + $0x1bf] sm:$0xff] }
  0x94   :  { %v13618_v61 = vpack.c.bf16 %v631_v52, %v630_v50  ;;  %v23641_v50 = vmov 0 }
  0x95   :  { %v23642_v50 = vsel %vm17394_vm4, 4294967295, %v23641_v50 }
  0x96   :  { %23643 = vst [vmem:[#allocation16_spill] sm:$0xff] %v23642_v50 }
  0x99   :  { %15551 = vmatmul.mubr.bf16.gmra.mxu0 %v17338_v2 }
  0x9a   :  { %15631 = vmatmul.mubr.msk.bf16.gmra.mxu1 %vm17237_vm2, %v13600_v4  ;;  %15554 = vmatprep.mubr.bf16.mxu0 %v17340_v5  ;;  %v13621_v4 = vpack.c.bf16 %v633_v58, %v632_v56  ;;  %v16985_v56 = vld [vmem:[#allocation7 + $0x170] sm:$0xff]  }
  0x9b   :  { %15634 = vmatprep.mubr.msk.bf16.mxu1 %vm17237_vm2, %v13603_v6  ;;  %v124_v6 = vld [vmem:[#allocation4 + $0x1e8] sm:$0xff]  ;;  %v1921_v58 = vld [vmem:[#allocation4 + $0x39] sm:$0xff] }
  0x9c   :  { %v17378_v17 = vpack.c.bf16 %v125_v7, %v124_v6  ;;  %v1923_v6 = vld [vmem:[#allocation4 + $0x49] sm:$0xff]  ;;  %v1924_v7 = vld [vmem:[#allocation4 + $0x51] sm:$0xff] }
  0xa1   :  { %15555 = vmatmul.mubr.bf16.gmra.mxu0 %v17348_v19 }
  0xa2   :  { %15635 = vmatmul.mubr.msk.bf16.gmra.mxu1 %vm17237_vm2, %v13606_v20  ;;  %15558 = vmatprep.mubr.bf16.mxu0 %v17350_v22  ;;  %v13624_v20 = vpack.c.bf16 %v635_v9, %v634_v8  ;;  %v16986_v8 = vld [vmem:[#allocation7 + $0x168] sm:$0xff]   ;;  %v16980_v9 = vld [vmem:[#allocation7 + $0xe0] sm:$0xff]  }
  0xa3   :  { %15638 = vmatprep.mubr.msk.bf16.mxu1 %vm17237_vm2, %v13609_v23  ;;  %v17380_v23 = vpack.c.bf16 %v127_v13, %v126_v11  ;;  %v16987_v11 = vld [vmem:[#allocation7 + $0x160] sm:$0xff]   ;;  %v1926_v13 = vld [vmem:[#allocation4 + $0x61] sm:$0xff] }
  0xa9   :  { %15559 = vmatmul.mubr.bf16.gmra.mxu0 %v17358_v39 }
  0xaa   :  { %15639 = vmatmul.mubr.msk.bf16.gmra.mxu1 %vm17237_vm2, %v13612_v40  ;;  %15562 = vmatprep.mubr.bf16.mxu0 %v17360_v41  ;;  %v1917_v40 = vld [vmem:[#allocation4 + $0x19] sm:$0xff] }
  0xab   :  { %15642 = vmatprep.mubr.msk.bf16.mxu1 %vm17237_vm2, %v13615_v42  ;;  %v1918_v42 = vld [vmem:[#allocation4 + $0x21] sm:$0xff] }
  0xac   :  { %v17398_v52 = vpack.c.bf16 %v1918_v42, %v1917_v40  ;;  %v16992_v42 = vld [vmem:[#allocation7 + $0x140] sm:$0xff]  }
  0xb1   :  { %15563 = vmatmul.mubr.bf16.gmra.mxu0 %v17368_v59 }
  0xb2   :  { %15643 = vmatmul.mubr.msk.bf16.gmra.mxu1 %vm17237_vm2, %v13618_v61  ;;  %15566 = vmatprep.mubr.bf16.mxu0 %v17370_v63  ;;  %v1922_v61 = vld [vmem:[#allocation4 + $0x41] sm:$0xff] }
  0xb3   :  { %15646 = vmatprep.mubr.msk.bf16.mxu1 %vm17237_vm2, %v13621_v4  ;;  %v16979_v4 = vld [vmem:[#allocation7 + $0xe8] sm:$0xff]  }
  0xb9   :  { %15567 = vmatmul.mubr.bf16.gmra.mxu0 %v17378_v17 }
  0xba   :  { %15647 = vmatmul.mubr.msk.bf16.gmra.mxu1 %vm17237_vm2, %v13624_v20  ;;  %15570 = vmatprep.mubr.bf16.mxu0 %v17380_v23  ;;  %v16989_v20 = vld [vmem:[#allocation7 + $0x158] sm:$0xff]  }
  0xbb   :  { %15650 = vmatprep.mubr.msk.bf16.mxu1 %vm17237_vm2, %v13627_v24 }
  0xc1   :  { %15571 = vmatmul.mubr.bf16.gmra.mxu0 %v161_v36  ;;  %v1932_v36 = vld [vmem:[#allocation4 + $0x91] sm:$0xff] }
  0xc2   :  { %15651 = vmatmul.mubr.msk.bf16.gmra.mxu1 %vm17237_vm2, %v13630_v37  ;;  %15670 = vmatprep.mubr.bf16.mxu0 %v23486_v0  ;;  %v16983_v37 = vld [vmem:[#allocation7 + $0xc8] sm:$0xff]   ;;  %v17437_v40 = vpack.c.bf16 %v1932_v36, %v1931_v32 }
  0xc3   :  { %15750 = vmatprep.mubr.bf16.mxu1 %v23486_v0  ;;  %v1951_v36 = vld [vmem:[#allocation4 + $0x139] sm:$0xff] }
  0xc9   :  { %15671 = vmatmul.mubr.bf16.vlgmr.msra.gmra.mxu0 %v17228_v15  ;;  %v17411_v15 = vpack.c.bf16 %v1922_v61, %v1921_v58  ;;  %v17449_v58 = vpack.c.bf16 %v1934_v44, %v1933_v43 }
  0xca   :  { %15815 = vmatpush3.bf16.msra.mxu0 %v17294_v54  ;;  %15751 = vmatmul.mubr.msk.bf16.vlgmr.msra.gmra.mxu1 %vm17394_vm4, %v17398_v52  ;;  %v17413_v54 = vpack.c.bf16 %v1924_v7, %v1923_v6  ;;  %v1939_v6 = vld [vmem:[#allocation4 + $0xc9] sm:$0xff]  ;;  %v1940_v7 = vld [vmem:[#allocation4 + $0xd1] sm:$0xff] }
  0xcb   :  { %15674 = vmatprep.mubr.bf16.mxu0 %v17234_v31  ;;  %15754 = vmatprep.mubr.msk.bf16.mxu1 %vm17394_vm4, %v17400_v53  ;;  %v1925_v31 = vld [vmem:[#allocation4 + $0x59] sm:$0xff] }
  0xcc   :  { %15816 = vmatprep.subr.bf16.mxu0 %v16978_v55  ;;  %15895 = vmatpush3.bf16.msra.mxu1 %v16984_v57  ;;  %v1927_v57 = vld [vmem:[#allocation4 + $0x69] sm:$0xff] }
  0xcd   :  { %15896 = vmatprep.subr.bf16.mxu1 %v16985_v56  ;;  %v17425_v24 = vpack.c.bf16 %v1928_v14, %v1927_v57 }
  0xce   :  { %15817 = vmatpush3.bf16.msra.mxu0 %v16978_v55  ;;  %v1935_v55 = vld [vmem:[#allocation4 + $0xa9] sm:$0xff] }
  0xcf   :  { %15818 = vmatprep.subr.bf16.mxu0 %v16979_v4 }
  0xd0   :  { %15897 = vmatpush3.bf16.msra.mxu1 %v16985_v56  ;;  %v1936_v56 = vld [vmem:[#allocation4 + $0xb1] sm:$0xff] }
  0xd1   :  { %15675 = vmatmul.mubr.bf16.gmra.mxu0 %v17241_v34  ;;  %15898 = vmatprep.subr.bf16.mxu1 %v16986_v8  ;;  %v17423_v34 = vpack.c.bf16 %v1926_v13, %v1925_v31  ;;  %v17451_v61 = vpack.c.bf16 %v1936_v56, %v1935_v55  ;;  %v1944_v31 = vld [vmem:[#allocation4 + $0xf1] sm:$0xff] }
  0xd2   :  { %15755 = vmatmul.mubr.msk.bf16.gmra.mxu1 %vm17394_vm4, %v17411_v15  ;;  %15678 = vmatprep.mubr.bf16.mxu0 %v17249_v46  ;;  %v16990_v46 = vld [vmem:[#allocation7 + $0x150] sm:$0xff]  }
  0xd3   :  { %15758 = vmatprep.mubr.msk.bf16.mxu1 %vm17394_vm4, %v17413_v54  ;;  %15819 = vmatpush3.bf16.msra.mxu0 %v16979_v4  ;;  %v1938_v4 = vld [vmem:[#allocation4 + $0xc1] sm:$0xff] }
  0xd4   :  { %15820 = vmatprep.subr.bf16.mxu0 %v16980_v9  ;;  %15899 = vmatpush3.bf16.msra.mxu1 %v16986_v8 }
  0xd5   :  { %15900 = vmatprep.subr.bf16.mxu1 %v16987_v11 }
  0xd7   :  { %15821 = vmatpush3.bf16.msra.mxu0 %v16980_v9  ;;  %v17464_v9 = vpack.c.bf16 %v1940_v7, %v1939_v6 }
  0xd8   :  { %15822 = vmatprep.subr.bf16.mxu0 %v16981_v16  ;;  %15901 = vmatpush3.bf16.msra.mxu1 %v16987_v11  ;;  %v1943_v11 = vld [vmem:[#allocation4 + $0xe9] sm:$0xff] }
  0xd9   :  { %15679 = vmatmul.mubr.bf16.gmra.mxu0 %v17251_v48  ;;  %15902 = vmatprep.subr.bf16.mxu1 %v16989_v20  ;;  %v16991_v48 = vld [vmem:[#allocation7 + $0x148] sm:$0xff]   ;;  %v17476_v57 = vpack.c.bf16 %v1944_v31, %v1943_v11 }
  0xda   :  { %15759 = vmatmul.mubr.msk.bf16.gmra.mxu1 %vm17394_vm4, %v17423_v34  ;;  %15682 = vmatprep.mubr.bf16.mxu0 %v17259_v60  ;;  %v16988_v60 = vld [vmem:[#allocation7 + $0xc0] sm:$0xff]   ;;  %v1955_v31 = vld [vmem:[#allocation4 + $0x159] sm:$0xff] }
  0xdb   :  { %15762 = vmatprep.mubr.msk.bf16.mxu1 %vm17394_vm4, %v17425_v24  ;;  %15823 = vmatpush3.bf16.msra.mxu0 %v16981_v16  ;;  %v1949_v16 = vld [vmem:[#allocation4 + $0x129] sm:$0xff] }
  0xdc   :  { %15824 = vmatprep.subr.bf16.mxu0 %v16982_v25  ;;  %15903 = vmatpush3.bf16.msra.mxu1 %v16989_v20  ;;  %v1950_v20 = vld [vmem:[#allocation4 + $0x131] sm:$0xff] }
  0xdd   :  { %15904 = vmatprep.subr.bf16.mxu1 %v16990_v46 }
  0xdf   :  { %15825 = vmatpush3.bf16.msra.mxu0 %v16982_v25 }
  0xe0   :  { %15826 = vmatprep.subr.bf16.mxu0 %v16983_v37  ;;  %15905 = vmatpush3.bf16.msra.mxu1 %v16990_v46  ;;  %v17494_v46 = vpack.c.bf16 %v1950_v20, %v1949_v16 }
  0xe1   :  { %15683 = vmatmul.mubr.bf16.gmra.mxu0 %v17261_v62  ;;  %15906 = vmatprep.subr.bf16.mxu1 %v16991_v48  ;;  %v17447_v62 = vld [vmem:[#allocation7 + $0x1b8] sm:$0xff]  }
  0xe2   :  { %15763 = vmatmul.mubr.msk.bf16.gmra.mxu1 %vm17394_vm4, %v17435_v38  ;;  %15686 = vmatprep.mubr.bf16.mxu0 %v17269_v10  ;;  %v1937_v10 = vld [vmem:[#allocation4 + $0xb9] sm:$0xff] }
  0xe3   :  { %15766 = vmatprep.mubr.msk.bf16.mxu1 %vm17394_vm4, %v17437_v40  ;;  %15827 = vmatpush3.bf16.msra.mxu0 %v16983_v37  ;;  %v17462_v8 = vpack.c.bf16 %v1938_v4, %v1937_v10  ;;  %v1952_v37 = vld [vmem:[#allocation4 + $0x141] sm:$0xff] }
  0xe4   :  { %15828 = vmatprep.subr.bf16.mxu0 %v16988_v60  ;;  %15907 = vmatpush3.bf16.msra.mxu1 %v16991_v48  ;;  %v13700_v55 = vpack.c.bf16 %v1952_v37, %v1951_v36 }
  0xe5   :  { %15908 = vmatprep.subr.bf16.mxu1 %v16992_v42 }
  0xe7   :  { %15829 = vmatpush3.bf16.msra.mxu0 %v16988_v60  ;;  %v1953_v60 = vld [vmem:[#allocation4 + $0x149] sm:$0xff] }
  0xe8   :  { %15909 = vmatpush3.bf16.msra.mxu1 %v16992_v42  ;;  %15974 = vmatprep.subr.bf16.mxu0 %v17447_v62  ;;  %v1954_v42 = vld [vmem:[#allocation4 + $0x151] sm:$0xff] }
  0xe9   :  { %15687 = vmatmul.mubr.bf16.gmra.mxu0 %v17271_v12  ;;  %v1941_v12 = vld [vmem:[#allocation4 + $0xd9] sm:$0xff]  ;;  %v17509_v10 = vpack.c.bf16 %v1954_v42, %v1953_v60 }
  0xea   :  { %15767 = vmatmul.mubr.msk.bf16.gmra.mxu1 %vm17394_vm4, %v17449_v58  ;;  %15690 = vmatprep.mubr.bf16.mxu0 %v17279_v27  ;;  %v1942_v27 = vld [vmem:[#allocation4 + $0xe1] sm:$0xff] }
  0xeb   :  { %15770 = vmatprep.mubr.msk.bf16.mxu1 %vm17394_vm4, %v17451_v61  ;;  %v17474_v13 = vpack.c.bf16 %v1942_v27, %v1941_v12 }
  0xf1   :  { %15691 = vmatmul.mubr.bf16.gmra.mxu0 %v17281_v29  ;;  %v1945_v29 = vld [vmem:[#allocation4 + $0xf9] sm:$0xff] }
  0xf2   :  { %15771 = vmatmul.mubr.msk.bf16.gmra.mxu1 %vm17394_vm4, %v17462_v8  ;;  %15694 = vmatprep.mubr.bf16.mxu0 %v17289_v45  ;;  %v1946_v45 = vld [vmem:[#allocation4 + $0x101] sm:$0xff] }
  0xf3   :  { %15774 = vmatprep.mubr.msk.bf16.mxu1 %vm17394_vm4, %v17464_v9  ;;  %v17486_v14 = vpack.c.bf16 %v1946_v45, %v1945_v29  ;;  %v1956_v29 = vld [vmem:[#allocation4 + $0x161] sm:$0xff] }
  0xf9   :  { %15695 = vmatmul.mubr.bf16.gmra.mxu0 %v17291_v49  ;;  %v1947_v49 = vld [vmem:[#allocation4 + $0x119] sm:$0xff] }
  0xfa   :  { %15775 = vmatmul.mubr.msk.bf16.gmra.mxu1 %vm17394_vm4, %v17474_v13  ;;  %15698 = vmatprep.mubr.bf16.mxu0 %v17302_v1  ;;  %v1948_v1 = vld [vmem:[#allocation4 + $0x121] sm:$0xff] }
  0xfb   :  { %15778 = vmatprep.mubr.msk.bf16.mxu1 %vm17394_vm4, %v17476_v57  ;;  %v13694_v25 = vpack.c.bf16 %v1948_v1, %v1947_v49  ;;  %v1957_v49 = vld [vmem:[#allocation4 + $0x169] sm:$0xff]  ;;  %v1958_v1 = vld [vmem:[#allocation4 + $0x171] sm:$0xff] }
 0x101   :  { %15699 = vmatmul.mubr.bf16.gmra.mxu0 %v17304_v3 }
 0x102   :  { %15779 = vmatmul.mubr.msk.bf16.gmra.mxu1 %vm17394_vm4, %v17486_v14  ;;  %15702 = vmatprep.mubr.bf16.mxu0 %v23486_v0 }
 0x103   :  { %15782 = vmatprep.mubr.bf16.mxu1 %v23486_v0 }
 0x109   :  { %v15512_v26 = vpop.f32.mrf.mxu0  ;;  %15703 = vmatmul.mubr.bf16.gmra.mxu0 %v17312_v18 }
 0x10a   :  { %v15592_v28 = vpop.f32.mrf.mxu1  ;;  %15783 = vmatmul.mubr.msk.bf16.gmra.mxu1 %vm17394_vm4, %v13694_v25  ;;  %15706 = vmatprep.mubr.bf16.mxu0 %v17318_v30  ;;  %v13706_v25 = vpack.c.bf16 %v1956_v29, %v1955_v31 }
 0x10b   :  { %v17500_v3 = vadd.f32 %v15592_v28, %v15512_v26  ;;  %v261_v32 = vpop.f32.mrf.mxu0  ;;  %15786 = vmatprep.mubr.msk.bf16.mxu1 %vm17394_vm4, %v17494_v46  ;;  %v13709_v28 = vpack.c.bf16 %v1958_v1, %v1957_v49 }
 0x10c   :  { %v834_v48 = vpop.f32.mrf.mxu1 }
 0x10d   :  { %v17505_v43 = vadd.f32 %v834_v48, %v261_v32  ;;  %v15513_v18 = vpop.f32.mrf.mxu0 }
 0x10e   :  { %v15593_v44 = vpop.f32.mrf.mxu1 }
 0x10f   :  { %v17507_v56 = vadd.f32 %v15593_v44, %v15513_v18  ;;  %v264_v30 = vpop.f32.mrf.mxu0  ;;  %v1959_v18 = vld [vmem:[#allocation4 + $0x179] sm:$0xff]  ;;  %v1960_v44 = vld [vmem:[#allocation4 + $0x181] sm:$0xff] }
 0x110   :  { %v837_v4 = vpop.f32.mrf.mxu1 }
 0x111   :  { %v17511_v6 = vadd.f32 %v837_v4, %v264_v30  ;;  %v15516_v7 = vpop.f32.mrf.mxu0  ;;  %15707 = vmatmul.mubr.bf16.gmra.mxu0 %v17320_v35  ;;  %v1961_v30 = vld [vmem:[#allocation4 + $0x189] sm:$0xff]  ;;  %v1962_v4 = vld [vmem:[#allocation4 + $0x191] sm:$0xff] }
 0x112   :  { %v15596_v12 = vpop.f32.mrf.mxu1  ;;  %15787 = vmatmul.mubr.msk.bf16.gmra.mxu1 %vm17394_vm4, %v13700_v55  ;;  %15710 = vmatprep.mubr.bf16.mxu0 %v17328_v47 }
 0x113   :  { %v17517_v27 = vadd.f32 %v15596_v12, %v15516_v7  ;;  %v277_v11 = vpop.f32.mrf.mxu0  ;;  %15790 = vmatprep.mubr.msk.bf16.mxu1 %vm17394_vm4, %v17509_v10 }
 0x114   :  { %v850_v45 = vpop.f32.mrf.mxu1 }
 0x115   :  { %v17522_v16 = vadd.f32 %v850_v45, %v277_v11  ;;  %v15517_v35 = vpop.f32.mrf.mxu0  ;;  %v13712_v11 = vpack.c.bf16 %v1960_v44, %v1959_v18 }
 0x116   :  { %v15597_v20 = vpop.f32.mrf.mxu1 }
 0x117   :  { %v17524_v26 = vadd.f32 %v15597_v20, %v15517_v35  ;;  %v280_v47 = vpop.f32.mrf.mxu0 }
 0x118   :  { %v853_v32 = vpop.f32.mrf.mxu1 }
 0x119   :  { %v17526_v36 = vadd.f32 %v853_v32, %v280_v47  ;;  %v15520_v37 = vpop.f32.mrf.mxu0  ;;  %15711 = vmatmul.mubr.bf16.gmra.mxu0 %v17330_v51  ;;  %v1963_v47 = vld [vmem:[#allocation4 + $0x199] sm:$0xff] }
 0x11a   :  { %v15600_v48 = vpop.f32.mrf.mxu1  ;;  %15791 = vmatmul.mubr.msk.bf16.gmra.mxu1 %vm17394_vm4, %v13706_v25  ;;  %15714 = vmatprep.mubr.bf16.mxu0 %v17338_v2  ;;  %v13715_v2 = vpack.c.bf16 %v1962_v4, %v1961_v30 }
 0x11b   :  { %v17532_v60 = vadd.f32 %v15600_v48, %v15520_v37  ;;  %v293_v42 = vpop.f32.mrf.mxu0  ;;  %15794 = vmatprep.mubr.msk.bf16.mxu1 %vm17394_vm4, %v13709_v28  ;;  %v1964_v28 = vld [vmem:[#allocation4 + $0x1a1] sm:$0xff]  ;;  %v1965_v37 = vld [vmem:[#allocation4 + $0x1a9] sm:$0xff]  ;;  %v1966_v48 = vld [vmem:[#allocation4 + $0x1b1] sm:$0xff] }
 0x11c   :  { %v866_v55 = vpop.f32.mrf.mxu1  ;;  %v13718_v44 = vpack.c.bf16 %v1964_v28, %v1963_v47  ;;  %v1969_v47 = vld [vmem:[#allocation4 + $0x1c9] sm:$0xff]  ;;  %v1970_v28 = vld [vmem:[#allocation4 + $0x1d1] sm:$0xff] }
 0x11d   :  { %v17536_v7 = vadd.f32 %v866_v55, %v293_v42  ;;  %v15521_v51 = vpop.f32.mrf.mxu0 }
 0x11e   :  { %v15601_v12 = vpop.f32.mrf.mxu1 }
 0x11f   :  { %v17538_v31 = vadd.f32 %v15601_v12, %v15521_v51  ;;  %v296_v29 = vpop.f32.mrf.mxu0 }
 0x120   :  { %v869_v45 = vpop.f32.mrf.mxu1 }
 0x121   :  { %v17540_v49 = vadd.f32 %v869_v45, %v296_v29  ;;  %v15524_v1 = vpop.f32.mrf.mxu0  ;;  %15715 = vmatmul.mubr.bf16.gmra.mxu0 %v17340_v5  ;;  %v17560_v29 = vld [vmem:[#allocation7 + $0x1f8] sm:$0xff]  }
 0x122   :  { %v15604_v35 = vpop.f32.mrf.mxu1  ;;  %15795 = vmatmul.mubr.msk.bf16.gmra.mxu1 %vm17394_vm4, %v13712_v11  ;;  %15718 = vmatprep.mubr.bf16.mxu0 %v17348_v19  ;;  %v13721_v19 = vpack.c.bf16 %v1966_v48, %v1965_v37 }
 0x123   :  { %v17546_v20 = vadd.f32 %v15604_v35, %v15524_v1  ;;  %v309_v25 = vpop.f32.mrf.mxu0  ;;  %15798 = vmatprep.mubr.msk.bf16.mxu1 %vm17394_vm4, %v13715_v2  ;;  %v1967_v1 = vld [vmem:[#allocation4 + $0x1b9] sm:$0xff]  ;;  %v1968_v35 = vld [vmem:[#allocation4 + $0x1c1] sm:$0xff]  ;;  %16054 = vmatprep.subr.bf16.mxu1 %v17560_v29 }
 0x124   :  { %v882_v32 = vpop.f32.mrf.mxu1 }
 0x125   :  { %v17550_v42 = vadd.f32 %v882_v32, %v309_v25  ;;  %v15525_v5 = vpop.f32.mrf.mxu0 }
 0x126   :  { %v15605_v18 = vpop.f32.mrf.mxu1 }
 0x127   :  { %v17552_v55 = vadd.f32 %v15605_v18, %v15525_v5  ;;  %v312_v30 = vpop.f32.mrf.mxu0  ;;  %v13727_v18 = vpack.c.bf16 %v1970_v28, %v1969_v47  ;;  %v1974_v47 = vld [vmem:[#allocation4 + $0x1f1] sm:$0xff] }
 0x128   :  { %v885_v4 = vpop.f32.mrf.mxu1 }
 0x129   :  { %v17554_v51 = vadd.f32 %v885_v4, %v312_v30  ;;  %v15528_v12 = vpop.f32.mrf.mxu0  ;;  %15719 = vmatmul.mubr.bf16.gmra.mxu0 %v17350_v22 }
 0x12a   :  { %v15608_v11 = vpop.f32.mrf.mxu1  ;;  %15799 = vmatmul.mubr.msk.bf16.gmra.mxu1 %vm17394_vm4, %v13718_v44  ;;  %15722 = vmatprep.mubr.bf16.mxu0 %v17358_v39  ;;  %v13724_v39 = vpack.c.bf16 %v1968_v35, %v1967_v1  ;;  %v1972_v1 = vld [vmem:[#allocation4 + $0x1e1] sm:$0xff] }
 0x12b   :  { %v17562_v2 = vadd.f32 %v15608_v11, %v15528_v12  ;;  %v325_v45 = vpop.f32.mrf.mxu0  ;;  %15802 = vmatprep.mubr.msk.bf16.mxu1 %vm17394_vm4, %v13721_v19 }
 0x12c   :  { %v898_v25 = vpop.f32.mrf.mxu1 }
 0x12d   :  { %v17567_v22 = vadd.f32 %v898_v25, %v325_v45  ;;  %v15529_v32 = vpop.f32.mrf.mxu0  ;;  %v1971_v45 = vld [vmem:[#allocation4 + $0x1d9] sm:$0xff]  ;;  %v1973_v25 = vld [vmem:[#allocation4 + $0x1e9] sm:$0xff] }
 0x12e   :  { %v15609_v37 = vpop.f32.mrf.mxu1 }
 0x12f   :  { %v17569_v48 = vadd.f32 %v15609_v37, %v15529_v32  ;;  %v328_v5 = vpop.f32.mrf.mxu0  ;;  %v13730_v37 = vpack.c.bf16 %v1972_v1, %v1971_v45  ;;  %v1976_v1 = vld [vmem:[#allocation4 + $0x201] sm:$0xff] }
 0x130   :  { %v901_v44 = vpop.f32.mrf.mxu1 }
 0x131   :  { %v17571_v30 = vadd.f32 %v901_v44, %v328_v5  ;;  %v15532_v19 = vpop.f32.mrf.mxu0  ;;  %15723 = vmatmul.mubr.bf16.gmra.mxu0 %v17360_v41 }
 0x132   :  { %v15612_v4 = vpop.f32.mrf.mxu1  ;;  %15803 = vmatmul.mubr.msk.bf16.gmra.mxu1 %vm17394_vm4, %v13724_v39  ;;  %15726 = vmatprep.mubr.bf16.mxu0 %v17368_v59  ;;  %v13733_v59 = vpack.c.bf16 %v1974_v47, %v1973_v25  ;;  %v2615_v25 = vld [vmem:[#allocation4 + $0x17] sm:$0xff]  ;;  %v2616_v47 = vld [vmem:[#allocation4 + $0x1f] sm:$0xff] }
 0x133   :  { %v17577_v12 = vadd.f32 %v15612_v4, %v15532_v19  ;;  %v341_v11 = vpop.f32.mrf.mxu0  ;;  %15806 = vmatprep.mubr.msk.bf16.mxu1 %vm17394_vm4, %v13727_v18  ;;  %v13747_v0 = vpack.c.bf16 %v2616_v47, %v2615_v25  ;;  %v2619_v25 = vld [vmem:[#allocation4 + $0x37] sm:$0xff]  ;;  %v2620_v47 = vld [vmem:[#allocation4 + $0x3f] sm:$0xff] }
 0x134   :  { %v914_v35 = vpop.f32.mrf.mxu1 }
 0x135   :  { %v17581_v28 = vadd.f32 %v914_v35, %v341_v11  ;;  %v15533_v41 = vpop.f32.mrf.mxu0  ;;  %v1975_v11 = vld [vmem:[#allocation4 + $0x1f9] sm:$0xff] }
 0x136   :  { %v15613_v32 = vpop.f32.mrf.mxu1 }
 0x137   :  { %v17583_v5 = vadd.f32 %v15613_v32, %v15533_v41  ;;  %v344_v39 = vpop.f32.mrf.mxu0 }
 0x138   :  { %v917_v44 = vpop.f32.mrf.mxu1 }
 0x139   :  { %v17585_v19 = vadd.f32 %v917_v44, %v344_v39  ;;  %v15536_v4 = vpop.f32.mrf.mxu0  ;;  %15727 = vmatmul.mubr.bf16.gmra.mxu0 %v17370_v63  ;;  %v13736_v44 = vpack.c.bf16 %v1976_v1, %v1975_v11 }
 0x13a   :  { %v15616_v18 = vpop.f32.mrf.mxu1  ;;  %15807 = vmatmul.mubr.msk.bf16.gmra.mxu1 %vm17394_vm4, %v13730_v37  ;;  %15730 = vmatprep.mubr.bf16.mxu0 %v17378_v17 }
 0x13b   :  { %v17591_v35 = vadd.f32 %v15616_v18, %v15536_v4  ;;  %v357_v45 = vpop.f32.mrf.mxu0  ;;  %15810 = vmatprep.mubr.msk.bf16.mxu1 %vm17394_vm4, %v13733_v59 }
 0x13c   :  { %v930_v41 = vpop.f32.mrf.mxu1 }
 0x13d   :  { %v17595_v32 = vadd.f32 %v930_v41, %v357_v45  ;;  %v15537_v63 = vpop.f32.mrf.mxu0  ;;  %v2617_v45 = vld [vmem:[#allocation4 + $0x27] sm:$0xff]  ;;  %v2618_v41 = vld [vmem:[#allocation4 + $0x2f] sm:$0xff] }
 0x13e   :  { %v15617_v39 = vpop.f32.mrf.mxu1 }
 0x13f   :  { %23644 = vst [vmem:[#allocation17_spill] sm:$0xff] %v17595_v32  ;;  %v17597_v37 = vadd.f32 %v15617_v39, %v15537_v63  ;;  %v360_v17 = vpop.f32.mrf.mxu0  ;;  %v13750_v39 = vpack.c.bf16 %v2618_v41, %v2617_v45  ;;  %v2621_v45 = vld [vmem:[#allocation4 + $0x47] sm:$0xff]  ;;  %v2622_v41 = vld [vmem:[#allocation4 + $0x4f] sm:$0xff] }
 0x140   :  { %v933_v21 = vpop.f32.mrf.mxu1 }
 0x141   :  { %23645 = vst [vmem:[#allocation18_spill] sm:$0xff] %v17597_v37  ;;  %v17599_v4 = vadd.f32 %v933_v21, %v360_v17  ;;  %v15540_v18 = vpop.f32.mrf.mxu0  ;;  %15731 = vmatmul.mubr.bf16.gmra.mxu0 %v17380_v23 }
 0x142   :  { %v15620_v59 = vpop.f32.mrf.mxu1  ;;  %15811 = vmatmul.mubr.msk.bf16.gmra.mxu1 %vm17394_vm4, %v13736_v44  ;;  %15830 = vmatprep.mubr.msk.bf16.mxu0 %vm17237_vm2, %v13747_v0 }
 0x143   :  { %23646 = vst [vmem:[#allocation19_spill] sm:$0xff] %v17599_v4  ;;  %v17606_v11 = vadd.f32 %v15620_v59, %v15540_v18  ;;  %v373_v1 = vpop.f32.mrf.mxu0  ;;  %15910 = vmatprep.mubr.msk.bf16.mxu1 %vm17394_vm4, %v17398_v52  ;;  %v13753_v4 = vpack.c.bf16 %v2620_v47, %v2619_v25  ;;  %v16994_v18 = vld [vmem:[#allocation7 + $0x1b0] sm:$0xff]   ;;  %v16995_v47 = vld [vmem:[#allocation7 + $0x1a8] sm:$0xff]  }
 0x144   :  { %v946_v21 = vpop.f32.mrf.mxu1  ;;  %v17001_v52 = vld [vmem:[#allocation7 + $0x1f0] sm:$0xff]  }
 0x145   :  { %23647 = vst [vmem:[#allocation20_spill] sm:$0xff] %v17606_v11  ;;  %v17611_v23 = vadd.f32 %v946_v21, %v373_v1  ;;  %v15541_v63 = vpop.f32.mrf.mxu0  ;;  %v2624_v25 = vld [vmem:[#allocation4 + $0x5f] sm:$0xff] }
 0x146   :  { %v15621_v44 = vpop.f32.mrf.mxu1 }
 0x147   :  { %v17613_v17 = vadd.f32 %v15621_v44, %v15541_v63  ;;  %v376_v0 = vpop.f32.mrf.mxu0 }
 0x148   :  { %v949_v37 = vpop.f32.mrf.mxu1 }
 0x149   :  { %23648 = vst [vmem:[#allocation21_spill] sm:$0xff] %v17613_v17  ;;  %v17615_v59 = vadd.f32 %v949_v37, %v376_v0  ;;  %v15544_v11 = vpop.f32.mrf.mxu0  ;;  %15831 = vmatmul.mubr.msk.bf16.vlgmr.msra.gmra.mxu0 %vm17237_vm2, %v13750_v39  ;;  %v2623_v37 = vld [vmem:[#allocation4 + $0x57] sm:$0xff] }
 0x14a   :  { %v15624_v32 = vpop.f32.mrf.mxu1  ;;  %15975 = vmatpush3.bf16.msra.mxu0 %v17447_v62  ;;  %15911 = vmatmul.mubr.msk.bf16.vlgmr.msra.gmra.mxu1 %vm17394_vm4, %v17400_v53  ;;  %v13759_v44 = vpack.c.bf16 %v2624_v25, %v2623_v37  ;;  %v2627_v37 = vld [vmem:[#allocation4 + $0x77] sm:$0xff]  ;;  %v2628_v25 = vld [vmem:[#allocation4 + $0x7f] sm:$0xff] }
 0x14b   :  { %23649 = vst [vmem:[#allocation22_spill] sm:$0xff] %v17615_v59  ;;  %v17623_v1 = vadd.f32 %v15624_v32, %v15544_v11  ;;  %v389_v21 = vpop.f32.mrf.mxu0  ;;  %15834 = vmatprep.mubr.msk.bf16.mxu0 %vm17237_vm2, %v13753_v4  ;;  %15914 = vmatprep.mubr.msk.bf16.mxu1 %vm17394_vm4, %v17411_v15  ;;  %v13756_v32 = vpack.c.bf16 %v2622_v41, %v2621_v45  ;;  %v17002_v11 = vld [vmem:[#allocation7 + $0x1e8] sm:$0xff]   ;;  %v2626_v41 = vld [vmem:[#allocation4 + $0x6f] sm:$0xff] }
 0x14c   :  { %v962_v62 = vpop.f32.mrf.mxu1  ;;  %15976 = vmatprep.subr.bf16.mxu0 %v16994_v18  ;;  %16055 = vmatpush3.bf16.msra.mxu1 %v17560_v29  ;;  %v17003_v29 = vld [vmem:[#allocation7 + $0x1e0] sm:$0xff]  }
 0x14d   :  { %23650 = vst [vmem:[#allocation23_spill] sm:$0xff] %v17623_v1  ;;  %v17631_v53 = vadd.f32 %v962_v62, %v389_v21  ;;  %v15545_v63 = vpop.f32.mrf.mxu0  ;;  %16056 = vmatprep.subr.bf16.mxu1 %v17001_v52  ;;  %v16996_v1 = vld [vmem:[#allocation7 + $0x1a0] sm:$0xff]  }
 0x14e   :  { %v15625_v39 = vpop.f32.mrf.mxu1  ;;  %15977 = vmatpush3.bf16.msra.mxu0 %v16994_v18  ;;  %v2625_v18 = vld [vmem:[#allocation4 + $0x67] sm:$0xff] }
 0x14f   :  { %v17633_v4 = vadd.f32 %v15625_v39, %v15545_v63  ;;  %v392_v0 = vpop.f32.mrf.mxu0  ;;  %15978 = vmatprep.subr.bf16.mxu0 %v16995_v47  ;;  %v16997_v63 = vld [vmem:[#allocation7 + $0x198] sm:$0xff]   ;;  %v13762_v39 = vpack.c.bf16 %v2626_v41, %v2625_v18 }
 0x150   :  { %v965_v15 = vpop.f32.mrf.mxu1  ;;  %16057 = vmatpush3.bf16.msra.mxu1 %v17001_v52  ;;  %v2630_v41 = vld [vmem:[#allocation4 + $0x8f] sm:$0xff] }
 0x151   :  { %v17635_v59 = vadd.f32 %v965_v15, %v392_v0  ;;  %v15548_v17 = vpop.f32.mrf.mxu0  ;;  %15835 = vmatmul.mubr.msk.bf16.gmra.mxu0 %vm17237_vm2, %v13756_v32  ;;  %16058 = vmatprep.subr.bf16.mxu1 %v17002_v11  ;;  %v13765_v0 = vpack.c.bf16 %v2628_v25, %v2627_v37  ;;  %v2631_v37 = vld [vmem:[#allocation4 + $0x97] sm:$0xff]  ;;  %v2632_v25 = vld [vmem:[#allocation4 + $0x9f] sm:$0xff] }
 0x152   :  { %v15628_v45 = vpop.f32.mrf.mxu1  ;;  %15915 = vmatmul.mubr.msk.bf16.gmra.mxu1 %vm17394_vm4, %v17413_v54  ;;  %15838 = vmatprep.mubr.msk.bf16.mxu0 %vm17237_vm2, %v13759_v44  ;;  %v17005_v44 = vld [vmem:[#allocation7 + $0x1d8] sm:$0xff]   ;;  %v23680_v50 = vld [vmem:[#allocation22_spill] sm:$0xff] }
 0x153   :  { %23651 = vst [vmem:[#allocation24_spill] sm:$0xff] %v17635_v59  ;;  %v17644_v21 = vadd.f32 %v15628_v45, %v15548_v17  ;;  %v405_v52 = vpop.f32.mrf.mxu0  ;;  %15918 = vmatprep.mubr.msk.bf16.mxu1 %vm17394_vm4, %v17423_v34  ;;  %15979 = vmatpush3.bf16.msra.mxu0 %v16995_v47 }
 0x154   :  { %v978_v62 = vpop.f32.mrf.mxu1  ;;  %15980 = vmatprep.subr.bf16.mxu0 %v16996_v1  ;;  %16059 = vmatpush3.bf16.msra.mxu1 %v17002_v11  ;;  %v17006_v11 = vld [vmem:[#allocation7 + $0x1d0] sm:$0xff]  }
 0x155   :  { %23652 = vst [vmem:[#allocation25_spill] sm:$0xff] %v17644_v21  ;;  %v17649_v54 = vadd.f32 %v978_v62, %v405_v52  ;;  %v15549_v32 = vpop.f32.mrf.mxu0  ;;  %16060 = vmatprep.subr.bf16.mxu1 %v17003_v29  ;;  %v16998_v21 = vld [vmem:[#allocation7 + $0x190] sm:$0xff]  }
 0x156   :  { %v15629_v17 = vpop.f32.mrf.mxu1 }
 0x157   :  { %v17651_v15 = vadd.f32 %v15629_v17, %v15549_v32  ;;  %v408_v45 = vpop.f32.mrf.mxu0  ;;  %15981 = vmatpush3.bf16.msra.mxu0 %v16996_v1  ;;  %v2629_v1 = vld [vmem:[#allocation4 + $0x87] sm:$0xff]  ;;  %v16999_v32 = vld [vmem:[#allocation7 + $0x188] sm:$0xff]  }
 0x158   :  { %v981_v34 = vpop.f32.mrf.mxu1  ;;  %15982 = vmatprep.subr.bf16.mxu0 %v16997_v63  ;;  %16061 = vmatpush3.bf16.msra.mxu1 %v17003_v29  ;;  %v13768_v17 = vpack.c.bf16 %v2630_v41, %v2629_v1  ;;  %v2634_v41 = vld [vmem:[#allocation4 + $0xaf] sm:$0xff] }
 0x159   :  { %v17653_v47 = vadd.f32 %v981_v34, %v408_v45  ;;  %v15552_v59 = vpop.f32.mrf.mxu0  ;;  %15839 = vmatmul.mubr.msk.bf16.gmra.mxu0 %vm17237_vm2, %v13762_v39  ;;  %16062 = vmatprep.subr.bf16.mxu1 %v17005_v44  ;;  %v13771_v45 = vpack.c.bf16 %v2632_v25, %v2631_v37  ;;  %v2635_v37 = vld [vmem:[#allocation4 + $0xb7] sm:$0xff]  ;;  %v2636_v25 = vld [vmem:[#allocation4 + $0xbf] sm:$0xff] }
 0x15a   :  { %v15632_v18 = vpop.f32.mrf.mxu1  ;;  %15919 = vmatmul.mubr.msk.bf16.gmra.mxu1 %vm17394_vm4, %v17425_v24  ;;  %15842 = vmatprep.mubr.msk.bf16.mxu0 %vm17237_vm2, %v13765_v0  ;;  %v17007_v0 = vld [vmem:[#allocation7 + $0x1c8] sm:$0xff]  }
 0x15b   :  { %23653 = vst [vmem:[#allocation26_spill] sm:$0xff] %v17653_v47  ;;  %v17662_v52 = vadd.f32 %v15632_v18, %v15552_v59  ;;  %v421_v29 = vpop.f32.mrf.mxu0  ;;  %15922 = vmatprep.mubr.msk.bf16.mxu1 %vm17394_vm4, %v17435_v38  ;;  %15983 = vmatpush3.bf16.msra.mxu0 %v16997_v63 }
 0x15c   :  { %v994_v62 = vpop.f32.mrf.mxu1  ;;  %15984 = vmatprep.subr.bf16.mxu0 %v16998_v21  ;;  %16063 = vmatpush3.bf16.msra.mxu1 %v17005_v44  ;;  %v17008_v44 = vld [vmem:[#allocation7 + $0x1c0] sm:$0xff]  }
 0x15d   :  { %23654 = vst [vmem:[#allocation27_spill] sm:$0xff] %v17662_v52  ;;  %v17667_v24 = vadd.f32 %v994_v62, %v421_v29  ;;  %v15553_v39 = vpop.f32.mrf.mxu0  ;;  %16064 = vmatprep.subr.bf16.mxu1 %v17006_v11  ;;  %v17004_v52 = vld [vmem:[#allocation7 + $0x180] sm:$0xff]  }
 0x15e   :  { %v15633_v59 = vpop.f32.mrf.mxu1 }
 0x15f   :  { %v17669_v34 = vadd.f32 %v15633_v59, %v15553_v39  ;;  %v424_v18 = vpop.f32.mrf.mxu0  ;;  %15985 = vmatpush3.bf16.msra.mxu0 %v16998_v21  ;;  %v2633_v21 = vld [vmem:[#allocation4 + $0xa7] sm:$0xff] }
 0x160   :  { %v997_v38 = vpop.f32.mrf.mxu1  ;;  %15986 = vmatprep.subr.bf16.mxu0 %v16999_v32  ;;  %16065 = vmatpush3.bf16.msra.mxu1 %v17006_v11  ;;  %v17685_v39 = vld [vmem:[#allocation7 + $0x238] sm:$0xff]   ;;  %v13774_v59 = vpack.c.bf16 %v2634_v41, %v2633_v21 }
 0x161   :  { %v17671_v63 = vadd.f32 %v997_v38, %v424_v18  ;;  %v15556_v47 = vpop.f32.mrf.mxu0  ;;  %15843 = vmatmul.mubr.msk.bf16.gmra.mxu0 %vm17237_vm2, %v13768_v17  ;;  %16066 = vmatprep.subr.bf16.mxu1 %v17007_v0  ;;  %v2637_v21 = vld [vmem:[#allocation4 + $0xc7] sm:$0xff] }
 0x162   :  { %v15636_v1 = vpop.f32.mrf.mxu1  ;;  %15923 = vmatmul.mubr.msk.bf16.gmra.mxu1 %vm17394_vm4, %v17437_v40  ;;  %15846 = vmatprep.mubr.msk.bf16.mxu0 %vm17237_vm2, %v13771_v45  ;;  %v13777_v45 = vpack.c.bf16 %v2636_v25, %v2635_v37  ;;  %v2640_v37 = vld [vmem:[#allocation4 + $0xdf] sm:$0xff] }
 0x163   :  { %v17680_v29 = vadd.f32 %v15636_v1, %v15556_v47  ;;  %v437_v11 = vpop.f32.mrf.mxu0  ;;  %15926 = vmatprep.mubr.msk.bf16.mxu1 %vm17394_vm4, %v17449_v58  ;;  %15987 = vmatpush3.bf16.msra.mxu0 %v16999_v32 }
 0x164   :  { %v1010_v62 = vpop.f32.mrf.mxu1  ;;  %15988 = vmatprep.subr.bf16.mxu0 %v17004_v52  ;;  %16067 = vmatpush3.bf16.msra.mxu1 %v17007_v0 }
 0x165   :  { %v17687_v40 = vadd.f32 %v1010_v62, %v437_v11  ;;  %v15557_v17 = vpop.f32.mrf.mxu0  ;;  %16068 = vmatprep.subr.bf16.mxu1 %v17008_v44  ;;  %v2639_v11 = vld [vmem:[#allocation4 + $0xd7] sm:$0xff] }
 0x166   :  { %v15637_v47 = vpop.f32.mrf.mxu1 }
 0x167   :  { %v17689_v18 = vadd.f32 %v15637_v47, %v15557_v17  ;;  %v440_v38 = vpop.f32.mrf.mxu0  ;;  %15989 = vmatpush3.bf16.msra.mxu0 %v17004_v52  ;;  %v2638_v52 = vld [vmem:[#allocation4 + $0xcf] sm:$0xff]  ;;  %v13783_v47 = vpack.c.bf16 %v2640_v37, %v2639_v11  ;;  %v2643_v37 = vld [vmem:[#allocation4 + $0xf7] sm:$0xff] }
 0x168   :  { %v1013_v58 = vpop.f32.mrf.mxu1  ;;  %16069 = vmatpush3.bf16.msra.mxu1 %v17008_v44  ;;  %16134 = vmatprep.subr.bf16.mxu0 %v17685_v39 }
 0x169   :  { %v17692_v32 = vadd.f32 %v1013_v58, %v440_v38  ;;  %v15560_v0 = vpop.f32.mrf.mxu0  ;;  %15847 = vmatmul.mubr.msk.bf16.gmra.mxu0 %vm17237_vm2, %v13774_v59  ;;  %v13780_v59 = vpack.c.bf16 %v2638_v52, %v2637_v21  ;;  %v2641_v21 = vld [vmem:[#allocation4 + $0xe7] sm:$0xff]  ;;  %v2642_v52 = vld [vmem:[#allocation4 + $0xef] sm:$0xff] }
 0x16a   :  { %v15640_v1 = vpop.f32.mrf.mxu1  ;;  %15927 = vmatmul.mubr.msk.bf16.gmra.mxu1 %vm17394_vm4, %v17451_v61  ;;  %15850 = vmatprep.mubr.msk.bf16.mxu0 %vm17237_vm2, %v13777_v45 }
 0x16b   :  { %23655 = vst [vmem:[#allocation28_spill] sm:$0xff] %v17692_v32  ;;  %v17701_v41 = vadd.f32 %v15640_v1, %v15560_v0  ;;  %v453_v44 = vpop.f32.mrf.mxu0  ;;  %15930 = vmatprep.mubr.msk.bf16.mxu1 %vm17394_vm4, %v17462_v8 }
 0x16c   :  { %v1026_v25 = vpop.f32.mrf.mxu1 }
 0x16d   :  { %23656 = vst [vmem:[#allocation29_spill] sm:$0xff] %v17701_v41  ;;  %v17706_v62 = vadd.f32 %v1026_v25, %v453_v44  ;;  %v15561_v17 = vpop.f32.mrf.mxu0  ;;  %v2644_v25 = vld [vmem:[#allocation4 + $0xff] sm:$0xff] }
 0x16e   :  { %v15641_v61 = vpop.f32.mrf.mxu1 }
 0x16f   :  { %23657 = vst [vmem:[#allocation30_spill] sm:$0xff] %v17706_v62  ;;  %v17708_v38 = vadd.f32 %v15641_v61, %v15561_v17  ;;  %v456_v45 = vpop.f32.mrf.mxu0 }
 0x170   :  { %v1029_v58 = vpop.f32.mrf.mxu1 }
 0x171   :  { %23658 = vst [vmem:[#allocation31_spill] sm:$0xff] %v17708_v38  ;;  %v17710_v0 = vadd.f32 %v1029_v58, %v456_v45  ;;  %v15564_v1 = vpop.f32.mrf.mxu0  ;;  %15851 = vmatmul.mubr.msk.bf16.gmra.mxu0 %vm17237_vm2, %v13780_v59  ;;  %v13786_v45 = vpack.c.bf16 %v2642_v52, %v2641_v21  ;;  %v13789_v58 = vpack.c.bf16 %v2644_v25, %v2643_v37  ;;  %v2645_v21 = vld [vmem:[#allocation4 + $0x107] sm:$0xff]  ;;  %v2646_v52 = vld [vmem:[#allocation4 + $0x10f] sm:$0xff] }
 0x172   :  { %v15644_v8 = vpop.f32.mrf.mxu1  ;;  %15931 = vmatmul.mubr.msk.bf16.gmra.mxu1 %vm17394_vm4, %v17464_v9  ;;  %15854 = vmatprep.mubr.msk.bf16.mxu0 %vm17237_vm2, %v13783_v47 }
 0x173   :  { %23659 = vst [vmem:[#allocation32_spill] sm:$0xff] %v17710_v0  ;;  %v17719_v44 = vadd.f32 %v15644_v8, %v15564_v1  ;;  %v469_v11 = vpop.f32.mrf.mxu0  ;;  %15934 = vmatprep.mubr.msk.bf16.mxu1 %vm17394_vm4, %v17474_v13 }
 0x174   :  { %v1042_v17 = vpop.f32.mrf.mxu1 }
 0x175   :  { %23660 = vst [vmem:[#allocation33_spill] sm:$0xff] %v17719_v44  ;;  %v17724_v59 = vadd.f32 %v1042_v17, %v469_v11  ;;  %v15565_v61 = vpop.f32.mrf.mxu0  ;;  %v3351_v11 = vld [vmem:[#allocation4 + $0x109] sm:$0xff]  ;;  %v2647_v17 = vld [vmem:[#allocation4 + $0x117] sm:$0xff] }
 0x176   :  { %v15645_v9 = vpop.f32.mrf.mxu1 }
 0x177   :  { %23661 = vst [vmem:[#allocation34_spill] sm:$0xff] %v17724_v59  ;;  %v17726_v0 = vadd.f32 %v15645_v9, %v15565_v61  ;;  %v472_v47 = vpop.f32.mrf.mxu0  ;;  %v2648_v61 = vld [vmem:[#allocation4 + $0x11f] sm:$0xff] }
 0x178   :  { %v1045_v38 = vpop.f32.mrf.mxu1  ;;  %v3353_v9 = vld [vmem:[#allocation4 + $0x119] sm:$0xff]  ;;  %v13795_v44 = vpack.c.bf16 %v2648_v61, %v2647_v17  ;;  %v3358_v17 = vld [vmem:[#allocation4 + $0x141] sm:$0xff] }
 0x179   :  { %23662 = vst [vmem:[#allocation35_spill] sm:$0xff] %v17726_v0  ;;  %v17728_v1 = vadd.f32 %v1045_v38, %v472_v47  ;;  %v15568_v8 = vpop.f32.mrf.mxu0  ;;  %15855 = vmatmul.mubr.msk.bf16.gmra.mxu0 %vm17237_vm2, %v13786_v45  ;;  %v3352_v38 = vld [vmem:[#allocation4 + $0x111] sm:$0xff]  ;;  %v3354_v47 = vld [vmem:[#allocation4 + $0x121] sm:$0xff] }
 0x17a   :  { %v15648_v13 = vpop.f32.mrf.mxu1  ;;  %15935 = vmatmul.mubr.msk.bf16.gmra.mxu1 %vm17394_vm4, %v17476_v57  ;;  %15858 = vmatprep.mubr.msk.bf16.mxu0 %vm17237_vm2, %v13789_v58  ;;  %v13792_v58 = vpack.c.bf16 %v2646_v52, %v2645_v21  ;;  %v13896_v59 = vpack.c.bf16 %v3352_v38, %v3351_v11  ;;  %v2649_v21 = vld [vmem:[#allocation4 + $0x127] sm:$0xff]  ;;  %v2650_v52 = vld [vmem:[#allocation4 + $0x12f] sm:$0xff]  ;;  %v2652_v11 = vld [vmem:[#allocation4 + $0x13f] sm:$0xff] }
 0x17b   :  { %23663 = vst [vmem:[#allocation36_spill] sm:$0xff] %v17728_v1  ;;  %v17737_v37 = vadd.f32 %v15648_v13, %v15568_v8  ;;  %v485_v25 = vpop.f32.mrf.mxu0  ;;  %15938 = vmatprep.mubr.msk.bf16.mxu1 %vm17394_vm4, %v17486_v14  ;;  %v3357_v38 = vld [vmem:[#allocation4 + $0x139] sm:$0xff] }
 0x17c   :  { %v1058_v45 = vpop.f32.mrf.mxu1 }
 0x17d   :  { %23664 = vst [vmem:[#allocation37_spill] sm:$0xff] %v17737_v37  ;;  %v17742_v57 = vadd.f32 %v1058_v45, %v485_v25  ;;  %v15569_v1 = vpop.f32.mrf.mxu0  ;;  %v13899_v37 = vpack.c.bf16 %v3354_v47, %v3353_v9 }
 0x17e   :  { %v15649_v0 = vpop.f32.mrf.mxu1 }
 0x17f   :  { %v17744_v8 = vadd.f32 %v15649_v0, %v15569_v1  ;;  %v488_v13 = vpop.f32.mrf.mxu0 }
 0x180   :  { %v1061_v62 = vpop.f32.mrf.mxu1 }
 0x181   :  { %v17746_v41 = vadd.f32 %v1061_v62, %v488_v13  ;;  %v15572_v14 = vpop.f32.mrf.mxu0  ;;  %15859 = vmatmul.mubr.msk.bf16.gmra.mxu0 %vm17237_vm2, %v13792_v58  ;;  %v2651_v62 = vld [vmem:[#allocation4 + $0x137] sm:$0xff] }
 0x182   :  { %v15652_v32 = vpop.f32.mrf.mxu1  ;;  %15939 = vmatmul.mubr.msk.bf16.gmra.mxu1 %vm17394_vm4, %v13896_v59  ;;  %15862 = vmatprep.mubr.msk.bf16.mxu0 %vm17237_vm2, %v13795_v44  ;;  %v13798_v59 = vpack.c.bf16 %v2650_v52, %v2649_v21  ;;  %v13801_v47 = vpack.c.bf16 %v2652_v11, %v2651_v62  ;;  %v2653_v21 = vld [vmem:[#allocation4 + $0x147] sm:$0xff]  ;;  %v2654_v52 = vld [vmem:[#allocation4 + $0x14f] sm:$0xff]  ;;  %v2655_v62 = vld [vmem:[#allocation4 + $0x157] sm:$0xff] }
 0x183   :  { %23665 = vst [vmem:[#allocation38_spill] sm:$0xff] %v17746_v41  ;;  %v17754_v0 = vadd.f32 %v15652_v32, %v15572_v14  ;;  %v501_v1 = vpop.f32.mrf.mxu0  ;;  %15942 = vmatprep.mubr.msk.bf16.mxu1 %vm17394_vm4, %v13899_v37  ;;  %v13905_v32 = vpack.c.bf16 %v3358_v17, %v3357_v38  ;;  %v2656_v11 = vld [vmem:[#allocation4 + $0x15f] sm:$0xff] }
 0x184   :  { %v1074_v25 = vpop.f32.mrf.mxu1  ;;  %v3362_v17 = vld [vmem:[#allocation4 + $0x161] sm:$0xff] }
 0x185   :  { %23666 = vst [vmem:[#allocation39_spill] sm:$0xff] %v17754_v0  ;;  %v17758_v61 = vadd.f32 %v1074_v25, %v501_v1  ;;  %v15573_v45 = vpop.f32.mrf.mxu0 }
 0x186   :  { %v15653_v9 = vpop.f32.mrf.mxu1 }
 0x187   :  { %v17760_v44 = vadd.f32 %v15653_v9, %v15573_v45  ;;  %v504_v58 = vpop.f32.mrf.mxu0 }
 0x188   :  { %v1077_v13 = vpop.f32.mrf.mxu1 }
 0x189   :  { %23667 = vst [vmem:[#allocation40_spill] sm:$0xff] %v17760_v44  ;;  %v17762_v14 = vadd.f32 %v1077_v13, %v504_v58  ;;  %v15672_v0 = vpop.f32.mrf.mxu0  ;;  %15863 = vmatmul.mubr.msk.bf16.gmra.mxu0 %vm17237_vm2, %v13798_v59  ;;  %v13807_v58 = vpack.c.bf16 %v2656_v11, %v2655_v62  ;;  %v3364_v11 = vld [vmem:[#allocation4 + $0x171] sm:$0xff] }
 0x18a   :  { %v1791_v37 = vadd.f32 %v15672_v0, %v17500_v3  ;;  %v15752_v41 = vpop.f32.mrf.mxu1  ;;  %15943 = vmatmul.mubr.msk.bf16.gmra.mxu1 %vm17394_vm4, %v17494_v46  ;;  %15866 = vmatprep.mubr.msk.bf16.mxu0 %vm17237_vm2, %v13801_v47  ;;  %v3361_v0 = vld [vmem:[#allocation4 + $0x159] sm:$0xff]  ;;  %v13804_v46 = vpack.c.bf16 %v2654_v52, %v2653_v21  ;;  %v2658_v52 = vld [vmem:[#allocation4 + $0x16f] sm:$0xff] }
 0x18b   :  { %23668 = vst [vmem:[#allocation41_spill] sm:$0xff] %v17762_v14  ;;  %v1470_v1 = vpop.f32.mrf.mxu0  ;;  %15946 = vmatprep.mubr.msk.bf16.mxu1 %vm17394_vm4, %v13905_v32  ;;  %v13911_v14 = vpack.c.bf16 %v3362_v17, %v3361_v0 }
 0x18c   :  { %v1789_v25 = vadd.f32 %v1470_v1, %v17505_v43  ;;  %v17775_v38 = vadd.f32 %v15752_v41, %v1791_v37  ;;  %v2168_v3 = vpop.f32.mrf.mxu1  ;;  %v3363_v1 = vld [vmem:[#allocation4 + $0x169] sm:$0xff] }
 0x18d   :  { %v15673_v45 = vpop.f32.mrf.mxu0 }
 0x18e   :  { %v1792_v59 = vadd.f32 %v15673_v45, %v17507_v56  ;;  %v17778_v9 = vadd.f32 %v2168_v3, %v1789_v25  ;;  %v15753_v47 = vpop.f32.mrf.mxu1  ;;  %v2659_v25 = vld [vmem:[#allocation4 + $0x177] sm:$0xff] }
 0x18f   :  { %v1473_v13 = vpop.f32.mrf.mxu0  ;;  %v3365_v45 = vld [vmem:[#allocation4 + $0x179] sm:$0xff] }
 0x190   :  { %v1790_v32 = vadd.f32 %v1473_v13, %v17511_v6  ;;  %v17781_v44 = vadd.f32 %v15753_v47, %v1792_v59  ;;  %v2171_v43 = vpop.f32.mrf.mxu1  ;;  %v2657_v6 = vld [vmem:[#allocation4 + $0x167] sm:$0xff] }
 0x191   :  { %v15676_v41 = vpop.f32.mrf.mxu0  ;;  %15867 = vmatmul.mubr.msk.bf16.gmra.mxu0 %vm17237_vm2, %v13804_v46  ;;  %v13810_v59 = vpack.c.bf16 %v2658_v52, %v2657_v6  ;;  %v2661_v52 = vld [vmem:[#allocation4 + $0x187] sm:$0xff] }
 0x192   :  { %23669 = vst [vmem:[#allocation42_spill] sm:$0xff] %v17781_v44  ;;  %v1795_v37 = vadd.f32 %v15676_v41, %v17517_v27  ;;  %v17786_v21 = vadd.f32 %v2171_v43, %v1790_v32  ;;  %v15756_v56 = vpop.f32.mrf.mxu1  ;;  %15947 = vmatmul.mubr.msk.bf16.gmra.mxu1 %vm17394_vm4, %v17509_v10  ;;  %15870 = vmatprep.mubr.msk.bf16.mxu0 %vm17237_vm2, %v13807_v58  ;;  %v2660_v27 = vld [vmem:[#allocation4 + $0x17f] sm:$0xff] }
 0x193   :  { %v1486_v62 = vpop.f32.mrf.mxu0  ;;  %15950 = vmatprep.mubr.msk.bf16.mxu1 %vm17394_vm4, %v13911_v14  ;;  %v3366_v10 = vld [vmem:[#allocation4 + $0x181] sm:$0xff]  ;;  %v13914_v32 = vpack.c.bf16 %v3364_v11, %v3363_v1  ;;  %v13813_v43 = vpack.c.bf16 %v2660_v27, %v2659_v25  ;;  %v3367_v1 = vld [vmem:[#allocation4 + $0x189] sm:$0xff]  ;;  %v3368_v11 = vld [vmem:[#allocation4 + $0x191] sm:$0xff] }
 0x194   :  { %23670 = vst [vmem:[#allocation43_spill] sm:$0xff] %v17786_v21  ;;  %v1793_v3 = vadd.f32 %v1486_v62, %v17522_v16  ;;  %v17796_v0 = vadd.f32 %v15756_v56, %v1795_v37  ;;  %v2184_v17 = vpop.f32.mrf.mxu1  ;;  %v13917_v41 = vpack.c.bf16 %v3366_v10, %v3365_v45  ;;  %v2663_v25 = vld [vmem:[#allocation4 + $0x197] sm:$0xff]  ;;  %v2664_v27 = vld [vmem:[#allocation4 + $0x19f] sm:$0xff] }
 0x195   :  { %v15677_v46 = vpop.f32.mrf.mxu0  ;;  %v3370_v45 = vld [vmem:[#allocation4 + $0x1a1] sm:$0xff] }
 0x196   :  { %v1796_v47 = vadd.f32 %v15677_v46, %v17524_v26  ;;  %v17799_v58 = vadd.f32 %v2184_v17, %v1793_v3  ;;  %v15757_v13 = vpop.f32.mrf.mxu1  ;;  %v3369_v17 = vld [vmem:[#allocation4 + $0x199] sm:$0xff] }
 0x197   :  { %v1489_v14 = vpop.f32.mrf.mxu0 }
 0x198   :  { %v1794_v21 = vadd.f32 %v1489_v14, %v17526_v36  ;;  %v17802_v44 = vadd.f32 %v15757_v13, %v1796_v47  ;;  %v2187_v16 = vpop.f32.mrf.mxu1  ;;  %v2662_v36 = vld [vmem:[#allocation4 + $0x18f] sm:$0xff] }
 0x199   :  { %v15680_v37 = vpop.f32.mrf.mxu0  ;;  %15871 = vmatmul.mubr.msk.bf16.gmra.mxu0 %vm17237_vm2, %v13810_v59  ;;  %v13816_v46 = vpack.c.bf16 %v2662_v36, %v2661_v52  ;;  %v2665_v36 = vld [vmem:[#allocation4 + $0x1a7] sm:$0xff] }
 0x19a   :  { %v1799_v56 = vadd.f32 %v15680_v37, %v17532_v60  ;;  %v17807_v6 = vadd.f32 %v2187_v16, %v1794_v21  ;;  %v15760_v26 = vpop.f32.mrf.mxu1  ;;  %15951 = vmatmul.mubr.msk.bf16.gmra.mxu1 %vm17394_vm4, %v13914_v32  ;;  %15874 = vmatprep.mubr.msk.bf16.mxu0 %vm17237_vm2, %v13813_v43  ;;  %v13920_v32 = vpack.c.bf16 %v3368_v11, %v3367_v1  ;;  %v3371_v1 = vld [vmem:[#allocation4 + $0x1a9] sm:$0xff]  ;;  %v3372_v11 = vld [vmem:[#allocation4 + $0x1b1] sm:$0xff] }
 0x19b   :  { %v1502_v62 = vpop.f32.mrf.mxu0  ;;  %15954 = vmatprep.mubr.msk.bf16.mxu1 %vm17394_vm4, %v13917_v41  ;;  %v13819_v43 = vpack.c.bf16 %v2664_v27, %v2663_v25  ;;  %v13923_v41 = vpack.c.bf16 %v3370_v45, %v3369_v17  ;;  %v2667_v25 = vld [vmem:[#allocation4 + $0x1b7] sm:$0xff]  ;;  %v2668_v27 = vld [vmem:[#allocation4 + $0x1bf] sm:$0xff] }
 0x19c   :  { %v1797_v60 = vadd.f32 %v1502_v62, %v17536_v7  ;;  %v17816_v21 = vadd.f32 %v15760_v26, %v1799_v56  ;;  %v2200_v3 = vpop.f32.mrf.mxu1  ;;  %v3373_v17 = vld [vmem:[#allocation4 + $0x1b9] sm:$0xff]  ;;  %v3374_v45 = vld [vmem:[#allocation4 + $0x1c1] sm:$0xff] }
 0x19d   :  { %v15681_v10 = vpop.f32.mrf.mxu0 }
 0x19e   :  { %v1800_v59 = vadd.f32 %v15681_v10, %v17538_v31  ;;  %v17819_v47 = vadd.f32 %v2200_v3, %v1797_v60  ;;  %v15761_v13 = vpop.f32.mrf.mxu1 }
 0x19f   :  { %v1505_v14 = vpop.f32.mrf.mxu0 }
 0x1a0   :  { %v1798_v16 = vadd.f32 %v1505_v14, %v17540_v49  ;;  %v17822_v37 = vadd.f32 %v15761_v13, %v1800_v59  ;;  %v2203_v7 = vpop.f32.mrf.mxu1  ;;  %v2666_v49 = vld [vmem:[#allocation4 + $0x1af] sm:$0xff]  ;;  %v13825_v14 = vpack.c.bf16 %v2668_v27, %v2667_v25  ;;  %v2671_v25 = vld [vmem:[#allocation4 + $0x1d7] sm:$0xff]  ;;  %v2672_v27 = vld [vmem:[#allocation4 + $0x1df] sm:$0xff] }
 0x1a1   :  { %v15684_v56 = vpop.f32.mrf.mxu0  ;;  %15875 = vmatmul.mubr.msk.bf16.gmra.mxu0 %vm17237_vm2, %v13816_v46  ;;  %v13822_v46 = vpack.c.bf16 %v2666_v49, %v2665_v36  ;;  %v2669_v49 = vld [vmem:[#allocation4 + $0x1c7] sm:$0xff] }
 0x1a2   :  { %v1803_v26 = vadd.f32 %v15684_v56, %v17546_v20  ;;  %v17827_v52 = vadd.f32 %v2203_v7, %v1798_v16  ;;  %v15764_v31 = vpop.f32.mrf.mxu1  ;;  %15955 = vmatmul.mubr.msk.bf16.gmra.mxu1 %vm17394_vm4, %v13920_v32  ;;  %15878 = vmatprep.mubr.msk.bf16.mxu0 %vm17237_vm2, %v13819_v43  ;;  %v13926_v43 = vpack.c.bf16 %v3372_v11, %v3371_v1  ;;  %v3375_v1 = vld [vmem:[#allocation4 + $0x1c9] sm:$0xff]  ;;  %v3376_v11 = vld [vmem:[#allocation4 + $0x1d1] sm:$0xff] }
 0x1a3   :  { %v1518_v62 = vpop.f32.mrf.mxu0  ;;  %15958 = vmatprep.mubr.msk.bf16.mxu1 %vm17394_vm4, %v13923_v41  ;;  %v13929_v16 = vpack.c.bf16 %v3374_v45, %v3373_v17  ;;  %v3377_v17 = vld [vmem:[#allocation4 + $0x1d9] sm:$0xff]  ;;  %v3378_v45 = vld [vmem:[#allocation4 + $0x1e1] sm:$0xff] }
 0x1a4   :  { %v1801_v20 = vadd.f32 %v1518_v62, %v17550_v42  ;;  %v17836_v60 = vadd.f32 %v15764_v31, %v1803_v26  ;;  %v2216_v3 = vpop.f32.mrf.mxu1 }
 0x1a5   :  { %v15685_v10 = vpop.f32.mrf.mxu0 }
 0x1a6   :  { %v1804_v59 = vadd.f32 %v15685_v10, %v17552_v55  ;;  %v17839_v13 = vadd.f32 %v2216_v3, %v1801_v20  ;;  %v15765_v32 = vpop.f32.mrf.mxu1 }
 0x1a7   :  { %v1521_v41 = vpop.f32.mrf.mxu0 }
 0x1a8   :  { %v1802_v7 = vadd.f32 %v1521_v41, %v17554_v51  ;;  %v17842_v56 = vadd.f32 %v15765_v32, %v1804_v59  ;;  %v2219_v42 = vpop.f32.mrf.mxu1  ;;  %v2670_v51 = vld [vmem:[#allocation4 + $0x1cf] sm:$0xff]  ;;  %v13831_v41 = vpack.c.bf16 %v2672_v27, %v2671_v25  ;;  %v2675_v25 = vld [vmem:[#allocation4 + $0x1f7] sm:$0xff]  ;;  %v2676_v27 = vld [vmem:[#allocation4 + $0x1ff] sm:$0xff] }
 0x1a9   :  { %v15688_v26 = vpop.f32.mrf.mxu0  ;;  %15879 = vmatmul.mubr.msk.bf16.gmra.mxu0 %vm17237_vm2, %v13822_v46  ;;  %v13828_v46 = vpack.c.bf16 %v2670_v51, %v2669_v49  ;;  %v2673_v51 = vld [vmem:[#allocation4 + $0x1e7] sm:$0xff] }
 0x1aa   :  { %v1807_v31 = vadd.f32 %v15688_v26, %v17562_v2  ;;  %v17847_v36 = vadd.f32 %v2219_v42, %v1802_v7  ;;  %v15768_v55 = vpop.f32.mrf.mxu1  ;;  %15959 = vmatmul.mubr.msk.bf16.gmra.mxu1 %vm17394_vm4, %v13926_v43  ;;  %15882 = vmatprep.mubr.msk.bf16.mxu0 %vm17237_vm2, %v13825_v14  ;;  %v13932_v14 = vpack.c.bf16 %v3376_v11, %v3375_v1  ;;  %v3379_v1 = vld [vmem:[#allocation4 + $0x1e9] sm:$0xff]  ;;  %v3380_v11 = vld [vmem:[#allocation4 + $0x1f1] sm:$0xff] }
 0x1ab   :  { %v1534_v62 = vpop.f32.mrf.mxu0  ;;  %15962 = vmatprep.mubr.msk.bf16.mxu1 %vm17394_vm4, %v13929_v16  ;;  %v13935_v7 = vpack.c.bf16 %v3378_v45, %v3377_v17  ;;  %v3381_v17 = vld [vmem:[#allocation4 + $0x1f9] sm:$0xff]  ;;  %v3382_v45 = vld [vmem:[#allocation4 + $0x201] sm:$0xff] }
 0x1ac   :  { %v1805_v2 = vadd.f32 %v1534_v62, %v17567_v22  ;;  %v17856_v20 = vadd.f32 %v15768_v55, %v1807_v31  ;;  %v2232_v3 = vpop.f32.mrf.mxu1 }
 0x1ad   :  { %v15689_v10 = vpop.f32.mrf.mxu0 }
 0x1ae   :  { %v1808_v59 = vadd.f32 %v15689_v10, %v17569_v48  ;;  %v17859_v32 = vadd.f32 %v2232_v3, %v1805_v2  ;;  %v15769_v43 = vpop.f32.mrf.mxu1 }
 0x1af   :  { %v1537_v16 = vpop.f32.mrf.mxu0 }
 0x1b0   :  { %v1806_v42 = vadd.f32 %v1537_v16, %v17571_v30  ;;  %v17862_v26 = vadd.f32 %v15769_v43, %v1808_v59  ;;  %v2235_v22 = vpop.f32.mrf.mxu1  ;;  %v2674_v30 = vld [vmem:[#allocation4 + $0x1ef] sm:$0xff]  ;;  %v13837_v16 = vpack.c.bf16 %v2676_v27, %v2675_v25  ;;  %v4027_v25 = vld [vmem:[#allocation4 + $0x27] sm:$0xff] }
 0x1b1   :  { %v15692_v31 = vpop.f32.mrf.mxu0  ;;  %15883 = vmatmul.mubr.msk.bf16.gmra.mxu0 %vm17237_vm2, %v13828_v46  ;;  %v13834_v46 = vpack.c.bf16 %v2674_v30, %v2673_v51  ;;  %v2677_v30 = vld [vmem:[#allocation4 + $0x207] sm:$0xff]  ;;  %v4028_v27 = vld [vmem:[#allocation4 + $0x2f] sm:$0xff] }
 0x1b2   :  { %v1811_v55 = vadd.f32 %v15692_v31, %v17577_v12  ;;  %v17867_v49 = vadd.f32 %v2235_v22, %v1806_v42  ;;  %v15772_v48 = vpop.f32.mrf.mxu1  ;;  %15963 = vmatmul.mubr.msk.bf16.gmra.mxu1 %vm17394_vm4, %v13932_v14  ;;  %15886 = vmatprep.mubr.msk.bf16.mxu0 %vm17237_vm2, %v13831_v41  ;;  %v13938_v41 = vpack.c.bf16 %v3380_v11, %v3379_v1  ;;  %v3383_v1 = vld [vmem:[#allocation4 + $0x209] sm:$0xff]  ;;  %v3384_v11 = vld [vmem:[#allocation4 + $0x211] sm:$0xff] }
 0x1b3   :  { %v1550_v62 = vpop.f32.mrf.mxu0  ;;  %15966 = vmatprep.mubr.msk.bf16.mxu1 %vm17394_vm4, %v13935_v7  ;;  %v13941_v42 = vpack.c.bf16 %v3382_v45, %v3381_v17  ;;  %v4723_v45 = vld [vmem:[#allocation4 + $0x28] sm:$0xff] }
 0x1b4   :  { %v1809_v12 = vadd.f32 %v1550_v62, %v17581_v28  ;;  %v17876_v2 = vadd.f32 %v15772_v48, %v1811_v55  ;;  %v2248_v3 = vpop.f32.mrf.mxu1 }
 0x1b5   :  { %v15693_v10 = vpop.f32.mrf.mxu0 }
 0x1b6   :  { %v1812_v59 = vadd.f32 %v15693_v10, %v17583_v5  ;;  %v17879_v43 = vadd.f32 %v2248_v3, %v1809_v12  ;;  %v15773_v14 = vpop.f32.mrf.mxu1  ;;  %v4724_v10 = vld [vmem:[#allocation4 + $0x30] sm:$0xff] }
 0x1b7   :  { %v1553_v7 = vpop.f32.mrf.mxu0 }
 0x1b8   :  { %23671 = vst [vmem:[#allocation44_spill] sm:$0xff] %v17879_v43  ;;  %v1810_v22 = vadd.f32 %v1553_v7, %v17585_v19  ;;  %v17882_v31 = vadd.f32 %v15773_v14, %v1812_v59  ;;  %v2251_v28 = vpop.f32.mrf.mxu1  ;;  %v2678_v19 = vld [vmem:[#allocation4 + $0x20f] sm:$0xff] }
 0x1b9   :  { %v15696_v55 = vpop.f32.mrf.mxu0  ;;  %15887 = vmatmul.mubr.msk.bf16.gmra.mxu0 %vm17237_vm2, %v13834_v46  ;;  %v13840_v59 = vpack.c.bf16 %v2678_v19, %v2677_v30  ;;  %v23675_v14 = vld [vmem:[#allocation18_spill] sm:$0xff] }
 0x1ba   :  { %23672 = vst [vmem:[#allocation45_spill] sm:$0xff] %v17882_v31  ;;  %v1815_v48 = vadd.f32 %v15696_v55, %v17591_v35  ;;  %v17887_v51 = vadd.f32 %v2251_v28, %v1810_v22  ;;  %v15776_v5 = vpop.f32.mrf.mxu1  ;;  %15967 = vmatmul.mubr.msk.bf16.gmra.mxu1 %vm17394_vm4, %v13938_v41  ;;  %15890 = vmatprep.mubr.msk.bf16.mxu0 %vm17237_vm2, %v13837_v16  ;;  %v23674_v35 = vld [vmem:[#allocation17_spill] sm:$0xff] }
 0x1bb   :  { %v1566_v62 = vpop.f32.mrf.mxu0  ;;  %15970 = vmatprep.mubr.msk.bf16.mxu1 %vm17394_vm4, %v13941_v42  ;;  %v13944_v22 = vpack.c.bf16 %v3384_v11, %v3383_v1  ;;  %v13955_v28 = vpack.c.bf16 %v4028_v27, %v4027_v25  ;;  %v4783_v55 = vpack.c.bf16 %v4724_v10, %v4723_v45  ;;  %v4029_v1 = vld [vmem:[#allocation4 + $0x37] sm:$0xff]  ;;  %v4726_v27 = vld [vmem:[#allocation4 + $0x40] sm:$0xff]  ;;  %v4032_v10 = vld [vmem:[#allocation4 + $0x4f] sm:$0xff] }
 0x1bc   :  { %23673 = vst [vmem:[#allocation46_spill] sm:$0xff] %v17887_v51  ;;  %v1813_v12 = vadd.f32 %v1566_v62, %v23674_v35  ;;  %v17896_v3 = vadd.f32 %v15776_v5, %v1815_v48  ;;  %v2264_v17 = vpop.f32.mrf.mxu1  ;;  %v23676_v51 = vld [vmem:[#allocation19_spill] sm:$0xff]  ;;  %v23677_v62 = vld [vmem:[#allocation20_spill] sm:$0xff] }
 0x1bd   :  { %v15697_v46 = vpop.f32.mrf.mxu0  ;;  %v4725_v25 = vld [vmem:[#allocation4 + $0x38] sm:$0xff] }
 0x1be   :  { %v1816_v41 = vadd.f32 %v15697_v46, %v23675_v14  ;;  %v17899_v16 = vadd.f32 %v2264_v17, %v1813_v12  ;;  %v15777_v7 = vpop.f32.mrf.mxu1  ;;  %v4031_v12 = vld [vmem:[#allocation4 + $0x47] sm:$0xff] }
 0x1bf   :  { %v1569_v42 = vpop.f32.mrf.mxu0  ;;  %v4727_v46 = vld [vmem:[#allocation4 + $0x48] sm:$0xff] }
 0x1c0   :  { %v1814_v31 = vadd.f32 %v1569_v42, %v23676_v51  ;;  %v17902_v43 = vadd.f32 %v15777_v7, %v1816_v41  ;;  %v2267_v48 = vpop.f32.mrf.mxu1  ;;  %v4030_v51 = vld [vmem:[#allocation4 + $0x3f] sm:$0xff]  ;;  %v23679_v7 = vld [vmem:[#allocation21_spill] sm:$0xff] }
 0x1c1   :  { %v15700_v5 = vpop.f32.mrf.mxu0  ;;  %15891 = vmatmul.mubr.msk.bf16.gmra.mxu0 %vm17237_vm2, %v13840_v59  ;;  %v4728_v59 = vld [vmem:[#allocation4 + $0x50] sm:$0xff]  ;;  %v13958_v41 = vpack.c.bf16 %v4030_v51, %v4029_v1  ;;  %v23682_v51 = vld [vmem:[#allocation23_spill] sm:$0xff] }
 0x1c2   :  { %v1819_v30 = vadd.f32 %v15700_v5, %v23677_v62  ;;  %v17907_v19 = vadd.f32 %v2267_v48, %v1814_v31  ;;  %v15780_v35 = vpop.f32.mrf.mxu1  ;;  %15971 = vmatmul.mubr.msk.bf16.gmra.mxu1 %vm17394_vm4, %v13944_v22  ;;  %15990 = vmatprep.mubr.msk.bf16.mxu0 %vm17237_vm2, %v13955_v28  ;;  %v4784_v48 = vpack.c.bf16 %v4726_v27, %v4725_v25  ;;  %v4033_v1 = vld [vmem:[#allocation4 + $0x57] sm:$0xff]  ;;  %v4034_v27 = vld [vmem:[#allocation4 + $0x5f] sm:$0xff] }
 0x1c3   :  { %v1582_v11 = vpop.f32.mrf.mxu0  ;;  %16070 = vmatprep.mubr.bf16.mxu1 %v4783_v55  ;;  %v13961_v5 = vpack.c.bf16 %v4032_v10, %v4031_v12  ;;  %v4785_v62 = vpack.c.bf16 %v4728_v59, %v4727_v46  ;;  %v4729_v12 = vld [vmem:[#allocation4 + $0x58] sm:$0xff]  ;;  %v4035_v10 = vld [vmem:[#allocation4 + $0x67] sm:$0xff]  ;;  %v4036_v46 = vld [vmem:[#allocation4 + $0x6f] sm:$0xff] }
 0x1c4   :  { %23678 = vst [vmem:[#allocation17_spill] sm:$0xff] %v17907_v19  ;;  %v1817_v17 = vadd.f32 %v1582_v11, %v17611_v23  ;;  %v17914_v45 = vadd.f32 %v15780_v35, %v1819_v30  ;;  %v2280_v31 = vpop.f32.mrf.mxu1  ;;  %v17010_v35 = vld [vmem:[#allocation7 + $0x230] sm:$0xff]   ;;  %v17011_v59 = vld [vmem:[#allocation7 + $0x228] sm:$0xff]  }
 0x1c5   :  { %v15701_v14 = vpop.f32.mrf.mxu0 }
 0x1c6   :  { %v1820_v22 = vadd.f32 %v15701_v14, %v23679_v7  ;;  %v17917_v28 = vadd.f32 %v2280_v31, %v1817_v17  ;;  %v15781_v42 = vpop.f32.mrf.mxu1 }
 0x1c7   :  { %v1585_v55 = vpop.f32.mrf.mxu0 }
 0x1c8   :  { %v1818_v19 = vadd.f32 %v1585_v55, %v23680_v50  ;;  %v17920_v23 = vadd.f32 %v15781_v42, %v1820_v22  ;;  %v2283_v30 = vpop.f32.mrf.mxu1  ;;  %v4730_v50 = vld [vmem:[#allocation4 + $0x60] sm:$0xff]  ;;  %v4732_v22 = vld [vmem:[#allocation4 + $0x70] sm:$0xff] }
 0x1c9   :  { %v15704_v11 = vpop.f32.mrf.mxu0  ;;  %15991 = vmatmul.mubr.msk.bf16.vlgmr.msra.gmra.mxu0 %vm17237_vm2, %v13958_v41 }
 0x1ca   :  { %23681 = vst [vmem:[#allocation18_spill] sm:$0xff] %v17920_v23  ;;  %v1823_v14 = vadd.f32 %v15704_v11, %v23682_v51  ;;  %v17925_v17 = vadd.f32 %v2283_v30, %v1818_v19  ;;  %16135 = vmatpush3.bf16.msra.mxu0 %v17685_v39  ;;  %v15784_v25 = vpop.f32.mrf.mxu1  ;;  %16071 = vmatmul.mubr.bf16.vlgmr.msra.gmra.mxu1 %v4784_v48  ;;  %v4731_v39 = vld [vmem:[#allocation4 + $0x68] sm:$0xff] }
 0x1cb   :  { %v1598_v31 = vpop.f32.mrf.mxu0  ;;  %15994 = vmatprep.mubr.msk.bf16.mxu0 %vm17237_vm2, %v13961_v5  ;;  %16074 = vmatprep.mubr.bf16.mxu1 %v4785_v62  ;;  %v13964_v48 = vpack.c.bf16 %v4034_v27, %v4033_v1  ;;  %v4786_v5 = vpack.c.bf16 %v4730_v50, %v4729_v12  ;;  %v13967_v62 = vpack.c.bf16 %v4036_v46, %v4035_v10  ;;  %v4038_v50 = vld [vmem:[#allocation4 + $0x7f] sm:$0xff] }
 0x1cc   :  { %23683 = vst [vmem:[#allocation19_spill] sm:$0xff] %v17925_v17  ;;  %v1821_v41 = vadd.f32 %v1598_v31, %v17631_v53  ;;  %v17931_v7 = vadd.f32 %v15784_v25, %v1823_v14  ;;  %v2296_v19 = vpop.f32.mrf.mxu1  ;;  %16136 = vmatprep.subr.bf16.mxu0 %v17010_v35  ;;  %v4787_v17 = vpack.c.bf16 %v4732_v22, %v4731_v39  ;;  %v23685_v53 = vld [vmem:[#allocation24_spill] sm:$0xff]  ;;  %v4733_v10 = vld [vmem:[#allocation4 + $0x78] sm:$0xff]  ;;  %v4040_v39 = vld [vmem:[#allocation4 + $0x8f] sm:$0xff] }
 0x1cd   :  { %v15705_v42 = vpop.f32.mrf.mxu0 }
 0x1ce   :  { %23684 = vst [vmem:[#allocation20_spill] sm:$0xff] %v17931_v7  ;;  %v1824_v55 = vadd.f32 %v15705_v42, %v17633_v4  ;;  %v17934_v30 = vadd.f32 %v2296_v19, %v1821_v41  ;;  %v15785_v11 = vpop.f32.mrf.mxu1  ;;  %16137 = vmatpush3.bf16.msra.mxu0 %v17010_v35  ;;  %v17012_v7 = vld [vmem:[#allocation7 + $0x220] sm:$0xff]   ;;  %v23686_v4 = vld [vmem:[#allocation25_spill] sm:$0xff]  ;;  %v4734_v41 = vld [vmem:[#allocation4 + $0x80] sm:$0xff] }
 0x1cf   :  { %v1601_v51 = vpop.f32.mrf.mxu0  ;;  %16138 = vmatprep.subr.bf16.mxu0 %v17011_v59  ;;  %v4037_v35 = vld [vmem:[#allocation4 + $0x77] sm:$0xff]  ;;  %v4039_v19 = vld [vmem:[#allocation4 + $0x87] sm:$0xff] }
 0x1d0   :  { %v1822_v14 = vadd.f32 %v1601_v51, %v23685_v53  ;;  %v17937_v25 = vadd.f32 %v15785_v11, %v1824_v55  ;;  %v2299_v31 = vpop.f32.mrf.mxu1  ;;  %v4736_v55 = vld [vmem:[#allocation4 + $0x90] sm:$0xff]  ;;  %v17013_v11 = vld [vmem:[#allocation7 + $0x218] sm:$0xff]  }
 0x1d1   :  { %v15708_v23 = vpop.f32.mrf.mxu0  ;;  %15995 = vmatmul.mubr.msk.bf16.gmra.mxu0 %vm17237_vm2, %v13964_v48  ;;  %v4735_v48 = vld [vmem:[#allocation4 + $0x88] sm:$0xff] }
 0x1d2   :  { %v1827_v1 = vadd.f32 %v15708_v23, %v23686_v4  ;;  %v17942_v27 = vadd.f32 %v2299_v31, %v1822_v14  ;;  %v15788_v12 = vpop.f32.mrf.mxu1  ;;  %16075 = vmatmul.mubr.bf16.gmra.mxu1 %v4786_v5  ;;  %15998 = vmatprep.mubr.msk.bf16.mxu0 %vm17237_vm2, %v13967_v62  ;;  %v13970_v62 = vpack.c.bf16 %v4038_v50, %v4037_v35 }
 0x1d3   :  { %v1614_v46 = vpop.f32.mrf.mxu0  ;;  %16078 = vmatprep.mubr.bf16.mxu1 %v4787_v17  ;;  %16139 = vmatpush3.bf16.msra.mxu0 %v17011_v59  ;;  %v4788_v14 = vpack.c.bf16 %v4734_v41, %v4733_v10  ;;  %v13973_v31 = vpack.c.bf16 %v4040_v39, %v4039_v19  ;;  %v4789_v59 = vpack.c.bf16 %v4736_v55, %v4735_v48  ;;  %v4042_v41 = vld [vmem:[#allocation4 + $0x9f] sm:$0xff]  ;;  %v4044_v48 = vld [vmem:[#allocation4 + $0xaf] sm:$0xff] }
 0x1d4   :  { %23687 = vst [vmem:[#allocation21_spill] sm:$0xff] %v17942_v27  ;;  %v1825_v22 = vadd.f32 %v1614_v46, %v17649_v54  ;;  %v17947_v42 = vadd.f32 %v15788_v12, %v1827_v1  ;;  %v2312_v23 = vpop.f32.mrf.mxu1  ;;  %16140 = vmatprep.subr.bf16.mxu0 %v17012_v7  ;;  %v23689_v54 = vld [vmem:[#allocation26_spill] sm:$0xff]  ;;  %v4737_v19 = vld [vmem:[#allocation4 + $0x98] sm:$0xff] }
 0x1d5   :  { %v15709_v5 = vpop.f32.mrf.mxu0 }
 0x1d6   :  { %23688 = vst [vmem:[#allocation22_spill] sm:$0xff] %v17947_v42  ;;  %v1828_v51 = vadd.f32 %v15709_v5, %v17651_v15  ;;  %v17950_v53 = vadd.f32 %v2312_v23, %v1825_v22  ;;  %v15789_v17 = vpop.f32.mrf.mxu1  ;;  %v17014_v42 = vld [vmem:[#allocation7 + $0x210] sm:$0xff]   ;;  %v23690_v15 = vld [vmem:[#allocation27_spill] sm:$0xff] }
 0x1d7   :  { %v1617_v4 = vpop.f32.mrf.mxu0  ;;  %16141 = vmatpush3.bf16.msra.mxu0 %v17012_v7  ;;  %v4041_v7 = vld [vmem:[#allocation4 + $0x97] sm:$0xff]  ;;  %v4738_v22 = vld [vmem:[#allocation4 + $0xa0] sm:$0xff] }
 0x1d8   :  { %v1826_v1 = vadd.f32 %v1617_v4, %v23689_v54  ;;  %v17953_v12 = vadd.f32 %v15789_v17, %v1828_v51  ;;  %v2315_v46 = vpop.f32.mrf.mxu1  ;;  %16142 = vmatprep.subr.bf16.mxu0 %v17013_v11  ;;  %v4043_v23 = vld [vmem:[#allocation4 + $0xa7] sm:$0xff]  ;;  %v4740_v51 = vld [vmem:[#allocation4 + $0xb0] sm:$0xff]  ;;  %v17015_v17 = vld [vmem:[#allocation7 + $0x208] sm:$0xff]  }
 0x1d9   :  { %v15712_v27 = vpop.f32.mrf.mxu0  ;;  %15999 = vmatmul.mubr.msk.bf16.gmra.mxu0 %vm17237_vm2, %v13970_v62  ;;  %v4739_v62 = vld [vmem:[#allocation4 + $0xa8] sm:$0xff] }
 0x1da   :  { %v1831_v35 = vadd.f32 %v15712_v27, %v23690_v15  ;;  %v17958_v50 = vadd.f32 %v2315_v46, %v1826_v1  ;;  %v15792_v10 = vpop.f32.mrf.mxu1  ;;  %16079 = vmatmul.mubr.bf16.gmra.mxu1 %v4788_v14  ;;  %16002 = vmatprep.mubr.msk.bf16.mxu0 %vm17237_vm2, %v13973_v31  ;;  %v13976_v31 = vpack.c.bf16 %v4042_v41, %v4041_v7 }
 0x1db   :  { %v1630_v39 = vpop.f32.mrf.mxu0  ;;  %16082 = vmatprep.mubr.bf16.mxu1 %v4789_v59  ;;  %16143 = vmatpush3.bf16.msra.mxu0 %v17013_v11  ;;  %v4790_v1 = vpack.c.bf16 %v4738_v22, %v4737_v19  ;;  %v13979_v46 = vpack.c.bf16 %v4044_v48, %v4043_v23  ;;  %v4791_v11 = vpack.c.bf16 %v4740_v51, %v4739_v62  ;;  %v4741_v19 = vld [vmem:[#allocation4 + $0xb8] sm:$0xff]  ;;  %v4742_v23 = vld [vmem:[#allocation4 + $0xc0] sm:$0xff]  ;;  %v4744_v51 = vld [vmem:[#allocation4 + $0xd0] sm:$0xff] }
 0x1dc   :  { %v1829_v55 = vadd.f32 %v1630_v39, %v17667_v24  ;;  %v17963_v5 = vadd.f32 %v15792_v10, %v1831_v35  ;;  %v2328_v27 = vpop.f32.mrf.mxu1  ;;  %16144 = vmatprep.subr.bf16.mxu0 %v17014_v42  ;;  %v17016_v39 = vld [vmem:[#allocation7 + $0x200] sm:$0xff]   ;;  %v4047_v48 = vld [vmem:[#allocation4 + $0xc7] sm:$0xff] }
 0x1dd   :  { %v15713_v14 = vpop.f32.mrf.mxu0 }
 0x1de   :  { %23691 = vst [vmem:[#allocation23_spill] sm:$0xff] %v17963_v5  ;;  %v1832_v4 = vadd.f32 %v15713_v14, %v17669_v34  ;;  %v17966_v54 = vadd.f32 %v2328_v27, %v1829_v55  ;;  %v15793_v59 = vpop.f32.mrf.mxu1  ;;  %v4048_v55 = vld [vmem:[#allocation4 + $0xcf] sm:$0xff] }
 0x1df   :  { %v1633_v15 = vpop.f32.mrf.mxu0  ;;  %16145 = vmatpush3.bf16.msra.mxu0 %v17014_v42  ;;  %v4045_v42 = vld [vmem:[#allocation4 + $0xb7] sm:$0xff] }
 0x1e0   :  { %v1830_v24 = vadd.f32 %v1633_v15, %v17671_v63  ;;  %v17969_v35 = vadd.f32 %v15793_v59, %v1832_v4  ;;  %v2331_v10 = vpop.f32.mrf.mxu1  ;;  %16146 = vmatprep.subr.bf16.mxu0 %v17015_v17  ;;  %v4046_v63 = vld [vmem:[#allocation4 + $0xbf] sm:$0xff]  ;;  %v13985_v15 = vpack.c.bf16 %v4048_v55, %v4047_v48 }
 0x1e1   :  { %v15716_v5 = vpop.f32.mrf.mxu0  ;;  %16003 = vmatmul.mubr.msk.bf16.gmra.mxu0 %vm17237_vm2, %v13976_v31  ;;  %v13982_v31 = vpack.c.bf16 %v4046_v63, %v4045_v42  ;;  %v23696_v42 = vld [vmem:[#allocation29_spill] sm:$0xff]  ;;  %v4746_v55 = vld [vmem:[#allocation4 + $0xe0] sm:$0xff] }
 0x1e2   :  { %v1835_v34 = vadd.f32 %v15716_v5, %v17680_v29  ;;  %v17974_v7 = vadd.f32 %v2331_v10, %v1830_v24  ;;  %v15796_v41 = vpop.f32.mrf.mxu1  ;;  %16083 = vmatmul.mubr.bf16.gmra.mxu1 %v4790_v1  ;;  %16006 = vmatprep.mubr.msk.bf16.mxu0 %vm17237_vm2, %v13979_v46  ;;  %v4743_v5 = vld [vmem:[#allocation4 + $0xc8] sm:$0xff]  ;;  %v4792_v46 = vpack.c.bf16 %v4742_v23, %v4741_v19  ;;  %v4049_v19 = vld [vmem:[#allocation4 + $0xd7] sm:$0xff] }
 0x1e3   :  { %v1646_v22 = vpop.f32.mrf.mxu0  ;;  %16086 = vmatprep.mubr.bf16.mxu1 %v4791_v11  ;;  %16147 = vmatpush3.bf16.msra.mxu0 %v17015_v17  ;;  %v4793_v24 = vpack.c.bf16 %v4744_v51, %v4743_v5  ;;  %v23694_v17 = vld [vmem:[#allocation28_spill] sm:$0xff]  ;;  %v4745_v23 = vld [vmem:[#allocation4 + $0xd8] sm:$0xff]  ;;  %v23698_v5 = vld [vmem:[#allocation30_spill] sm:$0xff] }
 0x1e4   :  { %v1833_v27 = vadd.f32 %v1646_v22, %v17687_v40  ;;  %v17979_v62 = vadd.f32 %v15796_v41, %v1835_v34  ;;  %v2344_v29 = vpop.f32.mrf.mxu1  ;;  %16148 = vmatprep.subr.bf16.mxu0 %v17016_v39 }
 0x1e5   :  { %v15717_v14 = vpop.f32.mrf.mxu0 }
 0x1e6   :  { %23692 = vst [vmem:[#allocation24_spill] sm:$0xff] %v17979_v62  ;;  %v1836_v4 = vadd.f32 %v15717_v14, %v17689_v18  ;;  %v17982_v59 = vadd.f32 %v2344_v29, %v1833_v27  ;;  %v15797_v1 = vpop.f32.mrf.mxu1  ;;  %v4051_v27 = vld [vmem:[#allocation4 + $0xe7] sm:$0xff]  ;;  %v4052_v29 = vld [vmem:[#allocation4 + $0xef] sm:$0xff] }
 0x1e7   :  { %v1649_v11 = vpop.f32.mrf.mxu0  ;;  %16149 = vmatpush3.bf16.msra.mxu0 %v17016_v39  ;;  %v4050_v39 = vld [vmem:[#allocation4 + $0xdf] sm:$0xff] }
 0x1e8   :  { %23693 = vst [vmem:[#allocation25_spill] sm:$0xff] %v17982_v59  ;;  %v1834_v40 = vadd.f32 %v1649_v11, %v23694_v17  ;;  %v17985_v10 = vadd.f32 %v15797_v1, %v1836_v4  ;;  %v2347_v34 = vpop.f32.mrf.mxu1  ;;  %v4747_v4 = vld [vmem:[#allocation4 + $0xe8] sm:$0xff]  ;;  %v4748_v1 = vld [vmem:[#allocation4 + $0xf0] sm:$0xff]  ;;  %v23700_v17 = vld [vmem:[#allocation31_spill] sm:$0xff] }
 0x1e9   :  { %v15720_v41 = vpop.f32.mrf.mxu0  ;;  %16007 = vmatmul.mubr.msk.bf16.gmra.mxu0 %vm17237_vm2, %v13982_v31 }
 0x1ea   :  { %23695 = vst [vmem:[#allocation26_spill] sm:$0xff] %v17985_v10  ;;  %v1839_v63 = vadd.f32 %v15720_v41, %v23696_v42  ;;  %v17990_v18 = vadd.f32 %v2347_v34, %v1834_v40  ;;  %v15800_v22 = vpop.f32.mrf.mxu1  ;;  %16087 = vmatmul.mubr.bf16.gmra.mxu1 %v4792_v46  ;;  %16010 = vmatprep.mubr.msk.bf16.mxu0 %vm17237_vm2, %v13985_v15  ;;  %v23702_v10 = vld [vmem:[#allocation32_spill] sm:$0xff] }
 0x1eb   :  { %v1662_v48 = vpop.f32.mrf.mxu0  ;;  %16090 = vmatprep.mubr.bf16.mxu1 %v4793_v24  ;;  %v13988_v46 = vpack.c.bf16 %v4050_v39, %v4049_v19  ;;  %v4794_v41 = vpack.c.bf16 %v4746_v55, %v4745_v23  ;;  %v13991_v42 = vpack.c.bf16 %v4052_v29, %v4051_v27  ;;  %v4053_v23 = vld [vmem:[#allocation4 + $0xf7] sm:$0xff]  ;;  %v4054_v55 = vld [vmem:[#allocation4 + $0xff] sm:$0xff] }
 0x1ec   :  { %23697 = vst [vmem:[#allocation27_spill] sm:$0xff] %v17990_v18  ;;  %v1837_v51 = vadd.f32 %v1662_v48, %v23698_v5  ;;  %v17995_v14 = vadd.f32 %v15800_v22, %v1839_v63  ;;  %v2360_v31 = vpop.f32.mrf.mxu1  ;;  %v4795_v18 = vpack.c.bf16 %v4748_v1, %v4747_v4  ;;  %v23704_v48 = vld [vmem:[#allocation33_spill] sm:$0xff]  ;;  %v4749_v27 = vld [vmem:[#allocation4 + $0xf8] sm:$0xff]  ;;  %v4750_v29 = vld [vmem:[#allocation4 + $0x100] sm:$0xff] }
 0x1ed   :  { %v15721_v11 = vpop.f32.mrf.mxu0  ;;  %v23706_v4 = vld [vmem:[#allocation34_spill] sm:$0xff] }
 0x1ee   :  { %23699 = vst [vmem:[#allocation28_spill] sm:$0xff] %v17995_v14  ;;  %v1840_v40 = vadd.f32 %v15721_v11, %v23700_v17  ;;  %v17998_v15 = vadd.f32 %v2360_v31, %v1837_v51  ;;  %v15801_v34 = vpop.f32.mrf.mxu1  ;;  %v4055_v51 = vld [vmem:[#allocation4 + $0x107] sm:$0xff]  ;;  %v4056_v31 = vld [vmem:[#allocation4 + $0x10f] sm:$0xff] }
 0x1ef   :  { %v1665_v24 = vpop.f32.mrf.mxu0  ;;  %v4752_v17 = vld [vmem:[#allocation4 + $0x110] sm:$0xff] }
 0x1f0   :  { %23701 = vst [vmem:[#allocation29_spill] sm:$0xff] %v17998_v15  ;;  %v1838_v59 = vadd.f32 %v1665_v24, %v23702_v10  ;;  %v18001_v62 = vadd.f32 %v15801_v34, %v1840_v40  ;;  %v2363_v63 = vpop.f32.mrf.mxu1  ;;  %v13994_v34 = vpack.c.bf16 %v4054_v55, %v4053_v23 }
 0x1f1   :  { %v15724_v22 = vpop.f32.mrf.mxu0  ;;  %16011 = vmatmul.mubr.msk.bf16.gmra.mxu0 %vm17237_vm2, %v13988_v46 }
 0x1f2   :  { %23703 = vst [vmem:[#allocation30_spill] sm:$0xff] %v18001_v62  ;;  %v1843_v19 = vadd.f32 %v15724_v22, %v23704_v48  ;;  %v18006_v39 = vadd.f32 %v2363_v63, %v1838_v59  ;;  %v15804_v5 = vpop.f32.mrf.mxu1  ;;  %16091 = vmatmul.mubr.bf16.gmra.mxu1 %v4794_v41  ;;  %16014 = vmatprep.mubr.msk.bf16.mxu0 %vm17237_vm2, %v13991_v42  ;;  %v4751_v59 = vld [vmem:[#allocation4 + $0x108] sm:$0xff]  ;;  %v23707_v41 = vld [vmem:[#allocation35_spill] sm:$0xff]  ;;  %v23708_v62 = vld [vmem:[#allocation36_spill] sm:$0xff] }
 0x1f3   :  { %v1678_v10 = vpop.f32.mrf.mxu0  ;;  %16094 = vmatprep.mubr.bf16.mxu1 %v4795_v18  ;;  %v4796_v22 = vpack.c.bf16 %v4750_v29, %v4749_v27  ;;  %v13997_v48 = vpack.c.bf16 %v4056_v31, %v4055_v51  ;;  %v4057_v29 = vld [vmem:[#allocation4 + $0x127] sm:$0xff] }
 0x1f4   :  { %23705 = vst [vmem:[#allocation31_spill] sm:$0xff] %v18006_v39  ;;  %v1841_v1 = vadd.f32 %v1678_v10, %v23706_v4  ;;  %v18011_v11 = vadd.f32 %v15804_v5, %v1843_v19  ;;  %v2376_v46 = vpop.f32.mrf.mxu1  ;;  %v4797_v39 = vpack.c.bf16 %v4752_v17, %v4751_v59  ;;  %v23710_v10 = vld [vmem:[#allocation37_spill] sm:$0xff]  ;;  %v4754_v59 = vld [vmem:[#allocation4 + $0x130] sm:$0xff] }
 0x1f5   :  { %v15725_v40 = vpop.f32.mrf.mxu0 }
 0x1f6   :  { %v1844_v24 = vadd.f32 %v15725_v40, %v23707_v41  ;;  %v18014_v42 = vadd.f32 %v2376_v46, %v1841_v1  ;;  %v15805_v63 = vpop.f32.mrf.mxu1  ;;  %v4753_v46 = vld [vmem:[#allocation4 + $0x128] sm:$0xff] }
 0x1f7   :  { %v1681_v18 = vpop.f32.mrf.mxu0 }
 0x1f8   :  { %v1842_v15 = vadd.f32 %v1681_v18, %v23708_v62  ;;  %v18017_v14 = vadd.f32 %v15805_v63, %v1844_v24  ;;  %v2379_v19 = vpop.f32.mrf.mxu1  ;;  %v4058_v62 = vld [vmem:[#allocation4 + $0x12f] sm:$0xff]  ;;  %v4798_v63 = vpack.c.bf16 %v4754_v59, %v4753_v46 }
 0x1f9   :  { %v15728_v5 = vpop.f32.mrf.mxu0  ;;  %16015 = vmatmul.mubr.msk.bf16.gmra.mxu0 %vm17237_vm2, %v13994_v34  ;;  %v14000_v41 = vpack.c.bf16 %v4058_v62, %v4057_v29  ;;  %v4755_v29 = vld [vmem:[#allocation4 + $0x138] sm:$0xff]  ;;  %v4062_v46 = vld [vmem:[#allocation4 + $0x14f] sm:$0xff] }
 0x1fa   :  { %23709 = vst [vmem:[#allocation32_spill] sm:$0xff] %v18017_v14  ;;  %v1847_v23 = vadd.f32 %v15728_v5, %v23710_v10  ;;  %v18022_v55 = vadd.f32 %v2379_v19, %v1842_v15  ;;  %v15808_v4 = vpop.f32.mrf.mxu1  ;;  %16095 = vmatmul.mubr.bf16.gmra.mxu1 %v4796_v22  ;;  %16018 = vmatprep.mubr.msk.bf16.mxu0 %vm17237_vm2, %v13997_v48  ;;  %v23714_v22 = vld [vmem:[#allocation38_spill] sm:$0xff]  ;;  %v23716_v19 = vmov 0.0|0.0   ;;  %v23717_v5 = vld [vmem:[#allocation39_spill] sm:$0xff] }
 0x1fb   :  { %v1694_v27 = vpop.f32.mrf.mxu0  ;;  %16098 = vmatprep.mubr.bf16.mxu1 %v4797_v39 }
 0x1fc   :  { %23711 = vst [vmem:[#allocation33_spill] sm:$0xff] %v18022_v55  ;;  %v1845_v51 = vadd.f32 %v1694_v27, %v17742_v57  ;;  %v18027_v31 = vadd.f32 %v15808_v4, %v1847_v23  ;;  %v2392_v1 = vpop.f32.mrf.mxu1  ;;  %v4060_v27 = vld [vmem:[#allocation4 + $0x13f] sm:$0xff] }
 0x1fd   :  { %v15729_v17 = vpop.f32.mrf.mxu0 }
 0x1fe   :  { %23712 = vst [vmem:[#allocation34_spill] sm:$0xff] %v18027_v31  ;;  %v1848_v15 = vadd.f32 %v15729_v17, %v17744_v8  ;;  %v18030_v40 = vadd.f32 %v2392_v1, %v1845_v51  ;;  %v15809_v34 = vpop.f32.mrf.mxu1  ;;  %v4059_v8 = vld [vmem:[#allocation4 + $0x137] sm:$0xff]  ;;  %v4756_v51 = vld [vmem:[#allocation4 + $0x140] sm:$0xff]  ;;  %v23720_v31 = vld [vmem:[#allocation41_spill] sm:$0xff] }
 0x1ff   :  { %v1697_v24 = vpop.f32.mrf.mxu0  ;;  %v4061_v1 = vld [vmem:[#allocation4 + $0x147] sm:$0xff] }
 0x200   :  { %23713 = vst [vmem:[#allocation35_spill] sm:$0xff] %v18030_v40  ;;  %v1846_v39 = vadd.f32 %v1697_v24, %v23714_v22  ;;  %v18033_v48 = vadd.f32 %v15809_v34, %v1848_v15  ;;  %v2395_v18 = vpop.f32.mrf.mxu1  ;;  %v4757_v34 = vld [vmem:[#allocation4 + $0x148] sm:$0xff]  ;;  %v4758_v24 = vld [vmem:[#allocation4 + $0x150] sm:$0xff] }
 0x201   :  { %v15732_v57 = vpop.f32.mrf.mxu0  ;;  %16019 = vmatmul.mubr.bf16.gmra.mxu0 %v23716_v19  ;;  %v4800_v40 = vpack.c.bf16 %v4758_v24, %v4757_v34  ;;  %v4761_v24 = vld [vmem:[#allocation4 + $0x168] sm:$0xff] }
 0x202   :  { %23715 = vst [vmem:[#allocation36_spill] sm:$0xff] %v18033_v48  ;;  %v1851_v10 = vadd.f32 %v15732_v57, %v23717_v5  ;;  %v18037_v23 = vadd.f32 %v2395_v18, %v1846_v39  ;;  %v15812_v4 = vpop.f32.mrf.mxu1  ;;  %16099 = vmatmul.mubr.bf16.gmra.mxu1 %v23716_v19  ;;  %16022 = vmatprep.mubr.msk.bf16.mxu0 %vm17237_vm2, %v14000_v41  ;;  %v23719_v18 = vld [vmem:[#allocation40_spill] sm:$0xff] }
 0x203   :  { %v1710_v62 = vpop.f32.mrf.mxu0  ;;  %16102 = vmatprep.mubr.bf16.mxu1 %v4798_v63  ;;  %v14003_v39 = vpack.c.bf16 %v4060_v27, %v4059_v8  ;;  %v14006_v48 = vpack.c.bf16 %v4062_v46, %v4061_v1  ;;  %v4760_v1 = vld [vmem:[#allocation4 + $0x160] sm:$0xff] }
 0x204   :  { %23718 = vst [vmem:[#allocation37_spill] sm:$0xff] %v18037_v23  ;;  %v1849_v59 = vadd.f32 %v1710_v62, %v17758_v61  ;;  %v18043_v17 = vadd.f32 %v15812_v4, %v1851_v10  ;;  %v2408_v15 = vpop.f32.mrf.mxu1  ;;  %v4799_v23 = vpack.c.bf16 %v4756_v51, %v4755_v29  ;;  %v4063_v29 = vld [vmem:[#allocation4 + $0x157] sm:$0xff]  ;;  %v4064_v62 = vld [vmem:[#allocation4 + $0x15f] sm:$0xff]  ;;  %v4065_v46 = vld [vmem:[#allocation4 + $0x167] sm:$0xff] }
 0x205   :  { %v15733_v22 = vpop.f32.mrf.mxu0  ;;  %v4759_v51 = vld [vmem:[#allocation4 + $0x158] sm:$0xff] }
 0x206   :  { %v1852_v57 = vadd.f32 %v15733_v22, %v23719_v18  ;;  %v18046_v41 = vadd.f32 %v2408_v15, %v1849_v59  ;;  %v15813_v5 = vpop.f32.mrf.mxu1  ;;  %v4066_v59 = vld [vmem:[#allocation4 + $0x16f] sm:$0xff] }
 0x207   :  { %v1713_v63 = vpop.f32.mrf.mxu0 }
 0x208   :  { %v1850_v55 = vadd.f32 %v1713_v63, %v23720_v31  ;;  %v18049_v14 = vadd.f32 %v15813_v5, %v1852_v57  ;;  %v2411_v61 = vpop.f32.mrf.mxu1  ;;  %v4801_v5 = vpack.c.bf16 %v4760_v1, %v4759_v51  ;;  %v14012_v63 = vpack.c.bf16 %v4066_v59, %v4065_v46  ;;  %v4067_v51 = vld [vmem:[#allocation4 + $0x177] sm:$0xff]  ;;  %v4764_v59 = vld [vmem:[#allocation4 + $0x180] sm:$0xff] }
 0x209   :  { %v15832_v10 = vpop.f32.mrf.mxu0  ;;  %16023 = vmatmul.mubr.msk.bf16.gmra.mxu0 %vm17237_vm2, %v14003_v39  ;;  %v23723_v39 = vld [vmem:[#allocation42_spill] sm:$0xff]  ;;  %v4763_v1 = vld [vmem:[#allocation4 + $0x178] sm:$0xff] }
 0x20a   :  { %23721 = vst [vmem:[#allocation38_spill] sm:$0xff] %v18049_v14  ;;  %v18053_v4 = vadd.f32 %v2411_v61, %v1850_v55  ;;  %v3195_v8 = vadd.f32 %v15832_v10, %v17775_v38  ;;  %v15912_v27 = vpop.f32.mrf.mxu1  ;;  %16103 = vmatmul.mubr.bf16.gmra.mxu1 %v4799_v23  ;;  %16026 = vmatprep.mubr.msk.bf16.mxu0 %vm17237_vm2, %v14006_v48  ;;  %v4762_v38 = vld [vmem:[#allocation4 + $0x170] sm:$0xff]  ;;  %v23724_v10 = vld [vmem:[#allocation43_spill] sm:$0xff] }
 0x20b   :  { %v2874_v31 = vpop.f32.mrf.mxu0  ;;  %16106 = vmatprep.mubr.bf16.mxu1 %v4800_v40  ;;  %v14009_v23 = vpack.c.bf16 %v4064_v62, %v4063_v29  ;;  %v4802_v61 = vpack.c.bf16 %v4762_v38, %v4761_v24 }
 0x20c   :  { %23722 = vst [vmem:[#allocation39_spill] sm:$0xff] %v18053_v4  ;;  %v3193_v15 = vadd.f32 %v2874_v31, %v17778_v9  ;;  %v18059_v34 = vadd.f32 %v15912_v27, %v3195_v8  ;;  %v3580_v55 = vpop.f32.mrf.mxu1  ;;  %v4068_v31 = vld [vmem:[#allocation4 + $0x17f] sm:$0xff] }
 0x20d   :  { %v15833_v22 = vpop.f32.mrf.mxu0 }
 0x20e   :  { %v3196_v18 = vadd.f32 %v15833_v22, %v23723_v39  ;;  %v18062_v48 = vadd.f32 %v3580_v55, %v3193_v15  ;;  %v15913_v57 = vpop.f32.mrf.mxu1  ;;  %v4069_v15 = vld [vmem:[#allocation4 + $0x187] sm:$0xff]  ;;  %v4070_v55 = vld [vmem:[#allocation4 + $0x18f] sm:$0xff]  ;;  %v14015_v39 = vpack.c.bf16 %v4068_v31, %v4067_v51  ;;  %v4071_v31 = vld [vmem:[#allocation4 + $0x197] sm:$0xff] }
 0x20f   :  { %v2877_v40 = vpop.f32.mrf.mxu0  ;;  %v4766_v22 = vld [vmem:[#allocation4 + $0x190] sm:$0xff] }
 0x210   :  { %v3194_v4 = vadd.f32 %v2877_v40, %v23724_v10  ;;  %v18065_v14 = vadd.f32 %v15913_v57, %v3196_v18  ;;  %v3583_v9 = vpop.f32.mrf.mxu1  ;;  %v14018_v40 = vpack.c.bf16 %v4070_v55, %v4069_v15  ;;  %v4073_v15 = vld [vmem:[#allocation4 + $0x1a7] sm:$0xff]  ;;  %v4074_v55 = vld [vmem:[#allocation4 + $0x1af] sm:$0xff] }
 0x211   :  { %v15836_v8 = vpop.f32.mrf.mxu0  ;;  %16027 = vmatmul.mubr.msk.bf16.gmra.mxu0 %vm17237_vm2, %v14009_v23 }
 0x212   :  { %v3199_v27 = vadd.f32 %v15836_v8, %v17796_v0  ;;  %v18070_v29 = vadd.f32 %v3583_v9, %v3194_v4  ;;  %v15916_v62 = vpop.f32.mrf.mxu1  ;;  %16107 = vmatmul.mubr.bf16.gmra.mxu1 %v4801_v5  ;;  %16030 = vmatprep.mubr.msk.bf16.mxu0 %vm17237_vm2, %v14012_v63  ;;  %v4765_v4 = vld [vmem:[#allocation4 + $0x188] sm:$0xff]  ;;  %v4803_v63 = vpack.c.bf16 %v4764_v59, %v4763_v1  ;;  %v4072_v1 = vld [vmem:[#allocation4 + $0x19f] sm:$0xff] }
 0x213   :  { %v2890_v46 = vpop.f32.mrf.mxu0  ;;  %16110 = vmatprep.mubr.bf16.mxu1 %v4802_v61  ;;  %v4804_v10 = vpack.c.bf16 %v4766_v22, %v4765_v4  ;;  %v4768_v59 = vld [vmem:[#allocation4 + $0x1a0] sm:$0xff]  ;;  %v4769_v4 = vld [vmem:[#allocation4 + $0x1a8] sm:$0xff]  ;;  %v4770_v22 = vld [vmem:[#allocation4 + $0x1b0] sm:$0xff] }
 0x214   :  { %v3197_v24 = vadd.f32 %v2890_v46, %v17799_v58  ;;  %v18075_v38 = vadd.f32 %v15916_v62, %v3199_v27  ;;  %v3596_v0 = vpop.f32.mrf.mxu1  ;;  %v4767_v46 = vld [vmem:[#allocation4 + $0x198] sm:$0xff] }
 0x215   :  { %v15837_v23 = vpop.f32.mrf.mxu0 }
 0x216   :  { %v3200_v18 = vadd.f32 %v15837_v23, %v17802_v44  ;;  %v18078_v57 = vadd.f32 %v3596_v0, %v3197_v24  ;;  %v15917_v5 = vpop.f32.mrf.mxu1 }
 0x217   :  { %v2893_v61 = vpop.f32.mrf.mxu0 }
 0x218   :  { %v3198_v9 = vadd.f32 %v2893_v61, %v17807_v6  ;;  %v18081_v8 = vadd.f32 %v15917_v5, %v3200_v18  ;;  %v3599_v58 = vpop.f32.mrf.mxu1  ;;  %v14024_v61 = vpack.c.bf16 %v4074_v55, %v4073_v15  ;;  %v4077_v15 = vld [vmem:[#allocation4 + $0x1c7] sm:$0xff]  ;;  %v4078_v55 = vld [vmem:[#allocation4 + $0x1cf] sm:$0xff] }
 0x219   :  { %v15840_v27 = vpop.f32.mrf.mxu0  ;;  %16031 = vmatmul.mubr.msk.bf16.gmra.mxu0 %vm17237_vm2, %v14015_v39  ;;  %v14021_v39 = vpack.c.bf16 %v4072_v1, %v4071_v31  ;;  %v4075_v1 = vld [vmem:[#allocation4 + $0x1b7] sm:$0xff] }
 0x21a   :  { %v3203_v62 = vadd.f32 %v15840_v27, %v17816_v21  ;;  %v18086_v51 = vadd.f32 %v3599_v58, %v3198_v9  ;;  %v15920_v44 = vpop.f32.mrf.mxu1  ;;  %16111 = vmatmul.mubr.bf16.gmra.mxu1 %v4803_v63  ;;  %16034 = vmatprep.mubr.msk.bf16.mxu0 %vm17237_vm2, %v14018_v40  ;;  %v4805_v40 = vpack.c.bf16 %v4768_v59, %v4767_v46  ;;  %v4076_v46 = vld [vmem:[#allocation4 + $0x1bf] sm:$0xff] }
 0x21b   :  { %v2906_v6 = vpop.f32.mrf.mxu0  ;;  %16114 = vmatprep.mubr.bf16.mxu1 %v4804_v10  ;;  %v4806_v9 = vpack.c.bf16 %v4770_v22, %v4769_v4  ;;  %v4772_v59 = vld [vmem:[#allocation4 + $0x1c0] sm:$0xff]  ;;  %v4773_v4 = vld [vmem:[#allocation4 + $0x1c8] sm:$0xff]  ;;  %v4774_v22 = vld [vmem:[#allocation4 + $0x1d0] sm:$0xff] }
 0x21c   :  { %v3201_v24 = vadd.f32 %v2906_v6, %v17819_v47  ;;  %v18091_v0 = vadd.f32 %v15920_v44, %v3203_v62  ;;  %v3612_v21 = vpop.f32.mrf.mxu1  ;;  %v4771_v6 = vld [vmem:[#allocation4 + $0x1b8] sm:$0xff] }
 0x21d   :  { %v15841_v23 = vpop.f32.mrf.mxu0 }
 0x21e   :  { %v3204_v18 = vadd.f32 %v15841_v23, %v17822_v37  ;;  %v18094_v5 = vadd.f32 %v3612_v21, %v3201_v24  ;;  %v15921_v63 = vpop.f32.mrf.mxu1 }
 0x21f   :  { %v2909_v10 = vpop.f32.mrf.mxu0 }
 0x220   :  { %v3202_v58 = vadd.f32 %v2909_v10, %v17827_v52  ;;  %v18097_v27 = vadd.f32 %v15921_v63, %v3204_v18  ;;  %v3615_v47 = vpop.f32.mrf.mxu1  ;;  %v14030_v10 = vpack.c.bf16 %v4078_v55, %v4077_v15  ;;  %v4081_v15 = vld [vmem:[#allocation4 + $0x1e7] sm:$0xff]  ;;  %v4082_v55 = vld [vmem:[#allocation4 + $0x1ef] sm:$0xff] }
 0x221   :  { %v15844_v62 = vpop.f32.mrf.mxu0  ;;  %16035 = vmatmul.mubr.msk.bf16.gmra.mxu0 %vm17237_vm2, %v14021_v39  ;;  %v14027_v39 = vpack.c.bf16 %v4076_v46, %v4075_v1  ;;  %v4079_v46 = vld [vmem:[#allocation4 + $0x1d7] sm:$0xff] }
 0x222   :  { %v3207_v44 = vadd.f32 %v15844_v62, %v17836_v60  ;;  %v18102_v31 = vadd.f32 %v3615_v47, %v3202_v58  ;;  %v15924_v37 = vpop.f32.mrf.mxu1  ;;  %16115 = vmatmul.mubr.bf16.gmra.mxu1 %v4805_v40  ;;  %16038 = vmatprep.mubr.msk.bf16.mxu0 %vm17237_vm2, %v14024_v61  ;;  %v4807_v61 = vpack.c.bf16 %v4772_v59, %v4771_v6  ;;  %v4080_v6 = vld [vmem:[#allocation4 + $0x1df] sm:$0xff] }
 0x223   :  { %v2922_v52 = vpop.f32.mrf.mxu0  ;;  %16118 = vmatprep.mubr.bf16.mxu1 %v4806_v9  ;;  %v4808_v58 = vpack.c.bf16 %v4774_v22, %v4773_v4  ;;  %v4776_v59 = vld [vmem:[#allocation4 + $0x1e0] sm:$0xff]  ;;  %v4777_v4 = vld [vmem:[#allocation4 + $0x1e8] sm:$0xff]  ;;  %v4778_v22 = vld [vmem:[#allocation4 + $0x1f0] sm:$0xff] }
 0x224   :  { %v3205_v24 = vadd.f32 %v2922_v52, %v17839_v13  ;;  %v18107_v21 = vadd.f32 %v15924_v37, %v3207_v44  ;;  %v3628_v60 = vpop.f32.mrf.mxu1  ;;  %v4775_v52 = vld [vmem:[#allocation4 + $0x1d8] sm:$0xff] }
 0x225   :  { %v15845_v23 = vpop.f32.mrf.mxu0 }
 0x226   :  { %v3208_v18 = vadd.f32 %v15845_v23, %v17842_v56  ;;  %v18110_v63 = vadd.f32 %v3628_v60, %v3205_v24  ;;  %v15925_v40 = vpop.f32.mrf.mxu1 }
 0x227   :  { %v2925_v9 = vpop.f32.mrf.mxu0 }
 0x228   :  { %v3206_v47 = vadd.f32 %v2925_v9, %v17847_v36  ;;  %v18113_v62 = vadd.f32 %v15925_v40, %v3208_v18  ;;  %v3631_v13 = vpop.f32.mrf.mxu1  ;;  %v14036_v9 = vpack.c.bf16 %v4082_v55, %v4081_v15  ;;  %v4086_v15 = vld [vmem:[#allocation4 + $0x20f] sm:$0xff]  ;;  %v23728_v55 = vld [vmem:[#allocation44_spill] sm:$0xff] }
 0x229   :  { %v15848_v44 = vpop.f32.mrf.mxu0  ;;  %16039 = vmatmul.mubr.msk.bf16.gmra.mxu0 %vm17237_vm2, %v14027_v39  ;;  %v14033_v39 = vpack.c.bf16 %v4080_v6, %v4079_v46  ;;  %v4083_v46 = vld [vmem:[#allocation4 + $0x1f7] sm:$0xff]  ;;  %v4084_v6 = vld [vmem:[#allocation4 + $0x1ff] sm:$0xff] }
 0x22a   :  { %v3211_v37 = vadd.f32 %v15848_v44, %v17856_v20  ;;  %v18118_v1 = vadd.f32 %v3631_v13, %v3206_v47  ;;  %v15928_v56 = vpop.f32.mrf.mxu1  ;;  %16119 = vmatmul.mubr.bf16.gmra.mxu1 %v4807_v61  ;;  %16042 = vmatprep.mubr.msk.bf16.mxu0 %vm17237_vm2, %v14030_v10  ;;  %v4809_v10 = vpack.c.bf16 %v4776_v59, %v4775_v52  ;;  %v4779_v52 = vld [vmem:[#allocation4 + $0x1f8] sm:$0xff]  ;;  %v4085_v59 = vld [vmem:[#allocation4 + $0x207] sm:$0xff] }
 0x22b   :  { %v2938_v36 = vpop.f32.mrf.mxu0  ;;  %16122 = vmatprep.mubr.bf16.mxu1 %v4808_v58  ;;  %v4810_v47 = vpack.c.bf16 %v4778_v22, %v4777_v4  ;;  %v4781_v22 = vld [vmem:[#allocation4 + $0x208] sm:$0xff] }
 0x22c   :  { %v3209_v24 = vadd.f32 %v2938_v36, %v17859_v32  ;;  %v18123_v60 = vadd.f32 %v15928_v56, %v3211_v37  ;;  %v3644_v20 = vpop.f32.mrf.mxu1  ;;  %v4780_v36 = vld [vmem:[#allocation4 + $0x200] sm:$0xff] }
 0x22d   :  { %v15849_v23 = vpop.f32.mrf.mxu0 }
 0x22e   :  { %v3212_v18 = vadd.f32 %v15849_v23, %v17862_v26  ;;  %v18126_v40 = vadd.f32 %v3644_v20, %v3209_v24  ;;  %v15929_v61 = vpop.f32.mrf.mxu1 }
 0x22f   :  { %v2941_v58 = vpop.f32.mrf.mxu0 }
 0x230   :  { %v18129_v13 = vadd.f32 %v2941_v58, %v17867_v49  ;;  %v18131_v32 = vadd.f32 %v15929_v61, %v3212_v18  ;;  %v18133_v44 = vpop.f32.mrf.mxu1  ;;  %v23729_v18 = vld [vmem:[#allocation45_spill] sm:$0xff]  ;;  %v4811_v58 = vpack.c.bf16 %v4780_v36, %v4779_v52 }
 0x231   :  { %23727 = vst [vmem:[#allocation42_spill] sm:$0xff] %v18133_v44  ;;  %v15852_v37 = vpop.f32.mrf.mxu0  ;;  %16043 = vmatmul.mubr.msk.bf16.gmra.mxu0 %vm17237_vm2, %v14033_v39  ;;  %v14039_v39 = vpack.c.bf16 %v4084_v6, %v4083_v46  ;;  %v5359_v36 = vld [vmem:[#allocation4 + $0x29] sm:$0xff] }
 0x232   :  { %23725 = vst [vmem:[#allocation40_spill] sm:$0xff] %v18129_v13  ;;  %23726 = vst [vmem:[#allocation41_spill] sm:$0xff] %v18131_v32  ;;  %v3215_v26 = vadd.f32 %v15852_v37, %v17876_v2  ;;  %v15932_v56 = vpop.f32.mrf.mxu1  ;;  %16123 = vmatmul.mubr.bf16.gmra.mxu1 %v4809_v10  ;;  %16046 = vmatprep.mubr.msk.bf16.mxu0 %vm17237_vm2, %v14036_v9  ;;  %v4782_v2 = vld [vmem:[#allocation4 + $0x210] sm:$0xff]  ;;  %v14042_v37 = vpack.c.bf16 %v4086_v15, %v4085_v59 }
 0x233   :  { %v2954_v49 = vpop.f32.mrf.mxu0  ;;  %16126 = vmatprep.mubr.bf16.mxu1 %v4810_v47  ;;  %v4812_v44 = vpack.c.bf16 %v4782_v2, %v4781_v22  ;;  %v23730_v13 = vld [vmem:[#allocation46_spill] sm:$0xff] }
 0x234   :  { %v3213_v24 = vadd.f32 %v2954_v49, %v23728_v55  ;;  %v18141_v20 = vadd.f32 %v15932_v56, %v3215_v26  ;;  %v3660_v4 = vpop.f32.mrf.mxu1 }
 0x235   :  { %v15853_v23 = vpop.f32.mrf.mxu0 }
 0x236   :  { %v3216_v61 = vadd.f32 %v15853_v23, %v23729_v18  ;;  %v18144_v10 = vadd.f32 %v3660_v4, %v3213_v24  ;;  %v15933_v9 = vpop.f32.mrf.mxu1 }
 0x237   :  { %v2957_v47 = vpop.f32.mrf.mxu0 }
 0x238   :  { %v18147_v32 = vadd.f32 %v2957_v47, %v23730_v13  ;;  %v18149_v49 = vadd.f32 %v15933_v9, %v3216_v61  ;;  %v18151_v26 = vpop.f32.mrf.mxu1  ;;  %v5360_v13 = vld [vmem:[#allocation4 + $0x31] sm:$0xff]  ;;  %v5362_v47 = vld [vmem:[#allocation4 + $0x41] sm:$0xff] }
 0x239   :  { %23732 = vst [vmem:[#allocation44_spill] sm:$0xff] %v18151_v26  ;;  %v15856_v56 = vpop.f32.mrf.mxu0  ;;  %16047 = vmatmul.mubr.msk.bf16.gmra.mxu0 %vm17237_vm2, %v14039_v39  ;;  %v14061_v2 = vpack.c.bf16 %v5360_v13, %v5359_v36  ;;  %v23733_v39 = vld [vmem:[#allocation17_spill] sm:$0xff] }
 0x23a   :  { %23731 = vst [vmem:[#allocation43_spill] sm:$0xff] %v18147_v32  ;;  %v3219_v46 = vadd.f32 %v15856_v56, %v17896_v3  ;;  %v15936_v6 = vpop.f32.mrf.mxu1  ;;  %16127 = vmatmul.mubr.bf16.gmra.mxu1 %v4811_v58  ;;  %16050 = vmatprep.mubr.msk.bf16.mxu0 %vm17237_vm2, %v14042_v37  ;;  %v5361_v37 = vld [vmem:[#allocation4 + $0x39] sm:$0xff] }
 0x23b   :  { %v2970_v52 = vpop.f32.mrf.mxu0  ;;  %16130 = vmatprep.mubr.bf16.mxu1 %v4812_v44 }
 0x23c   :  { %v3217_v59 = vadd.f32 %v2970_v52, %v17899_v16  ;;  %v18159_v15 = vadd.f32 %v15936_v6, %v3219_v46  ;;  %v3676_v55 = vpop.f32.mrf.mxu1  ;;  %v5363_v46 = vld [vmem:[#allocation4 + $0x49] sm:$0xff]  ;;  %v5364_v6 = vld [vmem:[#allocation4 + $0x51] sm:$0xff] }
 0x23d   :  { %v15857_v24 = vpop.f32.mrf.mxu0 }
 0x23e   :  { %v3220_v4 = vadd.f32 %v15857_v24, %v17902_v43  ;;  %v18162_v22 = vadd.f32 %v3676_v55, %v3217_v59  ;;  %v15937_v3 = vpop.f32.mrf.mxu1  ;;  %v14064_v55 = vpack.c.bf16 %v5362_v47, %v5361_v37  ;;  %v23737_v24 = vld [vmem:[#allocation18_spill] sm:$0xff]  ;;  %v5365_v47 = vld [vmem:[#allocation4 + $0x59] sm:$0xff] }
 0x23f   :  { %v2973_v23 = vpop.f32.mrf.mxu0 }
 0x240   :  { %v18165_v18 = vadd.f32 %v2973_v23, %v23733_v39  ;;  %v18167_v61 = vadd.f32 %v15937_v3, %v3220_v4  ;;  %v18169_v44 = vpop.f32.mrf.mxu1  ;;  %v14067_v23 = vpack.c.bf16 %v5364_v6, %v5363_v46  ;;  %v5367_v6 = vld [vmem:[#allocation4 + $0x69] sm:$0xff] }
 0x241   :  { %23735 = vst [vmem:[#allocation46_spill] sm:$0xff] %v18169_v44  ;;  %v15860_v9 = vpop.f32.mrf.mxu0  ;;  %16051 = vmatmul.mubr.bf16.gmra.mxu0 %v23716_v19 }
 0x242   :  { %23734 = vst [vmem:[#allocation45_spill] sm:$0xff] %v18165_v18  ;;  %v3223_v16 = vadd.f32 %v15860_v9, %v17914_v45  ;;  %v15940_v58 = vpop.f32.mrf.mxu1  ;;  %16131 = vmatmul.mubr.bf16.gmra.mxu1 %v23716_v19  ;;  %16150 = vmatprep.mubr.msk.bf16.mxu0 %vm17394_vm4, %v14061_v2  ;;  %v23738_v2 = vld [vmem:[#allocation19_spill] sm:$0xff] }
 0x243   :  { %v2986_v56 = vpop.f32.mrf.mxu0 }
 0x244   :  { %v3221_v52 = vadd.f32 %v2986_v56, %v17917_v28  ;;  %v18177_v36 = vadd.f32 %v15940_v58, %v3223_v16  ;;  %v3692_v13 = vpop.f32.mrf.mxu1  ;;  %v23741_v16 = vld [vmem:[#allocation20_spill] sm:$0xff] }
 0x245   :  { %v15861_v59 = vpop.f32.mrf.mxu0  ;;  %v5366_v56 = vld [vmem:[#allocation4 + $0x61] sm:$0xff] }
 0x246   :  { %v3224_v45 = vadd.f32 %v15861_v59, %v23737_v24  ;;  %v18180_v4 = vadd.f32 %v3692_v13, %v3221_v52  ;;  %v15941_v3 = vpop.f32.mrf.mxu1  ;;  %v5368_v52 = vld [vmem:[#allocation4 + $0x71] sm:$0xff] }
 0x247   :  { %v2989_v39 = vpop.f32.mrf.mxu0 }
 0x248   :  { %v18183_v9 = vadd.f32 %v2989_v39, %v23738_v2  ;;  %v18185_v33 = vadd.f32 %v15941_v3, %v3224_v45  ;;  %v18187_v44 = vpop.f32.mrf.mxu1  ;;  %v14070_v3 = vpack.c.bf16 %v5366_v56, %v5365_v47  ;;  %v5370_v56 = vld [vmem:[#allocation4 + $0x81] sm:$0xff] }
 0x249   :  { %23740 = vst [vmem:[#allocation18_spill] sm:$0xff] %v18187_v44  ;;  %v15864_v28 = vpop.f32.mrf.mxu0  ;;  %16151 = vmatmul.mubr.msk.bf16.vlgmr.msra.gmra.mxu0 %vm17394_vm4, %v14064_v55 }
 0x24a   :  { %23739 = vst [vmem:[#allocation17_spill] sm:$0xff] %v18183_v9  ;;  %v3227_v58 = vadd.f32 %v15864_v28, %v23741_v16  ;;  %v15944_v37 = vpop.f32.mrf.mxu1  ;;  %16154 = vmatprep.mubr.msk.bf16.mxu0 %vm17394_vm4, %v14067_v23  ;;  %v14073_v28 = vpack.c.bf16 %v5368_v52, %v5367_v6  ;;  %v23742_v23 = vld [vmem:[#allocation21_spill] sm:$0xff]  ;;  %v5372_v52 = vld [vmem:[#allocation4 + $0x91] sm:$0xff] }
 0x24b   :  { %v3002_v46 = vpop.f32.mrf.mxu0  ;;  %v5371_v6 = vld [vmem:[#allocation4 + $0x89] sm:$0xff] }
 0x24c   :  { %v3225_v13 = vadd.f32 %v3002_v46, %v17934_v30  ;;  %v18195_v59 = vadd.f32 %v15944_v37, %v3227_v58  ;;  %v3708_v24 = vpop.f32.mrf.mxu1  ;;  %v23745_v58 = vld [vmem:[#allocation22_spill] sm:$0xff] }
 0x24d   :  { %v15865_v45 = vpop.f32.mrf.mxu0 }
 0x24e   :  { %v3228_v55 = vadd.f32 %v15865_v45, %v17937_v25  ;;  %v18198_v39 = vadd.f32 %v3708_v24, %v3225_v13  ;;  %v15945_v2 = vpop.f32.mrf.mxu1  ;;  %v5369_v25 = vld [vmem:[#allocation4 + $0x79] sm:$0xff] }
 0x24f   :  { %v3005_v16 = vpop.f32.mrf.mxu0 }
 0x250   :  { %v18201_v44 = vadd.f32 %v3005_v16, %v23742_v23  ;;  %v18203_v9 = vadd.f32 %v15945_v2, %v3228_v55  ;;  %v18205_v18 = vpop.f32.mrf.mxu1  ;;  %v14076_v2 = vpack.c.bf16 %v5370_v56, %v5369_v25  ;;  %v5374_v56 = vld [vmem:[#allocation4 + $0xa1] sm:$0xff] }
 0x251   :  { %23744 = vst [vmem:[#allocation20_spill] sm:$0xff] %v18205_v18  ;;  %v15868_v30 = vpop.f32.mrf.mxu0  ;;  %16155 = vmatmul.mubr.msk.bf16.gmra.mxu0 %vm17394_vm4, %v14070_v3 }
 0x252   :  { %23743 = vst [vmem:[#allocation19_spill] sm:$0xff] %v18201_v44  ;;  %v3231_v37 = vadd.f32 %v15868_v30, %v23745_v58  ;;  %v15948_v47 = vpop.f32.mrf.mxu1  ;;  %16158 = vmatprep.mubr.msk.bf16.mxu0 %vm17394_vm4, %v14073_v28  ;;  %v14079_v30 = vpack.c.bf16 %v5372_v52, %v5371_v6  ;;  %v5375_v6 = vld [vmem:[#allocation4 + $0xa9] sm:$0xff] }
 0x253   :  { %v3018_v46 = vpop.f32.mrf.mxu0 }
 0x254   :  { %v3229_v13 = vadd.f32 %v3018_v46, %v17950_v53  ;;  %v18213_v24 = vadd.f32 %v15948_v47, %v3231_v37  ;;  %v3724_v45 = vpop.f32.mrf.mxu1  ;;  %v23748_v37 = vld [vmem:[#allocation23_spill] sm:$0xff] }
 0x255   :  { %v15869_v55 = vpop.f32.mrf.mxu0 }
 0x256   :  { %v3232_v3 = vadd.f32 %v15869_v55, %v17953_v12  ;;  %v18216_v16 = vadd.f32 %v3724_v45, %v3229_v13  ;;  %v15949_v23 = vpop.f32.mrf.mxu1  ;;  %v5373_v12 = vld [vmem:[#allocation4 + $0x99] sm:$0xff] }
 0x257   :  { %v3021_v58 = vpop.f32.mrf.mxu0 }
 0x258   :  { %v18219_v28 = vadd.f32 %v3021_v58, %v17958_v50  ;;  %v18221_v18 = vadd.f32 %v15949_v23, %v3232_v3  ;;  %v18223_v44 = vpop.f32.mrf.mxu1  ;;  %v5376_v50 = vld [vmem:[#allocation4 + $0xb1] sm:$0xff]  ;;  %v14082_v3 = vpack.c.bf16 %v5374_v56, %v5373_v12  ;;  %v5378_v56 = vld [vmem:[#allocation4 + $0xc1] sm:$0xff] }
 0x259   :  { %23747 = vst [vmem:[#allocation22_spill] sm:$0xff] %v18223_v44  ;;  %v15872_v53 = vpop.f32.mrf.mxu0  ;;  %16159 = vmatmul.mubr.msk.bf16.gmra.mxu0 %vm17394_vm4, %v14076_v2 }
 0x25a   :  { %23746 = vst [vmem:[#allocation21_spill] sm:$0xff] %v18219_v28  ;;  %v3235_v47 = vadd.f32 %v15872_v53, %v23748_v37  ;;  %v15952_v25 = vpop.f32.mrf.mxu1  ;;  %16162 = vmatprep.mubr.msk.bf16.mxu0 %vm17394_vm4, %v14079_v30  ;;  %v14085_v53 = vpack.c.bf16 %v5376_v50, %v5375_v6  ;;  %v5379_v6 = vld [vmem:[#allocation4 + $0xc9] sm:$0xff] }
 0x25b   :  { %v3034_v46 = vpop.f32.mrf.mxu0  ;;  %v23753_v50 = vld [vmem:[#allocation25_spill] sm:$0xff] }
 0x25c   :  { %v3233_v52 = vadd.f32 %v3034_v46, %v17966_v54  ;;  %v18231_v13 = vadd.f32 %v15952_v25, %v3235_v47  ;;  %v3740_v45 = vpop.f32.mrf.mxu1  ;;  %v23752_v47 = vld [vmem:[#allocation24_spill] sm:$0xff] }
 0x25d   :  { %v15873_v55 = vpop.f32.mrf.mxu0 }
 0x25e   :  { %v3236_v2 = vadd.f32 %v15873_v55, %v17969_v35  ;;  %v18234_v23 = vadd.f32 %v3740_v45, %v3233_v52  ;;  %v15953_v58 = vpop.f32.mrf.mxu1  ;;  %v5377_v35 = vld [vmem:[#allocation4 + $0xb9] sm:$0xff] }
 0x25f   :  { %v3037_v37 = vpop.f32.mrf.mxu0 }
 0x260   :  { %v18237_v30 = vadd.f32 %v3037_v37, %v17974_v7  ;;  %v18239_v44 = vadd.f32 %v15953_v58, %v3236_v2  ;;  %v18241_v28 = vpop.f32.mrf.mxu1  ;;  %v5380_v7 = vld [vmem:[#allocation4 + $0xd1] sm:$0xff]  ;;  %v14088_v58 = vpack.c.bf16 %v5378_v56, %v5377_v35  ;;  %v5381_v56 = vld [vmem:[#allocation4 + $0xd9] sm:$0xff] }
 0x261   :  { %23751 = vst [vmem:[#allocation48_spill] sm:$0xff] %v18241_v28  ;;  %v15876_v54 = vpop.f32.mrf.mxu0  ;;  %16163 = vmatmul.mubr.msk.bf16.gmra.mxu0 %vm17394_vm4, %v14082_v3  ;;  %v23755_v37 = vld [vmem:[#allocation26_spill] sm:$0xff] }
 0x262   :  { %23749 = vst [vmem:[#allocation23_spill] sm:$0xff] %v18237_v30  ;;  %23750 = vst [vmem:[#allocation47_spill] sm:$0xff] %v18239_v44  ;;  %v3239_v25 = vadd.f32 %v15876_v54, %v23752_v47  ;;  %v15956_v12 = vpop.f32.mrf.mxu1  ;;  %16166 = vmatprep.mubr.msk.bf16.mxu0 %vm17394_vm4, %v14085_v53  ;;  %v14091_v47 = vpack.c.bf16 %v5380_v7, %v5379_v6  ;;  %v23757_v53 = vld [vmem:[#allocation27_spill] sm:$0xff]  ;;  %v5382_v6 = vld [vmem:[#allocation4 + $0xe1] sm:$0xff] }
 0x263   :  { %v3050_v46 = vpop.f32.mrf.mxu0 }
 0x264   :  { %v3237_v52 = vadd.f32 %v3050_v46, %v23753_v50  ;;  %v18249_v45 = vadd.f32 %v15956_v12, %v3239_v25  ;;  %v3756_v55 = vpop.f32.mrf.mxu1  ;;  %v23761_v25 = vld [vmem:[#allocation28_spill] sm:$0xff]  ;;  %v5383_v50 = vld [vmem:[#allocation4 + $0xe9] sm:$0xff] }
 0x265   :  { %v15877_v2 = vpop.f32.mrf.mxu0 }
 0x266   :  { %23754 = vst [vmem:[#allocation24_spill] sm:$0xff] %v18249_v45  ;;  %v3240_v3 = vadd.f32 %v15877_v2, %v23755_v37  ;;  %v18252_v28 = vadd.f32 %v3756_v55, %v3237_v52  ;;  %v15957_v54 = vpop.f32.mrf.mxu1  ;;  %v23762_v52 = vld [vmem:[#allocation29_spill] sm:$0xff] }
 0x267   :  { %v3053_v30 = vpop.f32.mrf.mxu0 }
 0x268   :  { %23756 = vst [vmem:[#allocation25_spill] sm:$0xff] %v18252_v28  ;;  %v18255_v26 = vadd.f32 %v3053_v30, %v23757_v53  ;;  %v18257_v32 = vadd.f32 %v15957_v54, %v3240_v3  ;;  %v18259_v44 = vpop.f32.mrf.mxu1  ;;  %v5384_v30 = vld [vmem:[#allocation4 + $0xf1] sm:$0xff]  ;;  %v14094_v54 = vpack.c.bf16 %v5382_v6, %v5381_v56  ;;  %v5385_v56 = vld [vmem:[#allocation4 + $0xf9] sm:$0xff]  ;;  %v5386_v6 = vld [vmem:[#allocation4 + $0x101] sm:$0xff] }
 0x269   :  { %23760 = vst [vmem:[#allocation49_spill] sm:$0xff] %v18259_v44  ;;  %v15880_v46 = vpop.f32.mrf.mxu0  ;;  %16167 = vmatmul.mubr.msk.bf16.gmra.mxu0 %vm17394_vm4, %v14088_v58  ;;  %v23763_v53 = vld [vmem:[#allocation30_spill] sm:$0xff] }
 0x26a   :  { %23758 = vst [vmem:[#allocation26_spill] sm:$0xff] %v18255_v26  ;;  %23759 = vst [vmem:[#allocation27_spill] sm:$0xff] %v18257_v32  ;;  %v3243_v12 = vadd.f32 %v15880_v46, %v23761_v25  ;;  %v15960_v35 = vpop.f32.mrf.mxu1  ;;  %16170 = vmatprep.mubr.msk.bf16.mxu0 %vm17394_vm4, %v14091_v47  ;;  %v14097_v25 = vpack.c.bf16 %v5384_v30, %v5383_v50  ;;  %v23764_v47 = vld [vmem:[#allocation31_spill] sm:$0xff]  ;;  %v5387_v30 = vld [vmem:[#allocation4 + $0x109] sm:$0xff] }
 0x26b   :  { %v3066_v7 = vpop.f32.mrf.mxu0 }
 0x26c   :  { %v3241_v55 = vadd.f32 %v3066_v7, %v23762_v52  ;;  %v18267_v2 = vadd.f32 %v15960_v35, %v3243_v12  ;;  %v3772_v37 = vpop.f32.mrf.mxu1 }
 0x26d   :  { %v15881_v3 = vpop.f32.mrf.mxu0 }
 0x26e   :  { %v3244_v58 = vadd.f32 %v15881_v3, %v23763_v53  ;;  %v18270_v44 = vadd.f32 %v3772_v37, %v3241_v55  ;;  %v15961_v46 = vpop.f32.mrf.mxu1  ;;  %v14100_v53 = vpack.c.bf16 %v5386_v6, %v5385_v56 }
 0x26f   :  { %v3069_v26 = vpop.f32.mrf.mxu0 }
 0x270   :  { %v18273_v32 = vadd.f32 %v3069_v26, %v23764_v47  ;;  %v18275_v28 = vadd.f32 %v15961_v46, %v3244_v58  ;;  %v18277_v45 = vpop.f32.mrf.mxu1  ;;  %v5388_v26 = vld [vmem:[#allocation4 + $0x111] sm:$0xff]  ;;  %v23768_v58 = vld [vmem:[#allocation32_spill] sm:$0xff] }
 0x271   :  { %23767 = vst [vmem:[#allocation30_spill] sm:$0xff] %v18277_v45  ;;  %v15884_v7 = vpop.f32.mrf.mxu0  ;;  %16171 = vmatmul.mubr.msk.bf16.gmra.mxu0 %vm17394_vm4, %v14094_v54  ;;  %v14103_v47 = vpack.c.bf16 %v5388_v26, %v5387_v30  ;;  %v5390_v30 = vld [vmem:[#allocation4 + $0x131] sm:$0xff] }
 0x272   :  { %23765 = vst [vmem:[#allocation28_spill] sm:$0xff] %v18273_v32  ;;  %23766 = vst [vmem:[#allocation29_spill] sm:$0xff] %v18275_v28  ;;  %v3247_v12 = vadd.f32 %v15884_v7, %v18011_v11  ;;  %v15964_v35 = vpop.f32.mrf.mxu1  ;;  %16174 = vmatprep.mubr.msk.bf16.mxu0 %vm17394_vm4, %v14097_v25  ;;  %v23769_v25 = vld [vmem:[#allocation33_spill] sm:$0xff]  ;;  %v23774_v26 = vld [vmem:[#allocation35_spill] sm:$0xff] }
 0x273   :  { %v3082_v50 = vpop.f32.mrf.mxu0 }
 0x274   :  { %v3245_v52 = vadd.f32 %v3082_v50, %v18014_v42  ;;  %v18285_v55 = vadd.f32 %v15964_v35, %v3247_v12  ;;  %v3788_v37 = vpop.f32.mrf.mxu1  ;;  %v23773_v12 = vld [vmem:[#allocation34_spill] sm:$0xff] }
 0x275   :  { %v15885_v3 = vpop.f32.mrf.mxu0  ;;  %v5389_v50 = vld [vmem:[#allocation4 + $0x129] sm:$0xff] }
 0x276   :  { %v3248_v54 = vadd.f32 %v15885_v3, %v23768_v58  ;;  %v18288_v46 = vadd.f32 %v3788_v37, %v3245_v52  ;;  %v15965_v11 = vpop.f32.mrf.mxu1 }
 0x277   :  { %v3085_v7 = vpop.f32.mrf.mxu0 }
 0x278   :  { %v18291_v45 = vadd.f32 %v3085_v7, %v23769_v25  ;;  %v18293_v32 = vadd.f32 %v15965_v11, %v3248_v54  ;;  %v18295_v28 = vpop.f32.mrf.mxu1  ;;  %v23776_v54 = vld [vmem:[#allocation36_spill] sm:$0xff]  ;;  %v14106_v25 = vpack.c.bf16 %v5390_v30, %v5389_v50  ;;  %v5393_v30 = vld [vmem:[#allocation4 + $0x149] sm:$0xff] }
 0x279   :  { %23772 = vst [vmem:[#allocation33_spill] sm:$0xff] %v18295_v28  ;;  %v15888_v42 = vpop.f32.mrf.mxu0  ;;  %16175 = vmatmul.mubr.msk.bf16.gmra.mxu0 %vm17394_vm4, %v14100_v53 }
 0x27a   :  { %23770 = vst [vmem:[#allocation31_spill] sm:$0xff] %v18291_v45  ;;  %23771 = vst [vmem:[#allocation32_spill] sm:$0xff] %v18293_v32  ;;  %v3251_v35 = vadd.f32 %v15888_v42, %v23773_v12  ;;  %v15968_v56 = vpop.f32.mrf.mxu1  ;;  %16178 = vmatprep.mubr.msk.bf16.mxu0 %vm17394_vm4, %v14103_v47  ;;  %v23778_v12 = vld [vmem:[#allocation37_spill] sm:$0xff] }
 0x27b   :  { %v3098_v6 = vpop.f32.mrf.mxu0 }
 0x27c   :  { %v3249_v52 = vadd.f32 %v3098_v6, %v23774_v26  ;;  %v18303_v37 = vadd.f32 %v15968_v56, %v3251_v35  ;;  %v3804_v3 = vpop.f32.mrf.mxu1  ;;  %v5391_v6 = vld [vmem:[#allocation4 + $0x139] sm:$0xff]  ;;  %v5392_v26 = vld [vmem:[#allocation4 + $0x141] sm:$0xff] }
 0x27d   :  { %v15889_v58 = vpop.f32.mrf.mxu0 }
 0x27e   :  { %23775 = vst [vmem:[#allocation34_spill] sm:$0xff] %v18303_v37  ;;  %v3252_v11 = vadd.f32 %v15889_v58, %v23776_v54  ;;  %v18306_v7 = vadd.f32 %v3804_v3, %v3249_v52  ;;  %v15969_v53 = vpop.f32.mrf.mxu1  ;;  %v5394_v52 = vld [vmem:[#allocation4 + $0x151] sm:$0xff] }
 0x27f   :  { %v3101_v42 = vpop.f32.mrf.mxu0 }
 0x280   :  { %23777 = vst [vmem:[#allocation35_spill] sm:$0xff] %v18306_v7  ;;  %v18309_v28 = vadd.f32 %v3101_v42, %v23778_v12  ;;  %v18311_v47 = vadd.f32 %v15969_v53, %v3252_v11  ;;  %v18313_v45 = vpop.f32.mrf.mxu1  ;;  %v14109_v53 = vpack.c.bf16 %v5392_v26, %v5391_v6  ;;  %v23782_v42 = vld [vmem:[#allocation38_spill] sm:$0xff]  ;;  %v5395_v6 = vld [vmem:[#allocation4 + $0x159] sm:$0xff]  ;;  %v5396_v26 = vld [vmem:[#allocation4 + $0x161] sm:$0xff] }
 0x281   :  { %23781 = vst [vmem:[#allocation50_spill] sm:$0xff] %v18313_v45  ;;  %v15892_v32 = vpop.f32.mrf.mxu0  ;;  %16179 = vmatmul.mubr.bf16.gmra.mxu0 %v23716_v19 }
 0x282   :  { %23779 = vst [vmem:[#allocation36_spill] sm:$0xff] %v18309_v28  ;;  %23780 = vst [vmem:[#allocation37_spill] sm:$0xff] %v18311_v47  ;;  %v3255_v35 = vadd.f32 %v15892_v32, %v18043_v17  ;;  %v15972_v56 = vpop.f32.mrf.mxu1  ;;  %16182 = vmatprep.mubr.msk.bf16.mxu0 %vm17394_vm4, %v14106_v25  ;;  %v14112_v32 = vpack.c.bf16 %v5394_v52, %v5393_v30  ;;  %v23783_v25 = vld [vmem:[#allocation39_spill] sm:$0xff] }
 0x283   :  { %v3114_v50 = vpop.f32.mrf.mxu0  ;;  %v5398_v30 = vld [vmem:[#allocation4 + $0x171] sm:$0xff] }
 0x284   :  { %v3253_v3 = vadd.f32 %v3114_v50, %v18046_v41  ;;  %v18320_v58 = vadd.f32 %v15972_v56, %v3255_v35  ;;  %v3820_v54 = vpop.f32.mrf.mxu1  ;;  %v5397_v50 = vld [vmem:[#allocation4 + $0x169] sm:$0xff] }
 0x285   :  { %v15893_v11 = vpop.f32.mrf.mxu0 }
 0x286   :  { %v3256_v12 = vadd.f32 %v15893_v11, %v23782_v42  ;;  %v18323_v45 = vadd.f32 %v3820_v54, %v3253_v3  ;;  %v15973_v17 = vpop.f32.mrf.mxu1  ;;  %v14115_v11 = vpack.c.bf16 %v5396_v26, %v5395_v6  ;;  %v5401_v26 = vld [vmem:[#allocation4 + $0x189] sm:$0xff] }
 0x287   :  { %v3117_v28 = vpop.f32.mrf.mxu0 }
 0x288   :  { %v18326_v47 = vadd.f32 %v3117_v28, %v23783_v25  ;;  %v18328_v7 = vadd.f32 %v15973_v17, %v3256_v12  ;;  %v18330_v37 = vpop.f32.mrf.mxu1  ;;  %v5399_v25 = vld [vmem:[#allocation4 + $0x179] sm:$0xff] }
 0x289   :  { %23785 = vst [vmem:[#allocation39_spill] sm:$0xff] %v18330_v37  ;;  %v15992_v41 = vpop.f32.mrf.mxu0  ;;  %16183 = vmatmul.mubr.msk.bf16.gmra.mxu0 %vm17394_vm4, %v14109_v53  ;;  %v14118_v53 = vpack.c.bf16 %v5398_v30, %v5397_v50 }
 0x28a   :  { %23784 = vst [vmem:[#allocation38_spill] sm:$0xff] %v18326_v47  ;;  %v18335_v35 = vadd.f32 %v15992_v41, %v18059_v34  ;;  %v18337_v56 = vpop.f32.mrf.mxu1  ;;  %16186 = vmatprep.mubr.msk.bf16.mxu0 %vm17394_vm4, %v14112_v32 }
 0x28b   :  { %v4276_v28 = vpop.f32.mrf.mxu0 }
 0x28c   :  { %v18342_v52 = vadd.f32 %v4276_v28, %v18062_v48  ;;  %v18344_v3 = vpop.f32.mrf.mxu1  ;;  %v5402_v28 = vld [vmem:[#allocation4 + $0x191] sm:$0xff] }
 0x28d   :  { %v15993_v54 = vpop.f32.mrf.mxu0 }
 0x28e   :  { %v18347_v34 = vadd.f32 %v15993_v54, %v18065_v14  ;;  %v18349_v12 = vpop.f32.mrf.mxu1  ;;  %v5400_v14 = vld [vmem:[#allocation4 + $0x181] sm:$0xff] }
 0x28f   :  { %v4279_v42 = vpop.f32.mrf.mxu0  ;;  %v14121_v30 = vpack.c.bf16 %v5400_v14, %v5399_v25 }
 0x290   :  { %v18352_v17 = vadd.f32 %v4279_v42, %v18070_v29  ;;  %v18361_v41 = vpop.f32.mrf.mxu1 }
 0x291   :  { %v15996_v32 = vpop.f32.mrf.mxu0  ;;  %16187 = vmatmul.mubr.msk.bf16.gmra.mxu0 %vm17394_vm4, %v14115_v11 }
 0x292   :  { %v18357_v48 = vadd.f32 %v15996_v32, %v18075_v38  ;;  %16190 = vmatprep.mubr.msk.bf16.mxu0 %vm17394_vm4, %v14118_v53  ;;  %v14124_v38 = vpack.c.bf16 %v5402_v28, %v5401_v26  ;;  %v18369_v11 = vpop.f32.mrf.mxu1  ;;  %v5406_v26 = vld [vmem:[#allocation4 + $0x1b1] sm:$0xff] }
 0x293   :  { %v4292_v6 = vpop.f32.mrf.mxu0 }
 0x294   :  { %v18364_v29 = vadd.f32 %v4292_v6, %v18078_v57  ;;  %v5403_v57 = vld [vmem:[#allocation4 + $0x199] sm:$0xff]  ;;  %v18381_v25 = vpop.f32.mrf.mxu1  ;;  %v5405_v6 = vld [vmem:[#allocation4 + $0x1a9] sm:$0xff] }
 0x295   :  { %v15997_v50 = vpop.f32.mrf.mxu0 }
 0x296   :  { %v18367_v54 = vadd.f32 %v15997_v50, %v18081_v8  ;;  %v5404_v8 = vld [vmem:[#allocation4 + $0x1a1] sm:$0xff] }
 0x297   :  { %v4295_v42 = vpop.f32.mrf.mxu0  ;;  %v14127_v50 = vpack.c.bf16 %v5404_v8, %v5403_v57 }
 0x298   :  { %v18372_v53 = vadd.f32 %v4295_v42, %v18086_v51  ;;  %v18389_v42 = vpop.f32.mrf.mxu1 }
 0x299   :  { %v16000_v32 = vpop.f32.mrf.mxu0  ;;  %16191 = vmatmul.mubr.msk.bf16.gmra.mxu0 %vm17394_vm4, %v14121_v30 }
 0x29a   :  { %v18377_v37 = vadd.f32 %v16000_v32, %v18091_v0  ;;  %16194 = vmatprep.mubr.msk.bf16.mxu0 %vm17394_vm4, %v14124_v38  ;;  %v14130_v0 = vpack.c.bf16 %v5406_v26, %v5405_v6  ;;  %v18401_v57 = vpop.f32.mrf.mxu1  ;;  %v5410_v6 = vld [vmem:[#allocation4 + $0x1d1] sm:$0xff] }
 0x29b   :  { %v4308_v14 = vpop.f32.mrf.mxu0 }
 0x29c   :  { %23786 = vst [vmem:[#allocation51_spill] sm:$0xff] %v18377_v37  ;;  %v18384_v51 = vadd.f32 %v4308_v14, %v18094_v5  ;;  %v5407_v5 = vld [vmem:[#allocation4 + $0x1b9] sm:$0xff]  ;;  %v5409_v14 = vld [vmem:[#allocation4 + $0x1c9] sm:$0xff] }
 0x29d   :  { %v16001_v28 = vpop.f32.mrf.mxu0 }
 0x29e   :  { %v18387_v30 = vadd.f32 %v16001_v28, %v18097_v27  ;;  %v5408_v27 = vld [vmem:[#allocation4 + $0x1c1] sm:$0xff] }
 0x29f   :  { %v4311_v32 = vpop.f32.mrf.mxu0  ;;  %v14133_v28 = vpack.c.bf16 %v5408_v27, %v5407_v5 }
 0x2a0   :  { %23787 = vst [vmem:[#allocation52_spill] sm:$0xff] %v18387_v30  ;;  %v18392_v38 = vadd.f32 %v4311_v32, %v18102_v31 }
 0x2a1   :  { %v16004_v47 = vpop.f32.mrf.mxu0  ;;  %16195 = vmatmul.mubr.msk.bf16.gmra.mxu0 %vm17394_vm4, %v14127_v50 }
 0x2a2   :  { %v18397_v37 = vadd.f32 %v16004_v47, %v18107_v21  ;;  %16198 = vmatprep.mubr.msk.bf16.mxu0 %vm17394_vm4, %v14130_v0  ;;  %v14136_v21 = vpack.c.bf16 %v5410_v6, %v5409_v14  ;;  %v18409_v47 = vpop.f32.mrf.mxu1  ;;  %v5414_v14 = vld [vmem:[#allocation4 + $0x1f1] sm:$0xff] }
 0x2a3   :  { %v4324_v8 = vpop.f32.mrf.mxu0 }
 0x2a4   :  { %23788 = vst [vmem:[#allocation53_spill] sm:$0xff] %v18397_v37  ;;  %v18404_v31 = vadd.f32 %v4324_v8, %v18110_v63  ;;  %v5411_v63 = vld [vmem:[#allocation4 + $0x1d9] sm:$0xff]  ;;  %v18421_v5 = vpop.f32.mrf.mxu1  ;;  %v5413_v8 = vld [vmem:[#allocation4 + $0x1e9] sm:$0xff] }
 0x2a5   :  { %v16005_v26 = vpop.f32.mrf.mxu0 }
 0x2a6   :  { %v18407_v50 = vadd.f32 %v16005_v26, %v18113_v62  ;;  %v5412_v62 = vld [vmem:[#allocation4 + $0x1e1] sm:$0xff] }
 0x2a7   :  { %v4327_v32 = vpop.f32.mrf.mxu0  ;;  %v14139_v26 = vpack.c.bf16 %v5412_v62, %v5411_v63  ;;  %v5416_v63 = vld [vmem:[#allocation4 + $0x201] sm:$0xff] }
 0x2a8   :  { %23789 = vst [vmem:[#allocation54_spill] sm:$0xff] %v18407_v50  ;;  %v18412_v0 = vadd.f32 %v4327_v32, %v18118_v1  ;;  %v23791_v32 = vld [vmem:[#allocation41_spill] sm:$0xff] }
 0x2a9   :  { %v16008_v37 = vpop.f32.mrf.mxu0  ;;  %16199 = vmatmul.mubr.msk.bf16.gmra.mxu0 %vm17394_vm4, %v14133_v28 }
 0x2aa   :  { %v18417_v30 = vadd.f32 %v16008_v37, %v18123_v60  ;;  %16202 = vmatprep.mubr.msk.bf16.mxu0 %vm17394_vm4, %v14136_v21  ;;  %v14142_v60 = vpack.c.bf16 %v5414_v14, %v5413_v8  ;;  %v18429_v37 = vpop.f32.mrf.mxu1  ;;  %v5417_v8 = vld [vmem:[#allocation4 + $0x209] sm:$0xff]  ;;  %v5418_v14 = vld [vmem:[#allocation4 + $0x211] sm:$0xff] }
 0x2ab   :  { %v4340_v27 = vpop.f32.mrf.mxu0 }
 0x2ac   :  { %23790 = vst [vmem:[#allocation55_spill] sm:$0xff] %v18417_v30  ;;  %v18424_v1 = vadd.f32 %v4340_v27, %v18126_v40  ;;  %v5415_v40 = vld [vmem:[#allocation4 + $0x1f9] sm:$0xff]  ;;  %v18440_v62 = vpop.f32.mrf.mxu1 }
 0x2ad   :  { %v16009_v6 = vpop.f32.mrf.mxu0 }
 0x2ae   :  { %v18427_v28 = vadd.f32 %v16009_v6, %v23791_v32 }
 0x2af   :  { %v18431_v30 = vpop.f32.mrf.mxu0 }
 0x2b0   :  { %23792 = vst [vmem:[#allocation41_spill] sm:$0xff] %v18427_v28  ;;  %23793 = vst [vmem:[#allocation56_spill] sm:$0xff] %v18431_v30  ;;  %v14145_v28 = vpack.c.bf16 %v5416_v63, %v5415_v40 }
 0x2b1   :  { %v16012_v21 = vpop.f32.mrf.mxu0  ;;  %16203 = vmatmul.mubr.msk.bf16.gmra.mxu0 %vm17394_vm4, %v14139_v26 }
 0x2b2   :  { %v18436_v50 = vadd.f32 %v16012_v21, %v18141_v20  ;;  %16206 = vmatprep.mubr.msk.bf16.mxu0 %vm17394_vm4, %v14142_v60  ;;  %v14148_v20 = vpack.c.bf16 %v5418_v14, %v5417_v8  ;;  %v18448_v21 = vpop.f32.mrf.mxu1 }
 0x2b3   :  { %v4356_v27 = vpop.f32.mrf.mxu0 }
 0x2b4   :  { %23794 = vst [vmem:[#allocation57_spill] sm:$0xff] %v18436_v50  ;;  %v18443_v6 = vadd.f32 %v4356_v27, %v18144_v10  ;;  %v18459_v10 = vpop.f32.mrf.mxu1 }
 0x2b5   :  { %v16013_v32 = vpop.f32.mrf.mxu0 }
 0x2b6   :  { %v18446_v26 = vadd.f32 %v16013_v32, %v18149_v49  ;;  %v18467_v8 = vpop.f32.mrf.mxu1 }
 0x2b7   :  { %v18450_v50 = vpop.f32.mrf.mxu0 }
 0x2b8   :  { %v18476_v32 = vpop.f32.mrf.mxu1 }
 0x2b9   :  { %v16016_v60 = vpop.f32.mrf.mxu0  ;;  %16207 = vmatmul.mubr.msk.bf16.gmra.mxu0 %vm17394_vm4, %v14145_v28 }
 0x2ba   :  { %v18455_v30 = vadd.f32 %v16016_v60, %v18159_v15  ;;  %16210 = vmatprep.mubr.msk.bf16.mxu0 %vm17394_vm4, %v14148_v20 }
 0x2bb   :  { %v4372_v40 = vpop.f32.mrf.mxu0 }
 0x2bc   :  { %v18462_v49 = vadd.f32 %v4372_v40, %v18162_v22  ;;  %v18484_v40 = vpop.f32.mrf.mxu1 }
 0x2bd   :  { %v16017_v63 = vpop.f32.mrf.mxu0 }
 0x2be   :  { %v18465_v27 = vadd.f32 %v16017_v63, %v18167_v61 }
 0x2bf   :  { %v18469_v14 = vpop.f32.mrf.mxu0 }
 0x2c0   :  { %23795 = vst [vmem:[#allocation58_spill] sm:$0xff] %v18465_v27 }
 0x2c1   :  { %v16020_v28 = vpop.f32.mrf.mxu0  ;;  %16211 = vmatmul.mubr.bf16.gmra.mxu0 %v23716_v19 }
 0x2c2   :  { %v18473_v15 = vadd.f32 %v16020_v28, %v18177_v36  ;;  %16310 = vmatprep.mubr.bf16.mxu0 %v23716_v19  ;;  %v18491_v28 = vpop.f32.mrf.mxu1 }
 0x2c3   :  { %v4388_v22 = vpop.f32.mrf.mxu0 }
 0x2c4   :  { %23796 = vst [vmem:[#allocation59_spill] sm:$0xff] %v18473_v15  ;;  %v18479_v20 = vadd.f32 %v4388_v22, %v18180_v4 }
 0x2c5   :  { %v16021_v61 = vpop.f32.mrf.mxu0 }
 0x2c6   :  { %23797 = vst [vmem:[#allocation60_spill] sm:$0xff] %v18479_v20  ;;  %v18482_v60 = vadd.f32 %v16021_v61, %v18185_v33  ;;  %v17017_v33 = vld [vmem:[#allocation9 + $0x138] sm:$0xff]   ;;  %v18499_v61 = vpop.f32.mrf.mxu1 }
 0x2c7   :  { %v18486_v63 = vpop.f32.mrf.mxu0  ;;  %16214 = vmatprep.subr.bf16.mxu1 %v17017_v33 }
 0x2c8   :  { %23798 = vst [vmem:[#allocation61_spill] sm:$0xff] %v18482_v60  ;;  %23799 = vst [vmem:[#allocation62_spill] sm:$0xff] %v18486_v63  ;;  %16215 = vmatpush3.bf16.msra.mxu1 %v17017_v33 }
 0x2c9   :  { %v16024_v43 = vpop.f32.mrf.mxu0 }
 0x2ca   :  { %v18489_v36 = vadd.f32 %v16024_v43, %v18195_v59  ;;  %v18506_v59 = vpop.f32.mrf.mxu1 }
 0x2cb   :  { %v4404_v19 = vpop.f32.mrf.mxu0 }
 0x2cc   :  { %23800 = vst [vmem:[#allocation63_spill] sm:$0xff] %v18489_v36  ;;  %v18494_v15 = vadd.f32 %v4404_v19, %v18198_v39 }
 0x2cd   :  { %v16025_v4 = vpop.f32.mrf.mxu0 }
 0x2ce   :  { %23801 = vst [vmem:[#allocation64_spill] sm:$0xff] %v18494_v15  ;;  %v18497_v22 = vadd.f32 %v16025_v4, %v18203_v9  ;;  %v18514_v4 = vpop.f32.mrf.mxu1 }
 0x2cf   :  { %v18501_v60 = vpop.f32.mrf.mxu0 }
 0x2d0   :  { %23802 = vst [vmem:[#allocation65_spill] sm:$0xff] %v18497_v22  ;;  %23803 = vst [vmem:[#allocation66_spill] sm:$0xff] %v18501_v60 }
 0x2d1   :  { %v16028_v63 = vpop.f32.mrf.mxu0 }
 0x2d2   :  { %v18504_v43 = vadd.f32 %v16028_v63, %v18213_v24  ;;  %v18521_v24 = vpop.f32.mrf.mxu1 }
 0x2d3   :  { %v4420_v36 = vpop.f32.mrf.mxu0 }
 0x2d4   :  { %23804 = vst [vmem:[#allocation67_spill] sm:$0xff] %v18504_v43  ;;  %v18509_v19 = vadd.f32 %v4420_v36, %v18216_v16  ;;  %v23810_v36 = vld [vmem:[#allocation47_spill] sm:$0xff] }
 0x2d5   :  { %v16029_v39 = vpop.f32.mrf.mxu0 }
 0x2d6   :  { %23805 = vst [vmem:[#allocation68_spill] sm:$0xff] %v18509_v19  ;;  %v18512_v9 = vadd.f32 %v16029_v39, %v18221_v18  ;;  %v17018_v18 = vld [vmem:[#allocation9 + $0x130] sm:$0xff]   ;;  %v18529_v39 = vpop.f32.mrf.mxu1 }
 0x2d7   :  { %v18516_v22 = vpop.f32.mrf.mxu0  ;;  %16216 = vmatprep.subr.bf16.mxu1 %v17018_v18 }
 0x2d8   :  { %23806 = vst [vmem:[#allocation69_spill] sm:$0xff] %v18512_v9  ;;  %23807 = vst [vmem:[#allocation70_spill] sm:$0xff] %v18516_v22  ;;  %16217 = vmatpush3.bf16.msra.mxu1 %v17018_v18 }
 0x2d9   :  { %v16032_v60 = vpop.f32.mrf.mxu0 }
 0x2da   :  { %v18519_v33 = vadd.f32 %v16032_v60, %v18231_v13  ;;  %v23813_v13 = vld [vmem:[#allocation24_spill] sm:$0xff] }
 0x2db   :  { %v4436_v63 = vpop.f32.mrf.mxu0 }
 0x2dc   :  { %23808 = vst [vmem:[#allocation71_spill] sm:$0xff] %v18519_v33  ;;  %v18524_v43 = vadd.f32 %v4436_v63, %v18234_v23  ;;  %v18536_v33 = vpop.f32.mrf.mxu1  ;;  %v23815_v23 = vld [vmem:[#allocation25_spill] sm:$0xff] }
 0x2dd   :  { %v16033_v16 = vpop.f32.mrf.mxu0 }
 0x2de   :  { %23809 = vst [vmem:[#allocation72_spill] sm:$0xff] %v18524_v43  ;;  %v18527_v19 = vadd.f32 %v16033_v16, %v23810_v36  ;;  %v23817_v16 = vld [vmem:[#allocation27_spill] sm:$0xff] }
 0x2df   :  { %v18531_v9 = vpop.f32.mrf.mxu0 }
 0x2e0   :  { %23811 = vst [vmem:[#allocation47_spill] sm:$0xff] %v18527_v19  ;;  %23812 = vst [vmem:[#allocation73_spill] sm:$0xff] %v18531_v9  ;;  %v18544_v19 = vpop.f32.mrf.mxu1 }
 0x2e1   :  { %v16036_v22 = vpop.f32.mrf.mxu0 }
 0x2e2   :  { %v18534_v60 = vadd.f32 %v16036_v22, %v23813_v13  ;;  %v18551_v22 = vpop.f32.mrf.mxu1 }
 0x2e3   :  { %v4452_v15 = vpop.f32.mrf.mxu0 }
 0x2e4   :  { %23814 = vst [vmem:[#allocation24_spill] sm:$0xff] %v18534_v60  ;;  %v18539_v63 = vadd.f32 %v4452_v15, %v23815_v23  ;;  %v23822_v23 = vld [vmem:[#allocation29_spill] sm:$0xff] }
 0x2e5   :  { %v16037_v43 = vpop.f32.mrf.mxu0 }
 0x2e6   :  { %23816 = vst [vmem:[#allocation25_spill] sm:$0xff] %v18539_v63  ;;  %v18542_v36 = vadd.f32 %v16037_v43, %v23817_v16  ;;  %v17019_v43 = vld [vmem:[#allocation9 + $0x128] sm:$0xff]   ;;  %v18559_v16 = vpop.f32.mrf.mxu1 }
 0x2e7   :  { %v18546_v20 = vpop.f32.mrf.mxu0  ;;  %23824 = vst [vmem:[#allocation77_spill] sm:$0xff] %v18559_v16  ;;  %16218 = vmatprep.subr.bf16.mxu1 %v17019_v43  ;;  %v23831_v16 = vld [vmem:[#allocation34_spill] sm:$0xff] }
 0x2e8   :  { %23818 = vst [vmem:[#allocation27_spill] sm:$0xff] %v18542_v36  ;;  %23819 = vst [vmem:[#allocation74_spill] sm:$0xff] %v18546_v20  ;;  %16219 = vmatpush3.bf16.msra.mxu1 %v17019_v43 }
 0x2e9   :  { %v16040_v9 = vpop.f32.mrf.mxu0 }
 0x2ea   :  { %v18549_v18 = vadd.f32 %v16040_v9, %v18267_v2  ;;  %v18566_v9 = vpop.f32.mrf.mxu1 }
 0x2eb   :  { %v4468_v13 = vpop.f32.mrf.mxu0 }
 0x2ec   :  { %23820 = vst [vmem:[#allocation75_spill] sm:$0xff] %v18549_v18  ;;  %v18554_v60 = vadd.f32 %v4468_v13, %v18270_v44 }
 0x2ed   :  { %v16041_v15 = vpop.f32.mrf.mxu0 }
 0x2ee   :  { %23821 = vst [vmem:[#allocation76_spill] sm:$0xff] %v18554_v60  ;;  %v18557_v63 = vadd.f32 %v16041_v15, %v23822_v23  ;;  %v23828_v15 = vld [vmem:[#allocation32_spill] sm:$0xff] }
 0x2ef   :  { %v18561_v36 = vpop.f32.mrf.mxu0 }
 0x2f0   :  { %23823 = vst [vmem:[#allocation29_spill] sm:$0xff] %v18557_v63  ;;  %23825 = vst [vmem:[#allocation78_spill] sm:$0xff] %v18561_v36  ;;  %v18574_v63 = vpop.f32.mrf.mxu1 }
 0x2f1   :  { %v16044_v20 = vpop.f32.mrf.mxu0 }
 0x2f2   :  { %v18564_v2 = vadd.f32 %v16044_v20, %v18285_v55  ;;  %v18581_v55 = vpop.f32.mrf.mxu1 }
 0x2f3   :  { %v4484_v18 = vpop.f32.mrf.mxu0 }
 0x2f4   :  { %23826 = vst [vmem:[#allocation79_spill] sm:$0xff] %v18564_v2  ;;  %v18569_v44 = vadd.f32 %v4484_v18, %v18288_v46  ;;  %v23833_v2 = vld [vmem:[#allocation35_spill] sm:$0xff]  ;;  %v23835_v18 = vld [vmem:[#allocation37_spill] sm:$0xff] }
 0x2f5   :  { %v16045_v13 = vpop.f32.mrf.mxu0 }
 0x2f6   :  { %23827 = vst [vmem:[#allocation80_spill] sm:$0xff] %v18569_v44  ;;  %v18572_v23 = vadd.f32 %v16045_v13, %v23828_v15  ;;  %v17020_v13 = vld [vmem:[#allocation9 + $0x120] sm:$0xff]   ;;  %v18589_v15 = vpop.f32.mrf.mxu1 }
 0x2f7   :  { %v18576_v60 = vpop.f32.mrf.mxu0  ;;  %16220 = vmatprep.subr.bf16.mxu1 %v17020_v13 }
 0x2f8   :  { %23829 = vst [vmem:[#allocation32_spill] sm:$0xff] %v18572_v23  ;;  %23830 = vst [vmem:[#allocation81_spill] sm:$0xff] %v18576_v60  ;;  %16221 = vmatpush3.bf16.msra.mxu1 %v17020_v13 }
 0x2f9   :  { %v16048_v36 = vpop.f32.mrf.mxu0 }
 0x2fa   :  { %v18579_v43 = vadd.f32 %v16048_v36, %v23831_v16  ;;  %v18596_v16 = vpop.f32.mrf.mxu1 }
 0x2fb   :  { %v4500_v20 = vpop.f32.mrf.mxu0 }
 0x2fc   :  { %23832 = vst [vmem:[#allocation34_spill] sm:$0xff] %v18579_v43  ;;  %v18584_v27 = vadd.f32 %v4500_v20, %v23833_v2 }
 0x2fd   :  { %v16049_v46 = vpop.f32.mrf.mxu0 }
 0x2fe   :  { %23834 = vst [vmem:[#allocation35_spill] sm:$0xff] %v18584_v27  ;;  %v18587_v44 = vadd.f32 %v16049_v46, %v23835_v18  ;;  %v18604_v18 = vpop.f32.mrf.mxu1 }
 0x2ff   :  { %v18591_v23 = vpop.f32.mrf.mxu0 }
 0x300   :  { %23836 = vst [vmem:[#allocation37_spill] sm:$0xff] %v18587_v44  ;;  %23837 = vst [vmem:[#allocation82_spill] sm:$0xff] %v18591_v23  ;;  %v18608_v27 = vpop.f32.mrf.mxu1 }
 0x301   :  { %v16052_v60 = vpop.f32.mrf.mxu0 }
 0x302   :  { %v18594_v36 = vadd.f32 %v16052_v60, %v18320_v58  ;;  %v5231_v58 = vadd.f32 %v18344_v3, %v18342_v52  ;;  %v5235_v52 = vadd.f32 %v18381_v25, %v18364_v29 }
 0x303   :  { %v4516_v43 = vpop.f32.mrf.mxu0 }
 0x304   :  { %23838 = vst [vmem:[#allocation83_spill] sm:$0xff] %v18594_v36  ;;  %v18599_v2 = vadd.f32 %v4516_v43, %v18323_v45  ;;  %v5233_v45 = vadd.f32 %v18337_v56, %v18335_v35  ;;  %v5232_v43 = vadd.f32 %v18361_v41, %v18352_v17  ;;  %v5234_v36 = vadd.f32 %v18349_v12, %v18347_v34 }
 0x305   :  { %v16053_v20 = vpop.f32.mrf.mxu0 }
 0x306   :  { %23839 = vst [vmem:[#allocation84_spill] sm:$0xff] %v18599_v2  ;;  %v18602_v46 = vadd.f32 %v16053_v20, %v18328_v7  ;;  %v18618_v20 = vpop.f32.mrf.mxu1 }
 0x307   :  { %v18606_v44 = vpop.f32.mrf.mxu0 }
 0x308   :  { %23840 = vst [vmem:[#allocation85_spill] sm:$0xff] %v18602_v46  ;;  %23841 = vst [vmem:[#allocation86_spill] sm:$0xff] %v18606_v44  ;;  %v18636_v34 = vpop.f32.mrf.mxu1 }
 0x309   :  { %v16152_v23 = vpop.f32.mrf.mxu0 }
 0x30a   :  { %v18622_v44 = vadd.f32 %v16152_v23, %v5233_v45 }
 0x30b   :  { %v5608_v13 = vpop.f32.mrf.mxu0 }
 0x30c   :  { %v18616_v7 = vadd.f32 %v5608_v13, %v5231_v58  ;;  %v6191_v23 = vmul.f32 %v18622_v44, %v18622_v44  ;;  %v5236_v58 = vadd.f32 %v18401_v57, %v18372_v53 }
 0x30d   :  { %v16153_v60 = vpop.f32.mrf.mxu0 }
 0x30e   :  { %v6189_v35 = vmul.f32 %v18616_v7, %v18616_v7  ;;  %v18630_v56 = vadd.f32 %v16153_v60, %v5234_v36  ;;  %v5237_v36 = vadd.f32 %v18369_v11, %v18357_v48 }
 0x30f   :  { %v5611_v46 = vpop.f32.mrf.mxu0 }
 0x310   :  { %v18624_v2 = vadd.f32 %v5611_v46, %v5232_v43  ;;  %v6192_v60 = vmul.f32 %v18630_v56, %v18630_v56 }
 0x311   :  { %v16156_v3 = vpop.f32.mrf.mxu0 }
 0x312   :  { %23842 = vst [vmem:[#allocation87_spill] sm:$0xff] %v18624_v2  ;;  %v6119_v17 = vadd.f32 %v18624_v2, %v18616_v7  ;;  %v6190_v41 = vmul.f32 %v18624_v2, %v18624_v2  ;;  %v5238_v2 = vadd.f32 %v18389_v42, %v18367_v54 }
 0x313   :  { %v5624_v12 = vpop.f32.mrf.mxu0 }
 0x314   :  { %v6120_v29 = vadd.f32 %v6119_v17, %v18622_v44  ;;  %v6253_v25 = vadd.f32 %v6190_v41, %v6189_v35  ;;  %v18641_v46 = vadd.f32 %v5624_v12, %v5235_v52  ;;  %v18652_v17 = vpop.f32.mrf.mxu1  ;;  %v18654_v52 = vadd.f32 %v16156_v3, %v5237_v36 }
 0x315   :  { %v16157_v13 = vpop.f32.mrf.mxu0  ;;  %v5239_v41 = vadd.f32 %v18421_v5, %v18384_v51  ;;  %v23843_v51 = vld [vmem:[#allocation51_spill] sm:$0xff] }
 0x316   :  { %v6254_v45 = vadd.f32 %v6253_v25, %v6191_v23  ;;  %v6121_v43 = vadd.f32 %v6120_v29, %v18630_v56  ;;  %v6193_v11 = vmul.f32 %v18641_v46, %v18641_v46  ;;  %v18663_v29 = vadd.f32 %v16157_v13, %v5238_v2  ;;  %v18668_v3 = vpop.f32.mrf.mxu1 }
 0x317   :  { %v5627_v35 = vpop.f32.mrf.mxu0  ;;  %v6195_v36 = vmul.f32 %v18654_v52, %v18654_v52  ;;  %v5241_v5 = vadd.f32 %v18409_v47, %v23843_v51  ;;  %v5240_v13 = vadd.f32 %v18440_v62, %v18392_v38 }
 0x318   :  { %v6122_v48 = vadd.f32 %v6121_v43, %v18641_v46  ;;  %v6255_v53 = vadd.f32 %v6254_v45, %v6192_v60  ;;  %v18659_v57 = vadd.f32 %v5627_v35, %v5236_v58  ;;  %v6196_v43 = vmul.f32 %v18663_v29, %v18663_v29 }
 0x319   :  { %v16160_v12 = vpop.f32.mrf.mxu0 }
 0x31a   :  { %v6256_v23 = vadd.f32 %v6255_v53, %v6193_v11  ;;  %v6123_v54 = vadd.f32 %v6122_v48, %v18659_v57  ;;  %v6194_v42 = vmul.f32 %v18659_v57, %v18659_v57  ;;  %v23844_v11 = vld [vmem:[#allocation52_spill] sm:$0xff] }
 0x31b   :  { %v5640_v25 = vpop.f32.mrf.mxu0  ;;  %v5242_v53 = vadd.f32 %v18429_v37, %v23844_v11  ;;  %v5244_v11 = vadd.f32 %v18476_v32, %v18412_v0 }
 0x31c   :  { %v6124_v58 = vadd.f32 %v6123_v54, %v18654_v52  ;;  %v6257_v60 = vadd.f32 %v6256_v23, %v6194_v42  ;;  %v18673_v45 = vadd.f32 %v5640_v25, %v5239_v41  ;;  %v18684_v54 = vpop.f32.mrf.mxu1  ;;  %v18686_v41 = vadd.f32 %v16160_v12, %v5241_v5 }
 0x31d   :  { %v16161_v2 = vpop.f32.mrf.mxu0  ;;  %v5243_v25 = vadd.f32 %v18459_v10, %v18404_v31  ;;  %v23847_v31 = vld [vmem:[#allocation53_spill] sm:$0xff] }
 0x31e   :  { %v6258_v35 = vadd.f32 %v6257_v60, %v6195_v36  ;;  %v6125_v48 = vadd.f32 %v6124_v58, %v18663_v29  ;;  %v6197_v42 = vmul.f32 %v18673_v45, %v18673_v45  ;;  %v18695_v60 = vadd.f32 %v16161_v2, %v5242_v53  ;;  %v18700_v51 = vpop.f32.mrf.mxu1 }
 0x31f   :  { %v5643_v23 = vpop.f32.mrf.mxu0  ;;  %v5245_v10 = vadd.f32 %v18448_v21, %v23847_v31 }
 0x320   :  { %v6126_v47 = vadd.f32 %v6125_v48, %v18673_v45  ;;  %v6259_v38 = vadd.f32 %v6258_v35, %v6196_v43  ;;  %v18691_v62 = vadd.f32 %v5643_v23, %v5240_v13  ;;  %v6199_v43 = vmul.f32 %v18686_v41, %v18686_v41 }
 0x321   :  { %v16164_v36 = vpop.f32.mrf.mxu0  ;;  %v6200_v53 = vmul.f32 %v18695_v60, %v18695_v60 }
 0x322   :  { %23845 = vst [vmem:[#allocation51_spill] sm:$0xff] %v18691_v62  ;;  %v6260_v58 = vadd.f32 %v6259_v38, %v6197_v42  ;;  %v6127_v37 = vadd.f32 %v6126_v47, %v18691_v62  ;;  %v6198_v12 = vmul.f32 %v18691_v62, %v18691_v62  ;;  %v23848_v42 = vld [vmem:[#allocation40_spill] sm:$0xff]  ;;  %v23849_v38 = vld [vmem:[#allocation42_spill] sm:$0xff] }
 0x323   :  { %v5656_v5 = vpop.f32.mrf.mxu0  ;;  %v3916_v62 = vadd.f32 %v23849_v38, %v23848_v42 }
 0x324   :  { %v6128_v13 = vadd.f32 %v6127_v37, %v18686_v41  ;;  %v6261_v35 = vadd.f32 %v6260_v58, %v6198_v12  ;;  %v18705_v48 = vadd.f32 %v5656_v5, %v5243_v25  ;;  %v23850_v37 = vld [vmem:[#allocation54_spill] sm:$0xff]  ;;  %v18718_v58 = vpop.f32.mrf.mxu1  ;;  %v18720_v12 = vadd.f32 %v16164_v36, %v5245_v10 }
 0x325   :  { %v16165_v2 = vpop.f32.mrf.mxu0  ;;  %v5246_v25 = vadd.f32 %v18467_v8, %v23850_v37 }
 0x326   :  { %23846 = vst [vmem:[#allocation52_spill] sm:$0xff] %v18705_v48  ;;  %v6262_v23 = vadd.f32 %v6261_v35, %v6199_v43  ;;  %v6129_v47 = vadd.f32 %v6128_v13, %v18695_v60  ;;  %v6201_v0 = vmul.f32 %v18705_v48, %v18705_v48  ;;  %v5247_v13 = vadd.f32 %v18491_v28, %v18424_v1  ;;  %v23852_v35 = vld [vmem:[#allocation56_spill] sm:$0xff] }
 0x327   :  { %v5659_v21 = vpop.f32.mrf.mxu0  ;;  %v4612_v31 = vadd.f32 %v23852_v35, %v3916_v62  ;;  %v18730_v38 = vadd.f32 %v16165_v2, %v5246_v25  ;;  %v23853_v62 = vld [vmem:[#allocation55_spill] sm:$0xff]  ;;  %v23855_v35 = vld [vmem:[#allocation44_spill] sm:$0xff] }
 0x328   :  { %v6130_v5 = vadd.f32 %v6129_v47, %v18705_v48  ;;  %v6263_v32 = vadd.f32 %v6262_v23, %v6200_v53  ;;  %v18725_v43 = vadd.f32 %v5659_v21, %v5244_v11  ;;  %v18735_v47 = vpop.f32.mrf.mxu1  ;;  %v6203_v11 = vmul.f32 %v18720_v12, %v18720_v12  ;;  %v23856_v48 = vld [vmem:[#allocation41_spill] sm:$0xff] }
 0x329   :  { %v16168_v42 = vpop.f32.mrf.mxu0  ;;  %v5249_v2 = vadd.f32 %v18484_v40, %v23853_v62  ;;  %v5248_v25 = vadd.f32 %v18506_v59, %v4612_v31  ;;  %v6204_v21 = vmul.f32 %v18730_v38, %v18730_v38 }
 0x32a   :  { %23851 = vst [vmem:[#allocation53_spill] sm:$0xff] %v18725_v43  ;;  %v6264_v8 = vadd.f32 %v6263_v32, %v6201_v0  ;;  %v6131_v36 = vadd.f32 %v6130_v5, %v18725_v43  ;;  %v6202_v10 = vmul.f32 %v18725_v43, %v18725_v43  ;;  %v23854_v32 = vld [vmem:[#allocation43_spill] sm:$0xff] }
 0x32b   :  { %v5672_v37 = vpop.f32.mrf.mxu0  ;;  %v3920_v43 = vadd.f32 %v23855_v35, %v23854_v32 }
 0x32c   :  { %v6132_v53 = vadd.f32 %v6131_v36, %v18720_v12  ;;  %v6265_v1 = vadd.f32 %v6264_v8, %v6202_v10  ;;  %v18740_v28 = vadd.f32 %v5672_v37, %v5247_v13  ;;  %v5250_v8 = vadd.f32 %v18499_v61, %v23856_v48  ;;  %v18752_v13 = vpop.f32.mrf.mxu1 }
 0x32d   :  { %v16169_v23 = vpop.f32.mrf.mxu0  ;;  %v18754_v36 = vadd.f32 %v16168_v42, %v5249_v2 }
 0x32e   :  { %v6266_v5 = vadd.f32 %v6265_v1, %v6203_v11  ;;  %v6133_v0 = vadd.f32 %v6132_v53, %v18730_v38  ;;  %v6205_v59 = vmul.f32 %v18740_v28, %v18740_v28  ;;  %v5251_v11 = vadd.f32 %v18521_v24, %v18443_v6  ;;  %v18769_v2 = vpop.f32.mrf.mxu1 }
 0x32f   :  { %v5675_v40 = vpop.f32.mrf.mxu0  ;;  %v4616_v53 = vadd.f32 %v18450_v50, %v3920_v43  ;;  %v18764_v48 = vadd.f32 %v16169_v23, %v5250_v8  ;;  %v23857_v50 = vld [vmem:[#allocation57_spill] sm:$0xff] }
 0x330   :  { %v6134_v10 = vadd.f32 %v6133_v0, %v18740_v28  ;;  %v6267_v31 = vadd.f32 %v6266_v5, %v6204_v21  ;;  %v18759_v37 = vadd.f32 %v5675_v40, %v5248_v25  ;;  %v6207_v25 = vmul.f32 %v18754_v36, %v18754_v36  ;;  %v23858_v40 = vld [vmem:[#allocation45_spill] sm:$0xff] }
 0x331   :  { %v16172_v1 = vpop.f32.mrf.mxu0  ;;  %v5253_v43 = vadd.f32 %v18514_v4, %v23857_v50  ;;  %v5252_v5 = vadd.f32 %v18536_v33, %v4616_v53  ;;  %v6208_v32 = vmul.f32 %v18764_v48, %v18764_v48 }
 0x332   :  { %v6268_v61 = vadd.f32 %v6267_v31, %v6205_v59  ;;  %v6135_v42 = vadd.f32 %v6134_v10, %v18759_v37  ;;  %v6206_v62 = vmul.f32 %v18759_v37, %v18759_v37  ;;  %v23859_v10 = vld [vmem:[#allocation46_spill] sm:$0xff]  ;;  %v5254_v31 = vadd.f32 %v18529_v39, %v18446_v26 }
 0x333   :  { %v5688_v0 = vpop.f32.mrf.mxu0  ;;  %v3924_v59 = vadd.f32 %v23859_v10, %v23858_v40 }
 0x334   :  { %v6136_v21 = vadd.f32 %v6135_v42, %v18754_v36  ;;  %v6269_v6 = vadd.f32 %v6268_v61, %v6206_v62  ;;  %v18774_v24 = vadd.f32 %v5688_v0, %v5251_v11  ;;  %v18786_v11 = vpop.f32.mrf.mxu1  ;;  %v18788_v61 = vadd.f32 %v16172_v1, %v5253_v43 }
 0x335   :  { %v16173_v23 = vpop.f32.mrf.mxu0  ;;  %v5255_v0 = vadd.f32 %v18551_v22, %v18462_v49 }
 0x336   :  { %v6270_v35 = vadd.f32 %v6269_v6, %v6207_v25  ;;  %v6137_v8 = vadd.f32 %v6136_v21, %v18764_v48  ;;  %v6209_v33 = vmul.f32 %v18774_v24, %v18774_v24  ;;  %v4620_v25 = vadd.f32 %v18469_v14, %v3924_v59  ;;  %v18803_v50 = vpop.f32.mrf.mxu1  ;;  %v23860_v59 = vld [vmem:[#allocation17_spill] sm:$0xff] }
 0x337   :  { %v5691_v4 = vpop.f32.mrf.mxu0  ;;  %v18798_v39 = vadd.f32 %v16173_v23, %v5254_v31  ;;  %v5257_v14 = vadd.f32 %v18544_v19, %v18455_v30  ;;  %v23861_v31 = vld [vmem:[#allocation18_spill] sm:$0xff] }
 0x338   :  { %v6138_v42 = vadd.f32 %v6137_v8, %v18774_v24  ;;  %v6271_v53 = vadd.f32 %v6270_v35, %v6208_v32  ;;  %v18793_v62 = vadd.f32 %v5691_v4, %v5252_v5  ;;  %v6211_v5 = vmul.f32 %v18788_v61, %v18788_v61 }
 0x339   :  { %v16176_v21 = vpop.f32.mrf.mxu0  ;;  %v5256_v35 = vadd.f32 %v18566_v9, %v4620_v25  ;;  %v6212_v8 = vmul.f32 %v18798_v39, %v18798_v39  ;;  %v3928_v4 = vadd.f32 %v23861_v31, %v23860_v59 }
 0x33a   :  { %v6272_v26 = vadd.f32 %v6271_v53, %v6209_v33  ;;  %v6139_v1 = vadd.f32 %v6138_v42, %v18793_v62  ;;  %v6210_v6 = vmul.f32 %v18793_v62, %v18793_v62  ;;  %v23862_v42 = vld [vmem:[#allocation58_spill] sm:$0xff]  ;;  %v23863_v33 = vld [vmem:[#allocation77_spill] sm:$0xff] }
 0x33b   :  { %v5704_v43 = vpop.f32.mrf.mxu0  ;;  %v5258_v53 = vadd.f32 %v23863_v33, %v23862_v42 }
 0x33c   :  { %v6140_v32 = vadd.f32 %v6139_v1, %v18788_v61  ;;  %v6273_v49 = vadd.f32 %v6272_v26, %v6210_v6  ;;  %v18808_v22 = vadd.f32 %v5704_v43, %v5255_v0  ;;  %v18820_v0 = vpop.f32.mrf.mxu1  ;;  %v18822_v26 = vadd.f32 %v16176_v21, %v5257_v14  ;;  %v23865_v6 = vld [vmem:[#allocation60_spill] sm:$0xff] }
 0x33d   :  { %v16177_v23 = vpop.f32.mrf.mxu0  ;;  %v5259_v43 = vadd.f32 %v18581_v55, %v23865_v6  ;;  %v23870_v6 = vld [vmem:[#allocation20_spill] sm:$0xff] }
 0x33e   :  { %v6274_v40 = vadd.f32 %v6273_v49, %v6211_v5  ;;  %v6141_v10 = vadd.f32 %v6140_v32, %v18798_v39  ;;  %v6213_v9 = vmul.f32 %v18808_v22, %v18808_v22  ;;  %v23866_v5 = vld [vmem:[#allocation62_spill] sm:$0xff]  ;;  %v18832_v31 = vadd.f32 %v16177_v23, %v5258_v53 }
 0x33f   :  { %v5707_v30 = vpop.f32.mrf.mxu0  ;;  %v4624_v32 = vadd.f32 %v23866_v5, %v3928_v4  ;;  %v23868_v4 = vld [vmem:[#allocation59_spill] sm:$0xff] }
 0x340   :  { %v6142_v19 = vadd.f32 %v6141_v10, %v18808_v22  ;;  %v6275_v25 = vadd.f32 %v6274_v40, %v6212_v8  ;;  %v18827_v1 = vadd.f32 %v5707_v30, %v5256_v35  ;;  %v18837_v10 = vpop.f32.mrf.mxu1  ;;  %v6215_v35 = vmul.f32 %v18822_v26, %v18822_v26 }
 0x341   :  { %v16180_v49 = vpop.f32.mrf.mxu0  ;;  %v5261_v23 = vadd.f32 %v18574_v63, %v23868_v4  ;;  %v5260_v53 = vadd.f32 %v18596_v16, %v4624_v32  ;;  %v6216_v30 = vmul.f32 %v18832_v31, %v18832_v31 }
 0x342   :  { %23864 = vst [vmem:[#allocation40_spill] sm:$0xff] %v18827_v1  ;;  %v6276_v59 = vadd.f32 %v6275_v25, %v6213_v9  ;;  %v6143_v21 = vadd.f32 %v6142_v19, %v18827_v1  ;;  %v6214_v14 = vmul.f32 %v18827_v1, %v18827_v1  ;;  %v23869_v25 = vld [vmem:[#allocation19_spill] sm:$0xff]  ;;  %v23871_v1 = vld [vmem:[#allocation61_spill] sm:$0xff] }
 0x343   :  { %v5720_v42 = vpop.f32.mrf.mxu0  ;;  %v3932_v5 = vadd.f32 %v23870_v6, %v23869_v25 }
 0x344   :  { %v6144_v8 = vadd.f32 %v6143_v21, %v18822_v26  ;;  %v6277_v55 = vadd.f32 %v6276_v59, %v6214_v14  ;;  %v18842_v40 = vadd.f32 %v5720_v42, %v5259_v43  ;;  %v5262_v59 = vadd.f32 %v18589_v15, %v23871_v1  ;;  %v18854_v43 = vpop.f32.mrf.mxu1 }
 0x345   :  { %v16181_v33 = vpop.f32.mrf.mxu0  ;;  %v18856_v21 = vadd.f32 %v16180_v49, %v5261_v23 }
 0x346   :  { %23867 = vst [vmem:[#allocation42_spill] sm:$0xff] %v18842_v40  ;;  %v6278_v19 = vadd.f32 %v6277_v55, %v6215_v35  ;;  %v6145_v9 = vadd.f32 %v6144_v8, %v18832_v31  ;;  %v6217_v16 = vmul.f32 %v18842_v40, %v18842_v40  ;;  %v23873_v35 = vld [vmem:[#allocation64_spill] sm:$0xff]  ;;  %v23874_v55 = vld [vmem:[#allocation66_spill] sm:$0xff]  ;;  %v18866_v1 = vadd.f32 %v16181_v33, %v5262_v59 }
 0x347   :  { %v5723_v63 = vpop.f32.mrf.mxu0  ;;  %v5263_v8 = vadd.f32 %v18608_v27, %v23873_v35  ;;  %v4628_v4 = vadd.f32 %v23874_v55, %v3932_v5  ;;  %v23876_v5 = vld [vmem:[#allocation63_spill] sm:$0xff]  ;;  %v23877_v35 = vld [vmem:[#allocation21_spill] sm:$0xff]  ;;  %v23878_v55 = vld [vmem:[#allocation22_spill] sm:$0xff] }
 0x348   :  { %v6146_v14 = vadd.f32 %v6145_v9, %v18842_v40  ;;  %v6279_v32 = vadd.f32 %v6278_v19, %v6216_v30  ;;  %v18861_v42 = vadd.f32 %v5723_v63, %v5260_v53  ;;  %v18871_v9 = vpop.f32.mrf.mxu1  ;;  %v6219_v53 = vmul.f32 %v18856_v21, %v18856_v21  ;;  %v23879_v40 = vld [vmem:[#allocation65_spill] sm:$0xff] }
 0x349   :  { %v16184_v25 = vpop.f32.mrf.mxu0  ;;  %v5265_v33 = vadd.f32 %v18604_v18, %v23876_v5  ;;  %v5264_v63 = vadd.f32 %v18636_v34, %v4628_v4 }
 0x34a   :  { %23872 = vst [vmem:[#allocation54_spill] sm:$0xff] %v18861_v42  ;;  %v6280_v15 = vadd.f32 %v6279_v32, %v6217_v16  ;;  %v6147_v49 = vadd.f32 %v6146_v14, %v18861_v42  ;;  %v6218_v23 = vmul.f32 %v18861_v42, %v18861_v42  ;;  %v6220_v14 = vmul.f32 %v18866_v1, %v18866_v1 }
 0x34b   :  { %v5736_v6 = vpop.f32.mrf.mxu0  ;;  %v3936_v42 = vadd.f32 %v23878_v55, %v23877_v35 }
 0x34c   :  { %v6148_v30 = vadd.f32 %v6147_v49, %v18856_v21  ;;  %v6281_v27 = vadd.f32 %v6280_v15, %v6218_v23  ;;  %v18876_v19 = vadd.f32 %v5736_v6, %v5263_v8  ;;  %v5266_v15 = vadd.f32 %v18618_v20, %v23879_v40  ;;  %v18888_v8 = vpop.f32.mrf.mxu1 }
 0x34d   :  { %v16185_v59 = vpop.f32.mrf.mxu0  ;;  %v18890_v49 = vadd.f32 %v16184_v25, %v5265_v33 }
 0x34e   :  { %23875 = vst [vmem:[#allocation56_spill] sm:$0xff] %v18876_v19  ;;  %v6282_v16 = vadd.f32 %v6281_v27, %v6219_v53  ;;  %v6149_v32 = vadd.f32 %v6148_v30, %v18866_v1  ;;  %v6221_v34 = vmul.f32 %v18876_v19, %v18876_v19  ;;  %v23881_v53 = vld [vmem:[#allocation68_spill] sm:$0xff]  ;;  %v23882_v27 = vld [vmem:[#allocation70_spill] sm:$0xff]  ;;  %v18900_v40 = vadd.f32 %v16185_v59, %v5266_v15 }
 0x34f   :  { %v5739_v18 = vpop.f32.mrf.mxu0  ;;  %v5267_v30 = vadd.f32 %v18668_v3, %v23881_v53  ;;  %v4632_v5 = vadd.f32 %v23882_v27, %v3936_v42  ;;  %v23884_v42 = vld [vmem:[#allocation67_spill] sm:$0xff]  ;;  %v23886_v27 = vld [vmem:[#allocation48_spill] sm:$0xff] }
 0x350   :  { %v6150_v23 = vadd.f32 %v6149_v32, %v18876_v19  ;;  %v6283_v4 = vadd.f32 %v6282_v16, %v6220_v14  ;;  %v18895_v6 = vadd.f32 %v5739_v18, %v5264_v63  ;;  %v18905_v32 = vpop.f32.mrf.mxu1  ;;  %v6223_v63 = vmul.f32 %v18890_v49, %v18890_v49  ;;  %v23885_v53 = vld [vmem:[#allocation23_spill] sm:$0xff]  ;;  %v23887_v19 = vld [vmem:[#allocation69_spill] sm:$0xff] }
 0x351   :  { %v16188_v35 = vpop.f32.mrf.mxu0  ;;  %v5269_v59 = vadd.f32 %v18652_v17, %v23884_v42  ;;  %v5268_v18 = vadd.f32 %v18700_v51, %v4632_v5 }
 0x352   :  { %23880 = vst [vmem:[#allocation55_spill] sm:$0xff] %v18895_v6  ;;  %v6284_v20 = vadd.f32 %v6283_v4, %v6221_v34  ;;  %v6151_v25 = vadd.f32 %v6150_v23, %v18895_v6  ;;  %v6222_v33 = vmul.f32 %v18895_v6, %v18895_v6  ;;  %v6224_v23 = vmul.f32 %v18900_v40, %v18900_v40 }
 0x353   :  { %v5752_v55 = vpop.f32.mrf.mxu0  ;;  %v3940_v6 = vadd.f32 %v23886_v27, %v23885_v53 }
 0x354   :  { %v6152_v14 = vadd.f32 %v6151_v25, %v18890_v49  ;;  %v6285_v3 = vadd.f32 %v6284_v20, %v6222_v33  ;;  %v18910_v16 = vadd.f32 %v5752_v55, %v5267_v30  ;;  %v5270_v20 = vadd.f32 %v18684_v54, %v23887_v19  ;;  %v18922_v30 = vpop.f32.mrf.mxu1 }
 0x355   :  { %v16189_v15 = vpop.f32.mrf.mxu0  ;;  %v18924_v25 = vadd.f32 %v16188_v35, %v5269_v59 }
 0x356   :  { %23883 = vst [vmem:[#allocation43_spill] sm:$0xff] %v18910_v16  ;;  %v6286_v34 = vadd.f32 %v6285_v3, %v6223_v63  ;;  %v6153_v4 = vadd.f32 %v6152_v14, %v18900_v40  ;;  %v6225_v51 = vmul.f32 %v18910_v16, %v18910_v16  ;;  %v23889_v63 = vld [vmem:[#allocation72_spill] sm:$0xff]  ;;  %v23890_v3 = vld [vmem:[#allocation73_spill] sm:$0xff]  ;;  %v18934_v19 = vadd.f32 %v16189_v15, %v5270_v20 }
 0x357   :  { %v5755_v17 = vpop.f32.mrf.mxu0  ;;  %v5271_v14 = vadd.f32 %v18735_v47, %v23889_v63  ;;  %v4636_v42 = vadd.f32 %v23890_v3, %v3940_v6  ;;  %v23892_v6 = vld [vmem:[#allocation71_spill] sm:$0xff]  ;;  %v23893_v63 = vld [vmem:[#allocation26_spill] sm:$0xff]  ;;  %v23894_v3 = vld [vmem:[#allocation49_spill] sm:$0xff] }
 0x358   :  { %v6154_v33 = vadd.f32 %v6153_v4, %v18910_v16  ;;  %v6287_v5 = vadd.f32 %v6286_v34, %v6224_v23  ;;  %v18929_v55 = vadd.f32 %v5755_v17, %v5268_v18  ;;  %v18939_v4 = vpop.f32.mrf.mxu1  ;;  %v6227_v18 = vmul.f32 %v18924_v25, %v18924_v25  ;;  %v23895_v16 = vld [vmem:[#allocation47_spill] sm:$0xff] }
 0x359   :  { %v16192_v53 = vpop.f32.mrf.mxu0  ;;  %v5273_v15 = vadd.f32 %v18718_v58, %v23892_v6  ;;  %v5272_v17 = vadd.f32 %v18769_v2, %v4636_v42 }
 0x35a   :  { %23888 = vst [vmem:[#allocation44_spill] sm:$0xff] %v18929_v55  ;;  %v6288_v54 = vadd.f32 %v6287_v5, %v6225_v51  ;;  %v6155_v35 = vadd.f32 %v6154_v33, %v18929_v55  ;;  %v6226_v59 = vmul.f32 %v18929_v55, %v18929_v55  ;;  %v6228_v33 = vmul.f32 %v18934_v19, %v18934_v19 }
 0x35b   :  { %v5768_v27 = vpop.f32.mrf.mxu0  ;;  %v3944_v55 = vadd.f32 %v23894_v3, %v23893_v63 }
 0x35c   :  { %v6156_v23 = vadd.f32 %v6155_v35, %v18924_v25  ;;  %v6289_v47 = vadd.f32 %v6288_v54, %v6226_v59  ;;  %v18944_v34 = vadd.f32 %v5768_v27, %v5271_v14  ;;  %v5274_v54 = vadd.f32 %v18752_v13, %v23895_v16  ;;  %v18956_v14 = vpop.f32.mrf.mxu1 }
 0x35d   :  { %v16193_v20 = vpop.f32.mrf.mxu0  ;;  %v18958_v35 = vadd.f32 %v16192_v53, %v5273_v15 }
 0x35e   :  { %23891 = vst [vmem:[#allocation41_spill] sm:$0xff] %v18944_v34  ;;  %v6290_v51 = vadd.f32 %v6289_v47, %v6227_v18  ;;  %v6157_v5 = vadd.f32 %v6156_v23, %v18934_v19  ;;  %v6229_v2 = vmul.f32 %v18944_v34, %v18944_v34  ;;  %v23897_v18 = vld [vmem:[#allocation25_spill] sm:$0xff]  ;;  %v23898_v47 = vld [vmem:[#allocation74_spill] sm:$0xff]  ;;  %v18968_v16 = vadd.f32 %v16193_v20, %v5274_v54 }
 0x35f   :  { %v5771_v58 = vpop.f32.mrf.mxu0  ;;  %v5275_v23 = vadd.f32 %v18803_v50, %v23897_v18  ;;  %v4640_v6 = vadd.f32 %v23898_v47, %v3944_v55  ;;  %v23900_v55 = vld [vmem:[#allocation24_spill] sm:$0xff]  ;;  %v23902_v47 = vld [vmem:[#allocation30_spill] sm:$0xff] }
 0x360   :  { %v6158_v59 = vadd.f32 %v6157_v5, %v18944_v34  ;;  %v6291_v42 = vadd.f32 %v6290_v51, %v6228_v33  ;;  %v18963_v27 = vadd.f32 %v5771_v58, %v5272_v17  ;;  %v18973_v5 = vpop.f32.mrf.mxu1  ;;  %v6231_v17 = vmul.f32 %v18958_v35, %v18958_v35  ;;  %v23901_v18 = vld [vmem:[#allocation28_spill] sm:$0xff]  ;;  %v23903_v34 = vld [vmem:[#allocation27_spill] sm:$0xff] }
 0x361   :  { %v16196_v63 = vpop.f32.mrf.mxu0  ;;  %v5277_v20 = vadd.f32 %v18786_v11, %v23900_v55  ;;  %v5276_v58 = vadd.f32 %v18837_v10, %v4640_v6 }
 0x362   :  { %23896 = vst [vmem:[#allocation57_spill] sm:$0xff] %v18963_v27  ;;  %v6292_v13 = vadd.f32 %v6291_v42, %v6229_v2  ;;  %v6159_v53 = vadd.f32 %v6158_v59, %v18963_v27  ;;  %v6230_v15 = vmul.f32 %v18963_v27, %v18963_v27  ;;  %v6232_v59 = vmul.f32 %v18968_v16, %v18968_v16 }
 0x363   :  { %v5784_v3 = vpop.f32.mrf.mxu0  ;;  %v3948_v27 = vadd.f32 %v23902_v47, %v23901_v18 }
 0x364   :  { %v6160_v33 = vadd.f32 %v6159_v53, %v18958_v35  ;;  %v6293_v50 = vadd.f32 %v6292_v13, %v6230_v15  ;;  %v18978_v51 = vadd.f32 %v5784_v3, %v5275_v23  ;;  %v5278_v13 = vadd.f32 %v18820_v0, %v23903_v34  ;;  %v18990_v23 = vpop.f32.mrf.mxu1 }
 0x365   :  { %v16197_v54 = vpop.f32.mrf.mxu0  ;;  %v18992_v53 = vadd.f32 %v16196_v63, %v5277_v20 }
 0x366   :  { %23899 = vst [vmem:[#allocation45_spill] sm:$0xff] %v18978_v51  ;;  %v6294_v2 = vadd.f32 %v6293_v50, %v6231_v17  ;;  %v6161_v42 = vadd.f32 %v6160_v33, %v18968_v16  ;;  %v6233_v10 = vmul.f32 %v18978_v51, %v18978_v51  ;;  %v23905_v17 = vld [vmem:[#allocation76_spill] sm:$0xff]  ;;  %v23906_v50 = vld [vmem:[#allocation78_spill] sm:$0xff]  ;;  %v19002_v34 = vadd.f32 %v16197_v54, %v5278_v13 }
 0x367   :  { %v5787_v11 = vpop.f32.mrf.mxu0  ;;  %v5279_v33 = vadd.f32 %v18871_v9, %v23905_v17  ;;  %v4644_v55 = vadd.f32 %v23906_v50, %v3948_v27  ;;  %v23907_v27 = vld [vmem:[#allocation75_spill] sm:$0xff]  ;;  %v23909_v50 = vld [vmem:[#allocation33_spill] sm:$0xff] }
 0x368   :  { %v6162_v15 = vadd.f32 %v6161_v42, %v18978_v51  ;;  %v6295_v6 = vadd.f32 %v6294_v2, %v6232_v59  ;;  %v18997_v3 = vadd.f32 %v5787_v11, %v5276_v58  ;;  %v5136_v42 = vpop.f32.mrf.mxu1  ;;  %v6235_v58 = vmul.f32 %v18992_v53, %v18992_v53  ;;  %v23908_v17 = vld [vmem:[#allocation31_spill] sm:$0xff]  ;;  %v23910_v51 = vld [vmem:[#allocation29_spill] sm:$0xff] }
 0x369   :  { %v16200_v18 = vpop.f32.mrf.mxu0  ;;  %v5281_v11 = vadd.f32 %v18854_v43, %v23907_v27  ;;  %v5280_v13 = vadd.f32 %v18905_v32, %v4644_v55  ;;  %v23913_v27 = vld [vmem:[#allocation81_spill] sm:$0xff] }
 0x36a   :  { %23904 = vst [vmem:[#allocation46_spill] sm:$0xff] %v18997_v3  ;;  %v6296_v0 = vadd.f32 %v6295_v6, %v6233_v10  ;;  %v6163_v63 = vadd.f32 %v6162_v15, %v18997_v3  ;;  %v6234_v20 = vmul.f32 %v18997_v3, %v18997_v3  ;;  %v6236_v15 = vmul.f32 %v19002_v34, %v19002_v34 }
 0x36b   :  { %v5800_v47 = vpop.f32.mrf.mxu0  ;;  %v3952_v3 = vadd.f32 %v23909_v50, %v23908_v17 }
 0x36c   :  { %v6164_v59 = vadd.f32 %v6163_v63, %v18992_v53  ;;  %v6297_v2 = vadd.f32 %v6296_v0, %v6234_v20  ;;  %v19010_v9 = vadd.f32 %v5800_v47, %v5279_v33  ;;  %v5282_v0 = vadd.f32 %v18888_v8, %v23910_v51  ;;  %v19022_v33 = vpop.f32.mrf.mxu1  ;;  %v17023_v20 = vld [vmem:[#allocation9 + $0x38] sm:$0xff]  }
 0x36d   :  { %v16201_v54 = vpop.f32.mrf.mxu0  ;;  %v19024_v63 = vadd.f32 %v16200_v18, %v5281_v11  ;;  %v4648_v17 = vadd.f32 %v23913_v27, %v3952_v3  ;;  %16294 = vmatprep.subr.bf16.mxu0 %v17023_v20  ;;  %v23917_v27 = vld [vmem:[#allocation36_spill] sm:$0xff] }
 0x36e   :  { %v6298_v10 = vadd.f32 %v6297_v2, %v6235_v58  ;;  %v6165_v6 = vadd.f32 %v6164_v59, %v19002_v34  ;;  %v6237_v55 = vmul.f32 %v19010_v9, %v19010_v9  ;;  %v23912_v59 = vld [vmem:[#allocation80_spill] sm:$0xff]  ;;  %v19034_v18 = vadd.f32 %v16201_v54, %v5282_v0  ;;  %16295 = vmatpush3.bf16.msra.mxu0 %v17023_v20  ;;  %v5139_v50 = vpop.f32.mrf.mxu1 }
 0x36f   :  { %v5803_v43 = vpop.f32.mrf.mxu0  ;;  %v5283_v2 = vadd.f32 %v18939_v4, %v23912_v59 }
 0x370   :  { %v6166_v32 = vadd.f32 %v6165_v6, %v19010_v9  ;;  %v6299_v47 = vadd.f32 %v6298_v10, %v6236_v15  ;;  %v19029_v58 = vadd.f32 %v5803_v43, %v5280_v13  ;;  %23914 = vst [vmem:[#allocation18_spill] sm:$0xff] %v19034_v18  ;;  %v17025_v13 = vld [vmem:[#allocation9 + $0x30] sm:$0xff]   ;;  %v6239_v10 = vmul.f32 %v19024_v63, %v19024_v63 }
 0x371   :  { %v16204_v8 = vpop.f32.mrf.mxu0  ;;  %16296 = vmatprep.subr.bf16.mxu0 %v17025_v13  ;;  %v6240_v20 = vmul.f32 %v19034_v18, %v19034_v18 }
 0x372   :  { %23911 = vst [vmem:[#allocation17_spill] sm:$0xff] %v19029_v58  ;;  %v6300_v51 = vadd.f32 %v6299_v47, %v6237_v55  ;;  %v6167_v11 = vadd.f32 %v6166_v32, %v19029_v58  ;;  %v6238_v6 = vmul.f32 %v19029_v58, %v19029_v58  ;;  %v23916_v55 = vld [vmem:[#allocation79_spill] sm:$0xff]  ;;  %v5284_v32 = vadd.f32 %v18973_v5, %v4648_v17  ;;  %v23918_v58 = vld [vmem:[#allocation50_spill] sm:$0xff] }
 0x373   :  { %v5816_v15 = vpop.f32.mrf.mxu0  ;;  %v5285_v54 = vadd.f32 %v18922_v30, %v23916_v55  ;;  %16297 = vmatpush3.bf16.msra.mxu0 %v17025_v13  ;;  %v17026_v55 = vld [vmem:[#allocation9 + $0x28] sm:$0xff]   ;;  %v17021_v13 = vld [vmem:[#allocation9 + $0x118] sm:$0xff]  }
 0x374   :  { %v6168_v4 = vadd.f32 %v6167_v11, %v19024_v63  ;;  %v6301_v3 = vadd.f32 %v6300_v51, %v6238_v6  ;;  %v19042_v43 = vadd.f32 %v5816_v15, %v5283_v2  ;;  %v3956_v11 = vadd.f32 %v23918_v58, %v23917_v27  ;;  %v23919_v51 = vld [vmem:[#allocation32_spill] sm:$0xff]  ;;  %v19054_v6 = vpop.f32.mrf.mxu1  ;;  %v23922_v27 = vld [vmem:[#allocation82_spill] sm:$0xff]  ;;  %16298 = vmatprep.subr.bf16.mxu0 %v17026_v55 }
 0x375   :  { %v16205_v0 = vpop.f32.mrf.mxu0  ;;  %v5286_v2 = vadd.f32 %v18956_v14, %v23919_v51  ;;  %v19056_v30 = vadd.f32 %v16204_v8, %v5285_v54  ;;  %16222 = vmatprep.subr.bf16.mxu1 %v17021_v13 }
 0x376   :  { %23915 = vst [vmem:[#allocation58_spill] sm:$0xff] %v19042_v43  ;;  %v6302_v47 = vadd.f32 %v6301_v3, %v6239_v10  ;;  %v6169_v59 = vadd.f32 %v6168_v4, %v19034_v18  ;;  %v6241_v17 = vmul.f32 %v19042_v43, %v19042_v43  ;;  %v23921_v3 = vld [vmem:[#allocation35_spill] sm:$0xff]  ;;  %v4652_v18 = vadd.f32 %v23922_v27, %v3956_v11  ;;  %v23925_v27 = vld [vmem:[#allocation38_spill] sm:$0xff] }
 0x377   :  { %v5819_v15 = vpop.f32.mrf.mxu0  ;;  %v5287_v58 = vadd.f32 %v5136_v42, %v23921_v3  ;;  %v19065_v8 = vadd.f32 %v16205_v0, %v5286_v2  ;;  %16223 = vmatpush3.bf16.msra.mxu1 %v17021_v13  ;;  %16299 = vmatpush3.bf16.msra.mxu0 %v17026_v55  ;;  %v6243_v42 = vmul.f32 %v19056_v30, %v19056_v30  ;;  %v17022_v0 = vld [vmem:[#allocation9 + $0x110] sm:$0xff]   ;;  %v23924_v2 = vld [vmem:[#allocation34_spill] sm:$0xff] }
 0x378   :  { %v6170_v5 = vadd.f32 %v6169_v59, %v19042_v43  ;;  %v6303_v10 = vadd.f32 %v6302_v47, %v6240_v20  ;;  %v19061_v4 = vadd.f32 %v5819_v15, %v5284_v32  ;;  %v5152_v43 = vpop.f32.mrf.mxu1  ;;  %v17027_v32 = vld [vmem:[#allocation9 + $0x20] sm:$0xff]   ;;  %16224 = vmatprep.subr.bf16.mxu1 %v17022_v0 }
 0x379   :  { %v16208_v14 = vpop.f32.mrf.mxu0  ;;  %23923 = vst [vmem:[#allocation60_spill] sm:$0xff] %v19065_v8  ;;  %16300 = vmatprep.subr.bf16.mxu0 %v17027_v32  ;;  %v6244_v13 = vmul.f32 %v19065_v8, %v19065_v8 }
 0x37a   :  { %23920 = vst [vmem:[#allocation77_spill] sm:$0xff] %v19061_v4  ;;  %v6304_v51 = vadd.f32 %v6303_v10, %v6241_v17  ;;  %v6171_v54 = vadd.f32 %v6170_v5, %v19061_v4  ;;  %v6242_v59 = vmul.f32 %v19061_v4, %v19061_v4  ;;  %v5289_v5 = vadd.f32 %v18990_v23, %v23924_v2  ;;  %v23926_v4 = vld [vmem:[#allocation39_spill] sm:$0xff] }
 0x37b   :  { %v5832_v20 = vpop.f32.mrf.mxu0  ;;  %v5288_v10 = vadd.f32 %v5139_v50, %v4652_v18  ;;  %16225 = vmatpush3.bf16.msra.mxu1 %v17022_v0  ;;  %16301 = vmatpush3.bf16.msra.mxu0 %v17027_v32  ;;  %v17028_v18 = vld [vmem:[#allocation9 + $0x18] sm:$0xff]   ;;  %v17024_v2 = vld [vmem:[#allocation9 + $0x108] sm:$0xff]  }
 0x37c   :  { %v6172_v47 = vadd.f32 %v6171_v54, %v19056_v30  ;;  %v6305_v11 = vadd.f32 %v6304_v51, %v6242_v59  ;;  %v19073_v15 = vadd.f32 %v5832_v20, %v5287_v58  ;;  %v3960_v54 = vadd.f32 %v23926_v4, %v23925_v27  ;;  %v23927_v51 = vld [vmem:[#allocation37_spill] sm:$0xff]  ;;  %v16133_v59 = vpop.f32.mrf.mxu1  ;;  %v23929_v4 = vld [vmem:[#allocation84_spill] sm:$0xff]  ;;  %16302 = vmatprep.subr.bf16.mxu0 %v17028_v18 }
 0x37d   :  { %v16209_v17 = vpop.f32.mrf.mxu0  ;;  %v5290_v58 = vadd.f32 %v19022_v33, %v23927_v51  ;;  %v19084_v20 = vadd.f32 %v16208_v14, %v5289_v5  ;;  %v5291_v27 = vadd.f32 %v5152_v43, %v23929_v4  ;;  %16226 = vmatprep.subr.bf16.mxu1 %v17024_v2  ;;  %v23934_v4 = vld [vmem:[#allocation85_spill] sm:$0xff] }
 0x37e   :  { %v6306_v55 = vadd.f32 %v6305_v11, %v6243_v42  ;;  %v6173_v3 = vadd.f32 %v6172_v47, %v19065_v8  ;;  %v6245_v42 = vmul.f32 %v19073_v15, %v19073_v15  ;;  %v23930_v8 = vld [vmem:[#allocation86_spill] sm:$0xff] }
 0x37f   :  { %v5835_v23 = vpop.f32.mrf.mxu0  ;;  %v4656_v33 = vadd.f32 %v23930_v8, %v3960_v54  ;;  %v19093_v5 = vadd.f32 %v16209_v17, %v5290_v58  ;;  %16227 = vmatpush3.bf16.msra.mxu1 %v17024_v2  ;;  %16303 = vmatpush3.bf16.msra.mxu0 %v17028_v18  ;;  %v6247_v43 = vmul.f32 %v19084_v20, %v19084_v20  ;;  %v17029_v17 = vld [vmem:[#allocation9 + $0x100] sm:$0xff]   ;;  %v23933_v58 = vld [vmem:[#allocation83_spill] sm:$0xff] }
 0x380   :  { %v6174_v50 = vadd.f32 %v6173_v3, %v19073_v15  ;;  %v6307_v47 = vadd.f32 %v6306_v55, %v6244_v13  ;;  %v19089_v11 = vadd.f32 %v5835_v23, %v5288_v10  ;;  %v5155_v3 = vpop.f32.mrf.mxu1  ;;  %v17030_v10 = vld [vmem:[#allocation9 + $0x10] sm:$0xff]   ;;  %v5293_v23 = vadd.f32 %v19054_v6, %v23933_v58  ;;  %16228 = vmatprep.subr.bf16.mxu1 %v17029_v17 }
 0x381   :  { %v16212_v51 = vpop.f32.mrf.mxu0  ;;  %23931 = vst [vmem:[#allocation59_spill] sm:$0xff] %v19093_v5  ;;  %16304 = vmatprep.subr.bf16.mxu0 %v17030_v10 }
 0x382   :  { %23928 = vst [vmem:[#allocation62_spill] sm:$0xff] %v19089_v11  ;;  %v6308_v14 = vadd.f32 %v6307_v47, %v6245_v42  ;;  %v6175_v32 = vadd.f32 %v6174_v50, %v19089_v11  ;;  %v6246_v0 = vmul.f32 %v19089_v11, %v19089_v11  ;;  %v5292_v42 = vadd.f32 %v5155_v3, %v4656_v33 }
 0x383   :  { %v5848_v13 = vpop.f32.mrf.mxu0  ;;  %v6248_v47 = vmul.f32 %v19093_v5, %v19093_v5  ;;  %v5294_v11 = vadd.f32 %v16133_v59, %v23934_v4  ;;  %16229 = vmatpush3.bf16.msra.mxu1 %v17029_v17  ;;  %16305 = vmatpush3.bf16.msra.mxu0 %v17030_v10  ;;  %v19116_v17 = vld [vmem:[#allocation9 + $0x78] sm:$0xff]  }
 0x384   :  { %v6176_v8 = vadd.f32 %v6175_v32, %v19084_v20  ;;  %v6309_v55 = vadd.f32 %v6308_v14, %v6246_v0  ;;  %v19101_v54 = vadd.f32 %v5848_v13, %v5291_v27  ;;  %v19109_v32 = vadd.f32 %v16212_v51, %v5293_v23  ;;  %v17031_v14 = vld [vmem:[#allocation9 + $0x8] sm:$0xff]   ;;  %v17032_v13 = vld [vmem:[#allocation9] sm:$0xff]   ;;  %23936 = vst [vmem:[#allocation61_spill] sm:$0xff] %v19116_v17 }
 0x385   :  { %v16213_v50 = vpop.f32.mrf.mxu0  ;;  %16306 = vmatprep.subr.bf16.mxu0 %v17031_v14  ;;  %16374 = vmatprep.subr.bf16.mxu1 %v19116_v17 }
 0x386   :  { %23932 = vst [vmem:[#allocation19_spill] sm:$0xff] %v19101_v54  ;;  %v6310_v18 = vadd.f32 %v6309_v55, %v6247_v43  ;;  %v6177_v2 = vadd.f32 %v6176_v8, %v19093_v5  ;;  %23935 = vst [vmem:[#allocation20_spill] sm:$0xff] %v19109_v32  ;;  %v6249_v33 = vmul.f32 %v19101_v54, %v19101_v54  ;;  %v17188_v43 = vmov 0.0  }
 0x387   :  { %v5851_v27 = vpop.f32.mrf.mxu0  ;;  %62 = vst [vmem:[#allocation3 + $0x10] sm:$0xff] %v17188_v43  ;;  %63 = vst [vmem:[#allocation3 + $0x218] sm:$0xff] %v17188_v43  ;;  %v19114_v59 = vadd.f32 %v16213_v50, %v5294_v11  ;;  %16307 = vmatpush3.bf16.msra.mxu0 %v17031_v14  ;;  %v6251_v10 = vmul.f32 %v19109_v32, %v19109_v32 }
 0x388   :  { %v6178_v6 = vadd.f32 %v6177_v2, %v19101_v54  ;;  %v6311_v0 = vadd.f32 %v6310_v18, %v6248_v47  ;;  %v5988_v3 = vadd.f32 %v5851_v27, %v5292_v42  ;;  %16308 = vmatprep.subr.bf16.mxu0 %v17032_v13 }
 0x389   :  { %v6252_v42 = vmul.f32 %v19114_v59, %v19114_v59 }
 0x38a   :  { %v6312_v8 = vadd.f32 %v6311_v0, %v6249_v33  ;;  %v6179_v51 = vadd.f32 %v6178_v6, %v5988_v3  ;;  %v6250_v55 = vmul.f32 %v5988_v3, %v5988_v3 }
 0x38b   :  { %16309 = vmatpush3.bf16.msra.mxu0 %v17032_v13  ;;  %v6327_v13 = vld [vmem:[%s23484_s3] sm:$0x1] }
 0x38c   :  { %v6180_v58 = vadd.f32 %v6179_v51, %v19109_v32  ;;  %v6313_v23 = vadd.f32 %v6312_v8, %v6250_v55 }
 0x38e   :  { %v6181_v11 = vadd.f32 %v6180_v58, %v19114_v59  ;;  %v6314_v50 = vadd.f32 %v6313_v23, %v6251_v10  ;;  %v23937_v10 = vld [vmem:[#allocation14_spill] sm:$0xff] }
 0x38f   :  { %v19129_v23 = vsub.s32 0, %v23937_v10  ;;  %v23943_v10 = vld [vmem:[#allocation40_spill] sm:$0xff] }
 0x390   :  { %v6182_v47 = vrot.slane %v6181_v11, 4  ;;  %v6315_v18 = vadd.f32 %v6314_v50, %v6252_v42  ;;  %v6331_v50 = vld [vmem:[%s23484_s3 + $0x1] sm:$0x1] }
 0x391   :  { %23938 = vst [vmem:[#allocation64_spill] sm:$0xff] %v19129_v23 }
 0x392   :  { %v6183_v2 = vadd.f32 %v6182_v47, %v6181_v11  ;;  %v6316_v4 = vrot.slane %v6315_v18, 4 }
 0x394   :  { %v6184_v27 = vrot.slane %v6183_v2, 2  ;;  %v6317_v14 = vadd.f32 %v6316_v4, %v6315_v18 }
 0x396   :  { %v6185_v6 = vadd.f32 %v6184_v27, %v6183_v2  ;;  %v6318_v33 = vrot.slane %v6317_v14, 2  ;;  %v23939_v2 = vld [vmem:[#allocation87_spill] sm:$0xff] }
 0x398   :  { %v6186_v0 = vrot.slane %v6185_v6, 1  ;;  %v6319_v43 = vadd.f32 %v6318_v33, %v6317_v14 }
 0x39a   :  { %v6187_v8 = vadd.f32 %v6186_v0, %v6185_v6  ;;  %v6320_v51 = vrot.slane %v6319_v43, 1  ;;  %v23941_v0 = vld [vmem:[#allocation52_spill] sm:$0xff] }
 0x39c   :  { %v6321_v55 = vadd.f32 %v6320_v51, %v6319_v43  ;;  %v6323_v17 = vmul.f32 0.001953125, %v6187_v8 }
 0x39e   :  { %v6324_v32 = vmul.f32 0.001953125, %v6321_v55  ;;  %v6325_v54 = vmul.f32 %v6323_v17, %v6323_v17 }
 0x3a0   :  { %v6326_v5 = vsub.f32 %v6324_v32, %v6325_v54 }
 0x3a2   :  { %v6328_v58 = vadd.f32 1e-05, %v6326_v5 }
 0x3a4   :  { %17089 = vrsqrt.f32 %v6328_v58 }
 0x3b1   :  { %v17090_v42 = vpop.eup %17089 }
 0x3b2   :  { %v6330_v11 = vmul.f32 %v17090_v42, %v6327_v13 }
 0x3b4   :  { %v6332_v47 = vmul.f32 %v6330_v11, %v6323_v17  ;;  %v19135_v18 = vrot.slane %v6330_v11, %v19129_v23  ;;  %v23944_v11 = vld [vmem:[#allocation42_spill] sm:$0xff] }
 0x3b6   :  { %v6333_v54 = vsub.f32 %v6331_v50, %v6332_v47  ;;  %v6399_v5 = vmul.f32 %v19135_v18, %v5988_v3  ;;  %v19140_v32 = vmul.f32 %v19135_v18, %v18616_v7  ;;  %v19144_v4 = vmul.f32 %v19135_v18, %v23939_v2 }
 0x3b7   :  { %v19148_v27 = vmul.f32 %v19135_v18, %v18622_v44  ;;  %v19152_v17 = vmul.f32 %v19135_v18, %v18630_v56  ;;  %v19156_v14 = vmul.f32 %v19135_v18, %v18641_v46  ;;  %v19160_v7 = vmul.f32 %v19135_v18, %v18659_v57  ;;  %v23940_v46 = vld [vmem:[#allocation51_spill] sm:$0xff] }
 0x3b8   :  { %v19163_v3 = vrot.slane %v6333_v54, %v19129_v23  ;;  %v19167_v6 = vmul.f32 %v19135_v18, %v18654_v52  ;;  %v19171_v44 = vmul.f32 %v19135_v18, %v18663_v29  ;;  %v19175_v56 = vmul.f32 %v19135_v18, %v18673_v45  ;;  %v23942_v45 = vld [vmem:[#allocation53_spill] sm:$0xff]  ;;  %v23946_v54 = vld [vmem:[#allocation56_spill] sm:$0xff]  ;;  %v23959_v23 = vld [vmem:[#allocation58_spill] sm:$0xff] }
 0x3b9   :  { %v19179_v33 = vmul.f32 %v19135_v18, %v23940_v46  ;;  %v19183_v57 = vmul.f32 %v19135_v18, %v18686_v41  ;;  %v19187_v52 = vmul.f32 %v19135_v18, %v18695_v60  ;;  %v19191_v29 = vmul.f32 %v19135_v18, %v23941_v0  ;;  %v23948_v0 = vld [vmem:[#allocation43_spill] sm:$0xff] }
 0x3ba   :  { %v6467_v43 = vadd.f32 %v19163_v3, %v6399_v5  ;;  %v19196_v8 = vmul.f32 %v19135_v18, %v23942_v45  ;;  %v19200_v51 = vmul.f32 %v19135_v18, %v18720_v12  ;;  %v19204_v41 = vmul.f32 %v19135_v18, %v18730_v38  ;;  %v23947_v5 = vld [vmem:[#allocation55_spill] sm:$0xff] }
 0x3bb   :  { %v19208_v60 = vmul.f32 %v19135_v18, %v18740_v28  ;;  %v19212_v55 = vmul.f32 %v19135_v18, %v18759_v37  ;;  %v19216_v58 = vmul.f32 %v19135_v18, %v18754_v36  ;;  %v19220_v12 = vmul.f32 %v19135_v18, %v18764_v48 }
 0x3bc   :  { %vm6531_vm5 = vcmp.ge.f32.partialorder %v6467_v43, 0.0  ;;  %v6595_v13 = vmul.f32 0.01, %v6467_v43  ;;  %v19224_v38 = vmul.f32 %v19135_v18, %v18774_v24  ;;  %v19228_v28 = vmul.f32 %v19135_v18, %v18793_v62 }
 0x3bd   :  { %v19232_v37 = vmul.f32 %v19135_v18, %v18788_v61  ;;  %v19236_v36 = vmul.f32 %v19135_v18, %v18798_v39  ;;  %v19240_v48 = vmul.f32 %v19135_v18, %v18808_v22  ;;  %v19244_v24 = vmul.f32 %v19135_v18, %v23943_v10  ;;  %v23945_v22 = vld [vmem:[#allocation54_spill] sm:$0xff]  ;;  %v23950_v10 = vld [vmem:[#allocation41_spill] sm:$0xff] }
 0x3be   :  { %v6659_v42 = vsel %vm6531_vm5, %v6467_v43, %v6595_v13  ;;  %v19248_v62 = vmul.f32 %v19135_v18, %v18822_v26  ;;  %v19252_v61 = vmul.f32 %v19135_v18, %v18832_v31  ;;  %v19256_v39 = vmul.f32 %v19135_v18, %v23944_v11  ;;  %v23949_v43 = vld [vmem:[#allocation44_spill] sm:$0xff] }
 0x3bf   :  { %6724 = vst [vmem:[#allocation3 + $0x200] sm:$0xff] %v6659_v42  ;;  %v19260_v50 = vmul.f32 %v19135_v18, %v23945_v22  ;;  %v19264_v47 = vmul.f32 %v19135_v18, %v18856_v21  ;;  %v19268_v26 = vmul.f32 %v19135_v18, %v18866_v1  ;;  %v19272_v31 = vmul.f32 %v19135_v18, %v23946_v54  ;;  %v23951_v42 = vld [vmem:[#allocation57_spill] sm:$0xff] }
 0x3c0   :  { %v19276_v2 = vmul.f32 %v19135_v18, %v23947_v5  ;;  %v19280_v46 = vmul.f32 %v19135_v18, %v18890_v49  ;;  %v19284_v21 = vmul.f32 %v19135_v18, %v18900_v40  ;;  %v19288_v1 = vmul.f32 %v19135_v18, %v23948_v0  ;;  %v23952_v54 = vld [vmem:[#allocation45_spill] sm:$0xff]  ;;  %v23953_v5 = vld [vmem:[#allocation46_spill] sm:$0xff] }
 0x3c1   :  { %v19292_v45 = vmul.f32 %v19135_v18, %v23949_v43  ;;  %v19296_v13 = vmul.f32 %v19135_v18, %v18924_v25  ;;  %v19300_v49 = vmul.f32 %v19135_v18, %v18934_v19  ;;  %v19304_v40 = vmul.f32 %v19135_v18, %v23950_v10  ;;  %v23955_v10 = vld [vmem:[#allocation17_spill] sm:$0xff] }
 0x3c2   :  { %v19308_v11 = vmul.f32 %v19135_v18, %v23951_v42  ;;  %v19312_v22 = vmul.f32 %v19135_v18, %v18958_v35  ;;  %v19316_v25 = vmul.f32 %v19135_v18, %v18968_v16  ;;  %v19320_v19 = vmul.f32 %v19135_v18, %v23952_v54 }
 0x3c3   :  { %v19324_v0 = vmul.f32 %v19135_v18, %v23953_v5  ;;  %v19328_v43 = vmul.f32 %v19135_v18, %v18992_v53  ;;  %v19332_v35 = vmul.f32 %v19135_v18, %v19002_v34  ;;  %v19336_v16 = vmul.f32 %v19135_v18, %v19010_v9  ;;  %v23957_v5 = vld [vmem:[#allocation18_spill] sm:$0xff] }
 0x3c4   :  { %v19340_v42 = vmul.f32 %v19135_v18, %v23955_v10  ;;  %v19344_v54 = vmul.f32 %v19135_v18, %v19024_v63  ;;  %v19348_v53 = vmul.f32 %v19135_v18, %v23957_v5  ;;  %v19352_v34 = vmul.f32 %v19135_v18, %v23959_v23 }
 0x3c5   :  { %23954 = vst [vmem:[#allocation66_spill] sm:$0xff] %v19332_v35  ;;  %v23960_v35 = vld [vmem:[#allocation77_spill] sm:$0xff]  ;;  %v19360_v10 = vmul.f32 %v19135_v18, %v19056_v30  ;;  %v19368_v5 = vmul.f32 %v19135_v18, %v19073_v15 }
 0x3c6   :  { %23956 = vst [vmem:[#allocation63_spill] sm:$0xff] %v19340_v42  ;;  %23958 = vst [vmem:[#allocation21_spill] sm:$0xff] %v19348_v53  ;;  %v19356_v9 = vmul.f32 %v19135_v18, %v23960_v35  ;;  %v23963_v42 = vld [vmem:[#allocation60_spill] sm:$0xff]  ;;  %v23965_v53 = vld [vmem:[#allocation62_spill] sm:$0xff]  ;;  %v19376_v35 = vmul.f32 %v19135_v18, %v19084_v20  ;;  %v19396_v20 = vadd.f32 %v19163_v3, %v19140_v32 }
 0x3c7   :  { %23962 = vst [vmem:[#allocation65_spill] sm:$0xff] %v19360_v10  ;;  %v19364_v63 = vmul.f32 %v19135_v18, %v23963_v42  ;;  %v19372_v23 = vmul.f32 %v19135_v18, %v23965_v53  ;;  %v23967_v10 = vld [vmem:[#allocation19_spill] sm:$0xff]  ;;  %v19392_v53 = vmul.f32 %v19135_v18, %v19114_v59  ;;  %v19412_v59 = vadd.f32 %v19163_v3, %v19156_v14 }
 0x3c8   :  { %23961 = vst [vmem:[#allocation22_spill] sm:$0xff] %v19356_v9  ;;  %v23966_v9 = vld [vmem:[#allocation59_spill] sm:$0xff]  ;;  %v19384_v42 = vmul.f32 %v19135_v18, %v23967_v10  ;;  %v19404_v10 = vadd.f32 %v19163_v3, %v19148_v27  ;;  %v19420_v32 = vadd.f32 %v19163_v3, %v19167_v6  ;;  %v19428_v27 = vadd.f32 %v19163_v3, %v19175_v56 }
 0x3c9   :  { %23964 = vst [vmem:[#allocation68_spill] sm:$0xff] %v19364_v63  ;;  %v19380_v30 = vmul.f32 %v19135_v18, %v23966_v9  ;;  %v23968_v63 = vld [vmem:[#allocation20_spill] sm:$0xff]  ;;  %v19400_v9 = vadd.f32 %v19163_v3, %v19144_v4  ;;  %v19424_v4 = vadd.f32 %v19163_v3, %v19171_v44  ;;  %v19436_v14 = vadd.f32 %v19163_v3, %v19183_v57 }
 0x3ca   :  { %v19388_v15 = vmul.f32 %v19135_v18, %v23968_v63  ;;  %v19408_v63 = vadd.f32 %v19163_v3, %v19152_v17  ;;  %v19416_v18 = vadd.f32 %v19163_v3, %v19160_v7  ;;  %v19432_v17 = vadd.f32 %v19163_v3, %v19179_v33 }
 0x3cb   :  { %v19440_v7 = vadd.f32 %v19163_v3, %v19187_v52  ;;  %v19444_v6 = vadd.f32 %v19163_v3, %v19191_v29  ;;  %v19448_v44 = vadd.f32 %v19163_v3, %v19196_v8  ;;  %v19452_v56 = vadd.f32 %v19163_v3, %v19200_v51 }
 0x3cc   :  { %v19456_v33 = vadd.f32 %v19163_v3, %v19204_v41  ;;  %v19460_v57 = vadd.f32 %v19163_v3, %v19208_v60  ;;  %v19464_v52 = vadd.f32 %v19163_v3, %v19212_v55  ;;  %v19468_v29 = vadd.f32 %v19163_v3, %v19216_v58 }
 0x3cd   :  { %v19472_v8 = vadd.f32 %v19163_v3, %v19220_v12  ;;  %v19476_v51 = vadd.f32 %v19163_v3, %v19224_v38  ;;  %v19480_v41 = vadd.f32 %v19163_v3, %v19228_v28  ;;  %v19484_v60 = vadd.f32 %v19163_v3, %v19232_v37 }
 0x3ce   :  { %v19488_v55 = vadd.f32 %v19163_v3, %v19236_v36  ;;  %v19492_v58 = vadd.f32 %v19163_v3, %v19240_v48  ;;  %v19496_v12 = vadd.f32 %v19163_v3, %v19244_v24  ;;  %v19500_v38 = vadd.f32 %v19163_v3, %v19248_v62 }
 0x3cf   :  { %v19504_v28 = vadd.f32 %v19163_v3, %v19252_v61  ;;  %v19508_v37 = vadd.f32 %v19163_v3, %v19256_v39  ;;  %v19512_v36 = vadd.f32 %v19163_v3, %v19260_v50  ;;  %v19516_v48 = vadd.f32 %v19163_v3, %v19264_v47 }
 0x3d0   :  { %v19520_v24 = vadd.f32 %v19163_v3, %v19268_v26  ;;  %v19524_v62 = vadd.f32 %v19163_v3, %v19272_v31  ;;  %v19528_v61 = vadd.f32 %v19163_v3, %v19276_v2  ;;  %v19532_v39 = vadd.f32 %v19163_v3, %v19280_v46 }
 0x3d1   :  { %v19536_v50 = vadd.f32 %v19163_v3, %v19284_v21  ;;  %v19540_v47 = vadd.f32 %v19163_v3, %v19288_v1  ;;  %v19544_v26 = vadd.f32 %v19163_v3, %v19292_v45  ;;  %v19548_v31 = vadd.f32 %v19163_v3, %v19296_v13 }
 0x3d2   :  { %v19552_v2 = vadd.f32 %v19163_v3, %v19300_v49  ;;  %v19556_v46 = vadd.f32 %v19163_v3, %v19304_v40  ;;  %v19560_v21 = vadd.f32 %v19163_v3, %v19308_v11  ;;  %v19564_v1 = vadd.f32 %v19163_v3, %v19312_v22  ;;  %v23971_v11 = vld [vmem:[#allocation66_spill] sm:$0xff] }
 0x3d3   :  { %v19568_v45 = vadd.f32 %v19163_v3, %v19316_v25  ;;  %v19572_v13 = vadd.f32 %v19163_v3, %v19320_v19  ;;  %v19576_v49 = vadd.f32 %v19163_v3, %v19324_v0  ;;  %v19580_v40 = vadd.f32 %v19163_v3, %v19328_v43 }
 0x3d4   :  { %v19584_v22 = vadd.f32 %v19163_v3, %v23971_v11  ;;  %v19588_v25 = vadd.f32 %v19163_v3, %v19336_v16  ;;  %v19596_v0 = vadd.f32 %v19163_v3, %v19344_v54  ;;  %v19604_v11 = vadd.f32 %v19163_v3, %v19352_v34 }
 0x3d5   :  { %23969 = vst [vmem:[#allocation70_spill] sm:$0xff] %v19568_v45  ;;  %23970 = vst [vmem:[#allocation67_spill] sm:$0xff] %v19576_v49  ;;  %v23974_v45 = vld [vmem:[#allocation63_spill] sm:$0xff]  ;;  %v23977_v49 = vld [vmem:[#allocation21_spill] sm:$0xff]  ;;  %v19624_v34 = vadd.f32 %v19163_v3, %v19372_v23  ;;  %v19644_v23 = vadd.f32 %v19163_v3, %v19392_v53  ;;  %vm6470_vm6 = vcmp.ge.f32.partialorder %v19396_v20, 0.0  ;;  %vm6471_vm7 = vcmp.ge.f32.partialorder %v19400_v9, 0.0 }
 0x3d6   :  { %23972 = vst [vmem:[#allocation23_spill] sm:$0xff] %v19584_v22  ;;  %23973 = vst [vmem:[#allocation48_spill] sm:$0xff] %v19588_v25  ;;  %v19592_v19 = vadd.f32 %v19163_v3, %v23974_v45  ;;  %v19600_v43 = vadd.f32 %v19163_v3, %v23977_v49  ;;  %v23979_v22 = vld [vmem:[#allocation22_spill] sm:$0xff]  ;;  %v23981_v25 = vld [vmem:[#allocation65_spill] sm:$0xff]  ;;  %v19620_v49 = vadd.f32 %v19163_v3, %v19368_v5  ;;  %vm6472_vm8 = vcmp.ge.f32.partialorder %v19404_v10, 0.0 }
 0x3d7   :  { %23976 = vst [vmem:[#allocation72_spill] sm:$0xff] %v19596_v0  ;;  %23978 = vst [vmem:[#allocation73_spill] sm:$0xff] %v19604_v11  ;;  %v19608_v16 = vadd.f32 %v19163_v3, %v23979_v22  ;;  %v19612_v45 = vadd.f32 %v19163_v3, %v23981_v25  ;;  %v19628_v22 = vadd.f32 %v19163_v3, %v19376_v35  ;;  %vm6473_vm9 = vcmp.ge.f32.partialorder %v19408_v63, 0.0 }
 0x3d8   :  { %23975 = vst [vmem:[#allocation69_spill] sm:$0xff] %v19592_v19  ;;  %v23983_v19 = vld [vmem:[#allocation68_spill] sm:$0xff]  ;;  %23985 = vst [vmem:[#allocation47_spill] sm:$0xff] %v19620_v49  ;;  %v19632_v25 = vadd.f32 %v19163_v3, %v19380_v30  ;;  %v19640_v5 = vadd.f32 %v19163_v3, %v19388_v15  ;;  %vm6474_vm10 = vcmp.ge.f32.partialorder %v19412_v59, 0.0  ;;  %vm6475_vm11 = vcmp.ge.f32.partialorder %v19416_v18, 0.0 }
 0x3d9   :  { %23980 = vst [vmem:[#allocation71_spill] sm:$0xff] %v19608_v16  ;;  %23982 = vst [vmem:[#allocation26_spill] sm:$0xff] %v19612_v45  ;;  %v19616_v54 = vadd.f32 %v19163_v3, %v23983_v19  ;;  %v19636_v19 = vadd.f32 %v19163_v3, %v19384_v42  ;;  %vm6476_vm12 = vcmp.ge.f32.partialorder %v19420_v32, 0.0  ;;  %vm6477_vm13 = vcmp.ge.f32.partialorder %v19424_v4, 0.0 }
 0x3da   :  { %23986 = vst [vmem:[#allocation25_spill] sm:$0xff] %v19624_v34  ;;  %23987 = vst [vmem:[#allocation74_spill] sm:$0xff] %v19628_v22  ;;  %vm6478_vm14 = vcmp.ge.f32.partialorder %v19428_v27, 0.0  ;;  %vm6479_vm15 = vcmp.ge.f32.partialorder %v19432_v17, 0.0  ;;  %v6534_v3 = vmul.f32 0.01, %v19396_v20 }
 0x3db   :  { %23984 = vst [vmem:[#allocation49_spill] sm:$0xff] %v19616_v54  ;;  %23988 = vst [vmem:[#allocation24_spill] sm:$0xff] %v19632_v25  ;;  %v6535_v35 = vmul.f32 0.01, %v19400_v9  ;;  %v6536_v30 = vmul.f32 0.01, %v19404_v10 }
 0x3dc   :  { %23989 = vst [vmem:[#allocation28_spill] sm:$0xff] %v19636_v19  ;;  %23990 = vst [vmem:[#allocation30_spill] sm:$0xff] %v19640_v5  ;;  %vm6480_vm0 = vcmp.ge.f32.partialorder %v19436_v14, 0.0  ;;  %v6537_v42 = vmul.f32 0.01, %v19408_v63  ;;  %vm6481_vm1 = vcmp.ge.f32.partialorder %v19440_v7, 0.0  ;;  %v19670_v25 = vsel %vm6470_vm6, %v19396_v20, %v6534_v3 }
 0x3dd   :  { %23991 = vst [vmem:[#allocation27_spill] sm:$0xff] %v19644_v23  ;;  %v6538_v15 = vmul.f32 0.01, %v19412_v59  ;;  %v6539_v53 = vmul.f32 0.01, %v19416_v18  ;;  %23992 = vst [vmem:[#allocation76_spill] sm:$0xff] %v19670_v25  ;;  %v19683_v54 = vsel %vm6471_vm7, %v19400_v9, %v6535_v35  ;;  %v19699_v16 = vsel %vm6472_vm8, %v19404_v10, %v6536_v30 }
 0x3de   :  { %v6540_v23 = vmul.f32 0.01, %v19420_v32  ;;  %v6541_v5 = vmul.f32 0.01, %v19424_v4  ;;  %v6542_v19 = vmul.f32 0.01, %v19428_v27  ;;  %v19715_v11 = vsel %vm6473_vm9, %v19408_v63, %v6537_v42 }
 0x3df   :  { %vm6482_vm3 = vcmp.ge.f32.partialorder %v19444_v6, 0.0  ;;  %v6543_v22 = vmul.f32 0.01, %v19432_v17  ;;  %v19675_v34 = vmul.f32 0.01, %v19436_v14  ;;  %23993 = vst [vmem:[#allocation78_spill] sm:$0xff] %v19683_v54 }
 0x3e0   :  { %v19678_v49 = vmul.f32 0.01, %v19440_v7  ;;  %6663 = vst [vmem:[#allocation3 + $0x18] sm:$0xff] %v19670_v25  ;;  %vm6483_vm5 = vcmp.ge.f32.partialorder %v19448_v44, 0.0  ;;  %v19688_v20 = vmul.f32 0.01, %v19444_v6 }
 0x3e1   :  { %v19691_v3 = vmul.f32 0.01, %v19448_v44  ;;  %v19694_v45 = vmul.f32 0.01, %v19452_v56  ;;  %23994 = vst [vmem:[#allocation75_spill] sm:$0xff] %v19699_v16  ;;  %6664 = vst [vmem:[#allocation3 + $0x20] sm:$0xff] %v19683_v54 }
 0x3e2   :  { %vm6484_vm6 = vcmp.ge.f32.partialorder %v19452_v56, 0.0  ;;  %v19704_v9 = vmul.f32 0.01, %v19456_v33  ;;  %v19707_v35 = vmul.f32 0.01, %v19460_v57  ;;  %23996 = vst [vmem:[#allocation33_spill] sm:$0xff] %v19715_v11 }
 0x3e3   :  { %v19710_v25 = vmul.f32 0.01, %v19464_v52  ;;  %6665 = vst [vmem:[#allocation3 + $0x28] sm:$0xff] %v19699_v16  ;;  %vm6485_vm7 = vcmp.ge.f32.partialorder %v19456_v33, 0.0  ;;  %v19720_v10 = vmul.f32 0.01, %v19468_v29 }
 0x3e4   :  { %v19723_v30 = vmul.f32 0.01, %v19472_v8  ;;  %v19726_v54 = vmul.f32 0.01, %v19476_v51  ;;  %6666 = vst [vmem:[#allocation3 + $0x30] sm:$0xff] %v19715_v11  ;;  %vm6486_vm8 = vcmp.ge.f32.partialorder %v19460_v57, 0.0 }
 0x3e5   :  { %23995 = vst [vmem:[#allocation31_spill] sm:$0xff] %v19710_v25  ;;  %v19731_v25 = vsel %vm6474_vm10, %v19412_v59, %v6538_v15  ;;  %v19736_v63 = vmul.f32 0.01, %v19480_v41  ;;  %v19739_v42 = vmul.f32 0.01, %v19484_v60  ;;  %vm24058_vm9 = vcmp.ge.f32.partialorder %v19480_v41, 0.0 }
 0x3e6   :  { %23997 = vst [vmem:[#allocation29_spill] sm:$0xff] %v19726_v54  ;;  %23998 = vst [vmem:[#allocation80_spill] sm:$0xff] %v19731_v25  ;;  %v19742_v16 = vmul.f32 0.01, %v19488_v55  ;;  %v19747_v54 = vsel %vm6475_vm11, %v19416_v18, %v6539_v53  ;;  %v19752_v59 = vmul.f32 0.01, %v19492_v58 }
 0x3e7   :  { %24000 = vst [vmem:[#allocation79_spill] sm:$0xff] %v19747_v54  ;;  %6667 = vst [vmem:[#allocation3 + $0x38] sm:$0xff] %v19731_v25  ;;  %v19755_v15 = vmul.f32 0.01, %v19496_v12  ;;  %v19758_v11 = vmul.f32 0.01, %v19500_v38 }
 0x3e8   :  { %23999 = vst [vmem:[#allocation81_spill] sm:$0xff] %v19742_v16  ;;  %v19763_v16 = vsel %vm6476_vm12, %v19420_v32, %v6540_v23  ;;  %6668 = vst [vmem:[#allocation3 + $0x40] sm:$0xff] %v19747_v54  ;;  %v19768_v18 = vmul.f32 0.01, %v19504_v28  ;;  %v19771_v53 = vmul.f32 0.01, %v19508_v37 }
 0x3e9   :  { %24001 = vst [vmem:[#allocation36_spill] sm:$0xff] %v19758_v11  ;;  %24002 = vst [vmem:[#allocation50_spill] sm:$0xff] %v19763_v16  ;;  %v19774_v25 = vmul.f32 0.01, %v19512_v36  ;;  %v19779_v11 = vsel %vm6477_vm13, %v19424_v4, %v6541_v5  ;;  %vm6489_vm11 = vcmp.ge.f32.partialorder %v19472_v8, 0.0  ;;  %v19798_v4 = vsel %vm6478_vm14, %v19428_v27, %v6542_v19 }
 0x3ea   :  { %24003 = vst [vmem:[#allocation32_spill] sm:$0xff] %v19779_v11  ;;  %6669 = vst [vmem:[#allocation3 + $0x48] sm:$0xff] %v19763_v16  ;;  %v19787_v32 = vmul.f32 0.01, %v19516_v48  ;;  %v19790_v23 = vmul.f32 0.01, %v19520_v24  ;;  %v19817_v27 = vsel %vm6479_vm15, %v19432_v17, %v6543_v22  ;;  %v19837_v17 = vsel %vm6480_vm0, %v19436_v14, %v19675_v34 }
 0x3eb   :  { %v19793_v54 = vmul.f32 0.01, %v19524_v62  ;;  %24005 = vst [vmem:[#allocation82_spill] sm:$0xff] %v19798_v4  ;;  %6670 = vst [vmem:[#allocation3 + $0x50] sm:$0xff] %v19779_v11  ;;  %vm6493_vm13 = vcmp.ge.f32.partialorder %v19488_v55, 0.0  ;;  %vm6497_vm14 = vcmp.ge.f32.partialorder %v19504_v28, 0.0  ;;  %v19857_v14 = vsel %vm6481_vm1, %v19440_v7, %v19678_v49 }
 0x3ec   :  { %v19806_v5 = vmul.f32 0.01, %v19528_v61  ;;  %v19809_v16 = vmul.f32 0.01, %v19532_v39  ;;  %24007 = vst [vmem:[#allocation38_spill] sm:$0xff] %v19817_v27  ;;  %6671 = vst [vmem:[#allocation3 + $0x58] sm:$0xff] %v19798_v4  ;;  %v19877_v7 = vsel %vm6482_vm3, %v19444_v6, %v19688_v20  ;;  %v19897_v6 = vsel %vm6483_vm5, %v19448_v44, %v19691_v3 }
 0x3ed   :  { %24004 = vst [vmem:[#allocation35_spill] sm:$0xff] %v19793_v54  ;;  %v19812_v54 = vmul.f32 0.01, %v19536_v50  ;;  %v19825_v19 = vmul.f32 0.01, %v19540_v47  ;;  %24009 = vst [vmem:[#allocation37_spill] sm:$0xff] %v19837_v17  ;;  %v19917_v44 = vsel %vm6484_vm6, %v19452_v56, %v19694_v45  ;;  %v19937_v56 = vsel %vm6485_vm7, %v19456_v33, %v19704_v9 }
 0x3ee   :  { %v19828_v11 = vmul.f32 0.01, %v19544_v26  ;;  %6672 = vst [vmem:[#allocation3 + $0x60] sm:$0xff] %v19817_v27  ;;  %vm6501_vm15 = vcmp.ge.f32.partialorder %v19520_v24, 0.0  ;;  %v19845_v22 = vmul.f32 0.01, %v19552_v2  ;;  %v19957_v33 = vsel %vm6486_vm8, %v19460_v57, %v19707_v35 }
 0x3ef   :  { %24006 = vst [vmem:[#allocation34_spill] sm:$0xff] %v19812_v54  ;;  %v19831_v54 = vmul.f32 0.01, %v19548_v31  ;;  %v19848_v4 = vmul.f32 0.01, %v19556_v46  ;;  %24012 = vst [vmem:[#allocation83_spill] sm:$0xff] %v19857_v14 }
 0x3f0   :  { %6673 = vst [vmem:[#allocation3 + $0x68] sm:$0xff] %v19837_v17  ;;  %vm6505_vm0 = vcmp.ge.f32.partialorder %v19536_v50, 0.0  ;;  %v19865_v34 = vmul.f32 0.01, %v19564_v1  ;;  %v24014_v27 = vld [vmem:[#allocation70_spill] sm:$0xff]  ;;  %24017 = vst [vmem:[#allocation51_spill] sm:$0xff] %v19877_v7 }
 0x3f1   :  { %24008 = vst [vmem:[#allocation39_spill] sm:$0xff] %v19831_v54  ;;  %24010 = vst [vmem:[#allocation84_spill] sm:$0xff] %v19848_v4  ;;  %v19851_v54 = vmul.f32 0.01, %v19560_v21  ;;  %v19871_v4 = vmul.f32 0.01, %v19572_v13 }
 0x3f2   :  { %24013 = vst [vmem:[#allocation85_spill] sm:$0xff] %v19865_v34  ;;  %6674 = vst [vmem:[#allocation3 + $0x70] sm:$0xff] %v19857_v14  ;;  %vm6509_vm1 = vcmp.ge.f32.partialorder %v19552_v2, 0.0  ;;  %v24018_v49 = vld [vmem:[#allocation67_spill] sm:$0xff]  ;;  %vm6513_vm3 = vcmp.ge.f32.partialorder %v24014_v27, 0.0  ;;  %v24024_v20 = vld [vmem:[#allocation48_spill] sm:$0xff] }
 0x3f3   :  { %24011 = vst [vmem:[#allocation86_spill] sm:$0xff] %v19851_v54  ;;  %v19868_v54 = vmul.f32 0.01, %v24014_v27  ;;  %24016 = vst [vmem:[#allocation87_spill] sm:$0xff] %v19871_v4  ;;  %v19885_v17 = vmul.f32 0.01, %v24018_v49 }
 0x3f4   :  { %v19888_v4 = vmul.f32 0.01, %v19580_v40  ;;  %24023 = vst [vmem:[#allocation42_spill] sm:$0xff] %v19897_v6  ;;  %6675 = vst [vmem:[#allocation3 + $0x78] sm:$0xff] %v19877_v7  ;;  %v19905_v14 = vmul.f32 0.01, %v24024_v20 }
 0x3f5   :  { %24015 = vst [vmem:[#allocation14_spill] sm:$0xff] %v19868_v54  ;;  %24019 = vst [vmem:[#allocation52_spill] sm:$0xff] %v19885_v17  ;;  %v24021_v54 = vld [vmem:[#allocation23_spill] sm:$0xff]  ;;  %v19911_v17 = vmul.f32 0.01, %v19596_v0  ;;  %v24031_v7 = vld [vmem:[#allocation73_spill] sm:$0xff] }
 0x3f6   :  { %24020 = vst [vmem:[#allocation53_spill] sm:$0xff] %v19888_v4  ;;  %v19891_v34 = vmul.f32 0.01, %v24021_v54  ;;  %24025 = vst [vmem:[#allocation54_spill] sm:$0xff] %v19905_v14  ;;  %vm6517_vm5 = vcmp.ge.f32.partialorder %v24021_v54, 0.0  ;;  %vm6521_vm6 = vcmp.ge.f32.partialorder %v19600_v43, 0.0 }
 0x3f7   :  { %24028 = vst [vmem:[#allocation55_spill] sm:$0xff] %v19911_v17  ;;  %24029 = vst [vmem:[#allocation43_spill] sm:$0xff] %v19917_v44  ;;  %v19925_v3 = vmul.f32 0.01, %v19600_v43  ;;  %v19928_v17 = vmul.f32 0.01, %v24031_v7 }
 0x3f8   :  { %24022 = vst [vmem:[#allocation40_spill] sm:$0xff] %v19891_v34  ;;  %v24026_v34 = vld [vmem:[#allocation69_spill] sm:$0xff]  ;;  %6676 = vst [vmem:[#allocation3 + $0x80] sm:$0xff] %v19897_v6  ;;  %v24036_v45 = vld [vmem:[#allocation26_spill] sm:$0xff]  ;;  %vm24050_vm8 = vcmp.ge.f32.partialorder %v19464_v52, 0.0  ;;  %vm24057_vm7 = vcmp.ge.f32.partialorder %v19476_v51, 0.0 }
 0x3f9   :  { %v19908_v4 = vmul.f32 0.01, %v24026_v34  ;;  %24030 = vst [vmem:[#allocation44_spill] sm:$0xff] %v19925_v3  ;;  %24032 = vst [vmem:[#allocation41_spill] sm:$0xff] %v19928_v17  ;;  %v19945_v6 = vmul.f32 0.01, %v24036_v45 }
 0x3fa   :  { %24035 = vst [vmem:[#allocation45_spill] sm:$0xff] %v19937_v56  ;;  %6677 = vst [vmem:[#allocation3 + $0x88] sm:$0xff] %v19917_v44  ;;  %v24040_v3 = vld [vmem:[#allocation47_spill] sm:$0xff]  ;;  %v24043_v9 = vld [vmem:[#allocation25_spill] sm:$0xff] }
 0x3fb   :  { %24027 = vst [vmem:[#allocation56_spill] sm:$0xff] %v19908_v4  ;;  %v24033_v4 = vld [vmem:[#allocation71_spill] sm:$0xff]  ;;  %24037 = vst [vmem:[#allocation46_spill] sm:$0xff] %v19945_v6  ;;  %v19951_v0 = vmul.f32 0.01, %v24040_v3  ;;  %v24044_v44 = vld [vmem:[#allocation74_spill] sm:$0xff] }
 0x3fc   :  { %v19931_v14 = vmul.f32 0.01, %v24033_v4  ;;  %24042 = vst [vmem:[#allocation58_spill] sm:$0xff] %v19957_v33  ;;  %6678 = vst [vmem:[#allocation3 + $0x90] sm:$0xff] %v19937_v56  ;;  %v24047_v45 = vld [vmem:[#allocation24_spill] sm:$0xff]  ;;  %v24049_v57 = vld [vmem:[#allocation31_spill] sm:$0xff] }
 0x3fd   :  { %24041 = vst [vmem:[#allocation18_spill] sm:$0xff] %v19951_v0  ;;  %v19968_v0 = vmul.f32 0.01, %v24044_v44  ;;  %v19971_v6 = vmul.f32 0.01, %v24047_v45  ;;  %v19977_v35 = vsel %vm24050_vm8, %v19464_v52, %v24049_v57  ;;  %6679 = vst [vmem:[#allocation3 + $0x98] sm:$0xff] %v19957_v33  ;;  %v20004_v57 = vsel %vm6489_vm11, %v19472_v8, %v19723_v30 }
 0x3fe   :  { %24034 = vst [vmem:[#allocation57_spill] sm:$0xff] %v19931_v14  ;;  %v24038_v14 = vld [vmem:[#allocation49_spill] sm:$0xff]  ;;  %vm6529_vm10 = vcmp.ge.f32.partialorder %v24047_v45, 0.0  ;;  %v24051_v56 = vld [vmem:[#allocation28_spill] sm:$0xff]  ;;  %vm24054_vm8 = vcmp.ge.f32.partialorder %v19468_v29, 0.0  ;;  %6680 = vst [vmem:[#allocation3 + $0xa0] sm:$0xff] %v19977_v35 }
 0x3ff   :  { %v19948_v17 = vmul.f32 0.01, %v24038_v14  ;;  %24046 = vst [vmem:[#allocation60_spill] sm:$0xff] %v19968_v0  ;;  %24048 = vst [vmem:[#allocation62_spill] sm:$0xff] %v19971_v6  ;;  %vm6530_vm12 = vcmp.ge.f32.partialorder %v24051_v56, 0.0  ;;  %v19997_v52 = vsel %vm24054_vm8, %v19468_v29, %v19720_v10  ;;  %v24056_v33 = vld [vmem:[#allocation29_spill] sm:$0xff]  ;;  %v20016_v29 = vsel %vm24058_vm9, %v19480_v41, %v19736_v63 }
 0x400   :  { %v19985_v44 = vmul.f32 0.01, %v24051_v56  ;;  %24055 = vst [vmem:[#allocation59_spill] sm:$0xff] %v19997_v52  ;;  %vm24059_vm8 = vcmp.ge.f32.partialorder %v19484_v60, 0.0  ;;  %6681 = vst [vmem:[#allocation3 + $0xa8] sm:$0xff] %v19997_v52  ;;  %v24061_v8 = vld [vmem:[#allocation81_spill] sm:$0xff] }
 0x401   :  { %24039 = vst [vmem:[#allocation17_spill] sm:$0xff] %v19948_v17  ;;  %v19965_v17 = vmul.f32 0.01, %v24043_v9  ;;  %v24052_v9 = vld [vmem:[#allocation30_spill] sm:$0xff]  ;;  %v20022_v10 = vsel %vm24059_vm8, %v19484_v60, %v19739_v42  ;;  %vm24062_vm11 = vcmp.ge.f32.partialorder %v19492_v58, 0.0  ;;  %vm24063_vm9 = vcmp.ge.f32.partialorder %v19496_v12, 0.0 }
 0x402   :  { %v19988_v6 = vmul.f32 0.01, %v24052_v9  ;;  %24060 = vst [vmem:[#allocation19_spill] sm:$0xff] %v20022_v10  ;;  %v20035_v41 = vsel %vm24062_vm11, %v19492_v58, %v19752_v59  ;;  %v20041_v60 = vsel %vm24063_vm9, %v19496_v12, %v19755_v15  ;;  %v24064_v30 = vld [vmem:[#allocation36_spill] sm:$0xff]  ;;  %6682 = vst [vmem:[#allocation3 + $0xb0] sm:$0xff] %v20004_v57  ;;  %vm24067_vm8 = vcmp.ge.f32.partialorder %v19512_v36, 0.0 }
 0x403   :  { %24045 = vst [vmem:[#allocation77_spill] sm:$0xff] %v19965_v17  ;;  %v24053_v17 = vld [vmem:[#allocation27_spill] sm:$0xff]  ;;  %6684 = vst [vmem:[#allocation3 + $0xc0] sm:$0xff] %v20016_v29  ;;  %v20069_v12 = vsel %vm24067_vm8, %v19512_v36, %v19774_v25  ;;  %vm24068_vm11 = vcmp.ge.f32.partialorder %v19516_v48, 0.0  ;;  %vm24071_vm9 = vcmp.ge.f32.partialorder %v19528_v61, 0.0  ;;  %vm24077_vm8 = vcmp.ge.f32.partialorder %v19548_v31, 0.0 }
 0x404   :  { %v19991_v0 = vmul.f32 0.01, %v24053_v17  ;;  %v20010_v17 = vsel %vm24057_vm7, %v19476_v51, %v24056_v33  ;;  %v20029_v51 = vsel %vm6493_vm13, %v19488_v55, %v24061_v8  ;;  %vm24065_vm7 = vcmp.ge.f32.partialorder %v19500_v38, 0.0  ;;  %6685 = vst [vmem:[#allocation3 + $0xc8] sm:$0xff] %v20022_v10  ;;  %6687 = vst [vmem:[#allocation3 + $0xd8] sm:$0xff] %v20035_v41  ;;  %v24082_v59 = vld [vmem:[#allocation85_spill] sm:$0xff] }
 0x405   :  { %v20047_v63 = vsel %vm24065_vm7, %v19500_v38, %v24064_v30  ;;  %6683 = vst [vmem:[#allocation3 + $0xb8] sm:$0xff] %v20010_v17  ;;  %v20057_v55 = vsel %vm6497_vm14, %v19504_v28, %v19768_v18  ;;  %vm24066_vm13 = vcmp.ge.f32.partialorder %v19508_v37, 0.0  ;;  %v20075_v38 = vsel %vm24068_vm11, %v19516_v48, %v19787_v32  ;;  %6686 = vst [vmem:[#allocation3 + $0xd0] sm:$0xff] %v20029_v51  ;;  %v24085_v18 = vld [vmem:[#allocation87_spill] sm:$0xff]  ;;  %v24097_v8 = vld [vmem:[#allocation72_spill] sm:$0xff] }
 0x406   :  { %v20063_v58 = vsel %vm24066_vm13, %v19508_v37, %v19771_v53  ;;  %6688 = vst [vmem:[#allocation3 + $0xe0] sm:$0xff] %v20041_v60  ;;  %6689 = vst [vmem:[#allocation3 + $0xe8] sm:$0xff] %v20047_v63  ;;  %v20085_v28 = vsel %vm6501_vm15, %v19520_v24, %v19790_v23  ;;  %v24069_v37 = vld [vmem:[#allocation35_spill] sm:$0xff]  ;;  %vm24070_vm14 = vcmp.ge.f32.partialorder %v19524_v62, 0.0  ;;  %v20097_v48 = vsel %vm24071_vm9, %v19528_v61, %v19806_v5  ;;  %v24073_v24 = vld [vmem:[#allocation34_spill] sm:$0xff] }
 0x407   :  { %v20091_v36 = vsel %vm24070_vm14, %v19524_v62, %v24069_v37  ;;  %vm24072_vm7 = vcmp.ge.f32.partialorder %v19532_v39, 0.0  ;;  %6690 = vst [vmem:[#allocation3 + $0xf0] sm:$0xff] %v20057_v55  ;;  %6691 = vst [vmem:[#allocation3 + $0xf8] sm:$0xff] %v20063_v58  ;;  %v20113_v62 = vsel %vm6505_vm0, %v19536_v50, %v24073_v24  ;;  %vm24074_vm15 = vcmp.ge.f32.partialorder %v19540_v47, 0.0  ;;  %v24087_v53 = vld [vmem:[#allocation52_spill] sm:$0xff]  ;;  %v24089_v23 = vld [vmem:[#allocation53_spill] sm:$0xff] }
 0x408   :  { %v20103_v25 = vsel %vm24072_vm7, %v19532_v39, %v19809_v16  ;;  %6692 = vst [vmem:[#allocation3 + $0x100] sm:$0xff] %v20069_v12  ;;  %6693 = vst [vmem:[#allocation3 + $0x108] sm:$0xff] %v20075_v38  ;;  %v20119_v61 = vsel %vm24074_vm15, %v19540_v47, %v19825_v19  ;;  %vm24075_vm13 = vcmp.ge.f32.partialorder %v19544_v26, 0.0  ;;  %v24076_v16 = vld [vmem:[#allocation39_spill] sm:$0xff]  ;;  %v20141_v50 = vsel %vm6509_vm1, %v19552_v2, %v19845_v22  ;;  %v24078_v47 = vld [vmem:[#allocation84_spill] sm:$0xff] }
 0x409   :  { %v20125_v39 = vsel %vm24075_vm13, %v19544_v26, %v19828_v11  ;;  %v20131_v42 = vsel %vm24077_vm8, %v19548_v31, %v24076_v16  ;;  %6694 = vst [vmem:[#allocation3 + $0x110] sm:$0xff] %v20085_v28  ;;  %6695 = vst [vmem:[#allocation3 + $0x118] sm:$0xff] %v20091_v36  ;;  %vm24079_vm0 = vcmp.ge.f32.partialorder %v19556_v46, 0.0  ;;  %v24080_v31 = vld [vmem:[#allocation86_spill] sm:$0xff]  ;;  %vm24081_vm11 = vcmp.ge.f32.partialorder %v19560_v21, 0.0  ;;  %v20165_v2 = vld [vmem:[#allocation9 + $0xb8] sm:$0xff]  }
 0x40a   :  { %6696 = vst [vmem:[#allocation3 + $0x120] sm:$0xff] %v20097_v48  ;;  %6697 = vst [vmem:[#allocation3 + $0x128] sm:$0xff] %v20103_v25  ;;  %v20147_v26 = vsel %vm24079_vm0, %v19556_v46, %v24078_v47  ;;  %v20153_v11 = vsel %vm24081_vm11, %v19560_v21, %v24080_v31  ;;  %vm24083_vm14 = vcmp.ge.f32.partialorder %v19564_v1, 0.0  ;;  %v24084_v46 = vld [vmem:[#allocation14_spill] sm:$0xff]  ;;  %vm24086_vm1 = vcmp.ge.f32.partialorder %v19572_v13, 0.0  ;;  %v24094_v22 = vld [vmem:[#allocation56_spill] sm:$0xff]  ;;  %16454 = vmatprep.subr.bf16.mxu0 %v20165_v2 }
 0x40b   :  { %v20159_v15 = vsel %vm24083_vm14, %v19564_v1, %v24082_v59  ;;  %6698 = vst [vmem:[#allocation3 + $0x130] sm:$0xff] %v20113_v62  ;;  %6699 = vst [vmem:[#allocation3 + $0x138] sm:$0xff] %v20119_v61  ;;  %v20171_v21 = vsel %vm6513_vm3, %v24014_v27, %v24084_v46  ;;  %v20177_v1 = vsel %vm24086_vm1, %v19572_v13, %v24085_v18  ;;  %vm24088_vm9 = vcmp.ge.f32.partialorder %v24018_v49, 0.0  ;;  %v24091_v13 = vld [vmem:[#allocation40_spill] sm:$0xff]  ;;  %v24092_v19 = vld [vmem:[#allocation54_spill] sm:$0xff] }
 0x40c   :  { %6700 = vst [vmem:[#allocation3 + $0x140] sm:$0xff] %v20125_v39  ;;  %6701 = vst [vmem:[#allocation3 + $0x148] sm:$0xff] %v20131_v42  ;;  %v20183_v32 = vsel %vm24088_vm9, %v24018_v49, %v24087_v53  ;;  %vm24090_vm7 = vcmp.ge.f32.partialorder %v19580_v40, 0.0  ;;  %v20199_v27 = vsel %vm6517_vm5, %v24021_v54, %v24091_v13  ;;  %vm24093_vm3 = vcmp.ge.f32.partialorder %v24024_v20, 0.0  ;;  %v24096_v33 = vld [vmem:[#allocation55_spill] sm:$0xff]  ;;  %v7241_v54 = vld [vmem:[#allocation3 + $0x17] sm:$0xff] }
 0x40d   :  { %v20189_v5 = vsel %vm24090_vm7, %v19580_v40, %v24089_v23  ;;  %6702 = vst [vmem:[#allocation3 + $0x150] sm:$0xff] %v20141_v50  ;;  %6703 = vst [vmem:[#allocation3 + $0x158] sm:$0xff] %v20147_v26  ;;  %v20205_v40 = vsel %vm24093_vm3, %v24024_v20, %v24092_v19  ;;  %vm24095_vm15 = vcmp.ge.f32.partialorder %v24026_v34, 0.0  ;;  %vm24098_vm13 = vcmp.ge.f32.partialorder %v24097_v8, 0.0  ;;  %v24100_v20 = vld [vmem:[#allocation44_spill] sm:$0xff]  ;;  %v24101_v37 = vld [vmem:[#allocation41_spill] sm:$0xff] }
 0x40e   :  { %6704 = vst [vmem:[#allocation3 + $0x160] sm:$0xff] %v20153_v11  ;;  %6705 = vst [vmem:[#allocation3 + $0x168] sm:$0xff] %v20159_v15  ;;  %v20211_v49 = vsel %vm24095_vm15, %v24026_v34, %v24094_v22  ;;  %v20217_v30 = vsel %vm24098_vm13, %v24097_v8, %v24096_v33  ;;  %v20228_v34 = vsel %vm6521_vm6, %v19600_v43, %v24100_v20  ;;  %vm24102_vm5 = vcmp.ge.f32.partialorder %v24031_v7, 0.0  ;;  %v24103_v16 = vld [vmem:[#allocation57_spill] sm:$0xff]  ;;  %v24105_v31 = vld [vmem:[#allocation46_spill] sm:$0xff] }
 0x40f   :  { %24099 = vst [vmem:[#allocation20_spill] sm:$0xff] %v20217_v30  ;;  %6706 = vst [vmem:[#allocation3 + $0x170] sm:$0xff] %v20171_v21  ;;  %v20234_v24 = vsel %vm24102_vm5, %v24031_v7, %v24101_v37  ;;  %vm24104_vm8 = vcmp.ge.f32.partialorder %v24033_v4, 0.0  ;;  %v24106_v59 = vld [vmem:[#allocation26_spill] sm:$0xff]  ;;  %v7244_v18 = vld [vmem:[#allocation3 + $0x2f] sm:$0xff]  ;;  %vm24109_vm6 = vcmp.ge.f32.partialorder %v24038_v14, 0.0 }
 0x410   :  { %6707 = vst [vmem:[#allocation3 + $0x178] sm:$0xff] %v20177_v1  ;;  %6708 = vst [vmem:[#allocation3 + $0x180] sm:$0xff] %v20183_v32  ;;  %v20240_v47 = vsel %vm24104_vm8, %v24033_v4, %v24103_v16  ;;  %vm24107_vm0 = vcmp.ge.f32.partialorder %v24106_v59, 0.0  ;;  %v7242_v43 = vld [vmem:[#allocation3 + $0x1f] sm:$0xff]  ;;  %v7243_v7 = vld [vmem:[#allocation3 + $0x27] sm:$0xff]  ;;  %vm24111_vm11 = vcmp.ge.f32.partialorder %v24040_v3, 0.0  ;;  %v20290_v16 = vsel %vm6530_vm12, %v24051_v56, %v19985_v44 }
 0x411   :  { %6709 = vst [vmem:[#allocation3 + $0x188] sm:$0xff] %v20189_v5  ;;  %v20246_v46 = vsel %vm24107_vm0, %v24106_v59, %v24105_v31  ;;  %6710 = vst [vmem:[#allocation3 + $0x190] sm:$0xff] %v20199_v27  ;;  %v24108_v53 = vld [vmem:[#allocation17_spill] sm:$0xff]  ;;  %v24110_v23 = vld [vmem:[#allocation18_spill] sm:$0xff]  ;;  %vm24120_vm9 = vcmp.ge.f32.partialorder %v24052_v9, 0.0  ;;  %v14167_v56 = vpack.c.bf16 %v7242_v43, %v7241_v54 }
 0x412   :  { %6711 = vst [vmem:[#allocation3 + $0x198] sm:$0xff] %v20205_v40  ;;  %6712 = vst [vmem:[#allocation3 + $0x1a0] sm:$0xff] %v20211_v49  ;;  %v20256_v4 = vsel %vm24109_vm6, %v24038_v14, %v24108_v53  ;;  %v20262_v13 = vsel %vm24111_vm11, %v24040_v3, %v24110_v23  ;;  %v24112_v19 = vld [vmem:[#allocation77_spill] sm:$0xff]  ;;  %v24115_v8 = vld [vmem:[#allocation60_spill] sm:$0xff]  ;;  %v20296_v31 = vsel %vm24120_vm9, %v24052_v9, %v19988_v6 }
 0x413   :  { %6713 = vst [vmem:[#allocation3 + $0x1a8] sm:$0xff] %v20217_v30  ;;  %v24113_v22 = vld [vmem:[#allocation25_spill] sm:$0xff]  ;;  %v24116_v20 = vld [vmem:[#allocation74_spill] sm:$0xff]  ;;  %6714 = vst [vmem:[#allocation3 + $0x1b0] sm:$0xff] %v20228_v34  ;;  %16311 = vmatmul.mubr.msk.bf16.vlgmr.msra.gmra.mxu0 %vm17237_vm2, %v14167_v56 }
 0x414   :  { %vm24114_vm14 = vcmp.ge.f32.partialorder %v24113_v22, 0.0  ;;  %vm24117_vm1 = vcmp.ge.f32.partialorder %v24116_v20, 0.0  ;;  %6715 = vst [vmem:[#allocation3 + $0x1b8] sm:$0xff] %v20234_v24  ;;  %6716 = vst [vmem:[#allocation3 + $0x1c0] sm:$0xff] %v20240_v47  ;;  %v24118_v14 = vld [vmem:[#allocation62_spill] sm:$0xff]  ;;  %v24122_v59 = vld [vmem:[#allocation27_spill] sm:$0xff]  ;;  %16455 = vmatpush3.bf16.msra.mxu0 %v20165_v2 }
 0x415   :  { %v20268_v33 = vsel %vm24114_vm14, %v24113_v22, %v24112_v19  ;;  %v20274_v37 = vsel %vm24117_vm1, %v24116_v20, %v24115_v8  ;;  %6717 = vst [vmem:[#allocation3 + $0x1c8] sm:$0xff] %v20246_v46  ;;  %v20284_v3 = vsel %vm6529_vm10, %v24047_v45, %v24118_v14  ;;  %24119 = vst [vmem:[#allocation66_spill] sm:$0xff] %v20290_v16  ;;  %vm24123_vm7 = vcmp.ge.f32.partialorder %v24122_v59, 0.0  ;;  %v24125_v6 = vld [vmem:[#allocation76_spill] sm:$0xff]  ;;  %v24126_v44 = vld [vmem:[#allocation78_spill] sm:$0xff] }
 0x416   :  { %24121 = vst [vmem:[#allocation63_spill] sm:$0xff] %v20296_v31  ;;  %v20302_v53 = vsel %vm24123_vm7, %v24122_v59, %v19991_v0  ;;  %6718 = vst [vmem:[#allocation3 + $0x1d0] sm:$0xff] %v20256_v4  ;;  %v20314_v0 = vpack.c.bf16 %v24126_v44, %v24125_v6  ;;  %v24128_v45 = vld [vmem:[#allocation75_spill] sm:$0xff]  ;;  %v24129_v9 = vld [vmem:[#allocation33_spill] sm:$0xff]  ;;  %v14170_v19 = vpack.c.bf16 %v7244_v18, %v7243_v7 }
 0x417   :  { %24124 = vst [vmem:[#allocation21_spill] sm:$0xff] %v20302_v53  ;;  %6719 = vst [vmem:[#allocation3 + $0x1d8] sm:$0xff] %v20262_v13  ;;  %v20318_v23 = vpack.c.bf16 %v24129_v9, %v24128_v45  ;;  %v24131_v22 = vld [vmem:[#allocation80_spill] sm:$0xff]  ;;  %v24132_v8 = vld [vmem:[#allocation79_spill] sm:$0xff] }
 0x418   :  { %6720 = vst [vmem:[#allocation3 + $0x1e0] sm:$0xff] %v20268_v33  ;;  %6721 = vst [vmem:[#allocation3 + $0x1e8] sm:$0xff] %v20274_v37  ;;  %v20322_v20 = vpack.c.bf16 %v24132_v8, %v24131_v22  ;;  %v24134_v14 = vld [vmem:[#allocation50_spill] sm:$0xff]  ;;  %v24135_v59 = vld [vmem:[#allocation32_spill] sm:$0xff]  ;;  %16230 = vmatprep.mubr.bf16.mxu1 %v20314_v0  ;;  %16314 = vmatprep.mubr.msk.bf16.mxu0 %vm17237_vm2, %v14170_v19 }
 0x419   :  { %6722 = vst [vmem:[#allocation3 + $0x1f0] sm:$0xff] %v20284_v3  ;;  %6723 = vst [vmem:[#allocation3 + $0x1f8] sm:$0xff] %v20290_v16  ;;  %v20326_v16 = vpack.c.bf16 %v24135_v59, %v24134_v14  ;;  %v24138_v54 = vld [vmem:[#allocation82_spill] sm:$0xff]  ;;  %v24141_v44 = vld [vmem:[#allocation37_spill] sm:$0xff]  ;;  %16231 = vmatmul.mubr.bf16.vlgmr.msra.gmra.mxu1 %v20318_v23 }
 0x41a   :  { %6725 = vst [vmem:[#allocation3 + $0x208] sm:$0xff] %v20296_v31  ;;  %6726 = vst [vmem:[#allocation3 + $0x210] sm:$0xff] %v20302_v53  ;;  %v17034_v31 = vld [vmem:[#allocation9 + $0x70] sm:$0xff]   ;;  %v24139_v43 = vld [vmem:[#allocation38_spill] sm:$0xff]  ;;  %16234 = vmatprep.mubr.bf16.mxu1 %v20322_v20 }
 0x41b   :  { %24127 = vst [vmem:[#allocation22_spill] sm:$0xff] %v20314_v0  ;;  %24130 = vst [vmem:[#allocation65_spill] sm:$0xff] %v20318_v23  ;;  %v20333_v6 = vpack.c.bf16 %v24139_v43, %v24138_v54  ;;  %v24142_v7 = vld [vmem:[#allocation83_spill] sm:$0xff]  ;;  %v24144_v9 = vld [vmem:[#allocation42_spill] sm:$0xff] }
 0x41c   :  { %24133 = vst [vmem:[#allocation68_spill] sm:$0xff] %v20322_v20  ;;  %24136 = vst [vmem:[#allocation70_spill] sm:$0xff] %v20326_v16  ;;  %v20337_v18 = vpack.c.bf16 %v24142_v7, %v24141_v44  ;;  %v24143_v45 = vld [vmem:[#allocation51_spill] sm:$0xff]  ;;  %v17041_v8 = vld [vmem:[#allocation9 + $0xb0] sm:$0xff]  }
 0x41d   :  { %24140 = vst [vmem:[#allocation67_spill] sm:$0xff] %v20333_v6  ;;  %v20344_v22 = vpack.c.bf16 %v24144_v9, %v24143_v45  ;;  %v24145_v56 = vld [vmem:[#allocation61_spill] sm:$0xff]  ;;  %v24146_v14 = vld [vmem:[#allocation43_spill] sm:$0xff]  ;;  %v24148_v43 = vld [vmem:[#allocation58_spill] sm:$0xff]  ;;  %16456 = vmatprep.subr.bf16.mxu0 %v17041_v8 }
 0x41e   :  { %16375 = vmatpush3.bf16.msra.mxu1 %v24145_v56  ;;  %v24147_v59 = vld [vmem:[#allocation45_spill] sm:$0xff]  ;;  %v17035_v0 = vld [vmem:[#allocation9 + $0x68] sm:$0xff]   ;;  %v17036_v54 = vld [vmem:[#allocation9 + $0x60] sm:$0xff]   ;;  %16457 = vmatpush3.bf16.msra.mxu0 %v17041_v8 }
 0x41f   :  { %v7245_v7 = vld [vmem:[#allocation3 + $0x37] sm:$0xff]  ;;  %v7246_v23 = vld [vmem:[#allocation3 + $0x3f] sm:$0xff]  ;;  %16376 = vmatprep.subr.bf16.mxu1 %v17034_v31  ;;  %v7247_v9 = vld [vmem:[#allocation3 + $0x47] sm:$0xff] }
 0x420   :  { %v7248_v20 = vld [vmem:[#allocation3 + $0x4f] sm:$0xff]  ;;  %v14173_v52 = vpack.c.bf16 %v7246_v23, %v7245_v7  ;;  %v7250_v23 = vld [vmem:[#allocation3 + $0x5f] sm:$0xff]  ;;  %v7251_v2 = vld [vmem:[#allocation3 + $0x67] sm:$0xff]  ;;  %v6817_v7 = vpack.c.bf16 %v20240_v47, %v20234_v24 }
 0x421   :  { %v14176_v10 = vpack.c.bf16 %v7248_v20, %v7247_v9  ;;  %16235 = vmatmul.mubr.bf16.gmra.mxu1 %v20326_v16  ;;  %v17042_v9 = vld [vmem:[#allocation9 + $0xa8] sm:$0xff]   ;;  %v17037_v44 = vld [vmem:[#allocation9 + $0x58] sm:$0xff]   ;;  %v17038_v30 = vld [vmem:[#allocation9 + $0x50] sm:$0xff]  }
 0x422   :  { %16377 = vmatpush3.bf16.msra.mxu1 %v17034_v31  ;;  %16315 = vmatmul.mubr.msk.bf16.gmra.mxu0 %vm17237_vm2, %v14173_v52  ;;  %v7249_v31 = vld [vmem:[#allocation3 + $0x57] sm:$0xff]  ;;  %v7252_v56 = vld [vmem:[#allocation3 + $0x6f] sm:$0xff]  ;;  %v17043_v8 = vld [vmem:[#allocation9 + $0xa0] sm:$0xff]  }
 0x423   :  { %16378 = vmatprep.subr.bf16.mxu1 %v17035_v0  ;;  %16318 = vmatprep.mubr.msk.bf16.mxu0 %vm17237_vm2, %v14176_v10  ;;  %v14179_v10 = vpack.c.bf16 %v7250_v23, %v7249_v31  ;;  %v24149_v19 = vld [vmem:[#allocation63_spill] sm:$0xff]  ;;  %v24150_v20 = vld [vmem:[#allocation21_spill] sm:$0xff]  ;;  %v14182_v16 = vpack.c.bf16 %v7252_v56, %v7251_v2  ;;  %v17045_v52 = vld [vmem:[#allocation9 + $0x40] sm:$0xff]  }
 0x424   :  { %16238 = vmatprep.mubr.bf16.mxu1 %v20333_v6  ;;  %16458 = vmatprep.subr.bf16.mxu0 %v17042_v9  ;;  %v7253_v31 = vld [vmem:[#allocation3 + $0x77] sm:$0xff]  ;;  %v17040_v23 = vld [vmem:[#allocation9 + $0x48] sm:$0xff]   ;;  %v7296_v47 = vld [vmem:[#allocation3 + $0x1df] sm:$0xff] }
 0x425   :  { %16459 = vmatpush3.bf16.msra.mxu0 %v17042_v9  ;;  %v7255_v56 = vld [vmem:[#allocation3 + $0x87] sm:$0xff]  ;;  %v7256_v2 = vld [vmem:[#allocation3 + $0x8f] sm:$0xff]  ;;  %v17044_v6 = vld [vmem:[#allocation9 + $0x98] sm:$0xff]   ;;  %v24152_v9 = vpack.c.bf16 %v19977_v35, %v24148_v43 }
 0x426   :  { %16379 = vmatpush3.bf16.msra.mxu1 %v17035_v0  ;;  %v6818_v0 = vpack.c.bf16 %v20256_v4, %v20246_v46  ;;  %16460 = vmatprep.subr.bf16.mxu0 %v17043_v8  ;;  %v17048_v35 = vld [vmem:[#allocation9 + $0x80] sm:$0xff]   ;;  %v24153_v43 = vld [vmem:[#allocation59_spill] sm:$0xff]  ;;  %v7295_v24 = vld [vmem:[#allocation3 + $0x1d7] sm:$0xff] }
 0x427   :  { %16380 = vmatprep.subr.bf16.mxu1 %v17036_v54  ;;  %v24175_v46 = vld [vmem:[#allocation66_spill] sm:$0xff] }
 0x429   :  { %16239 = vmatmul.mubr.bf16.gmra.mxu1 %v20337_v18  ;;  %16461 = vmatpush3.bf16.msra.mxu0 %v17043_v8  ;;  %v7258_v8 = vld [vmem:[#allocation3 + $0x9f] sm:$0xff] }
 0x42a   :  { %16381 = vmatpush3.bf16.msra.mxu1 %v17036_v54  ;;  %16319 = vmatmul.mubr.msk.bf16.gmra.mxu0 %vm17237_vm2, %v14179_v10  ;;  %v7254_v54 = vld [vmem:[#allocation3 + $0x7f] sm:$0xff]  ;;  %v14188_v10 = vpack.c.bf16 %v7256_v2, %v7255_v56  ;;  %v17047_v56 = vld [vmem:[#allocation9 + $0x88] sm:$0xff]  }
 0x42b   :  { %16382 = vmatprep.subr.bf16.mxu1 %v17037_v44  ;;  %16322 = vmatprep.mubr.msk.bf16.mxu0 %vm17237_vm2, %v14182_v16  ;;  %v14185_v45 = vpack.c.bf16 %v7254_v54, %v7253_v31  ;;  %v17046_v16 = vld [vmem:[#allocation9 + $0x90] sm:$0xff]   ;;  %v20419_v31 = vld [vmem:[#allocation9 + $0xf8] sm:$0xff]  }
 0x42c   :  { %16242 = vmatprep.mubr.bf16.mxu1 %v20344_v22  ;;  %16462 = vmatprep.subr.bf16.mxu0 %v17044_v6  ;;  %v7260_v54 = vld [vmem:[#allocation3 + $0xaf] sm:$0xff]  ;;  %v7262_v2 = vld [vmem:[#allocation3 + $0xbf] sm:$0xff] }
 0x42d   :  { %16463 = vmatpush3.bf16.msra.mxu0 %v17044_v6  ;;  %v24154_v6 = vpack.c.bf16 %v20004_v57, %v24153_v43  ;;  %v24156_v57 = vld [vmem:[#allocation19_spill] sm:$0xff]  ;;  %v24161_v43 = vpack.c.bf16 %v20085_v28, %v20075_v38  ;;  %v24165_v38 = vpack.c.bf16 %v20125_v39, %v20119_v61  ;;  %v7275_v28 = vld [vmem:[#allocation3 + $0x137] sm:$0xff]  ;;  %v7280_v39 = vld [vmem:[#allocation3 + $0x15f] sm:$0xff] }
 0x42e   :  { %16383 = vmatpush3.bf16.msra.mxu1 %v17037_v44  ;;  %v24151_v44 = vpack.c.bf16 %v24147_v59, %v24146_v14  ;;  %16464 = vmatprep.subr.bf16.mxu0 %v17046_v16  ;;  %v7279_v61 = vld [vmem:[#allocation3 + $0x157] sm:$0xff] }
 0x42f   :  { %16384 = vmatprep.subr.bf16.mxu1 %v17038_v30 }
 0x431   :  { %16243 = vmatmul.mubr.bf16.gmra.mxu1 %v24151_v44  ;;  %16465 = vmatpush3.bf16.msra.mxu0 %v17046_v16  ;;  %v7264_v16 = vld [vmem:[#allocation3 + $0xcf] sm:$0xff] }
 0x432   :  { %16385 = vmatpush3.bf16.msra.mxu1 %v17038_v30  ;;  %16323 = vmatmul.mubr.msk.bf16.gmra.mxu0 %vm17237_vm2, %v14185_v45  ;;  %v7257_v30 = vld [vmem:[#allocation3 + $0x97] sm:$0xff]  ;;  %v7259_v45 = vld [vmem:[#allocation3 + $0xa7] sm:$0xff] }
 0x433   :  { %16386 = vmatprep.subr.bf16.mxu1 %v17040_v23  ;;  %16326 = vmatprep.mubr.msk.bf16.mxu0 %vm17237_vm2, %v14188_v10  ;;  %v14191_v14 = vpack.c.bf16 %v7258_v8, %v7257_v30  ;;  %v14194_v59 = vpack.c.bf16 %v7260_v54, %v7259_v45  ;;  %v7263_v10 = vld [vmem:[#allocation3 + $0xc7] sm:$0xff]  ;;  %v24157_v30 = vpack.c.bf16 %v20029_v51, %v24156_v57  ;;  %v7266_v8 = vld [vmem:[#allocation3 + $0xdf] sm:$0xff]  ;;  %v7268_v54 = vld [vmem:[#allocation3 + $0xef] sm:$0xff] }
 0x434   :  { %16246 = vmatprep.mubr.bf16.mxu1 %v24152_v9  ;;  %16466 = vmatprep.subr.bf16.mxu0 %v17047_v56  ;;  %v14200_v9 = vpack.c.bf16 %v7264_v16, %v7263_v10  ;;  %v7267_v45 = vld [vmem:[#allocation3 + $0xe7] sm:$0xff]  ;;  %v24159_v51 = vpack.c.bf16 %v20057_v55, %v20047_v63  ;;  %v24163_v63 = vpack.c.bf16 %v20097_v48, %v20091_v36  ;;  %v7271_v55 = vld [vmem:[#allocation3 + $0x117] sm:$0xff]  ;;  %v7276_v36 = vld [vmem:[#allocation3 + $0x13f] sm:$0xff] }
 0x435   :  { %16467 = vmatpush3.bf16.msra.mxu0 %v17047_v56  ;;  %v24164_v10 = vpack.c.bf16 %v20113_v62, %v20103_v25  ;;  %v7277_v48 = vld [vmem:[#allocation3 + $0x147] sm:$0xff]  ;;  %v7278_v16 = vld [vmem:[#allocation3 + $0x14f] sm:$0xff]  ;;  %v24166_v25 = vpack.c.bf16 %v20141_v50, %v20131_v42  ;;  %v24167_v62 = vpack.c.bf16 %v20153_v11, %v20147_v26  ;;  %v24168_v42 = vpack.c.bf16 %v20171_v21, %v20159_v15  ;;  %v7283_v26 = vld [vmem:[#allocation3 + $0x177] sm:$0xff] }
 0x436   :  { %16387 = vmatpush3.bf16.msra.mxu1 %v17040_v23  ;;  %v24155_v23 = vpack.c.bf16 %v20016_v29, %v20010_v17  ;;  %16468 = vmatprep.subr.bf16.mxu0 %v17048_v35  ;;  %v24158_v17 = vpack.c.bf16 %v20041_v60, %v20035_v41  ;;  %v7265_v29 = vld [vmem:[#allocation3 + $0xd7] sm:$0xff]  ;;  %v24160_v41 = vpack.c.bf16 %v20069_v12, %v20063_v58  ;;  %v7273_v58 = vld [vmem:[#allocation3 + $0x127] sm:$0xff]  ;;  %v7274_v12 = vld [vmem:[#allocation3 + $0x12f] sm:$0xff] }
 0x437   :  { %16388 = vmatprep.subr.bf16.mxu1 %v17045_v52  ;;  %v14203_v56 = vpack.c.bf16 %v7266_v8, %v7265_v29  ;;  %v7269_v60 = vld [vmem:[#allocation3 + $0xf7] sm:$0xff]  ;;  %v7281_v57 = vld [vmem:[#allocation3 + $0x167] sm:$0xff]  ;;  %v24169_v50 = vpack.c.bf16 %v20183_v32, %v20177_v1  ;;  %v7284_v11 = vld [vmem:[#allocation3 + $0x17f] sm:$0xff]  ;;  %v24170_v15 = vpack.c.bf16 %v20199_v27, %v20189_v5  ;;  %v24171_v21 = vpack.c.bf16 %v20211_v49, %v20205_v40 }
 0x438   :  { %v7285_v8 = vld [vmem:[#allocation3 + $0x187] sm:$0xff]  ;;  %v7287_v1 = vld [vmem:[#allocation3 + $0x197] sm:$0xff]  ;;  %v7288_v32 = vld [vmem:[#allocation3 + $0x19f] sm:$0xff] }
 0x439   :  { %16247 = vmatmul.mubr.bf16.gmra.mxu1 %v24154_v6  ;;  %16469 = vmatpush3.bf16.msra.mxu0 %v17048_v35  ;;  %v24162_v6 = vmov 0.0|0.0   ;;  %v24172_v5 = vld [vmem:[#allocation20_spill] sm:$0xff]  ;;  %v7292_v49 = vld [vmem:[#allocation3 + $0x1bf] sm:$0xff] }
 0x43a   :  { %16389 = vmatpush3.bf16.msra.mxu1 %v17045_v52  ;;  %16327 = vmatmul.mubr.msk.bf16.gmra.mxu0 %vm17237_vm2, %v14191_v14  ;;  %v7261_v52 = vld [vmem:[#allocation3 + $0xb7] sm:$0xff]  ;;  %v14206_v14 = vpack.c.bf16 %v7268_v54, %v7267_v45  ;;  %v7286_v45 = vld [vmem:[#allocation3 + $0x18f] sm:$0xff]  ;;  %v14230_v54 = vpack.c.bf16 %v7284_v11, %v7283_v26  ;;  %v24173_v27 = vpack.c.bf16 %v20228_v34, %v24172_v5  ;;  %v24182_v26 = vld [vmem:[#allocation70_spill] sm:$0xff] }
 0x43b   :  { %16534 = vmatprep.subr.bf16.mxu1 %v20419_v31  ;;  %16330 = vmatprep.mubr.msk.bf16.mxu0 %vm17237_vm2, %v14194_v59  ;;  %v14197_v44 = vpack.c.bf16 %v7262_v2, %v7261_v52  ;;  %v7270_v59 = vld [vmem:[#allocation3 + $0xff] sm:$0xff]  ;;  %v14215_v2 = vpack.c.bf16 %v7274_v12, %v7273_v58  ;;  %v7291_v40 = vld [vmem:[#allocation3 + $0x1b7] sm:$0xff]  ;;  %v24174_v34 = vpack.c.bf16 %v20268_v33, %v20262_v13  ;;  %v8586_v5 = vld [vmem:[#allocation3 + $0x89] sm:$0xff] }
 0x43c   :  { %16250 = vmatprep.mubr.bf16.mxu1 %v24155_v23  ;;  %v14209_v35 = vpack.c.bf16 %v7270_v59, %v7269_v60  ;;  %v7272_v23 = vld [vmem:[#allocation3 + $0x11f] sm:$0xff]  ;;  %v14248_v12 = vpack.c.bf16 %v7296_v47, %v7295_v24  ;;  %v7299_v13 = vld [vmem:[#allocation3 + $0x1f7] sm:$0xff] }
 0x43d   :  { %v14212_v52 = vpack.c.bf16 %v7272_v23, %v7271_v55  ;;  %v17055_v59 = vld [vmem:[#allocation9 + $0x178] sm:$0xff]   ;;  %v7298_v23 = vld [vmem:[#allocation3 + $0x1ef] sm:$0xff]  ;;  %v20521_v58 = vld [vmem:[#allocation3 + $0x200] sm:$0xff] }
 0x43e   :  { %16614 = vmatprep.subr.bf16.mxu0 %v17055_v59  ;;  %v6821_v4 = vpack.c.bf16 %v20521_v58, %v24175_v46  ;;  %v7300_v33 = vld [vmem:[#allocation3 + $0x1ff] sm:$0xff]  ;;  %v8591_v46 = vld [vmem:[#allocation3 + $0xb1] sm:$0xff] }
 0x43f   :  { %v8580_v11 = vld [vmem:[#allocation3 + $0x59] sm:$0xff]  ;;  %v8589_v47 = vld [vmem:[#allocation3 + $0xa1] sm:$0xff] }
 0x440   :  { %v8588_v24 = vld [vmem:[#allocation3 + $0x99] sm:$0xff] }
 0x441   :  { %16251 = vmatmul.mubr.bf16.gmra.mxu1 %v24157_v30  ;;  %v7282_v30 = vld [vmem:[#allocation3 + $0x16f] sm:$0xff] }
 0x442   :  { %16331 = vmatmul.mubr.msk.bf16.gmra.mxu0 %vm17237_vm2, %v14197_v44  ;;  %16254 = vmatprep.mubr.bf16.mxu1 %v24158_v17  ;;  %v14218_v44 = vpack.c.bf16 %v7276_v36, %v7275_v28  ;;  %v14224_v17 = vpack.c.bf16 %v7280_v39, %v7279_v61  ;;  %v14227_v29 = vpack.c.bf16 %v7282_v30, %v7281_v57  ;;  %v8575_v28 = vld [vmem:[#allocation3 + $0x31] sm:$0xff]  ;;  %v17051_v61 = vld [vmem:[#allocation9 + $0xe8] sm:$0xff]  }
 0x443   :  { %16334 = vmatprep.mubr.msk.bf16.mxu0 %vm17237_vm2, %v14200_v9  ;;  %v14221_v9 = vpack.c.bf16 %v7278_v16, %v7277_v48  ;;  %v17050_v16 = vld [vmem:[#allocation9 + $0xf0] sm:$0xff]   ;;  %v17058_v30 = vld [vmem:[#allocation9 + $0x168] sm:$0xff]  }
 0x444   :  { %v8578_v39 = vld [vmem:[#allocation3 + $0x49] sm:$0xff]  ;;  %v8579_v57 = vld [vmem:[#allocation3 + $0x51] sm:$0xff] }
 0x449   :  { %16255 = vmatmul.mubr.bf16.gmra.mxu1 %v24159_v51  ;;  %v7290_v51 = vld [vmem:[#allocation3 + $0x1af] sm:$0xff] }
 0x44a   :  { %16335 = vmatmul.mubr.msk.bf16.gmra.mxu0 %vm17237_vm2, %v14203_v56  ;;  %16258 = vmatprep.mubr.bf16.mxu1 %v24160_v41  ;;  %v14233_v56 = vpack.c.bf16 %v7286_v45, %v7285_v8  ;;  %v14236_v41 = vpack.c.bf16 %v7288_v32, %v7287_v1  ;;  %v8581_v8 = vld [vmem:[#allocation3 + $0x61] sm:$0xff]  ;;  %v17053_v45 = vld [vmem:[#allocation9 + $0xd8] sm:$0xff]   ;;  %v17054_v32 = vld [vmem:[#allocation9 + $0xd0] sm:$0xff]  }
 0x44b   :  { %16338 = vmatprep.mubr.msk.bf16.mxu0 %vm17237_vm2, %v14206_v14  ;;  %v7289_v14 = vld [vmem:[#allocation3 + $0x1a7] sm:$0xff] }
 0x44c   :  { %v14239_v60 = vpack.c.bf16 %v7290_v51, %v7289_v14  ;;  %v17062_v14 = vld [vmem:[#allocation9 + $0x150] sm:$0xff]   ;;  %v24183_v51 = vld [vmem:[#allocation67_spill] sm:$0xff] }
 0x451   :  { %16259 = vmatmul.mubr.bf16.gmra.mxu1 %v24161_v43  ;;  %v7294_v43 = vld [vmem:[#allocation3 + $0x1cf] sm:$0xff] }
 0x452   :  { %16339 = vmatmul.mubr.msk.bf16.gmra.mxu0 %vm17237_vm2, %v14209_v35  ;;  %16262 = vmatprep.mubr.bf16.mxu1 %v24163_v63  ;;  %v7293_v35 = vld [vmem:[#allocation3 + $0x1c7] sm:$0xff]  ;;  %v14242_v63 = vpack.c.bf16 %v7292_v49, %v7291_v40 }
 0x453   :  { %16342 = vmatprep.mubr.bf16.mxu0 %v24162_v6  ;;  %v14245_v55 = vpack.c.bf16 %v7294_v43, %v7293_v35  ;;  %v17063_v40 = vld [vmem:[#allocation9 + $0x148] sm:$0xff]   ;;  %v7951_v35 = vld [vmem:[#allocation3 + $0x90] sm:$0xff] }
 0x454   :  { %v7950_v49 = vld [vmem:[#allocation3 + $0x88] sm:$0xff] }
 0x459   :  { %16263 = vmatmul.mubr.bf16.gmra.mxu1 %v24164_v10  ;;  %v24177_v10 = vpack.c.bf16 %v24150_v20, %v24149_v19  ;;  %v24179_v19 = vld [vmem:[#allocation22_spill] sm:$0xff]  ;;  %v24180_v20 = vld [vmem:[#allocation65_spill] sm:$0xff] }
 0x45a   :  { %16343 = vmatmul.mubr.msk.bf16.gmra.mxu0 %vm17237_vm2, %v14212_v52  ;;  %16266 = vmatprep.mubr.bf16.mxu1 %v24165_v38  ;;  %v8574_v38 = vld [vmem:[#allocation3 + $0x29] sm:$0xff] }
 0x45b   :  { %16346 = vmatprep.mubr.msk.bf16.mxu0 %vm17237_vm2, %v14215_v2  ;;  %v14254_v2 = vpack.c.bf16 %v7300_v33, %v7299_v13  ;;  %v20541_v48 = vpack.c.bf16 %v8575_v28, %v8574_v38  ;;  %v7957_v38 = vld [vmem:[#allocation3 + $0xc0] sm:$0xff]  ;;  %v8594_v28 = vld [vmem:[#allocation3 + $0xc9] sm:$0xff] }
 0x461   :  { %16267 = vmatmul.mubr.bf16.gmra.mxu1 %v24166_v25  ;;  %v8576_v25 = vld [vmem:[#allocation3 + $0x39] sm:$0xff] }
 0x462   :  { %16347 = vmatmul.mubr.msk.bf16.gmra.mxu0 %vm17237_vm2, %v14218_v44  ;;  %16270 = vmatprep.mubr.bf16.mxu1 %v24167_v62  ;;  %v8577_v62 = vld [vmem:[#allocation3 + $0x41] sm:$0xff] }
 0x463   :  { %16350 = vmatprep.mubr.msk.bf16.mxu0 %vm17237_vm2, %v14221_v9  ;;  %v17057_v9 = vld [vmem:[#allocation9 + $0x170] sm:$0xff]  }
 0x469   :  { %16271 = vmatmul.mubr.bf16.gmra.mxu1 %v24168_v42  ;;  %v17052_v42 = vld [vmem:[#allocation9 + $0xe0] sm:$0xff]  }
 0x46a   :  { %16351 = vmatmul.mubr.msk.bf16.gmra.mxu0 %vm17237_vm2, %v14224_v17  ;;  %16274 = vmatprep.mubr.bf16.mxu1 %v24169_v50  ;;  %v20552_v17 = vpack.c.bf16 %v8577_v62, %v8576_v25  ;;  %v24181_v50 = vld [vmem:[#allocation68_spill] sm:$0xff] }
 0x46b   :  { %16354 = vmatprep.mubr.msk.bf16.mxu0 %vm17237_vm2, %v14227_v29  ;;  %v20554_v29 = vpack.c.bf16 %v8579_v57, %v8578_v39  ;;  %v8596_v39 = vld [vmem:[#allocation3 + $0xd9] sm:$0xff]  ;;  %v8597_v57 = vld [vmem:[#allocation3 + $0xe1] sm:$0xff] }
 0x471   :  { %16275 = vmatmul.mubr.bf16.gmra.mxu1 %v24170_v15  ;;  %v17060_v15 = vld [vmem:[#allocation9 + $0x158] sm:$0xff]  }
 0x472   :  { %16355 = vmatmul.mubr.msk.bf16.gmra.mxu0 %vm17237_vm2, %v14230_v54  ;;  %16278 = vmatprep.mubr.bf16.mxu1 %v24171_v21  ;;  %v8582_v54 = vld [vmem:[#allocation3 + $0x69] sm:$0xff]  ;;  %v20564_v21 = vpack.c.bf16 %v8581_v8, %v8580_v11  ;;  %v20610_v8 = vpack.c.bf16 %v8597_v57, %v8596_v39 }
 0x473   :  { %16358 = vmatprep.mubr.msk.bf16.mxu0 %vm17237_vm2, %v14233_v56  ;;  %v8583_v56 = vld [vmem:[#allocation3 + $0x71] sm:$0xff] }
 0x474   :  { %v20566_v1 = vpack.c.bf16 %v8583_v56, %v8582_v54  ;;  %v7963_v11 = vld [vmem:[#allocation3 + $0xf0] sm:$0xff] }
 0x479   :  { %16279 = vmatmul.mubr.bf16.gmra.mxu1 %v24173_v27  ;;  %v8587_v27 = vld [vmem:[#allocation3 + $0x91] sm:$0xff] }
 0x47a   :  { %16359 = vmatmul.mubr.msk.bf16.gmra.mxu0 %vm17237_vm2, %v14236_v41  ;;  %16282 = vmatprep.mubr.bf16.mxu1 %v6817_v7  ;;  %v7297_v7 = vld [vmem:[#allocation3 + $0x1e7] sm:$0xff]  ;;  %v8584_v41 = vld [vmem:[#allocation3 + $0x79] sm:$0xff] }
 0x47b   :  { %16362 = vmatprep.mubr.msk.bf16.mxu0 %vm17237_vm2, %v14239_v60  ;;  %v14251_v52 = vpack.c.bf16 %v7298_v23, %v7297_v7  ;;  %v8585_v60 = vld [vmem:[#allocation3 + $0x81] sm:$0xff]  ;;  %v7952_v7 = vld [vmem:[#allocation3 + $0x98] sm:$0xff] }
 0x47c   :  { %v20576_v43 = vpack.c.bf16 %v8585_v60, %v8584_v41  ;;  %v20587_v23 = vld [vmem:[#allocation9 + $0x1b8] sm:$0xff]  }
 0x481   :  { %16283 = vmatmul.mubr.bf16.gmra.mxu1 %v6818_v0  ;;  %v24176_v0 = vpack.c.bf16 %v20284_v3, %v20274_v37  ;;  %v8572_v37 = vld [vmem:[#allocation3 + $0x19] sm:$0xff]  ;;  %v8573_v3 = vld [vmem:[#allocation3 + $0x21] sm:$0xff] }
 0x482   :  { %16363 = vmatmul.mubr.msk.bf16.gmra.mxu0 %vm17237_vm2, %v14242_v63  ;;  %16286 = vmatprep.mubr.bf16.mxu1 %v24174_v34  ;;  %v20539_v36 = vpack.c.bf16 %v8573_v3, %v8572_v37  ;;  %v20578_v63 = vpack.c.bf16 %v8587_v27, %v8586_v5  ;;  %v17064_v34 = vld [vmem:[#allocation9 + $0x140] sm:$0xff]   ;;  %v7956_v3 = vld [vmem:[#allocation3 + $0xb8] sm:$0xff] }
 0x483   :  { %16366 = vmatprep.mubr.msk.bf16.mxu0 %vm17237_vm2, %v14245_v55  ;;  %v17061_v55 = vld [vmem:[#allocation9 + $0xc0] sm:$0xff]   ;;  %v8006_v25 = vpack.c.bf16 %v7957_v38, %v7956_v3  ;;  %v7966_v27 = vld [vmem:[#allocation3 + $0x118] sm:$0xff] }
 0x484   :  { %v8593_v37 = vld [vmem:[#allocation3 + $0xc1] sm:$0xff] }
 0x485   :  { %v8603_v5 = vld [vmem:[#allocation3 + $0x121] sm:$0xff] }
 0x486   :  { %v7971_v38 = vld [vmem:[#allocation3 + $0x140] sm:$0xff] }
 0x489   :  { %16287 = vmatmul.mubr.bf16.gmra.mxu1 %v24176_v0  ;;  %v7955_v0 = vld [vmem:[#allocation3 + $0xb0] sm:$0xff] }
 0x48a   :  { %16367 = vmatmul.mubr.msk.bf16.gmra.mxu0 %vm17237_vm2, %v14248_v12  ;;  %16290 = vmatprep.mubr.bf16.mxu1 %v6821_v4  ;;  %v7953_v12 = vld [vmem:[#allocation3 + $0xa0] sm:$0xff]  ;;  %v7954_v4 = vld [vmem:[#allocation3 + $0xa8] sm:$0xff] }
 0x48b   :  { %16370 = vmatprep.mubr.msk.bf16.mxu0 %vm17237_vm2, %v14251_v52  ;;  %v8590_v52 = vld [vmem:[#allocation3 + $0xa9] sm:$0xff]  ;;  %v8004_v13 = vpack.c.bf16 %v7953_v12, %v7952_v7 }
 0x48c   :  { %v20591_v33 = vpack.c.bf16 %v8591_v46, %v8590_v52 }
 0x491   :  { %16291 = vmatmul.mubr.bf16.gmra.mxu1 %v24177_v10  ;;  %v8592_v10 = vld [vmem:[#allocation3 + $0xb9] sm:$0xff] }
 0x492   :  { %16371 = vmatmul.mubr.msk.bf16.gmra.mxu0 %vm17237_vm2, %v14254_v2  ;;  %16390 = vmatprep.mubr.bf16.mxu1 %v24162_v6  ;;  %v8005_v2 = vpack.c.bf16 %v7955_v0, %v7954_v4 }
 0x493   :  { %16470 = vmatprep.mubr.bf16.mxu0 %v24162_v6 }
 0x499   :  { %16391 = vmatmul.mubr.bf16.vlgmr.msra.gmra.mxu1 %v24179_v19  ;;  %v7959_v19 = vld [vmem:[#allocation3 + $0xd0] sm:$0xff] }
 0x49a   :  { %16471 = vmatmul.mubr.msk.bf16.vlgmr.msra.gmra.mxu0 %vm17394_vm4, %v20539_v36  ;;  %16394 = vmatprep.mubr.bf16.mxu1 %v24180_v20  ;;  %v20600_v20 = vpack.c.bf16 %v8593_v37, %v8592_v10  ;;  %v7970_v10 = vld [vmem:[#allocation3 + $0x138] sm:$0xff] }
 0x49b   :  { %16474 = vmatprep.mubr.msk.bf16.mxu0 %vm17394_vm4, %v20541_v48  ;;  %16535 = vmatpush3.bf16.msra.mxu1 %v20419_v31  ;;  %v17059_v31 = vld [vmem:[#allocation9 + $0x160] sm:$0xff]  }
 0x49c   :  { %16536 = vmatprep.subr.bf16.mxu1 %v17050_v16  ;;  %16615 = vmatpush3.bf16.msra.mxu0 %v17055_v59  ;;  %v17056_v59 = vld [vmem:[#allocation9 + $0xc8] sm:$0xff]  }
 0x49d   :  { %16616 = vmatprep.subr.bf16.mxu0 %v17057_v9 }
 0x49f   :  { %16537 = vmatpush3.bf16.msra.mxu1 %v17050_v16  ;;  %v8595_v16 = vld [vmem:[#allocation3 + $0xd1] sm:$0xff] }
 0x4a0   :  { %16538 = vmatprep.subr.bf16.mxu1 %v17051_v61  ;;  %16617 = vmatpush3.bf16.msra.mxu0 %v17057_v9  ;;  %v7958_v9 = vld [vmem:[#allocation3 + $0xc8] sm:$0xff]  ;;  %v20602_v62 = vpack.c.bf16 %v8595_v16, %v8594_v28  ;;  %v8609_v16 = vld [vmem:[#allocation3 + $0x151] sm:$0xff] }
 0x4a1   :  { %16618 = vmatprep.subr.bf16.mxu0 %v17058_v30  ;;  %16395 = vmatmul.mubr.bf16.gmra.mxu1 %v24181_v50  ;;  %v8599_v50 = vld [vmem:[#allocation3 + $0xf1] sm:$0xff]  ;;  %v8608_v28 = vld [vmem:[#allocation3 + $0x149] sm:$0xff] }
 0x4a2   :  { %16475 = vmatmul.mubr.msk.bf16.gmra.mxu0 %vm17394_vm4, %v20552_v17  ;;  %16398 = vmatprep.mubr.bf16.mxu1 %v24182_v26  ;;  %v7962_v26 = vld [vmem:[#allocation3 + $0xe8] sm:$0xff] }
 0x4a3   :  { %16478 = vmatprep.mubr.msk.bf16.mxu0 %vm17394_vm4, %v20554_v29  ;;  %16539 = vmatpush3.bf16.msra.mxu1 %v17051_v61  ;;  %v8007_v61 = vpack.c.bf16 %v7959_v19, %v7958_v9  ;;  %v8009_v56 = vpack.c.bf16 %v7963_v11, %v7962_v26  ;;  %v7972_v19 = vld [vmem:[#allocation3 + $0x148] sm:$0xff] }
 0x4a4   :  { %16540 = vmatprep.subr.bf16.mxu1 %v17052_v42  ;;  %16619 = vmatpush3.bf16.msra.mxu0 %v17058_v30  ;;  %v7960_v30 = vld [vmem:[#allocation3 + $0xd8] sm:$0xff] }
 0x4a5   :  { %16620 = vmatprep.subr.bf16.mxu0 %v17059_v31 }
 0x4a7   :  { %16541 = vmatpush3.bf16.msra.mxu1 %v17052_v42  ;;  %v7961_v42 = vld [vmem:[#allocation3 + $0xe0] sm:$0xff] }
 0x4a8   :  { %16542 = vmatprep.subr.bf16.mxu1 %v17053_v45  ;;  %16621 = vmatpush3.bf16.msra.mxu0 %v17059_v31  ;;  %v8598_v31 = vld [vmem:[#allocation3 + $0xe9] sm:$0xff] }
 0x4a9   :  { %16622 = vmatprep.subr.bf16.mxu0 %v17060_v15  ;;  %16399 = vmatmul.mubr.bf16.gmra.mxu1 %v24183_v51  ;;  %v20612_v54 = vpack.c.bf16 %v8599_v50, %v8598_v31  ;;  %v7965_v51 = vld [vmem:[#allocation3 + $0x100] sm:$0xff]  ;;  %v14327_v31 = vpack.c.bf16 %v8609_v16, %v8608_v28 }
 0x4aa   :  { %16479 = vmatmul.mubr.msk.bf16.gmra.mxu0 %vm17394_vm4, %v20564_v21  ;;  %16402 = vmatprep.mubr.bf16.mxu1 %v20337_v18  ;;  %v8003_v18 = vpack.c.bf16 %v7951_v35, %v7950_v49  ;;  %v8604_v49 = vld [vmem:[#allocation3 + $0x129] sm:$0xff]  ;;  %v8605_v35 = vld [vmem:[#allocation3 + $0x131] sm:$0xff]  ;;  %v8614_v16 = vld [vmem:[#allocation3 + $0x179] sm:$0xff] }
 0x4ab   :  { %16482 = vmatprep.mubr.msk.bf16.mxu0 %vm17394_vm4, %v20566_v1  ;;  %16543 = vmatpush3.bf16.msra.mxu1 %v17053_v45  ;;  %v8008_v45 = vpack.c.bf16 %v7961_v42, %v7960_v30  ;;  %v8013_v42 = vpack.c.bf16 %v7971_v38, %v7970_v10 }
 0x4ac   :  { %16544 = vmatprep.subr.bf16.mxu1 %v17054_v32  ;;  %16623 = vmatpush3.bf16.msra.mxu0 %v17060_v15  ;;  %v8600_v15 = vld [vmem:[#allocation3 + $0xf9] sm:$0xff] }
 0x4ad   :  { %16624 = vmatprep.subr.bf16.mxu0 %v17062_v14 }
 0x4af   :  { %16545 = vmatpush3.bf16.msra.mxu1 %v17054_v32  ;;  %v8601_v32 = vld [vmem:[#allocation3 + $0x101] sm:$0xff] }
 0x4b0   :  { %16546 = vmatprep.subr.bf16.mxu1 %v17056_v59  ;;  %16625 = vmatpush3.bf16.msra.mxu0 %v17062_v14  ;;  %v7964_v14 = vld [vmem:[#allocation3 + $0xf8] sm:$0xff]  ;;  %v20620_v41 = vpack.c.bf16 %v8601_v32, %v8600_v15 }
 0x4b1   :  { %16626 = vmatprep.subr.bf16.mxu0 %v17063_v40  ;;  %16403 = vmatmul.mubr.bf16.gmra.mxu1 %v20344_v22  ;;  %v20589_v22 = vpack.c.bf16 %v8589_v47, %v8588_v24  ;;  %v8010_v60 = vpack.c.bf16 %v7965_v51, %v7964_v14  ;;  %v14321_v47 = vpack.c.bf16 %v8605_v35, %v8604_v49  ;;  %v8610_v14 = vld [vmem:[#allocation3 + $0x159] sm:$0xff]  ;;  %v8611_v51 = vld [vmem:[#allocation3 + $0x161] sm:$0xff]  ;;  %v8613_v49 = vld [vmem:[#allocation3 + $0x171] sm:$0xff] }
 0x4b2   :  { %16483 = vmatmul.mubr.msk.bf16.gmra.mxu0 %vm17394_vm4, %v20576_v43  ;;  %16406 = vmatprep.mubr.bf16.mxu1 %v8003_v18  ;;  %v7969_v18 = vld [vmem:[#allocation3 + $0x130] sm:$0xff] }
 0x4b3   :  { %16486 = vmatprep.mubr.msk.bf16.mxu0 %vm17394_vm4, %v20578_v63  ;;  %16547 = vmatpush3.bf16.msra.mxu1 %v17056_v59  ;;  %v8602_v59 = vld [vmem:[#allocation3 + $0x119] sm:$0xff] }
 0x4b4   :  { %16548 = vmatprep.subr.bf16.mxu1 %v17061_v55  ;;  %16627 = vmatpush3.bf16.msra.mxu0 %v17063_v40  ;;  %v7967_v40 = vld [vmem:[#allocation3 + $0x120] sm:$0xff] }
 0x4b5   :  { %16628 = vmatprep.subr.bf16.mxu0 %v17064_v34  ;;  %v8011_v24 = vpack.c.bf16 %v7967_v40, %v7966_v27  ;;  %v7975_v27 = vld [vmem:[#allocation3 + $0x160] sm:$0xff]  ;;  %v8612_v40 = vld [vmem:[#allocation3 + $0x169] sm:$0xff] }
 0x4b7   :  { %16549 = vmatpush3.bf16.msra.mxu1 %v17061_v55  ;;  %v7968_v55 = vld [vmem:[#allocation3 + $0x128] sm:$0xff] }
 0x4b8   :  { %16629 = vmatpush3.bf16.msra.mxu0 %v17064_v34  ;;  %16694 = vmatprep.subr.bf16.mxu1 %v20587_v23  ;;  %v20627_v34 = vpack.c.bf16 %v8603_v5, %v8602_v59  ;;  %v8012_v12 = vpack.c.bf16 %v7969_v18, %v7968_v55  ;;  %v7976_v55 = vld [vmem:[#allocation3 + $0x168] sm:$0xff]  ;;  %v7977_v18 = vld [vmem:[#allocation3 + $0x170] sm:$0xff] }
 0x4b9   :  { %16407 = vmatmul.mubr.bf16.gmra.mxu1 %v8004_v13  ;;  %v8606_v13 = vld [vmem:[#allocation3 + $0x139] sm:$0xff] }
 0x4ba   :  { %16487 = vmatmul.mubr.msk.bf16.gmra.mxu0 %vm17394_vm4, %v20589_v22  ;;  %16410 = vmatprep.mubr.bf16.mxu1 %v8005_v2  ;;  %v8607_v2 = vld [vmem:[#allocation3 + $0x141] sm:$0xff] }
 0x4bb   :  { %16490 = vmatprep.mubr.msk.bf16.mxu0 %vm17394_vm4, %v20591_v33  ;;  %v20640_v57 = vpack.c.bf16 %v8607_v2, %v8606_v13  ;;  %v8016_v2 = vpack.c.bf16 %v7977_v18, %v7976_v55 }
 0x4c1   :  { %16411 = vmatmul.mubr.bf16.gmra.mxu1 %v8006_v25  ;;  %v7973_v25 = vld [vmem:[#allocation3 + $0x150] sm:$0xff] }
 0x4c2   :  { %16491 = vmatmul.mubr.msk.bf16.gmra.mxu0 %vm17394_vm4, %v20600_v20  ;;  %16414 = vmatprep.mubr.bf16.mxu1 %v8007_v61  ;;  %v8014_v11 = vpack.c.bf16 %v7973_v25, %v7972_v19  ;;  %v7978_v19 = vld [vmem:[#allocation3 + $0x178] sm:$0xff] }
 0x4c3   :  { %16494 = vmatprep.mubr.msk.bf16.mxu0 %vm17394_vm4, %v20602_v62 }
 0x4c9   :  { %16415 = vmatmul.mubr.bf16.gmra.mxu1 %v8008_v45 }
 0x4ca   :  { %16495 = vmatmul.mubr.msk.bf16.gmra.mxu0 %vm17394_vm4, %v20610_v8  ;;  %16418 = vmatprep.mubr.bf16.mxu1 %v8009_v56 }
 0x4cb   :  { %16498 = vmatprep.mubr.msk.bf16.mxu0 %vm17394_vm4, %v20612_v54 }
 0x4d1   :  { %16419 = vmatmul.mubr.bf16.gmra.mxu1 %v8010_v60  ;;  %v7974_v60 = vld [vmem:[#allocation3 + $0x158] sm:$0xff] }
 0x4d2   :  { %16499 = vmatmul.mubr.msk.bf16.gmra.mxu0 %vm17394_vm4, %v20620_v41  ;;  %16422 = vmatprep.mubr.bf16.mxu1 %v24162_v6 }
 0x4d3   :  { %16502 = vmatprep.mubr.bf16.mxu0 %v24162_v6  ;;  %v16312_v7 = vpop.f32.mrf.mxu0  ;;  %v8629_v6 = vld [vmem:[#allocation3 + $0x1f1] sm:$0xff] }
 0x4d5   :  { %v7489_v4 = vpop.f32.mrf.mxu0 }
 0x4d7   :  { %v16313_v3 = vpop.f32.mrf.mxu0 }
 0x4d9   :  { %v16232_v52 = vpop.f32.mrf.mxu1  ;;  %16423 = vmatmul.mubr.bf16.gmra.mxu1 %v8011_v24  ;;  %v7492_v39 = vpop.f32.mrf.mxu0 }
 0x4da   :  { %16503 = vmatmul.mubr.msk.bf16.gmra.mxu0 %vm17394_vm4, %v20627_v34  ;;  %v20634_v46 = vadd.f32 %v16312_v7, %v16232_v52  ;;  %16426 = vmatprep.mubr.bf16.mxu1 %v8012_v12  ;;  %v20655_v7 = vpack.c.bf16 %v8611_v51, %v8610_v14  ;;  %v8015_v52 = vpack.c.bf16 %v7975_v27, %v7974_v60 }
 0x4db   :  { %16506 = vmatprep.mubr.msk.bf16.mxu0 %vm17394_vm4, %v14321_v47  ;;  %v6922_v0 = vpop.f32.mrf.mxu1 }
 0x4dc   :  { %v20636_v37 = vadd.f32 %v7489_v4, %v6922_v0  ;;  %v14333_v4 = vpack.c.bf16 %v8613_v49, %v8612_v40 }
 0x4dd   :  { %v16233_v9 = vpop.f32.mrf.mxu1 }
 0x4de   :  { %v20638_v61 = vadd.f32 %v16313_v3, %v16233_v9  ;;  %v8615_v9 = vld [vmem:[#allocation3 + $0x181] sm:$0xff] }
 0x4df   :  { %v6925_v30 = vpop.f32.mrf.mxu1  ;;  %v20670_v14 = vpack.c.bf16 %v8615_v9, %v8614_v16  ;;  %v7984_v9 = vld [vmem:[#allocation3 + $0x1a8] sm:$0xff] }
 0x4e0   :  { %v20642_v50 = vadd.f32 %v7492_v39, %v6925_v30  ;;  %v7979_v30 = vld [vmem:[#allocation3 + $0x180] sm:$0xff] }
 0x4e1   :  { %v16236_v45 = vpop.f32.mrf.mxu1  ;;  %16427 = vmatmul.mubr.bf16.gmra.mxu1 %v8013_v42  ;;  %v8616_v42 = vld [vmem:[#allocation3 + $0x189] sm:$0xff]  ;;  %v8017_v60 = vpack.c.bf16 %v7979_v30, %v7978_v19 }
 0x4e2   :  { %v16316_v26 = vpop.f32.mrf.mxu0  ;;  %16507 = vmatmul.mubr.msk.bf16.gmra.mxu0 %vm17394_vm4, %v20640_v57  ;;  %16430 = vmatprep.mubr.bf16.mxu1 %v8014_v11  ;;  %v7980_v11 = vld [vmem:[#allocation3 + $0x188] sm:$0xff]  ;;  %v7985_v19 = vld [vmem:[#allocation3 + $0x1b0] sm:$0xff] }
 0x4e3   :  { %16510 = vmatprep.mubr.msk.bf16.mxu0 %vm17394_vm4, %v14327_v31  ;;  %v20649_v56 = vadd.f32 %v16316_v26, %v16236_v45  ;;  %v6938_v32 = vpop.f32.mrf.mxu1  ;;  %v8617_v31 = vld [vmem:[#allocation3 + $0x191] sm:$0xff] }
 0x4e4   :  { %v7505_v15 = vpop.f32.mrf.mxu0  ;;  %v7981_v45 = vld [vmem:[#allocation3 + $0x190] sm:$0xff] }
 0x4e5   :  { %v20651_v59 = vadd.f32 %v7505_v15, %v6938_v32  ;;  %v16237_v35 = vpop.f32.mrf.mxu1  ;;  %v8018_v49 = vpack.c.bf16 %v7981_v45, %v7980_v11 }
 0x4e6   :  { %v16317_v5 = vpop.f32.mrf.mxu0 }
 0x4e7   :  { %v20653_v24 = vadd.f32 %v16317_v5, %v16237_v35  ;;  %v6941_v12 = vpop.f32.mrf.mxu1  ;;  %v14339_v5 = vpack.c.bf16 %v8617_v31, %v8616_v42 }
 0x4e8   :  { %v7508_v47 = vpop.f32.mrf.mxu0 }
 0x4e9   :  { %v20657_v0 = vadd.f32 %v7508_v47, %v6941_v12  ;;  %v16240_v10 = vpop.f32.mrf.mxu1  ;;  %16431 = vmatmul.mubr.bf16.gmra.mxu1 %v8015_v52  ;;  %v8618_v12 = vld [vmem:[#allocation3 + $0x199] sm:$0xff]  ;;  %v8619_v52 = vld [vmem:[#allocation3 + $0x1a1] sm:$0xff] }
 0x4ea   :  { %v16320_v13 = vpop.f32.mrf.mxu0  ;;  %16511 = vmatmul.mubr.msk.bf16.gmra.mxu0 %vm17394_vm4, %v20655_v7  ;;  %16434 = vmatprep.mubr.bf16.mxu1 %v8016_v2  ;;  %v20685_v42 = vpack.c.bf16 %v8619_v52, %v8618_v12  ;;  %v7986_v12 = vld [vmem:[#allocation3 + $0x1b8] sm:$0xff] }
 0x4eb   :  { %16514 = vmatprep.mubr.msk.bf16.mxu0 %vm17394_vm4, %v14333_v4  ;;  %v20664_v3 = vadd.f32 %v16320_v13, %v16240_v10  ;;  %v6954_v28 = vpop.f32.mrf.mxu1  ;;  %v7982_v4 = vld [vmem:[#allocation3 + $0x198] sm:$0xff]  ;;  %v7983_v10 = vld [vmem:[#allocation3 + $0x1a0] sm:$0xff] }
 0x4ec   :  { %v7521_v38 = vpop.f32.mrf.mxu0 }
 0x4ed   :  { %v20666_v25 = vadd.f32 %v7521_v38, %v6954_v28  ;;  %v16241_v26 = vpop.f32.mrf.mxu1  ;;  %v8620_v38 = vld [vmem:[#allocation3 + $0x1a9] sm:$0xff]  ;;  %v8621_v28 = vld [vmem:[#allocation3 + $0x1b1] sm:$0xff] }
 0x4ee   :  { %v16321_v39 = vpop.f32.mrf.mxu0  ;;  %v14345_v11 = vpack.c.bf16 %v8621_v28, %v8620_v38  ;;  %v8625_v38 = vld [vmem:[#allocation3 + $0x1d1] sm:$0xff] }
 0x4ef   :  { %v20668_v15 = vadd.f32 %v16321_v39, %v16241_v26  ;;  %v6957_v51 = vpop.f32.mrf.mxu1  ;;  %v8019_v26 = vpack.c.bf16 %v7983_v10, %v7982_v4  ;;  %v8624_v10 = vld [vmem:[#allocation3 + $0x1c9] sm:$0xff] }
 0x4f0   :  { %v7524_v32 = vpop.f32.mrf.mxu0 }
 0x4f1   :  { %v20672_v27 = vadd.f32 %v7524_v32, %v6957_v51  ;;  %v16244_v35 = vpop.f32.mrf.mxu1  ;;  %16435 = vmatmul.mubr.bf16.gmra.mxu1 %v8017_v60  ;;  %v8020_v51 = vpack.c.bf16 %v7985_v19, %v7984_v9  ;;  %v20692_v60 = vld [vmem:[#allocation9 + $0x1f8] sm:$0xff]   ;;  %v7989_v9 = vld [vmem:[#allocation3 + $0x1d0] sm:$0xff] }
 0x4f2   :  { %v16324_v40 = vpop.f32.mrf.mxu0  ;;  %16515 = vmatmul.mubr.msk.bf16.gmra.mxu0 %vm17394_vm4, %v20670_v14  ;;  %16438 = vmatprep.mubr.bf16.mxu1 %v8018_v49 }
 0x4f3   :  { %16518 = vmatprep.mubr.msk.bf16.mxu0 %vm17394_vm4, %v14339_v5  ;;  %v20679_v55 = vadd.f32 %v16324_v40, %v16244_v35  ;;  %v6970_v47 = vpop.f32.mrf.mxu1  ;;  %16774 = vmatprep.subr.bf16.mxu0 %v20692_v60 }
 0x4f4   :  { %v7537_v18 = vpop.f32.mrf.mxu0 }
 0x4f5   :  { %v20681_v13 = vadd.f32 %v7537_v18, %v6970_v47  ;;  %v16245_v16 = vpop.f32.mrf.mxu1  ;;  %v8622_v18 = vld [vmem:[#allocation3 + $0x1b9] sm:$0xff]  ;;  %v8623_v47 = vld [vmem:[#allocation3 + $0x1c1] sm:$0xff] }
 0x4f6   :  { %v16325_v2 = vpop.f32.mrf.mxu0 }
 0x4f7   :  { %v20683_v39 = vadd.f32 %v16325_v2, %v16245_v16  ;;  %v6973_v31 = vpop.f32.mrf.mxu1  ;;  %v7987_v2 = vld [vmem:[#allocation3 + $0x1c0] sm:$0xff]  ;;  %v7988_v16 = vld [vmem:[#allocation3 + $0x1c8] sm:$0xff] }
 0x4f8   :  { %v7540_v30 = vpop.f32.mrf.mxu0 }
 0x4f9   :  { %v20687_v45 = vadd.f32 %v7540_v30, %v6973_v31  ;;  %v16248_v5 = vpop.f32.mrf.mxu1  ;;  %16439 = vmatmul.mubr.bf16.gmra.mxu1 %v8019_v26  ;;  %v20703_v31 = vpack.c.bf16 %v8623_v47, %v8622_v18 }
 0x4fa   :  { %v16328_v32 = vpop.f32.mrf.mxu0  ;;  %16519 = vmatmul.mubr.msk.bf16.gmra.mxu0 %vm17394_vm4, %v20685_v42  ;;  %16442 = vmatprep.mubr.bf16.mxu1 %v8020_v51 }
 0x4fb   :  { %16522 = vmatprep.mubr.msk.bf16.mxu0 %vm17394_vm4, %v14345_v11  ;;  %v20696_v40 = vadd.f32 %v16328_v32, %v16248_v5  ;;  %v6986_v35 = vpop.f32.mrf.mxu1  ;;  %v8021_v11 = vpack.c.bf16 %v7987_v2, %v7986_v12  ;;  %v14351_v32 = vpack.c.bf16 %v8625_v38, %v8624_v10  ;;  %v8626_v12 = vld [vmem:[#allocation3 + $0x1d9] sm:$0xff]  ;;  %v8627_v2 = vld [vmem:[#allocation3 + $0x1e1] sm:$0xff] }
 0x4fc   :  { %v7553_v49 = vpop.f32.mrf.mxu0  ;;  %v7990_v10 = vld [vmem:[#allocation3 + $0x1d8] sm:$0xff] }
 0x4fd   :  { %v20699_v52 = vadd.f32 %v7553_v49, %v6986_v35  ;;  %v16249_v28 = vpop.f32.mrf.mxu1  ;;  %v8022_v49 = vpack.c.bf16 %v7989_v9, %v7988_v16  ;;  %v7992_v9 = vld [vmem:[#allocation3 + $0x1e8] sm:$0xff] }
 0x4fe   :  { %v16329_v4 = vpop.f32.mrf.mxu0 }
 0x4ff   :  { %24184 = vst [vmem:[#allocation23_spill] sm:$0xff] %v20699_v52  ;;  %v20701_v19 = vadd.f32 %v16329_v4, %v16249_v28  ;;  %v6989_v26 = vpop.f32.mrf.mxu1 }
 0x500   :  { %v7556_v30 = vpop.f32.mrf.mxu0 }
 0x501   :  { %24185 = vst [vmem:[#allocation48_spill] sm:$0xff] %v20701_v19  ;;  %v20705_v51 = vadd.f32 %v7556_v30, %v6989_v26  ;;  %v16252_v35 = vpop.f32.mrf.mxu1  ;;  %16443 = vmatmul.mubr.bf16.gmra.mxu1 %v8021_v11  ;;  %v7991_v30 = vld [vmem:[#allocation3 + $0x1e0] sm:$0xff]  ;;  %v8628_v26 = vld [vmem:[#allocation3 + $0x1e9] sm:$0xff] }
 0x502   :  { %v16332_v5 = vpop.f32.mrf.mxu0  ;;  %16523 = vmatmul.mubr.msk.bf16.gmra.mxu0 %vm17394_vm4, %v20703_v31  ;;  %16446 = vmatprep.mubr.bf16.mxu1 %v8022_v49  ;;  %v7993_v11 = vld [vmem:[#allocation3 + $0x1f0] sm:$0xff]  ;;  %v8023_v49 = vpack.c.bf16 %v7991_v30, %v7990_v10  ;;  %v8630_v10 = vld [vmem:[#allocation3 + $0x1f9] sm:$0xff] }
 0x503   :  { %24186 = vst [vmem:[#allocation69_spill] sm:$0xff] %v20705_v51  ;;  %16526 = vmatprep.mubr.msk.bf16.mxu0 %vm17394_vm4, %v14351_v32  ;;  %v20712_v4 = vadd.f32 %v16332_v5, %v16252_v35  ;;  %v7002_v47 = vpop.f32.mrf.mxu1  ;;  %v20718_v5 = vpack.c.bf16 %v8627_v2, %v8626_v12 }
 0x504   :  { %v7569_v18 = vpop.f32.mrf.mxu0 }
 0x505   :  { %24187 = vst [vmem:[#allocation73_spill] sm:$0xff] %v20712_v4  ;;  %v20714_v38 = vadd.f32 %v7569_v18, %v7002_v47  ;;  %v16253_v16 = vpop.f32.mrf.mxu1  ;;  %v14357_v4 = vpack.c.bf16 %v8629_v6, %v8628_v26  ;;  %v8024_v18 = vpack.c.bf16 %v7993_v11, %v7992_v9  ;;  %v8631_v6 = vld [vmem:[#allocation3 + $0x201] sm:$0xff] }
 0x506   :  { %v16333_v28 = vpop.f32.mrf.mxu0 }
 0x507   :  { %v20716_v51 = vadd.f32 %v16333_v28, %v16253_v16  ;;  %v7005_v35 = vpop.f32.mrf.mxu1  ;;  %v7994_v16 = vld [vmem:[#allocation3 + $0x1f8] sm:$0xff] }
 0x508   :  { %v7572_v32 = vpop.f32.mrf.mxu0 }
 0x509   :  { %v20720_v19 = vadd.f32 %v7572_v32, %v7005_v35  ;;  %v16256_v47 = vpop.f32.mrf.mxu1  ;;  %16447 = vmatmul.mubr.bf16.gmra.mxu1 %v8023_v49  ;;  %v9268_v35 = vld [vmem:[#allocation3 + $0x17] sm:$0xff]  ;;  %v20733_v49 = vpack.c.bf16 %v8631_v6, %v8630_v10 }
 0x50a   :  { %v16336_v52 = vpop.f32.mrf.mxu0  ;;  %16527 = vmatmul.mubr.msk.bf16.gmra.mxu0 %vm17394_vm4, %v20718_v5  ;;  %16450 = vmatprep.mubr.bf16.mxu1 %v8024_v18 }
 0x50b   :  { %24188 = vst [vmem:[#allocation71_spill] sm:$0xff] %v20720_v19  ;;  %16530 = vmatprep.mubr.msk.bf16.mxu0 %vm17394_vm4, %v14357_v4  ;;  %v20727_v28 = vadd.f32 %v16336_v52, %v16256_v47  ;;  %v7018_v2 = vpop.f32.mrf.mxu1  ;;  %v9269_v19 = vld [vmem:[#allocation3 + $0x1f] sm:$0xff]  ;;  %v8025_v52 = vpack.c.bf16 %v20521_v58, %v7994_v16 }
 0x50c   :  { %v7585_v12 = vpop.f32.mrf.mxu0 }
 0x50d   :  { %v20729_v30 = vadd.f32 %v7585_v12, %v7018_v2  ;;  %v16257_v32 = vpop.f32.mrf.mxu1  ;;  %v14371_v12 = vpack.c.bf16 %v9269_v19, %v9268_v35  ;;  %v9272_v19 = vld [vmem:[#allocation3 + $0x37] sm:$0xff]  ;;  %v9273_v35 = vld [vmem:[#allocation3 + $0x3f] sm:$0xff] }
 0x50e   :  { %v16337_v26 = vpop.f32.mrf.mxu0 }
 0x50f   :  { %v20731_v9 = vadd.f32 %v16337_v26, %v16257_v32  ;;  %v7021_v4 = vpop.f32.mrf.mxu1  ;;  %v9270_v32 = vld [vmem:[#allocation3 + $0x27] sm:$0xff] }
 0x510   :  { %v7588_v11 = vpop.f32.mrf.mxu0 }
 0x511   :  { %24189 = vst [vmem:[#allocation49_spill] sm:$0xff] %v20731_v9  ;;  %v20736_v47 = vadd.f32 %v7588_v11, %v7021_v4  ;;  %v16260_v2 = vpop.f32.mrf.mxu1  ;;  %16451 = vmatmul.mubr.bf16.gmra.mxu1 %v8025_v52  ;;  %v9271_v11 = vld [vmem:[#allocation3 + $0x2f] sm:$0xff] }
 0x512   :  { %v16340_v18 = vpop.f32.mrf.mxu0  ;;  %16531 = vmatmul.mubr.msk.bf16.gmra.mxu0 %vm17394_vm4, %v20733_v49  ;;  %16550 = vmatprep.mubr.msk.bf16.mxu1 %vm17237_vm2, %v14371_v12  ;;  %v14377_v12 = vpack.c.bf16 %v9273_v35, %v9272_v19  ;;  %v9275_v19 = vld [vmem:[#allocation3 + $0x4f] sm:$0xff]  ;;  %v9276_v35 = vld [vmem:[#allocation3 + $0x57] sm:$0xff] }
 0x513   :  { %24190 = vst [vmem:[#allocation47_spill] sm:$0xff] %v20736_v47  ;;  %16630 = vmatprep.mubr.msk.bf16.mxu0 %vm17394_vm4, %v20539_v36  ;;  %v20744_v26 = vadd.f32 %v16340_v18, %v16260_v2  ;;  %v7034_v58 = vpop.f32.mrf.mxu1  ;;  %v20752_v36 = vpack.c.bf16 %v9271_v11, %v9270_v32  ;;  %v17066_v18 = vld [vmem:[#allocation9 + $0x1b0] sm:$0xff]  }
 0x514   :  { %v7601_v10 = vpop.f32.mrf.mxu0 }
 0x515   :  { %24191 = vst [vmem:[#allocation24_spill] sm:$0xff] %v20744_v26  ;;  %v20748_v6 = vadd.f32 %v7601_v10, %v7034_v58  ;;  %v16261_v4 = vpop.f32.mrf.mxu1  ;;  %v17073_v10 = vld [vmem:[#allocation9 + $0x1f0] sm:$0xff]  }
 0x516   :  { %v16341_v16 = vpop.f32.mrf.mxu0 }
 0x517   :  { %v20750_v52 = vadd.f32 %v16341_v16, %v16261_v4  ;;  %v7037_v9 = vpop.f32.mrf.mxu1  ;;  %v9274_v4 = vld [vmem:[#allocation3 + $0x47] sm:$0xff] }
 0x518   :  { %v7604_v47 = vpop.f32.mrf.mxu0 }
 0x519   :  { %24192 = vst [vmem:[#allocation31_spill] sm:$0xff] %v20750_v52  ;;  %v20754_v2 = vadd.f32 %v7604_v47, %v7037_v9  ;;  %v16264_v58 = vpop.f32.mrf.mxu1  ;;  %16551 = vmatmul.mubr.msk.bf16.vlgmr.msra.gmra.mxu1 %vm17237_vm2, %v20752_v36  ;;  %v17067_v47 = vld [vmem:[#allocation9 + $0x1a8] sm:$0xff]   ;;  %v17068_v52 = vld [vmem:[#allocation9 + $0x1a0] sm:$0xff]  }
 0x51a   :  { %v16344_v26 = vpop.f32.mrf.mxu0  ;;  %16631 = vmatmul.mubr.msk.bf16.vlgmr.msra.gmra.mxu0 %vm17394_vm4, %v20541_v48  ;;  %16554 = vmatprep.mubr.msk.bf16.mxu1 %vm17237_vm2, %v14377_v12 }
 0x51b   :  { %24193 = vst [vmem:[#allocation28_spill] sm:$0xff] %v20754_v2  ;;  %16634 = vmatprep.mubr.msk.bf16.mxu0 %vm17394_vm4, %v20552_v17  ;;  %v20765_v16 = vadd.f32 %v16344_v26, %v16264_v58  ;;  %16695 = vmatpush3.bf16.msra.mxu1 %v20587_v23  ;;  %v7050_v48 = vpop.f32.mrf.mxu1  ;;  %v17074_v17 = vld [vmem:[#allocation9 + $0x1e8] sm:$0xff]   ;;  %v9277_v58 = vld [vmem:[#allocation3 + $0x5f] sm:$0xff]  ;;  %v20775_v2 = vpack.c.bf16 %v9275_v19, %v9274_v4 }
 0x51c   :  { %v7617_v9 = vpop.f32.mrf.mxu0  ;;  %16696 = vmatprep.subr.bf16.mxu1 %v17066_v18  ;;  %16775 = vmatpush3.bf16.msra.mxu0 %v20692_v60  ;;  %v17069_v4 = vld [vmem:[#allocation9 + $0x198] sm:$0xff]  }
 0x51d   :  { %24194 = vst [vmem:[#allocation30_spill] sm:$0xff] %v20765_v16  ;;  %v20771_v32 = vadd.f32 %v7617_v9, %v7050_v48  ;;  %16776 = vmatprep.subr.bf16.mxu0 %v17073_v10  ;;  %v16265_v26 = vpop.f32.mrf.mxu1  ;;  %v14383_v48 = vpack.c.bf16 %v9277_v58, %v9276_v35  ;;  %v9278_v35 = vld [vmem:[#allocation3 + $0x67] sm:$0xff]  ;;  %v9279_v58 = vld [vmem:[#allocation3 + $0x6f] sm:$0xff] }
 0x51e   :  { %v16345_v11 = vpop.f32.mrf.mxu0 }
 0x51f   :  { %24195 = vst [vmem:[#allocation29_spill] sm:$0xff] %v20771_v32  ;;  %v20773_v16 = vadd.f32 %v16345_v11, %v16265_v26  ;;  %16697 = vmatpush3.bf16.msra.mxu1 %v17066_v18  ;;  %v7053_v23 = vpop.f32.mrf.mxu1  ;;  %v17075_v32 = vld [vmem:[#allocation9 + $0x1e0] sm:$0xff]  }
 0x520   :  { %v7620_v12 = vpop.f32.mrf.mxu0  ;;  %16698 = vmatprep.subr.bf16.mxu1 %v17067_v47  ;;  %16777 = vmatpush3.bf16.msra.mxu0 %v17073_v10 }
 0x521   :  { %v20777_v60 = vadd.f32 %v7620_v12, %v7053_v23  ;;  %16778 = vmatprep.subr.bf16.mxu0 %v17074_v17  ;;  %v16268_v11 = vpop.f32.mrf.mxu1  ;;  %16555 = vmatmul.mubr.msk.bf16.gmra.mxu1 %vm17237_vm2, %v20775_v2  ;;  %v17076_v12 = vld [vmem:[#allocation9 + $0x1d8] sm:$0xff]  }
 0x522   :  { %v16348_v9 = vpop.f32.mrf.mxu0  ;;  %16635 = vmatmul.mubr.msk.bf16.gmra.mxu0 %vm17394_vm4, %v20554_v29  ;;  %16558 = vmatprep.mubr.msk.bf16.mxu1 %vm17237_vm2, %v14383_v48 }
 0x523   :  { %24196 = vst [vmem:[#allocation81_spill] sm:$0xff] %v20777_v60  ;;  %16638 = vmatprep.mubr.msk.bf16.mxu0 %vm17394_vm4, %v20564_v21  ;;  %v20788_v18 = vadd.f32 %v16348_v9, %v16268_v11  ;;  %16699 = vmatpush3.bf16.msra.mxu1 %v17067_v47  ;;  %v7066_v29 = vpop.f32.mrf.mxu1  ;;  %v9280_v21 = vld [vmem:[#allocation3 + $0x77] sm:$0xff]  ;;  %v9281_v9 = vld [vmem:[#allocation3 + $0x7f] sm:$0xff]  ;;  %v20796_v47 = vpack.c.bf16 %v9279_v58, %v9278_v35 }
 0x524   :  { %v7633_v10 = vpop.f32.mrf.mxu0  ;;  %16700 = vmatprep.subr.bf16.mxu1 %v17068_v52  ;;  %16779 = vmatpush3.bf16.msra.mxu0 %v17074_v17  ;;  %v17070_v60 = vld [vmem:[#allocation9 + $0x190] sm:$0xff]  }
 0x525   :  { %24197 = vst [vmem:[#allocation36_spill] sm:$0xff] %v20788_v18  ;;  %v20792_v19 = vadd.f32 %v7633_v10, %v7066_v29  ;;  %16780 = vmatprep.subr.bf16.mxu0 %v17075_v32  ;;  %v16269_v23 = vpop.f32.mrf.mxu1  ;;  %v14389_v29 = vpack.c.bf16 %v9281_v9, %v9280_v21  ;;  %v9283_v21 = vld [vmem:[#allocation3 + $0x8f] sm:$0xff] }
 0x526   :  { %v16349_v26 = vpop.f32.mrf.mxu0  ;;  %v17079_v9 = vld [vmem:[#allocation9 + $0x1c8] sm:$0xff]  }
 0x527   :  { %24198 = vst [vmem:[#allocation35_spill] sm:$0xff] %v20792_v19  ;;  %v20794_v11 = vadd.f32 %v16349_v26, %v16269_v23  ;;  %16701 = vmatpush3.bf16.msra.mxu1 %v17068_v52  ;;  %v7069_v48 = vpop.f32.mrf.mxu1  ;;  %v17078_v19 = vld [vmem:[#allocation9 + $0x1d0] sm:$0xff]   ;;  %v9282_v23 = vld [vmem:[#allocation3 + $0x87] sm:$0xff] }
 0x528   :  { %v7636_v18 = vpop.f32.mrf.mxu0  ;;  %16702 = vmatprep.subr.bf16.mxu1 %v17069_v4  ;;  %16781 = vmatpush3.bf16.msra.mxu0 %v17075_v32 }
 0x529   :  { %v20798_v17 = vadd.f32 %v7636_v18, %v7069_v48  ;;  %16782 = vmatprep.subr.bf16.mxu0 %v17076_v12  ;;  %v16272_v26 = vpop.f32.mrf.mxu1  ;;  %16559 = vmatmul.mubr.msk.bf16.gmra.mxu1 %vm17237_vm2, %v20796_v47  ;;  %v17072_v18 = vld [vmem:[#allocation9 + $0x188] sm:$0xff]  }
 0x52a   :  { %v16352_v10 = vpop.f32.mrf.mxu0  ;;  %16639 = vmatmul.mubr.msk.bf16.gmra.mxu0 %vm17394_vm4, %v20566_v1  ;;  %16562 = vmatprep.mubr.msk.bf16.mxu1 %vm17237_vm2, %v14389_v29 }
 0x52b   :  { %24199 = vst [vmem:[#allocation34_spill] sm:$0xff] %v20798_v17  ;;  %16642 = vmatprep.mubr.msk.bf16.mxu0 %vm17394_vm4, %v20576_v43  ;;  %v20809_v52 = vadd.f32 %v16352_v10, %v16272_v26  ;;  %16703 = vmatpush3.bf16.msra.mxu1 %v17069_v4  ;;  %v7082_v1 = vpop.f32.mrf.mxu1  ;;  %v9284_v43 = vld [vmem:[#allocation3 + $0x97] sm:$0xff]  ;;  %v9285_v10 = vld [vmem:[#allocation3 + $0x9f] sm:$0xff]  ;;  %v20817_v4 = vpack.c.bf16 %v9283_v21, %v9282_v23 }
 0x52c   :  { %v7649_v32 = vpop.f32.mrf.mxu0  ;;  %16704 = vmatprep.subr.bf16.mxu1 %v17070_v60  ;;  %16783 = vmatpush3.bf16.msra.mxu0 %v17076_v12  ;;  %v17077_v17 = vld [vmem:[#allocation9 + $0x180] sm:$0xff]  }
 0x52d   :  { %24200 = vst [vmem:[#allocation39_spill] sm:$0xff] %v20809_v52  ;;  %v20813_v35 = vadd.f32 %v7649_v32, %v7082_v1  ;;  %16784 = vmatprep.subr.bf16.mxu0 %v17078_v19  ;;  %v16273_v48 = vpop.f32.mrf.mxu1  ;;  %v14395_v1 = vpack.c.bf16 %v9285_v10, %v9284_v43  ;;  %v9287_v43 = vld [vmem:[#allocation3 + $0xaf] sm:$0xff] }
 0x52e   :  { %v16353_v58 = vpop.f32.mrf.mxu0 }
 0x52f   :  { %24201 = vst [vmem:[#allocation84_spill] sm:$0xff] %v20813_v35  ;;  %v20815_v26 = vadd.f32 %v16353_v58, %v16273_v48  ;;  %16705 = vmatpush3.bf16.msra.mxu1 %v17070_v60  ;;  %v7085_v29 = vpop.f32.mrf.mxu1  ;;  %v17080_v35 = vld [vmem:[#allocation9 + $0x1c0] sm:$0xff]  }
 0x530   :  { %v7652_v52 = vpop.f32.mrf.mxu0  ;;  %16706 = vmatprep.subr.bf16.mxu1 %v17072_v18  ;;  %16785 = vmatpush3.bf16.msra.mxu0 %v17078_v19  ;;  %v9286_v48 = vld [vmem:[#allocation3 + $0xa7] sm:$0xff] }
 0x531   :  { %v20819_v12 = vadd.f32 %v7652_v52, %v7085_v29  ;;  %16786 = vmatprep.subr.bf16.mxu0 %v17079_v9  ;;  %v16276_v58 = vpop.f32.mrf.mxu1  ;;  %16563 = vmatmul.mubr.msk.bf16.gmra.mxu1 %vm17237_vm2, %v20817_v4  ;;  %v20834_v52 = vld [vmem:[#allocation9 + $0x238] sm:$0xff]  }
 0x532   :  { %v16356_v32 = vpop.f32.mrf.mxu0  ;;  %16643 = vmatmul.mubr.msk.bf16.gmra.mxu0 %vm17394_vm4, %v20578_v63  ;;  %16566 = vmatprep.mubr.msk.bf16.mxu1 %vm17237_vm2, %v14395_v1  ;;  %v9289_v29 = vld [vmem:[#allocation3 + $0xbf] sm:$0xff] }
 0x533   :  { %16646 = vmatprep.mubr.msk.bf16.mxu0 %vm17394_vm4, %v20589_v22  ;;  %v20830_v60 = vadd.f32 %v16356_v32, %v16276_v58  ;;  %16707 = vmatpush3.bf16.msra.mxu1 %v17072_v18  ;;  %v7098_v63 = vpop.f32.mrf.mxu1  ;;  %v9288_v22 = vld [vmem:[#allocation3 + $0xb7] sm:$0xff]  ;;  %v20840_v18 = vpack.c.bf16 %v9287_v43, %v9286_v48  ;;  %v9290_v43 = vld [vmem:[#allocation3 + $0xc7] sm:$0xff] }
 0x534   :  { %v7665_v19 = vpop.f32.mrf.mxu0  ;;  %16708 = vmatprep.subr.bf16.mxu1 %v17077_v17  ;;  %16787 = vmatpush3.bf16.msra.mxu0 %v17079_v9 }
 0x535   :  { %v20836_v23 = vadd.f32 %v7665_v19, %v7098_v63  ;;  %16788 = vmatprep.subr.bf16.mxu0 %v17080_v35  ;;  %v16277_v10 = vpop.f32.mrf.mxu1  ;;  %v14401_v63 = vpack.c.bf16 %v9289_v29, %v9288_v22  ;;  %v9292_v29 = vld [vmem:[#allocation3 + $0xd7] sm:$0xff] }
 0x536   :  { %v16357_v21 = vpop.f32.mrf.mxu0 }
 0x537   :  { %24202 = vst [vmem:[#allocation86_spill] sm:$0xff] %v20836_v23  ;;  %v20838_v32 = vadd.f32 %v16357_v21, %v16277_v10  ;;  %16709 = vmatpush3.bf16.msra.mxu1 %v17077_v17  ;;  %v7101_v1 = vpop.f32.mrf.mxu1  ;;  %v9291_v10 = vld [vmem:[#allocation3 + $0xcf] sm:$0xff] }
 0x538   :  { %v7668_v58 = vpop.f32.mrf.mxu0  ;;  %16789 = vmatpush3.bf16.msra.mxu0 %v17080_v35  ;;  %16854 = vmatprep.subr.bf16.mxu1 %v20834_v52 }
 0x539   :  { %24203 = vst [vmem:[#allocation85_spill] sm:$0xff] %v20838_v32  ;;  %v20843_v9 = vadd.f32 %v7668_v58, %v7101_v1  ;;  %v16280_v23 = vpop.f32.mrf.mxu1  ;;  %16567 = vmatmul.mubr.msk.bf16.gmra.mxu1 %vm17237_vm2, %v20840_v18  ;;  %v9293_v58 = vld [vmem:[#allocation3 + $0xdf] sm:$0xff] }
 0x53a   :  { %v16360_v19 = vpop.f32.mrf.mxu0  ;;  %16647 = vmatmul.mubr.msk.bf16.gmra.mxu0 %vm17394_vm4, %v20591_v33  ;;  %16570 = vmatprep.mubr.msk.bf16.mxu1 %vm17237_vm2, %v14401_v63  ;;  %v14407_v63 = vpack.c.bf16 %v9293_v58, %v9292_v29  ;;  %v9296_v29 = vld [vmem:[#allocation3 + $0xf7] sm:$0xff]  ;;  %v9297_v58 = vld [vmem:[#allocation3 + $0xff] sm:$0xff] }
 0x53b   :  { %24204 = vst [vmem:[#allocation14_spill] sm:$0xff] %v20843_v9  ;;  %16650 = vmatprep.mubr.msk.bf16.mxu0 %vm17394_vm4, %v20600_v20  ;;  %v20854_v17 = vadd.f32 %v16360_v19, %v16280_v23  ;;  %v7114_v21 = vpop.f32.mrf.mxu1  ;;  %v20862_v20 = vpack.c.bf16 %v9291_v10, %v9290_v43  ;;  %v9294_v43 = vld [vmem:[#allocation3 + $0xe7] sm:$0xff]  ;;  %v9295_v10 = vld [vmem:[#allocation3 + $0xef] sm:$0xff] }
 0x53c   :  { %v7681_v35 = vpop.f32.mrf.mxu0 }
 0x53d   :  { %v20858_v48 = vadd.f32 %v7681_v35, %v7114_v21  ;;  %v16281_v22 = vpop.f32.mrf.mxu1 }
 0x53e   :  { %v16361_v33 = vpop.f32.mrf.mxu0 }
 0x53f   :  { %24205 = vst [vmem:[#allocation87_spill] sm:$0xff] %v20858_v48  ;;  %v20860_v1 = vadd.f32 %v16361_v33, %v16281_v22  ;;  %v7117_v32 = vpop.f32.mrf.mxu1 }
 0x540   :  { %v7684_v9 = vpop.f32.mrf.mxu0 }
 0x541   :  { %24206 = vst [vmem:[#allocation52_spill] sm:$0xff] %v20860_v1  ;;  %v20864_v23 = vadd.f32 %v7684_v9, %v7117_v32  ;;  %v16284_v35 = vpop.f32.mrf.mxu1  ;;  %16571 = vmatmul.mubr.msk.bf16.gmra.mxu1 %vm17237_vm2, %v20862_v20 }
 0x542   :  { %v16364_v19 = vpop.f32.mrf.mxu0  ;;  %16651 = vmatmul.mubr.msk.bf16.gmra.mxu0 %vm17394_vm4, %v20602_v62  ;;  %16574 = vmatprep.mubr.msk.bf16.mxu1 %vm17237_vm2, %v14407_v63  ;;  %v14413_v63 = vpack.c.bf16 %v9297_v58, %v9296_v29  ;;  %v9299_v29 = vld [vmem:[#allocation3 + $0x10f] sm:$0xff] }
 0x543   :  { %24207 = vst [vmem:[#allocation53_spill] sm:$0xff] %v20864_v23  ;;  %16654 = vmatprep.mubr.msk.bf16.mxu0 %vm17394_vm4, %v20610_v8  ;;  %v20875_v21 = vadd.f32 %v16364_v19, %v16284_v35  ;;  %v7130_v32 = vpop.f32.mrf.mxu1  ;;  %v20883_v8 = vpack.c.bf16 %v9295_v10, %v9294_v43  ;;  %v10005_v43 = vld [vmem:[#allocation3 + $0x111] sm:$0xff] }
 0x544   :  { %v7697_v33 = vpop.f32.mrf.mxu0 }
 0x545   :  { %v20879_v9 = vadd.f32 %v7697_v33, %v7130_v32  ;;  %v16285_v22 = vpop.f32.mrf.mxu1  ;;  %24210 = vst [vmem:[#allocation56_spill] sm:$0xff] %v20883_v8 }
 0x546   :  { %v16365_v62 = vpop.f32.mrf.mxu0 }
 0x547   :  { %24208 = vst [vmem:[#allocation40_spill] sm:$0xff] %v20879_v9  ;;  %v20881_v23 = vadd.f32 %v16365_v62, %v16285_v22  ;;  %v7133_v48 = vpop.f32.mrf.mxu1  ;;  %v9298_v22 = vld [vmem:[#allocation3 + $0x107] sm:$0xff] }
 0x548   :  { %v7700_v1 = vpop.f32.mrf.mxu0 }
 0x549   :  { %24209 = vst [vmem:[#allocation54_spill] sm:$0xff] %v20881_v23  ;;  %v20885_v19 = vadd.f32 %v7700_v1, %v7133_v48  ;;  %v16288_v33 = vpop.f32.mrf.mxu1  ;;  %16575 = vmatmul.mubr.msk.bf16.gmra.mxu1 %vm17237_vm2, %v20883_v8  ;;  %v10004_v1 = vld [vmem:[#allocation3 + $0x109] sm:$0xff]  ;;  %v9301_v23 = vld [vmem:[#allocation3 + $0x11f] sm:$0xff] }
 0x54a   :  { %v16368_v35 = vpop.f32.mrf.mxu0  ;;  %16655 = vmatmul.mubr.msk.bf16.gmra.mxu0 %vm17394_vm4, %v20612_v54  ;;  %16578 = vmatprep.mubr.msk.bf16.mxu1 %vm17237_vm2, %v14413_v63 }
 0x54b   :  { %24211 = vst [vmem:[#allocation55_spill] sm:$0xff] %v20885_v19  ;;  %16658 = vmatprep.mubr.msk.bf16.mxu0 %vm17394_vm4, %v20620_v41  ;;  %v20896_v32 = vadd.f32 %v16368_v35, %v16288_v33  ;;  %v7146_v48 = vpop.f32.mrf.mxu1  ;;  %v9300_v19 = vld [vmem:[#allocation3 + $0x117] sm:$0xff]  ;;  %v14520_v35 = vpack.c.bf16 %v10005_v43, %v10004_v1 }
 0x54c   :  { %v7713_v62 = vpop.f32.mrf.mxu0 }
 0x54d   :  { %24212 = vst [vmem:[#allocation72_spill] sm:$0xff] %v20896_v32  ;;  %v20900_v54 = vadd.f32 %v7713_v62, %v7146_v48  ;;  %v16289_v58 = vpop.f32.mrf.mxu1  ;;  %v20904_v32 = vpack.c.bf16 %v9299_v29, %v9298_v22  ;;  %v14419_v62 = vpack.c.bf16 %v9301_v23, %v9300_v19  ;;  %v10008_v22 = vld [vmem:[#allocation3 + $0x129] sm:$0xff]  ;;  %v10009_v29 = vld [vmem:[#allocation3 + $0x131] sm:$0xff] }
 0x54e   :  { %v16369_v10 = vpop.f32.mrf.mxu0  ;;  %v9302_v19 = vld [vmem:[#allocation3 + $0x127] sm:$0xff] }
 0x54f   :  { %24213 = vst [vmem:[#allocation44_spill] sm:$0xff] %v20900_v54  ;;  %v20902_v9 = vadd.f32 %v16369_v10, %v16289_v58  ;;  %v7149_v33 = vpop.f32.mrf.mxu1  ;;  %24215 = vst [vmem:[#allocation57_spill] sm:$0xff] %v20904_v32 }
 0x550   :  { %v7716_v41 = vpop.f32.mrf.mxu0 }
 0x551   :  { %24214 = vst [vmem:[#allocation41_spill] sm:$0xff] %v20902_v9  ;;  %v20906_v8 = vadd.f32 %v7716_v41, %v7149_v33  ;;  %v16292_v48 = vpop.f32.mrf.mxu1  ;;  %16579 = vmatmul.mubr.msk.bf16.gmra.mxu1 %vm17237_vm2, %v20904_v32  ;;  %v9303_v41 = vld [vmem:[#allocation3 + $0x12f] sm:$0xff]  ;;  %v9304_v33 = vld [vmem:[#allocation3 + $0x137] sm:$0xff] }
 0x552   :  { %v16372_v63 = vpop.f32.mrf.mxu0  ;;  %16659 = vmatmul.mubr.msk.bf16.gmra.mxu0 %vm17394_vm4, %v14520_v35  ;;  %16582 = vmatprep.mubr.msk.bf16.mxu1 %vm17237_vm2, %v14419_v62 }
 0x553   :  { %24216 = vst [vmem:[#allocation46_spill] sm:$0xff] %v20906_v8  ;;  %16662 = vmatprep.mubr.msk.bf16.mxu0 %vm17394_vm4, %v20627_v34  ;;  %v20916_v1 = vadd.f32 %v16372_v63, %v16292_v48  ;;  %v7162_v10 = vpop.f32.mrf.mxu1  ;;  %v9305_v8 = vld [vmem:[#allocation3 + $0x13f] sm:$0xff]  ;;  %v14526_v63 = vpack.c.bf16 %v10009_v29, %v10008_v22 }
 0x554   :  { %v7729_v43 = vpop.f32.mrf.mxu0 }
 0x555   :  { %24217 = vst [vmem:[#allocation26_spill] sm:$0xff] %v20916_v1  ;;  %v20920_v58 = vadd.f32 %v7729_v43, %v7162_v10  ;;  %v16293_v35 = vpop.f32.mrf.mxu1  ;;  %v20924_v1 = vpack.c.bf16 %v9303_v41, %v9302_v19  ;;  %v20930_v43 = vpack.c.bf16 %v9305_v8, %v9304_v33  ;;  %v10012_v19 = vld [vmem:[#allocation3 + $0x149] sm:$0xff]  ;;  %v10013_v8 = vld [vmem:[#allocation3 + $0x151] sm:$0xff] }
 0x556   :  { %v16373_v23 = vpop.f32.mrf.mxu0  ;;  %v9306_v33 = vld [vmem:[#allocation3 + $0x147] sm:$0xff] }
 0x557   :  { %24218 = vst [vmem:[#allocation17_spill] sm:$0xff] %v20920_v58  ;;  %v20922_v9 = vadd.f32 %v16373_v23, %v16293_v35  ;;  %v7165_v48 = vpop.f32.mrf.mxu1  ;;  %24220 = vst [vmem:[#allocation77_spill] sm:$0xff] %v20924_v1 }
 0x558   :  { %v7732_v34 = vpop.f32.mrf.mxu0  ;;  %24222 = vst [vmem:[#allocation60_spill] sm:$0xff] %v20930_v43 }
 0x559   :  { %24219 = vst [vmem:[#allocation18_spill] sm:$0xff] %v20922_v9  ;;  %v20926_v54 = vadd.f32 %v7732_v34, %v7165_v48  ;;  %v16392_v10 = vpop.f32.mrf.mxu1  ;;  %16583 = vmatmul.mubr.msk.bf16.gmra.mxu1 %vm17237_vm2, %v20924_v1  ;;  %v9307_v34 = vld [vmem:[#allocation3 + $0x14f] sm:$0xff]  ;;  %v14532_v9 = vpack.c.bf16 %v10013_v8, %v10012_v19 }
 0x55a   :  { %v16472_v62 = vpop.f32.mrf.mxu0  ;;  %16663 = vmatmul.mubr.msk.bf16.gmra.mxu0 %vm17394_vm4, %v14526_v63  ;;  %v8446_v22 = vadd.f32 %v16392_v10, %v20634_v46  ;;  %16586 = vmatprep.mubr.msk.bf16.mxu1 %vm17237_vm2, %v20930_v43  ;;  %v20948_v1 = vpack.c.bf16 %v9307_v34, %v9306_v33 }
 0x55b   :  { %24221 = vst [vmem:[#allocation25_spill] sm:$0xff] %v20926_v54  ;;  %16666 = vmatprep.mubr.msk.bf16.mxu0 %vm17394_vm4, %v20640_v57  ;;  %v8125_v23 = vpop.f32.mrf.mxu1  ;;  %v9308_v54 = vld [vmem:[#allocation3 + $0x157] sm:$0xff]  ;;  %v9309_v57 = vld [vmem:[#allocation3 + $0x15f] sm:$0xff] }
 0x55c   :  { %v8821_v29 = vpop.f32.mrf.mxu0  ;;  %v8444_v41 = vadd.f32 %v8125_v23, %v20636_v37  ;;  %v20943_v63 = vadd.f32 %v16472_v62, %v8446_v22  ;;  %v14431_v62 = vpack.c.bf16 %v9309_v57, %v9308_v54  ;;  %v10016_v54 = vld [vmem:[#allocation3 + $0x169] sm:$0xff] }
 0x55d   :  { %v16393_v48 = vpop.f32.mrf.mxu1 }
 0x55e   :  { %v16473_v35 = vpop.f32.mrf.mxu0  ;;  %v8447_v46 = vadd.f32 %v16393_v48, %v20638_v61  ;;  %v20946_v58 = vadd.f32 %v8821_v29, %v8444_v41  ;;  %v9310_v41 = vld [vmem:[#allocation3 + $0x167] sm:$0xff]  ;;  %v9313_v48 = vld [vmem:[#allocation3 + $0x17f] sm:$0xff] }
 0x55f   :  { %v8128_v43 = vpop.f32.mrf.mxu1 }
 0x560   :  { %v8824_v10 = vpop.f32.mrf.mxu0  ;;  %v8445_v32 = vadd.f32 %v8128_v43, %v20642_v50  ;;  %v20953_v22 = vadd.f32 %v16473_v35, %v8447_v46  ;;  %v10017_v43 = vld [vmem:[#allocation3 + $0x171] sm:$0xff] }
 0x561   :  { %v16396_v23 = vpop.f32.mrf.mxu1  ;;  %16587 = vmatmul.mubr.msk.bf16.gmra.mxu1 %vm17237_vm2, %v20948_v1  ;;  %v9311_v35 = vld [vmem:[#allocation3 + $0x16f] sm:$0xff]  ;;  %v14538_v46 = vpack.c.bf16 %v10017_v43, %v10016_v54 }
 0x562   :  { %v16476_v37 = vpop.f32.mrf.mxu0  ;;  %16667 = vmatmul.mubr.msk.bf16.gmra.mxu0 %vm17394_vm4, %v14532_v9  ;;  %v8450_v61 = vadd.f32 %v16396_v23, %v20649_v56  ;;  %16590 = vmatprep.mubr.msk.bf16.mxu1 %vm17237_vm2, %v14431_v62  ;;  %v20964_v50 = vadd.f32 %v8824_v10, %v8445_v32  ;;  %v20972_v10 = vpack.c.bf16 %v9311_v35, %v9310_v41  ;;  %v10020_v43 = vld [vmem:[#allocation3 + $0x189] sm:$0xff] }
 0x563   :  { %16670 = vmatprep.mubr.msk.bf16.mxu0 %vm17394_vm4, %v20655_v7  ;;  %v8141_v9 = vpop.f32.mrf.mxu1  ;;  %v9312_v7 = vld [vmem:[#allocation3 + $0x177] sm:$0xff]  ;;  %v9314_v35 = vld [vmem:[#allocation3 + $0x187] sm:$0xff] }
 0x564   :  { %v8837_v29 = vpop.f32.mrf.mxu0  ;;  %v8448_v19 = vadd.f32 %v8141_v9, %v20651_v59  ;;  %v20967_v33 = vadd.f32 %v16476_v37, %v8450_v61  ;;  %v14437_v37 = vpack.c.bf16 %v9313_v48, %v9312_v7 }
 0x565   :  { %v16397_v34 = vpop.f32.mrf.mxu1 }
 0x566   :  { %v16477_v8 = vpop.f32.mrf.mxu0  ;;  %v8451_v56 = vadd.f32 %v16397_v34, %v20653_v24  ;;  %v20970_v62 = vadd.f32 %v8837_v29, %v8448_v19  ;;  %v10021_v19 = vld [vmem:[#allocation3 + $0x191] sm:$0xff] }
 0x567   :  { %v8144_v32 = vpop.f32.mrf.mxu1  ;;  %v9315_v34 = vld [vmem:[#allocation3 + $0x18f] sm:$0xff] }
 0x568   :  { %v8840_v57 = vpop.f32.mrf.mxu0  ;;  %v8449_v23 = vadd.f32 %v8144_v32, %v20657_v0  ;;  %v20977_v61 = vadd.f32 %v16477_v8, %v8451_v56  ;;  %v9317_v56 = vld [vmem:[#allocation3 + $0x19f] sm:$0xff]  ;;  %v14544_v32 = vpack.c.bf16 %v10021_v19, %v10020_v43  ;;  %v10024_v19 = vld [vmem:[#allocation3 + $0x1a9] sm:$0xff] }
 0x569   :  { %v16400_v9 = vpop.f32.mrf.mxu1  ;;  %16591 = vmatmul.mubr.msk.bf16.gmra.mxu1 %vm17237_vm2, %v20972_v10 }
 0x56a   :  { %v16480_v59 = vpop.f32.mrf.mxu0  ;;  %16671 = vmatmul.mubr.msk.bf16.gmra.mxu0 %vm17394_vm4, %v14538_v46  ;;  %v8454_v24 = vadd.f32 %v16400_v9, %v20664_v3  ;;  %16594 = vmatprep.mubr.msk.bf16.mxu1 %vm17237_vm2, %v14437_v37  ;;  %v20988_v0 = vadd.f32 %v8840_v57, %v8449_v23  ;;  %v20996_v23 = vpack.c.bf16 %v9315_v34, %v9314_v35  ;;  %v9318_v34 = vld [vmem:[#allocation3 + $0x1a7] sm:$0xff] }
 0x56b   :  { %16674 = vmatprep.mubr.msk.bf16.mxu0 %vm17394_vm4, %v20670_v14  ;;  %v8157_v54 = vpop.f32.mrf.mxu1  ;;  %v9316_v14 = vld [vmem:[#allocation3 + $0x197] sm:$0xff] }
 0x56c   :  { %v8853_v29 = vpop.f32.mrf.mxu0  ;;  %v8452_v8 = vadd.f32 %v8157_v54, %v20666_v25  ;;  %v20991_v7 = vadd.f32 %v16480_v59, %v8454_v24  ;;  %v14443_v59 = vpack.c.bf16 %v9317_v56, %v9316_v14 }
 0x56d   :  { %v16401_v48 = vpop.f32.mrf.mxu1 }
 0x56e   :  { %v16481_v41 = vpop.f32.mrf.mxu0  ;;  %v8455_v3 = vadd.f32 %v16401_v48, %v20668_v15  ;;  %v20994_v37 = vadd.f32 %v8853_v29, %v8452_v8  ;;  %v10025_v8 = vld [vmem:[#allocation3 + $0x1b1] sm:$0xff] }
 0x56f   :  { %v8160_v57 = vpop.f32.mrf.mxu1  ;;  %v9319_v48 = vld [vmem:[#allocation3 + $0x1af] sm:$0xff] }
 0x570   :  { %v8856_v46 = vpop.f32.mrf.mxu0  ;;  %v8453_v9 = vadd.f32 %v8160_v57, %v20672_v27  ;;  %v21001_v24 = vadd.f32 %v16481_v41, %v8455_v3  ;;  %v9321_v3 = vld [vmem:[#allocation3 + $0x1bf] sm:$0xff]  ;;  %v14550_v57 = vpack.c.bf16 %v10025_v8, %v10024_v19  ;;  %v10028_v8 = vld [vmem:[#allocation3 + $0x1c9] sm:$0xff] }
 0x571   :  { %v16404_v54 = vpop.f32.mrf.mxu1  ;;  %16595 = vmatmul.mubr.msk.bf16.gmra.mxu1 %vm17237_vm2, %v20996_v23 }
 0x572   :  { %v16484_v25 = vpop.f32.mrf.mxu0  ;;  %16675 = vmatmul.mubr.msk.bf16.gmra.mxu0 %vm17394_vm4, %v14544_v32  ;;  %v8458_v15 = vadd.f32 %v16404_v54, %v20679_v55  ;;  %16598 = vmatprep.mubr.msk.bf16.mxu1 %vm17237_vm2, %v14443_v59  ;;  %v21012_v27 = vadd.f32 %v8856_v46, %v8453_v9  ;;  %v21020_v9 = vpack.c.bf16 %v9319_v48, %v9318_v34 }
 0x573   :  { %16678 = vmatprep.mubr.msk.bf16.mxu0 %vm17394_vm4, %v20685_v42  ;;  %v8173_v43 = vpop.f32.mrf.mxu1  ;;  %v9320_v42 = vld [vmem:[#allocation3 + $0x1b7] sm:$0xff] }
 0x574   :  { %v8869_v29 = vpop.f32.mrf.mxu0  ;;  %v8456_v41 = vadd.f32 %v8173_v43, %v20681_v13  ;;  %v21015_v14 = vadd.f32 %v16484_v25, %v8458_v15  ;;  %v14449_v25 = vpack.c.bf16 %v9321_v3, %v9320_v42  ;;  %v9323_v42 = vld [vmem:[#allocation3 + $0x1cf] sm:$0xff] }
 0x575   :  { %v16405_v56 = vpop.f32.mrf.mxu1 }
 0x576   :  { %v16485_v35 = vpop.f32.mrf.mxu0  ;;  %v8459_v55 = vadd.f32 %v16405_v56, %v20683_v39  ;;  %v21018_v59 = vadd.f32 %v8869_v29, %v8456_v41  ;;  %v10029_v41 = vld [vmem:[#allocation3 + $0x1d1] sm:$0xff]  ;;  %v9322_v56 = vld [vmem:[#allocation3 + $0x1c7] sm:$0xff] }
 0x577   :  { %v8176_v46 = vpop.f32.mrf.mxu1 }
 0x578   :  { %v8872_v32 = vpop.f32.mrf.mxu0  ;;  %24223 = vst [vmem:[#allocation74_spill] sm:$0xff] %v21018_v59  ;;  %v8457_v54 = vadd.f32 %v8176_v46, %v20687_v45  ;;  %v21025_v15 = vadd.f32 %v16485_v35, %v8459_v55  ;;  %v24226_v35 = vld [vmem:[#allocation23_spill] sm:$0xff] }
 0x579   :  { %v16408_v43 = vpop.f32.mrf.mxu1  ;;  %16599 = vmatmul.mubr.msk.bf16.gmra.mxu1 %vm17237_vm2, %v21020_v9 }
 0x57a   :  { %v16488_v13 = vpop.f32.mrf.mxu0  ;;  %16679 = vmatmul.mubr.msk.bf16.gmra.mxu0 %vm17394_vm4, %v14550_v57  ;;  %24224 = vst [vmem:[#allocation62_spill] sm:$0xff] %v21025_v15  ;;  %v8462_v39 = vadd.f32 %v16408_v43, %v20696_v40  ;;  %16602 = vmatprep.mubr.msk.bf16.mxu1 %vm17237_vm2, %v14449_v25  ;;  %v21036_v45 = vadd.f32 %v8872_v32, %v8457_v54  ;;  %v9325_v57 = vld [vmem:[#allocation3 + $0x1df] sm:$0xff]  ;;  %v24227_v40 = vld [vmem:[#allocation48_spill] sm:$0xff] }
 0x57b   :  { %16682 = vmatprep.mubr.msk.bf16.mxu0 %vm17394_vm4, %v20703_v31  ;;  %v8189_v19 = vpop.f32.mrf.mxu1  ;;  %v9324_v31 = vld [vmem:[#allocation3 + $0x1d7] sm:$0xff]  ;;  %v14556_v15 = vpack.c.bf16 %v10029_v41, %v10028_v8  ;;  %v21044_v54 = vpack.c.bf16 %v9323_v42, %v9322_v56 }
 0x57c   :  { %v8885_v29 = vpop.f32.mrf.mxu0  ;;  %24225 = vst [vmem:[#allocation27_spill] sm:$0xff] %v21036_v45  ;;  %v8460_v34 = vadd.f32 %v8189_v19, %v24226_v35  ;;  %v21039_v3 = vadd.f32 %v16488_v13, %v8462_v39  ;;  %v24228_v45 = vld [vmem:[#allocation69_spill] sm:$0xff]  ;;  %v14455_v13 = vpack.c.bf16 %v9325_v57, %v9324_v31  ;;  %v9327_v31 = vld [vmem:[#allocation3 + $0x1ef] sm:$0xff] }
 0x57d   :  { %v16409_v55 = vpop.f32.mrf.mxu1 }
 0x57e   :  { %v16489_v48 = vpop.f32.mrf.mxu0  ;;  %v8463_v46 = vadd.f32 %v16409_v55, %v24227_v40  ;;  %v21042_v25 = vadd.f32 %v8885_v29, %v8460_v34  ;;  %v24230_v29 = vld [vmem:[#allocation73_spill] sm:$0xff]  ;;  %v10032_v34 = vld [vmem:[#allocation3 + $0x1e9] sm:$0xff] }
 0x57f   :  { %v8192_v32 = vpop.f32.mrf.mxu1  ;;  %v9326_v55 = vld [vmem:[#allocation3 + $0x1e7] sm:$0xff] }
 0x580   :  { %v8888_v43 = vpop.f32.mrf.mxu0  ;;  %v8461_v59 = vadd.f32 %v8192_v32, %v24228_v45  ;;  %v21049_v39 = vadd.f32 %v16489_v48, %v8463_v46  ;;  %v10033_v48 = vld [vmem:[#allocation3 + $0x1f1] sm:$0xff]  ;;  %v9329_v46 = vld [vmem:[#allocation3 + $0x1ff] sm:$0xff] }
 0x581   :  { %v16412_v35 = vpop.f32.mrf.mxu1  ;;  %16603 = vmatmul.mubr.msk.bf16.gmra.mxu1 %vm17237_vm2, %v21044_v54 }
 0x582   :  { %v16492_v19 = vpop.f32.mrf.mxu0  ;;  %16683 = vmatmul.mubr.msk.bf16.gmra.mxu0 %vm17394_vm4, %v14556_v15  ;;  %24229 = vst [vmem:[#allocation76_spill] sm:$0xff] %v21049_v39  ;;  %v8466_v8 = vadd.f32 %v16412_v35, %v24230_v29  ;;  %16606 = vmatprep.mubr.msk.bf16.mxu1 %vm17237_vm2, %v14455_v13  ;;  %v21060_v45 = vadd.f32 %v8888_v43, %v8461_v59 }
 0x583   :  { %16686 = vmatprep.mubr.msk.bf16.mxu0 %vm17394_vm4, %v20718_v5  ;;  %v8205_v15 = vpop.f32.mrf.mxu1  ;;  %v9328_v5 = vld [vmem:[#allocation3 + $0x1f7] sm:$0xff]  ;;  %v14562_v29 = vpack.c.bf16 %v10033_v48, %v10032_v34  ;;  %v21068_v43 = vpack.c.bf16 %v9327_v31, %v9326_v55  ;;  %v10036_v48 = vld [vmem:[#allocation3 + $0x209] sm:$0xff] }
 0x584   :  { %v8901_v41 = vpop.f32.mrf.mxu0  ;;  %24231 = vst [vmem:[#allocation78_spill] sm:$0xff] %v21060_v45  ;;  %v8464_v56 = vadd.f32 %v8205_v15, %v20714_v38  ;;  %v21063_v57 = vadd.f32 %v16492_v19, %v8466_v8  ;;  %v24233_v45 = vld [vmem:[#allocation71_spill] sm:$0xff]  ;;  %v21073_v19 = vpack.c.bf16 %v9329_v46, %v9328_v5  ;;  %v11377_v46 = vld [vmem:[#allocation3 + $0x30] sm:$0xff] }
 0x585   :  { %v16413_v40 = vpop.f32.mrf.mxu1  ;;  %v11376_v5 = vld [vmem:[#allocation3 + $0x28] sm:$0xff] }
 0x586   :  { %v16493_v42 = vpop.f32.mrf.mxu0  ;;  %v8467_v32 = vadd.f32 %v16413_v40, %v20716_v51  ;;  %v21066_v13 = vadd.f32 %v8901_v41, %v8464_v56  ;;  %24234 = vst [vmem:[#allocation33_spill] sm:$0xff] %v21073_v19  ;;  %v10037_v56 = vld [vmem:[#allocation3 + $0x211] sm:$0xff] }
 0x587   :  { %v8208_v59 = vpop.f32.mrf.mxu1  ;;  %v9331_v40 = vld [vmem:[#allocation3 + $0x20f] sm:$0xff] }
 0x588   :  { %v8904_v35 = vpop.f32.mrf.mxu0  ;;  %24232 = vst [vmem:[#allocation75_spill] sm:$0xff] %v21066_v13  ;;  %v8465_v39 = vadd.f32 %v8208_v59, %v24233_v45  ;;  %v21075_v8 = vadd.f32 %v16493_v42, %v8467_v32  ;;  %v9330_v42 = vld [vmem:[#allocation3 + $0x207] sm:$0xff]  ;;  %v24237_v32 = vld [vmem:[#allocation49_spill] sm:$0xff] }
 0x589   :  { %v16416_v15 = vpop.f32.mrf.mxu1  ;;  %16607 = vmatmul.mubr.msk.bf16.gmra.mxu1 %vm17237_vm2, %v21068_v43 }
 0x58a   :  { %v16496_v38 = vpop.f32.mrf.mxu0  ;;  %16687 = vmatmul.mubr.msk.bf16.gmra.mxu0 %vm17394_vm4, %v14562_v29  ;;  %24235 = vst [vmem:[#allocation80_spill] sm:$0xff] %v21075_v8  ;;  %v8470_v51 = vadd.f32 %v16416_v15, %v20727_v28  ;;  %16610 = vmatprep.mubr.msk.bf16.mxu1 %vm17237_vm2, %v21073_v19  ;;  %v21087_v45 = vadd.f32 %v8904_v35, %v8465_v39  ;;  %v24240_v8 = vld [vmem:[#allocation47_spill] sm:$0xff] }
 0x58b   :  { %16690 = vmatprep.mubr.msk.bf16.mxu0 %vm17394_vm4, %v20733_v49  ;;  %v8221_v34 = vpop.f32.mrf.mxu1  ;;  %v14568_v15 = vpack.c.bf16 %v10037_v56, %v10036_v48  ;;  %v21095_v35 = vpack.c.bf16 %v9331_v40, %v9330_v42  ;;  %v11378_v42 = vld [vmem:[#allocation3 + $0x38] sm:$0xff] }
 0x58c   :  { %v8917_v41 = vpop.f32.mrf.mxu0  ;;  %24236 = vst [vmem:[#allocation79_spill] sm:$0xff] %v21087_v45  ;;  %v8468_v55 = vadd.f32 %v8221_v34, %v20729_v30  ;;  %v21090_v49 = vadd.f32 %v16496_v38, %v8470_v51  ;;  %v11436_v45 = vpack.c.bf16 %v11377_v46, %v11376_v5  ;;  %v24242_v51 = vld [vmem:[#allocation24_spill] sm:$0xff]  ;;  %v10683_v46 = vld [vmem:[#allocation3 + $0x3f] sm:$0xff] }
 0x58d   :  { %v16417_v28 = vpop.f32.mrf.mxu1  ;;  %24239 = vst [vmem:[#allocation32_spill] sm:$0xff] %v21095_v35 }
 0x58e   :  { %v16497_v31 = vpop.f32.mrf.mxu0  ;;  %v8471_v29 = vadd.f32 %v16417_v28, %v24237_v32  ;;  %v21093_v19 = vadd.f32 %v8917_v41, %v8468_v55  ;;  %v11379_v55 = vld [vmem:[#allocation3 + $0x40] sm:$0xff]  ;;  %v11380_v28 = vld [vmem:[#allocation3 + $0x48] sm:$0xff]  ;;  %v11381_v32 = vld [vmem:[#allocation3 + $0x50] sm:$0xff] }
 0x58f   :  { %v8224_v39 = vpop.f32.mrf.mxu1  ;;  %v11438_v44 = vpack.c.bf16 %v11381_v32, %v11380_v28  ;;  %v10687_v32 = vld [vmem:[#allocation3 + $0x5f] sm:$0xff] }
 0x590   :  { %v8920_v59 = vpop.f32.mrf.mxu0  ;;  %24238 = vst [vmem:[#allocation50_spill] sm:$0xff] %v21093_v19  ;;  %v8469_v13 = vadd.f32 %v8224_v39, %v24240_v8  ;;  %v21100_v34 = vadd.f32 %v16497_v31, %v8471_v29  ;;  %v10682_v31 = vld [vmem:[#allocation3 + $0x37] sm:$0xff] }
 0x591   :  { %v16420_v38 = vpop.f32.mrf.mxu1  ;;  %16611 = vmatmul.mubr.msk.bf16.gmra.mxu1 %vm17237_vm2, %v21095_v35 }
 0x592   :  { %v16500_v30 = vpop.f32.mrf.mxu0  ;;  %16691 = vmatmul.mubr.msk.bf16.gmra.mxu0 %vm17394_vm4, %v14568_v15  ;;  %24241 = vst [vmem:[#allocation15_spill] sm:$0xff] %v21100_v34  ;;  %v8474_v41 = vadd.f32 %v16420_v38, %v24242_v51  ;;  %16710 = vmatprep.mubr.msk.bf16.mxu1 %vm17237_vm2, %v20752_v36  ;;  %v21109_v8 = vadd.f32 %v8920_v59, %v8469_v13  ;;  %v24244_v15 = vld [vmem:[#allocation31_spill] sm:$0xff]  ;;  %v24245_v34 = vld [vmem:[#allocation28_spill] sm:$0xff] }
 0x593   :  { %16790 = vmatprep.mubr.bf16.mxu0 %v11436_v45  ;;  %v8237_v56 = vpop.f32.mrf.mxu1  ;;  %v11437_v51 = vpack.c.bf16 %v11379_v55, %v11378_v42  ;;  %v14582_v59 = vpack.c.bf16 %v10683_v46, %v10682_v31  ;;  %v11383_v31 = vld [vmem:[#allocation3 + $0x60] sm:$0xff]  ;;  %v24249_v46 = vld [vmem:[#allocation29_spill] sm:$0xff] }
 0x594   :  { %v8933_v48 = vpop.f32.mrf.mxu0  ;;  %24243 = vst [vmem:[#allocation82_spill] sm:$0xff] %v21109_v8  ;;  %v8472_v40 = vadd.f32 %v8237_v56, %v20748_v6  ;;  %v21112_v45 = vadd.f32 %v16500_v30, %v8474_v41  ;;  %v17082_v8 = vld [vmem:[#allocation9 + $0x230] sm:$0xff]   ;;  %v24247_v30 = vld [vmem:[#allocation30_spill] sm:$0xff] }
 0x595   :  { %v16421_v29 = vpop.f32.mrf.mxu1 }
 0x596   :  { %v16501_v5 = vpop.f32.mrf.mxu0  ;;  %v8475_v39 = vadd.f32 %v16421_v29, %v24244_v15  ;;  %v21115_v36 = vadd.f32 %v8933_v48, %v8472_v40  ;;  %v11382_v48 = vld [vmem:[#allocation3 + $0x58] sm:$0xff]  ;;  %v11385_v29 = vld [vmem:[#allocation3 + $0x70] sm:$0xff] }
 0x597   :  { %v8240_v13 = vpop.f32.mrf.mxu1  ;;  %v10686_v40 = vld [vmem:[#allocation3 + $0x57] sm:$0xff] }
 0x598   :  { %v8936_v38 = vpop.f32.mrf.mxu0  ;;  %v8473_v19 = vadd.f32 %v8240_v13, %v24245_v34  ;;  %v21118_v56 = vadd.f32 %v16501_v5, %v8475_v39  ;;  %v17083_v5 = vld [vmem:[#allocation9 + $0x228] sm:$0xff]   ;;  %v14588_v13 = vpack.c.bf16 %v10687_v32, %v10686_v40  ;;  %v11387_v40 = vld [vmem:[#allocation3 + $0x80] sm:$0xff] }
 0x599   :  { %v16424_v35 = vpop.f32.mrf.mxu1  ;;  %16711 = vmatmul.mubr.msk.bf16.vlgmr.msra.gmra.mxu1 %vm17237_vm2, %v14582_v59  ;;  %v24254_v32 = vld [vmem:[#allocation35_spill] sm:$0xff] }
 0x59a   :  { %v16504_v6 = vpop.f32.mrf.mxu0  ;;  %16791 = vmatmul.mubr.bf16.vlgmr.msra.gmra.mxu0 %v11437_v51  ;;  %24246 = vst [vmem:[#allocation38_spill] sm:$0xff] %v21118_v56  ;;  %v8478_v41 = vadd.f32 %v16424_v35, %v24247_v30  ;;  %16714 = vmatprep.mubr.msk.bf16.mxu1 %vm17237_vm2, %v20775_v2  ;;  %v21127_v34 = vadd.f32 %v8936_v38, %v8473_v19  ;;  %v11384_v35 = vld [vmem:[#allocation3 + $0x68] sm:$0xff]  ;;  %v17084_v30 = vld [vmem:[#allocation9 + $0x220] sm:$0xff]  }
 0x59b   :  { %16794 = vmatprep.mubr.bf16.mxu0 %v11438_v44  ;;  %16855 = vmatpush3.bf16.msra.mxu1 %v20834_v52  ;;  %v8253_v55 = vpop.f32.mrf.mxu1  ;;  %v11439_v51 = vpack.c.bf16 %v11383_v31, %v11382_v48  ;;  %v11440_v59 = vpack.c.bf16 %v11385_v29, %v11384_v35 }
 0x59c   :  { %v8949_v42 = vpop.f32.mrf.mxu0  ;;  %24248 = vst [vmem:[#allocation37_spill] sm:$0xff] %v21127_v34  ;;  %16856 = vmatprep.subr.bf16.mxu1 %v17082_v8  ;;  %v8476_v28 = vadd.f32 %v8253_v55, %v24249_v46  ;;  %v21130_v15 = vadd.f32 %v16504_v6, %v8478_v41  ;;  %v24250_v55 = vld [vmem:[#allocation81_spill] sm:$0xff] }
 0x59d   :  { %v16425_v39 = vpop.f32.mrf.mxu1 }
 0x59e   :  { %v16505_v44 = vpop.f32.mrf.mxu0  ;;  %v8479_v2 = vadd.f32 %v16425_v39, %v20773_v16  ;;  %v21133_v19 = vadd.f32 %v8949_v42, %v8476_v28  ;;  %v24252_v16 = vld [vmem:[#allocation36_spill] sm:$0xff]  ;;  %v11386_v42 = vld [vmem:[#allocation3 + $0x78] sm:$0xff] }
 0x59f   :  { %16857 = vmatpush3.bf16.msra.mxu1 %v17082_v8  ;;  %v8256_v38 = vpop.f32.mrf.mxu1  ;;  %v10690_v28 = vld [vmem:[#allocation3 + $0x77] sm:$0xff]  ;;  %v10691_v39 = vld [vmem:[#allocation3 + $0x7f] sm:$0xff] }
 0x5a0   :  { %v8952_v52 = vpop.f32.mrf.mxu0  ;;  %16858 = vmatprep.subr.bf16.mxu1 %v17083_v5  ;;  %v8477_v46 = vadd.f32 %v8256_v38, %v24250_v55  ;;  %v21136_v56 = vadd.f32 %v16505_v44, %v8479_v2  ;;  %v17085_v44 = vld [vmem:[#allocation9 + $0x218] sm:$0xff]   ;;  %v11388_v2 = vld [vmem:[#allocation3 + $0x88] sm:$0xff] }
 0x5a1   :  { %v16428_v6 = vpop.f32.mrf.mxu1  ;;  %16715 = vmatmul.mubr.msk.bf16.gmra.mxu1 %vm17237_vm2, %v14588_v13 }
 0x5a2   :  { %v16508_v34 = vpop.f32.mrf.mxu0  ;;  %16795 = vmatmul.mubr.bf16.gmra.mxu0 %v11439_v51  ;;  %24251 = vst [vmem:[#allocation83_spill] sm:$0xff] %v21136_v56  ;;  %v8482_v8 = vadd.f32 %v16428_v6, %v24252_v16  ;;  %16718 = vmatprep.mubr.msk.bf16.mxu1 %vm17237_vm2, %v20796_v47  ;;  %v21144_v48 = vadd.f32 %v8952_v52, %v8477_v46  ;;  %v11389_v51 = vld [vmem:[#allocation3 + $0x90] sm:$0xff] }
 0x5a3   :  { %16798 = vmatprep.mubr.bf16.mxu0 %v11440_v59  ;;  %16859 = vmatpush3.bf16.msra.mxu1 %v17083_v5  ;;  %v8269_v31 = vpop.f32.mrf.mxu1  ;;  %v11441_v5 = vpack.c.bf16 %v11387_v40, %v11386_v42  ;;  %v14594_v46 = vpack.c.bf16 %v10691_v39, %v10690_v28  ;;  %v11442_v6 = vpack.c.bf16 %v11389_v51, %v11388_v2  ;;  %v17086_v16 = vld [vmem:[#allocation9 + $0x210] sm:$0xff]   ;;  %v11391_v28 = vld [vmem:[#allocation3 + $0xa0] sm:$0xff] }
 0x5a4   :  { %v8965_v41 = vpop.f32.mrf.mxu0  ;;  %24253 = vst [vmem:[#allocation51_spill] sm:$0xff] %v21144_v48  ;;  %16860 = vmatprep.subr.bf16.mxu1 %v17084_v30  ;;  %v8480_v35 = vadd.f32 %v8269_v31, %v24254_v32  ;;  %v21147_v38 = vadd.f32 %v16508_v34, %v8482_v8  ;;  %v24255_v31 = vld [vmem:[#allocation34_spill] sm:$0xff]  ;;  %v24258_v39 = vld [vmem:[#allocation84_spill] sm:$0xff] }
 0x5a5   :  { %v16429_v13 = vpop.f32.mrf.mxu1 }
 0x5a6   :  { %v16509_v29 = vpop.f32.mrf.mxu0  ;;  %v8483_v47 = vadd.f32 %v16429_v13, %v20794_v11  ;;  %v21150_v52 = vadd.f32 %v8965_v41, %v8480_v35  ;;  %v24256_v11 = vld [vmem:[#allocation39_spill] sm:$0xff]  ;;  %v11390_v41 = vld [vmem:[#allocation3 + $0x98] sm:$0xff] }
 0x5a7   :  { %16861 = vmatpush3.bf16.msra.mxu1 %v17084_v30  ;;  %v8272_v55 = vpop.f32.mrf.mxu1  ;;  %v10694_v35 = vld [vmem:[#allocation3 + $0x97] sm:$0xff]  ;;  %v10695_v13 = vld [vmem:[#allocation3 + $0x9f] sm:$0xff] }
 0x5a8   :  { %v8968_v59 = vpop.f32.mrf.mxu0  ;;  %16862 = vmatprep.subr.bf16.mxu1 %v17085_v44  ;;  %v8481_v32 = vadd.f32 %v8272_v55, %v24255_v31  ;;  %v21153_v56 = vadd.f32 %v16509_v29, %v8483_v47  ;;  %v17087_v29 = vld [vmem:[#allocation9 + $0x208] sm:$0xff]  }
 0x5a9   :  { %v16432_v34 = vpop.f32.mrf.mxu1  ;;  %16719 = vmatmul.mubr.msk.bf16.gmra.mxu1 %vm17237_vm2, %v14594_v46  ;;  %v11392_v47 = vld [vmem:[#allocation3 + $0xa8] sm:$0xff] }
 0x5aa   :  { %v16512_v48 = vpop.f32.mrf.mxu0  ;;  %16799 = vmatmul.mubr.bf16.gmra.mxu0 %v11441_v5  ;;  %v8486_v30 = vadd.f32 %v16432_v34, %v24256_v11  ;;  %16722 = vmatprep.mubr.msk.bf16.mxu1 %vm17237_vm2, %v20817_v4  ;;  %v21161_v42 = vadd.f32 %v8968_v59, %v8481_v32  ;;  %v11393_v5 = vld [vmem:[#allocation3 + $0xb0] sm:$0xff]  ;;  %v14600_v32 = vpack.c.bf16 %v10695_v13, %v10694_v35  ;;  %v17088_v11 = vld [vmem:[#allocation9 + $0x200] sm:$0xff]  }
 0x5ab   :  { %16802 = vmatprep.mubr.bf16.mxu0 %v11442_v6  ;;  %16863 = vmatpush3.bf16.msra.mxu1 %v17085_v44  ;;  %v8285_v40 = vpop.f32.mrf.mxu1  ;;  %v11443_v44 = vpack.c.bf16 %v11391_v28, %v11390_v41  ;;  %v11444_v34 = vpack.c.bf16 %v11393_v5, %v11392_v47  ;;  %v11395_v41 = vld [vmem:[#allocation3 + $0xc0] sm:$0xff]  ;;  %v10698_v28 = vld [vmem:[#allocation3 + $0xb7] sm:$0xff]  ;;  %v11396_v47 = vld [vmem:[#allocation3 + $0xc8] sm:$0xff] }
 0x5ac   :  { %v8981_v8 = vpop.f32.mrf.mxu0  ;;  %24257 = vst [vmem:[#allocation42_spill] sm:$0xff] %v21161_v42  ;;  %16864 = vmatprep.subr.bf16.mxu1 %v17086_v16  ;;  %v8484_v2 = vadd.f32 %v8285_v40, %v24258_v39  ;;  %v21164_v55 = vadd.f32 %v16512_v48, %v8486_v30  ;;  %v24260_v35 = vld [vmem:[#allocation86_spill] sm:$0xff]  ;;  %v11397_v5 = vld [vmem:[#allocation3 + $0xd0] sm:$0xff] }
 0x5ad   :  { %v16433_v46 = vpop.f32.mrf.mxu1  ;;  %v10699_v13 = vld [vmem:[#allocation3 + $0xbf] sm:$0xff] }
 0x5ae   :  { %v16513_v51 = vpop.f32.mrf.mxu0  ;;  %v8487_v4 = vadd.f32 %v16433_v46, %v20815_v26  ;;  %v21167_v59 = vadd.f32 %v8981_v8, %v8484_v2  ;;  %v11394_v8 = vld [vmem:[#allocation3 + $0xb8] sm:$0xff] }
 0x5af   :  { %16865 = vmatpush3.bf16.msra.mxu1 %v17086_v16  ;;  %v8288_v31 = vpop.f32.mrf.mxu1 }
 0x5b0   :  { %v8984_v6 = vpop.f32.mrf.mxu0  ;;  %16866 = vmatprep.subr.bf16.mxu1 %v17087_v29  ;;  %v8485_v40 = vadd.f32 %v8288_v31, %v20819_v12  ;;  %v21170_v42 = vadd.f32 %v16513_v51, %v8487_v4  ;;  %v24261_v4 = vld [vmem:[#allocation85_spill] sm:$0xff] }
 0x5b1   :  { %v16436_v48 = vpop.f32.mrf.mxu1  ;;  %16723 = vmatmul.mubr.msk.bf16.gmra.mxu1 %vm17237_vm2, %v14600_v32  ;;  %v14606_v32 = vpack.c.bf16 %v10699_v13, %v10698_v28  ;;  %v10702_v28 = vld [vmem:[#allocation3 + $0xd7] sm:$0xff] }
 0x5b2   :  { %v16516_v39 = vpop.f32.mrf.mxu0  ;;  %16803 = vmatmul.mubr.bf16.gmra.mxu0 %v11443_v44  ;;  %v8490_v26 = vadd.f32 %v16436_v48, %v20830_v60  ;;  %16726 = vmatprep.mubr.msk.bf16.mxu1 %vm17237_vm2, %v20840_v18  ;;  %v21178_v30 = vadd.f32 %v8984_v6, %v8485_v40  ;;  %v24262_v40 = vld [vmem:[#allocation14_spill] sm:$0xff] }
 0x5b3   :  { %16806 = vmatprep.mubr.bf16.mxu0 %v11444_v34  ;;  %16867 = vmatpush3.bf16.msra.mxu1 %v17087_v29  ;;  %v8301_v12 = vpop.f32.mrf.mxu1  ;;  %v11445_v29 = vpack.c.bf16 %v11395_v41, %v11394_v8  ;;  %v11446_v34 = vpack.c.bf16 %v11397_v5, %v11396_v47  ;;  %v11398_v8 = vld [vmem:[#allocation3 + $0xd8] sm:$0xff]  ;;  %v11399_v41 = vld [vmem:[#allocation3 + $0xe0] sm:$0xff]  ;;  %v11400_v5 = vld [vmem:[#allocation3 + $0xe8] sm:$0xff] }
 0x5b4   :  { %v8997_v16 = vpop.f32.mrf.mxu0  ;;  %24259 = vst [vmem:[#allocation61_spill] sm:$0xff] %v21178_v30  ;;  %16868 = vmatprep.subr.bf16.mxu1 %v17088_v11  ;;  %v8488_v2 = vadd.f32 %v8301_v12, %v24260_v35  ;;  %v21181_v60 = vadd.f32 %v16516_v39, %v8490_v26  ;;  %v10703_v47 = vld [vmem:[#allocation3 + $0xdf] sm:$0xff] }
 0x5b5   :  { %v16437_v46 = vpop.f32.mrf.mxu1 }
 0x5b6   :  { %v16517_v51 = vpop.f32.mrf.mxu0  ;;  %v8491_v44 = vadd.f32 %v16437_v46, %v24261_v4  ;;  %v21184_v6 = vadd.f32 %v8997_v16, %v8488_v2  ;;  %v24264_v2 = vld [vmem:[#allocation87_spill] sm:$0xff]  ;;  %v11401_v46 = vld [vmem:[#allocation3 + $0xf0] sm:$0xff] }
 0x5b7   :  { %16869 = vmatpush3.bf16.msra.mxu1 %v17088_v11  ;;  %v8304_v31 = vpop.f32.mrf.mxu1 }
 0x5b8   :  { %v9000_v18 = vpop.f32.mrf.mxu0  ;;  %v8489_v48 = vadd.f32 %v8304_v31, %v24262_v40  ;;  %v21187_v35 = vadd.f32 %v16517_v51, %v8491_v44  ;;  %v11447_v31 = vpack.c.bf16 %v11399_v41, %v11398_v8  ;;  %v24267_v40 = vld [vmem:[#allocation53_spill] sm:$0xff]  ;;  %v24269_v8 = vld [vmem:[#allocation56_spill] sm:$0xff] }
 0x5b9   :  { %v16440_v30 = vpop.f32.mrf.mxu1  ;;  %16727 = vmatmul.mubr.msk.bf16.gmra.mxu1 %vm17237_vm2, %v14606_v32  ;;  %v14612_v32 = vpack.c.bf16 %v10703_v47, %v10702_v28  ;;  %v11402_v28 = vld [vmem:[#allocation3 + $0xf8] sm:$0xff] }
 0x5ba   :  { %v16520_v12 = vpop.f32.mrf.mxu0  ;;  %16807 = vmatmul.mubr.bf16.gmra.mxu0 %v11445_v29  ;;  %v8494_v39 = vadd.f32 %v16440_v30, %v20854_v17  ;;  %16730 = vmatprep.mubr.msk.bf16.mxu1 %vm17237_vm2, %v20862_v20  ;;  %v21195_v11 = vadd.f32 %v9000_v18, %v8489_v48  ;;  %v24265_v30 = vld [vmem:[#allocation52_spill] sm:$0xff] }
 0x5bb   :  { %16810 = vmatprep.mubr.bf16.mxu0 %v11446_v34  ;;  %v8317_v16 = vpop.f32.mrf.mxu1  ;;  %v11448_v34 = vpack.c.bf16 %v11401_v46, %v11400_v5  ;;  %v10706_v47 = vld [vmem:[#allocation3 + $0xf7] sm:$0xff] }
 0x5bc   :  { %v9013_v26 = vpop.f32.mrf.mxu0  ;;  %24263 = vst [vmem:[#allocation43_spill] sm:$0xff] %v21195_v11  ;;  %v8492_v51 = vadd.f32 %v8317_v16, %v24264_v2  ;;  %v21198_v4 = vadd.f32 %v16520_v12, %v8494_v39 }
 0x5bd   :  { %v16441_v17 = vpop.f32.mrf.mxu1 }
 0x5be   :  { %v16521_v13 = vpop.f32.mrf.mxu0  ;;  %v8495_v44 = vadd.f32 %v16441_v17, %v24265_v30  ;;  %v21201_v20 = vadd.f32 %v9013_v26, %v8492_v51  ;;  %v11403_v51 = vld [vmem:[#allocation3 + $0x100] sm:$0xff]  ;;  %v11404_v30 = vld [vmem:[#allocation3 + $0x108] sm:$0xff] }
 0x5bf   :  { %v8320_v18 = vpop.f32.mrf.mxu1  ;;  %v10707_v17 = vld [vmem:[#allocation3 + $0xff] sm:$0xff] }
 0x5c0   :  { %v9016_v29 = vpop.f32.mrf.mxu0  ;;  %24266 = vst [vmem:[#allocation45_spill] sm:$0xff] %v21201_v20  ;;  %v8493_v48 = vadd.f32 %v8320_v18, %v24267_v40  ;;  %v21204_v16 = vadd.f32 %v16521_v13, %v8495_v44  ;;  %v24271_v13 = vld [vmem:[#allocation40_spill] sm:$0xff]  ;;  %v24272_v18 = vld [vmem:[#allocation54_spill] sm:$0xff]  ;;  %v11449_v40 = vpack.c.bf16 %v11403_v51, %v11402_v28  ;;  %v24277_v28 = vld [vmem:[#allocation57_spill] sm:$0xff] }
 0x5c1   :  { %v16444_v2 = vpop.f32.mrf.mxu1  ;;  %16731 = vmatmul.mubr.msk.bf16.gmra.mxu1 %vm17237_vm2, %v14612_v32  ;;  %v11405_v44 = vld [vmem:[#allocation3 + $0x110] sm:$0xff] }
 0x5c2   :  { %v16524_v11 = vpop.f32.mrf.mxu0  ;;  %16811 = vmatmul.mubr.bf16.gmra.mxu0 %v11447_v31  ;;  %24268 = vst [vmem:[#allocation58_spill] sm:$0xff] %v21204_v16  ;;  %v8498_v12 = vadd.f32 %v16444_v2, %v20875_v21  ;;  %16734 = vmatprep.mubr.msk.bf16.mxu1 %vm17237_vm2, %v24269_v8  ;;  %v21212_v26 = vadd.f32 %v9016_v29, %v8493_v48 }
 0x5c3   :  { %16814 = vmatprep.mubr.bf16.mxu0 %v11448_v34  ;;  %v8333_v41 = vpop.f32.mrf.mxu1  ;;  %v14618_v48 = vpack.c.bf16 %v10707_v17, %v10706_v47  ;;  %v11450_v8 = vpack.c.bf16 %v11405_v44, %v11404_v30  ;;  %v11407_v17 = vld [vmem:[#allocation3 + $0x130] sm:$0xff] }
 0x5c4   :  { %v9029_v39 = vpop.f32.mrf.mxu0  ;;  %24270 = vst [vmem:[#allocation63_spill] sm:$0xff] %v21212_v26  ;;  %v8496_v5 = vadd.f32 %v8333_v41, %v24271_v13  ;;  %v21215_v31 = vadd.f32 %v16524_v11, %v8498_v12  ;;  %v24274_v26 = vld [vmem:[#allocation55_spill] sm:$0xff]  ;;  %v24276_v11 = vld [vmem:[#allocation72_spill] sm:$0xff] }
 0x5c5   :  { %v16445_v21 = vpop.f32.mrf.mxu1 }
 0x5c6   :  { %v16525_v46 = vpop.f32.mrf.mxu0  ;;  %v8499_v32 = vadd.f32 %v16445_v21, %v24272_v18  ;;  %v21218_v2 = vadd.f32 %v9029_v39, %v8496_v5  ;;  %v24281_v18 = vld [vmem:[#allocation41_spill] sm:$0xff] }
 0x5c7   :  { %v8336_v29 = vpop.f32.mrf.mxu1 }
 0x5c8   :  { %v9032_v34 = vpop.f32.mrf.mxu0  ;;  %24273 = vst [vmem:[#allocation21_spill] sm:$0xff] %v21218_v2  ;;  %v8497_v16 = vadd.f32 %v8336_v29, %v24274_v26  ;;  %v21221_v41 = vadd.f32 %v16525_v46, %v8499_v32  ;;  %v24279_v26 = vld [vmem:[#allocation44_spill] sm:$0xff]  ;;  %v11406_v46 = vld [vmem:[#allocation3 + $0x128] sm:$0xff] }
 0x5c9   :  { %v16448_v13 = vpop.f32.mrf.mxu1  ;;  %16735 = vmatmul.mubr.msk.bf16.gmra.mxu1 %vm17237_vm2, %v14618_v48 }
 0x5ca   :  { %v16528_v20 = vpop.f32.mrf.mxu0  ;;  %16815 = vmatmul.mubr.bf16.gmra.mxu0 %v11449_v40  ;;  %24275 = vst [vmem:[#allocation59_spill] sm:$0xff] %v21221_v41  ;;  %v8502_v12 = vadd.f32 %v16448_v13, %v24276_v11  ;;  %16738 = vmatprep.mubr.msk.bf16.mxu1 %vm17237_vm2, %v24277_v28  ;;  %v21229_v39 = vadd.f32 %v9032_v34, %v8497_v16  ;;  %v24283_v13 = vld [vmem:[#allocation46_spill] sm:$0xff]  ;;  %v24284_v34 = vmov 0.0|0.0  }
 0x5cb   :  { %16818 = vmatprep.mubr.bf16.mxu0 %v11450_v8  ;;  %v8349_v51 = vpop.f32.mrf.mxu1  ;;  %v11451_v8 = vpack.c.bf16 %v11407_v17, %v11406_v46  ;;  %v11408_v46 = vld [vmem:[#allocation3 + $0x138] sm:$0xff]  ;;  %v11409_v17 = vld [vmem:[#allocation3 + $0x140] sm:$0xff] }
 0x5cc   :  { %v9045_v21 = vpop.f32.mrf.mxu0  ;;  %24278 = vst [vmem:[#allocation19_spill] sm:$0xff] %v21229_v39  ;;  %v8500_v47 = vadd.f32 %v8349_v51, %v24279_v26  ;;  %v21232_v30 = vadd.f32 %v16528_v20, %v8502_v12  ;;  %v24286_v20 = vld [vmem:[#allocation26_spill] sm:$0xff] }
 0x5cd   :  { %v16449_v44 = vpop.f32.mrf.mxu1 }
 0x5ce   :  { %v16529_v5 = vpop.f32.mrf.mxu0  ;;  %24280 = vst [vmem:[#allocation20_spill] sm:$0xff] %v21232_v30  ;;  %v8503_v32 = vadd.f32 %v16449_v44, %v24281_v18  ;;  %v21235_v29 = vadd.f32 %v9045_v21, %v8500_v47  ;;  %v24287_v44 = vld [vmem:[#allocation77_spill] sm:$0xff]  ;;  %v11452_v30 = vpack.c.bf16 %v11409_v17, %v11408_v46 }
 0x5cf   :  { %v8352_v48 = vpop.f32.mrf.mxu1  ;;  %v24289_v18 = vld [vmem:[#allocation17_spill] sm:$0xff] }
 0x5d0   :  { %v9048_v40 = vpop.f32.mrf.mxu0  ;;  %24282 = vst [vmem:[#allocation66_spill] sm:$0xff] %v21235_v29  ;;  %v8501_v11 = vadd.f32 %v8352_v48, %v24283_v13  ;;  %v21239_v28 = vadd.f32 %v16529_v5, %v8503_v32  ;;  %v11410_v32 = vld [vmem:[#allocation3 + $0x148] sm:$0xff]  ;;  %v11411_v13 = vld [vmem:[#allocation3 + $0x150] sm:$0xff]  ;;  %v24290_v29 = vld [vmem:[#allocation18_spill] sm:$0xff] }
 0x5d1   :  { %v16452_v51 = vpop.f32.mrf.mxu1  ;;  %16739 = vmatmul.mubr.bf16.gmra.mxu1 %v24284_v34  ;;  %v11412_v46 = vld [vmem:[#allocation3 + $0x158] sm:$0xff] }
 0x5d2   :  { %v16532_v16 = vpop.f32.mrf.mxu0  ;;  %16819 = vmatmul.mubr.bf16.gmra.mxu0 %v24284_v34  ;;  %24285 = vst [vmem:[#allocation22_spill] sm:$0xff] %v21239_v28  ;;  %v8506_v12 = vadd.f32 %v16452_v51, %v24286_v20  ;;  %16742 = vmatprep.mubr.msk.bf16.mxu1 %vm17237_vm2, %v24287_v44  ;;  %v21246_v21 = vadd.f32 %v9048_v40, %v8501_v11  ;;  %v24291_v11 = vld [vmem:[#allocation25_spill] sm:$0xff] }
 0x5d3   :  { %16822 = vmatprep.mubr.bf16.mxu0 %v11451_v8  ;;  %v8365_v47 = vpop.f32.mrf.mxu1  ;;  %v11453_v40 = vpack.c.bf16 %v11411_v13, %v11410_v32  ;;  %v10716_v17 = vld [vmem:[#allocation3 + $0x157] sm:$0xff]  ;;  %v10717_v32 = vld [vmem:[#allocation3 + $0x15f] sm:$0xff]  ;;  %v11414_v13 = vld [vmem:[#allocation3 + $0x168] sm:$0xff] }
 0x5d4   :  { %v9061_v26 = vpop.f32.mrf.mxu0  ;;  %24288 = vst [vmem:[#allocation65_spill] sm:$0xff] %v21246_v21  ;;  %v8504_v48 = vadd.f32 %v8365_v47, %v24289_v18  ;;  %v21249_v28 = vadd.f32 %v16532_v16, %v8506_v12  ;;  %v24292_v18 = vld [vmem:[#allocation60_spill] sm:$0xff] }
 0x5d5   :  { %v16453_v8 = vpop.f32.mrf.mxu1 }
 0x5d6   :  { %v16533_v5 = vpop.f32.mrf.mxu0  ;;  %v8507_v51 = vadd.f32 %v16453_v8, %v24290_v29  ;;  %v21252_v39 = vadd.f32 %v9061_v26, %v8504_v48  ;;  %v11415_v8 = vld [vmem:[#allocation3 + $0x170] sm:$0xff] }
 0x5d7   :  { %v8368_v44 = vpop.f32.mrf.mxu1 }
 0x5d8   :  { %v9064_v20 = vpop.f32.mrf.mxu0  ;;  %v8505_v21 = vadd.f32 %v8368_v44, %v24291_v11  ;;  %v21255_v2 = vadd.f32 %v16533_v5, %v8507_v51 }
 0x5d9   :  { %v16552_v47 = vpop.f32.mrf.mxu1  ;;  %16743 = vmatmul.mubr.msk.bf16.gmra.mxu1 %vm17237_vm2, %v24292_v18 }
 0x5da   :  { %v16632_v41 = vpop.f32.mrf.mxu0  ;;  %16823 = vmatmul.mubr.bf16.gmra.mxu0 %v11452_v30  ;;  %v9848_v29 = vadd.f32 %v16552_v47, %v20943_v63  ;;  %16746 = vmatprep.mubr.msk.bf16.mxu1 %vm17237_vm2, %v20948_v1  ;;  %v21264_v12 = vadd.f32 %v9064_v20, %v8505_v21  ;;  %v11413_v30 = vld [vmem:[#allocation3 + $0x160] sm:$0xff]  ;;  %v14633_v20 = vpack.c.bf16 %v10717_v32, %v10716_v17  ;;  %v11418_v32 = vld [vmem:[#allocation3 + $0x188] sm:$0xff] }
 0x5db   :  { %16826 = vmatprep.mubr.bf16.mxu0 %v11453_v40  ;;  %v9527_v26 = vpop.f32.mrf.mxu1  ;;  %v11454_v11 = vpack.c.bf16 %v11413_v30, %v11412_v46  ;;  %v11455_v47 = vpack.c.bf16 %v11415_v8, %v11414_v13  ;;  %v11417_v46 = vld [vmem:[#allocation3 + $0x180] sm:$0xff]  ;;  %v10720_v30 = vld [vmem:[#allocation3 + $0x177] sm:$0xff] }
 0x5dc   :  { %v10233_v16 = vpop.f32.mrf.mxu0  ;;  %24293 = vst [vmem:[#allocation68_spill] sm:$0xff] %v21264_v12  ;;  %v9846_v48 = vadd.f32 %v9527_v26, %v20946_v58  ;;  %v21267_v51 = vadd.f32 %v16632_v41, %v9848_v29  ;;  %v11419_v13 = vld [vmem:[#allocation3 + $0x190] sm:$0xff] }
 0x5dd   :  { %v16553_v63 = vpop.f32.mrf.mxu1 }
 0x5de   :  { %v16633_v5 = vpop.f32.mrf.mxu0  ;;  %v9849_v44 = vadd.f32 %v16553_v63, %v20953_v22  ;;  %v21270_v1 = vadd.f32 %v10233_v16, %v9846_v48 }
 0x5df   :  { %v9530_v21 = vpop.f32.mrf.mxu1 }
 0x5e0   :  { %v10236_v40 = vpop.f32.mrf.mxu0  ;;  %v9847_v18 = vadd.f32 %v9530_v21, %v20964_v50  ;;  %v21273_v58 = vadd.f32 %v16633_v5, %v9849_v44  ;;  %v11416_v50 = vld [vmem:[#allocation3 + $0x178] sm:$0xff] }
 0x5e1   :  { %v16556_v26 = vpop.f32.mrf.mxu1  ;;  %16747 = vmatmul.mubr.msk.bf16.gmra.mxu1 %vm17237_vm2, %v14633_v20  ;;  %v10721_v5 = vld [vmem:[#allocation3 + $0x17f] sm:$0xff]  ;;  %v11457_v20 = vpack.c.bf16 %v11419_v13, %v11418_v32 }
 0x5e2   :  { %v16636_v12 = vpop.f32.mrf.mxu0  ;;  %16827 = vmatmul.mubr.bf16.gmra.mxu0 %v11454_v11  ;;  %v9852_v22 = vadd.f32 %v16556_v26, %v20967_v33  ;;  %16750 = vmatprep.mubr.msk.bf16.mxu1 %vm17237_vm2, %v20972_v10  ;;  %v21281_v29 = vadd.f32 %v10236_v40, %v9847_v18  ;;  %v11456_v11 = vpack.c.bf16 %v11417_v46, %v11416_v50  ;;  %v10724_v50 = vld [vmem:[#allocation3 + $0x197] sm:$0xff] }
 0x5e3   :  { %16830 = vmatprep.mubr.bf16.mxu0 %v11455_v47  ;;  %v9543_v16 = vpop.f32.mrf.mxu1  ;;  %v14639_v21 = vpack.c.bf16 %v10721_v5, %v10720_v30  ;;  %v11423_v5 = vld [vmem:[#allocation3 + $0x1b0] sm:$0xff] }
 0x5e4   :  { %v10249_v41 = vpop.f32.mrf.mxu0  ;;  %v9850_v17 = vadd.f32 %v9543_v16, %v20970_v62  ;;  %v21284_v8 = vadd.f32 %v16636_v12, %v9852_v22  ;;  %v11421_v16 = vld [vmem:[#allocation3 + $0x1a0] sm:$0xff] }
 0x5e5   :  { %v16557_v33 = vpop.f32.mrf.mxu1 }
 0x5e6   :  { %v16637_v48 = vpop.f32.mrf.mxu0  ;;  %v9853_v63 = vadd.f32 %v16557_v33, %v20977_v61  ;;  %v21287_v10 = vadd.f32 %v10249_v41, %v9850_v17  ;;  %v10725_v17 = vld [vmem:[#allocation3 + $0x19f] sm:$0xff] }
 0x5e7   :  { %v9546_v40 = vpop.f32.mrf.mxu1 }
 0x5e8   :  { %v10252_v44 = vpop.f32.mrf.mxu0  ;;  %v9851_v47 = vadd.f32 %v9546_v40, %v20988_v0  ;;  %v21290_v62 = vadd.f32 %v16637_v48, %v9853_v63  ;;  %v11420_v0 = vld [vmem:[#allocation3 + $0x198] sm:$0xff]  ;;  %v11422_v48 = vld [vmem:[#allocation3 + $0x1a8] sm:$0xff] }
 0x5e9   :  { %v16560_v26 = vpop.f32.mrf.mxu1  ;;  %16751 = vmatmul.mubr.msk.bf16.gmra.mxu1 %vm17237_vm2, %v14639_v21  ;;  %v11458_v63 = vpack.c.bf16 %v11421_v16, %v11420_v0  ;;  %v11459_v40 = vpack.c.bf16 %v11423_v5, %v11422_v48  ;;  %v24294_v0 = vld [vmem:[#allocation74_spill] sm:$0xff] }
 0x5ea   :  { %v16640_v18 = vpop.f32.mrf.mxu0  ;;  %16831 = vmatmul.mubr.bf16.gmra.mxu0 %v11456_v11  ;;  %v9856_v61 = vadd.f32 %v16560_v26, %v20991_v7  ;;  %16754 = vmatprep.mubr.msk.bf16.mxu1 %vm17237_vm2, %v20996_v23  ;;  %v21298_v22 = vadd.f32 %v10252_v44, %v9851_v47  ;;  %v14645_v11 = vpack.c.bf16 %v10725_v17, %v10724_v50  ;;  %v11427_v17 = vld [vmem:[#allocation3 + $0x1d0] sm:$0xff]  ;;  %v24295_v5 = vld [vmem:[#allocation62_spill] sm:$0xff] }
 0x5eb   :  { %16834 = vmatprep.mubr.bf16.mxu0 %v11457_v20  ;;  %v9559_v41 = vpop.f32.mrf.mxu1 }
 0x5ec   :  { %v10265_v12 = vpop.f32.mrf.mxu0  ;;  %v9854_v46 = vadd.f32 %v9559_v41, %v20994_v37  ;;  %v21301_v32 = vadd.f32 %v16640_v18, %v9856_v61  ;;  %v10728_v41 = vld [vmem:[#allocation3 + $0x1b7] sm:$0xff] }
 0x5ed   :  { %v16561_v7 = vpop.f32.mrf.mxu1 }
 0x5ee   :  { %v16641_v30 = vpop.f32.mrf.mxu0  ;;  %v9857_v13 = vadd.f32 %v16561_v7, %v21001_v24  ;;  %v21304_v23 = vadd.f32 %v10265_v12, %v9854_v46  ;;  %v11425_v12 = vld [vmem:[#allocation3 + $0x1c0] sm:$0xff] }
 0x5ef   :  { %v9562_v44 = vpop.f32.mrf.mxu1  ;;  %v10729_v46 = vld [vmem:[#allocation3 + $0x1bf] sm:$0xff] }
 0x5f0   :  { %v10268_v33 = vpop.f32.mrf.mxu0  ;;  %v9855_v21 = vadd.f32 %v9562_v44, %v21012_v27  ;;  %v21307_v37 = vadd.f32 %v16641_v30, %v9857_v13  ;;  %v11424_v27 = vld [vmem:[#allocation3 + $0x1b8] sm:$0xff]  ;;  %v11426_v30 = vld [vmem:[#allocation3 + $0x1c8] sm:$0xff]  ;;  %v14651_v44 = vpack.c.bf16 %v10729_v46, %v10728_v41  ;;  %v11429_v41 = vld [vmem:[#allocation3 + $0x1e0] sm:$0xff] }
 0x5f1   :  { %v16564_v47 = vpop.f32.mrf.mxu1  ;;  %16755 = vmatmul.mubr.msk.bf16.gmra.mxu1 %vm17237_vm2, %v14645_v11  ;;  %v11461_v11 = vpack.c.bf16 %v11427_v17, %v11426_v30  ;;  %v10733_v30 = vld [vmem:[#allocation3 + $0x1df] sm:$0xff]  ;;  %v11430_v17 = vld [vmem:[#allocation3 + $0x1e8] sm:$0xff] }
 0x5f2   :  { %v16644_v20 = vpop.f32.mrf.mxu0  ;;  %16835 = vmatmul.mubr.bf16.gmra.mxu0 %v11458_v63  ;;  %v9860_v24 = vadd.f32 %v16564_v47, %v21015_v14  ;;  %16758 = vmatprep.mubr.msk.bf16.mxu1 %vm17237_vm2, %v21020_v9  ;;  %v21315_v26 = vadd.f32 %v10268_v33, %v9855_v21  ;;  %v11460_v63 = vpack.c.bf16 %v11425_v12, %v11424_v27  ;;  %v11428_v12 = vld [vmem:[#allocation3 + $0x1d8] sm:$0xff] }
 0x5f3   :  { %16838 = vmatprep.mubr.bf16.mxu0 %v11459_v40  ;;  %v9575_v61 = vpop.f32.mrf.mxu1  ;;  %v24296_v40 = vld [vmem:[#allocation27_spill] sm:$0xff] }
 0x5f4   :  { %v10281_v18 = vpop.f32.mrf.mxu0  ;;  %v9858_v16 = vadd.f32 %v9575_v61, %v24294_v0  ;;  %v21318_v48 = vadd.f32 %v16644_v20, %v9860_v24 }
 0x5f5   :  { %v16565_v14 = vpop.f32.mrf.mxu1 }
 0x5f6   :  { %v16645_v50 = vpop.f32.mrf.mxu0  ;;  %v9861_v7 = vadd.f32 %v16565_v14, %v24295_v5  ;;  %v21321_v9 = vadd.f32 %v10281_v18, %v9858_v16  ;;  %v10732_v16 = vld [vmem:[#allocation3 + $0x1d7] sm:$0xff] }
 0x5f7   :  { %v9578_v33 = vpop.f32.mrf.mxu1  ;;  %v11431_v14 = vld [vmem:[#allocation3 + $0x1f0] sm:$0xff] }
 0x5f8   :  { %v10284_v13 = vpop.f32.mrf.mxu0  ;;  %v9859_v21 = vadd.f32 %v9578_v33, %v24296_v40  ;;  %v21324_v61 = vadd.f32 %v16645_v50, %v9861_v7  ;;  %v24298_v7 = vld [vmem:[#allocation76_spill] sm:$0xff]  ;;  %v11463_v40 = vpack.c.bf16 %v11431_v14, %v11430_v17  ;;  %v11434_v17 = vld [vmem:[#allocation3 + $0x208] sm:$0xff] }
 0x5f9   :  { %v16568_v0 = vpop.f32.mrf.mxu1  ;;  %16759 = vmatmul.mubr.msk.bf16.gmra.mxu1 %vm17237_vm2, %v14651_v44  ;;  %v11462_v44 = vpack.c.bf16 %v11429_v41, %v11428_v12  ;;  %v11432_v41 = vld [vmem:[#allocation3 + $0x1f8] sm:$0xff]  ;;  %v11435_v14 = vld [vmem:[#allocation3 + $0x210] sm:$0xff] }
 0x5fa   :  { %v16648_v47 = vpop.f32.mrf.mxu0  ;;  %16839 = vmatmul.mubr.bf16.gmra.mxu0 %v11460_v63  ;;  %v9864_v20 = vadd.f32 %v16568_v0, %v21039_v3  ;;  %16762 = vmatprep.mubr.msk.bf16.mxu1 %vm17237_vm2, %v21044_v54  ;;  %v21332_v18 = vadd.f32 %v10284_v13, %v9859_v21  ;;  %v24299_v21 = vld [vmem:[#allocation78_spill] sm:$0xff] }
 0x5fb   :  { %16842 = vmatprep.mubr.bf16.mxu0 %v11461_v11  ;;  %v9591_v27 = vpop.f32.mrf.mxu1  ;;  %v14657_v11 = vpack.c.bf16 %v10733_v30, %v10732_v16  ;;  %v11433_v16 = vld [vmem:[#allocation3 + $0x200] sm:$0xff] }
 0x5fc   :  { %v10297_v24 = vpop.f32.mrf.mxu0  ;;  %24297 = vst [vmem:[#allocation70_spill] sm:$0xff] %v21332_v18  ;;  %v9862_v50 = vadd.f32 %v9591_v27, %v21042_v25  ;;  %v21335_v5 = vadd.f32 %v16648_v47, %v9864_v20 }
 0x5fd   :  { %v16569_v3 = vpop.f32.mrf.mxu1 }
 0x5fe   :  { %v16649_v46 = vpop.f32.mrf.mxu0  ;;  %v9865_v63 = vadd.f32 %v16569_v3, %v24298_v7  ;;  %v21338_v54 = vadd.f32 %v10297_v24, %v9862_v50  ;;  %v24300_v50 = vld [vmem:[#allocation75_spill] sm:$0xff] }
 0x5ff   :  { %v9594_v13 = vpop.f32.mrf.mxu1 }
 0x600   :  { %v10300_v33 = vpop.f32.mrf.mxu0  ;;  %v9863_v0 = vadd.f32 %v9594_v13, %v24299_v21  ;;  %v21341_v25 = vadd.f32 %v16649_v46, %v9865_v63  ;;  %v24301_v63 = vld [vmem:[#allocation80_spill] sm:$0xff]  ;;  %v11464_v13 = vpack.c.bf16 %v11433_v16, %v11432_v41 }
 0x601   :  { %v16572_v27 = vpop.f32.mrf.mxu1  ;;  %16763 = vmatmul.mubr.msk.bf16.gmra.mxu1 %vm17237_vm2, %v14657_v11  ;;  %v24304_v41 = vld [vmem:[#allocation32_spill] sm:$0xff] }
 0x602   :  { %v16652_v18 = vpop.f32.mrf.mxu0  ;;  %16843 = vmatmul.mubr.bf16.gmra.mxu0 %v11462_v44  ;;  %v9868_v47 = vadd.f32 %v16572_v27, %v21063_v57  ;;  %16766 = vmatprep.mubr.msk.bf16.mxu1 %vm17237_vm2, %v21068_v43  ;;  %v21349_v24 = vadd.f32 %v10300_v33, %v9863_v0  ;;  %v11465_v33 = vpack.c.bf16 %v11435_v14, %v11434_v17 }
 0x603   :  { %16846 = vmatprep.mubr.bf16.mxu0 %v11463_v40  ;;  %v9607_v12 = vpop.f32.mrf.mxu1  ;;  %v24302_v40 = vld [vmem:[#allocation79_spill] sm:$0xff] }
 0x604   :  { %v10313_v20 = vpop.f32.mrf.mxu0  ;;  %v9866_v46 = vadd.f32 %v9607_v12, %v24300_v50  ;;  %v21352_v3 = vadd.f32 %v16652_v18, %v9868_v47  ;;  %v24303_v50 = vld [vmem:[#allocation33_spill] sm:$0xff] }
 0x605   :  { %v16573_v7 = vpop.f32.mrf.mxu1 }
 0x606   :  { %v16653_v30 = vpop.f32.mrf.mxu0  ;;  %v9869_v57 = vadd.f32 %v16573_v7, %v24301_v63  ;;  %v21355_v11 = vadd.f32 %v10313_v20, %v9866_v46  ;;  %v24305_v46 = vld [vmem:[#allocation50_spill] sm:$0xff]  ;;  %v12012_v63 = vld [vmem:[#allocation3 + $0x29] sm:$0xff] }
 0x607   :  { %v9610_v43 = vpop.f32.mrf.mxu1 }
 0x608   :  { %v10316_v44 = vpop.f32.mrf.mxu0  ;;  %v9867_v21 = vadd.f32 %v9610_v43, %v24302_v40  ;;  %v21358_v27 = vadd.f32 %v16653_v30, %v9869_v57  ;;  %v12013_v57 = vld [vmem:[#allocation3 + $0x31] sm:$0xff] }
 0x609   :  { %v16576_v12 = vpop.f32.mrf.mxu1  ;;  %16767 = vmatmul.mubr.msk.bf16.gmra.mxu1 %vm17237_vm2, %v24303_v50 }
 0x60a   :  { %v16656_v0 = vpop.f32.mrf.mxu0  ;;  %16847 = vmatmul.mubr.bf16.gmra.mxu0 %v11464_v13  ;;  %v9872_v18 = vadd.f32 %v16576_v12, %v21090_v49  ;;  %16770 = vmatprep.mubr.msk.bf16.mxu1 %vm17237_vm2, %v24304_v41  ;;  %v21367_v20 = vadd.f32 %v10316_v44, %v9867_v21  ;;  %v24307_v13 = vld [vmem:[#allocation15_spill] sm:$0xff]  ;;  %v24309_v12 = vld [vmem:[#allocation82_spill] sm:$0xff]  ;;  %v14685_v44 = vpack.c.bf16 %v12013_v57, %v12012_v63 }
 0x60b   :  { %16850 = vmatprep.mubr.bf16.mxu0 %v11465_v33  ;;  %v9623_v16 = vpop.f32.mrf.mxu1  ;;  %v12014_v63 = vld [vmem:[#allocation3 + $0x39] sm:$0xff]  ;;  %v12015_v57 = vld [vmem:[#allocation3 + $0x41] sm:$0xff] }
 0x60c   :  { %v10329_v47 = vpop.f32.mrf.mxu0  ;;  %v9870_v17 = vadd.f32 %v9623_v16, %v24305_v46  ;;  %v21370_v14 = vadd.f32 %v16656_v0, %v9872_v18 }
 0x60d   :  { %v16577_v7 = vpop.f32.mrf.mxu1 }
 0x60e   :  { %v16657_v30 = vpop.f32.mrf.mxu0  ;;  %24306 = vst [vmem:[#allocation67_spill] sm:$0xff] %v21370_v14  ;;  %v9873_v43 = vadd.f32 %v16577_v7, %v24307_v13  ;;  %v21373_v49 = vadd.f32 %v10329_v47, %v9870_v17 }
 0x60f   :  { %v9626_v40 = vpop.f32.mrf.mxu1 }
 0x610   :  { %v10332_v33 = vpop.f32.mrf.mxu0  ;;  %24308 = vst [vmem:[#allocation23_spill] sm:$0xff] %v21373_v49  ;;  %v9871_v53 = vadd.f32 %v9626_v40, %v24309_v12  ;;  %v21377_v21 = vadd.f32 %v16657_v30, %v9873_v43  ;;  %v12016_v43 = vld [vmem:[#allocation3 + $0x49] sm:$0xff]  ;;  %v12017_v40 = vld [vmem:[#allocation3 + $0x51] sm:$0xff]  ;;  %v24313_v12 = vld [vmem:[#allocation38_spill] sm:$0xff] }
 0x611   :  { %v16580_v41 = vpop.f32.mrf.mxu1  ;;  %16771 = vmatmul.mubr.bf16.gmra.mxu1 %v24284_v34  ;;  %v14691_v14 = vpack.c.bf16 %v12017_v40, %v12016_v43  ;;  %v12020_v43 = vld [vmem:[#allocation3 + $0x69] sm:$0xff]  ;;  %v12021_v40 = vld [vmem:[#allocation3 + $0x71] sm:$0xff] }
 0x612   :  { %v16660_v50 = vpop.f32.mrf.mxu0  ;;  %16851 = vmatmul.mubr.bf16.gmra.mxu0 %v24284_v34  ;;  %24310 = vst [vmem:[#allocation48_spill] sm:$0xff] %v21377_v21  ;;  %v9876_v0 = vadd.f32 %v16580_v41, %v21112_v45  ;;  %16870 = vmatprep.mubr.msk.bf16.mxu1 %vm17394_vm4, %v14685_v44  ;;  %v21383_v47 = vadd.f32 %v10332_v33, %v9871_v53  ;;  %v24314_v33 = vld [vmem:[#allocation37_spill] sm:$0xff] }
 0x613   :  { %v9639_v46 = vpop.f32.mrf.mxu1  ;;  %v14688_v44 = vpack.c.bf16 %v12015_v57, %v12014_v63  ;;  %v12018_v57 = vld [vmem:[#allocation3 + $0x59] sm:$0xff] }
 0x614   :  { %v10345_v18 = vpop.f32.mrf.mxu0  ;;  %24312 = vst [vmem:[#allocation69_spill] sm:$0xff] %v21383_v47  ;;  %v9874_v17 = vadd.f32 %v9639_v46, %v21115_v36  ;;  %v21386_v13 = vadd.f32 %v16660_v50, %v9876_v0 }
 0x615   :  { %v16581_v30 = vpop.f32.mrf.mxu1 }
 0x616   :  { %v16661_v7 = vpop.f32.mrf.mxu0  ;;  %v9877_v21 = vadd.f32 %v16581_v30, %v24313_v12  ;;  %v21389_v41 = vadd.f32 %v10345_v18, %v9874_v17  ;;  %v12019_v30 = vld [vmem:[#allocation3 + $0x61] sm:$0xff] }
 0x617   :  { %v9642_v49 = vpop.f32.mrf.mxu1  ;;  %v24317_v12 = vld [vmem:[#allocation83_spill] sm:$0xff] }
 0x618   :  { %v10348_v45 = vpop.f32.mrf.mxu0  ;;  %v9875_v53 = vadd.f32 %v9642_v49, %v24314_v33  ;;  %v21392_v36 = vadd.f32 %v16661_v7, %v9877_v21 }
 0x619   :  { %v16584_v46 = vpop.f32.mrf.mxu1  ;;  %16871 = vmatmul.mubr.msk.bf16.vlgmr.msra.gmra.mxu1 %vm17394_vm4, %v14688_v44 }
 0x61a   :  { %v16664_v47 = vpop.f32.mrf.mxu0  ;;  %24315 = vst [vmem:[#allocation73_spill] sm:$0xff] %v21392_v36  ;;  %v9880_v50 = vadd.f32 %v16584_v46, %v21130_v15  ;;  %16874 = vmatprep.mubr.msk.bf16.mxu1 %vm17394_vm4, %v14691_v14  ;;  %v21399_v18 = vadd.f32 %v10348_v45, %v9875_v53  ;;  %v14694_v14 = vpack.c.bf16 %v12019_v30, %v12018_v57  ;;  %v24318_v45 = vld [vmem:[#allocation51_spill] sm:$0xff] }
 0x61b   :  { %v9655_v17 = vpop.f32.mrf.mxu1  ;;  %v14697_v36 = vpack.c.bf16 %v12021_v40, %v12020_v43  ;;  %v12023_v43 = vld [vmem:[#allocation3 + $0x81] sm:$0xff] }
 0x61c   :  { %v10361_v0 = vpop.f32.mrf.mxu0  ;;  %24316 = vst [vmem:[#allocation71_spill] sm:$0xff] %v21399_v18  ;;  %v9878_v63 = vadd.f32 %v9655_v17, %v21133_v19  ;;  %v21402_v21 = vadd.f32 %v16664_v47, %v9880_v50 }
 0x61d   :  { %v16585_v7 = vpop.f32.mrf.mxu1 }
 0x61e   :  { %v16665_v49 = vpop.f32.mrf.mxu0  ;;  %v9881_v44 = vadd.f32 %v16585_v7, %v24317_v12  ;;  %v21405_v33 = vadd.f32 %v10361_v0, %v9878_v63  ;;  %v12022_v7 = vld [vmem:[#allocation3 + $0x79] sm:$0xff]  ;;  %v12024_v12 = vld [vmem:[#allocation3 + $0x89] sm:$0xff] }
 0x61f   :  { %v9658_v46 = vpop.f32.mrf.mxu1 }
 0x620   :  { %v10364_v15 = vpop.f32.mrf.mxu0  ;;  %v9879_v53 = vadd.f32 %v9658_v46, %v24318_v45  ;;  %v21408_v19 = vadd.f32 %v16665_v49, %v9881_v44  ;;  %v12025_v44 = vld [vmem:[#allocation3 + $0x91] sm:$0xff] }
 0x621   :  { %v16588_v17 = vpop.f32.mrf.mxu1  ;;  %16875 = vmatmul.mubr.msk.bf16.gmra.mxu1 %vm17394_vm4, %v14694_v14 }
 0x622   :  { %v16668_v18 = vpop.f32.mrf.mxu0  ;;  %v9884_v47 = vadd.f32 %v16588_v17, %v21147_v38  ;;  %16878 = vmatprep.mubr.msk.bf16.mxu1 %vm17394_vm4, %v14697_v36  ;;  %v21415_v0 = vadd.f32 %v10364_v15, %v9879_v53  ;;  %v14700_v36 = vpack.c.bf16 %v12023_v43, %v12022_v7  ;;  %v24320_v15 = vld [vmem:[#allocation42_spill] sm:$0xff] }
 0x623   :  { %v9671_v63 = vpop.f32.mrf.mxu1  ;;  %v12026_v43 = vld [vmem:[#allocation3 + $0x99] sm:$0xff] }
 0x624   :  { %v10377_v50 = vpop.f32.mrf.mxu0  ;;  %24319 = vst [vmem:[#allocation49_spill] sm:$0xff] %v21415_v0  ;;  %v9882_v57 = vadd.f32 %v9671_v63, %v21150_v52  ;;  %v21418_v49 = vadd.f32 %v16668_v18, %v9884_v47  ;;  %v14703_v0 = vpack.c.bf16 %v12025_v44, %v12024_v12  ;;  %v12028_v44 = vld [vmem:[#allocation3 + $0xa9] sm:$0xff] }
 0x625   :  { %v16589_v40 = vpop.f32.mrf.mxu1 }
 0x626   :  { %v16669_v30 = vpop.f32.mrf.mxu0  ;;  %v9885_v46 = vadd.f32 %v16589_v40, %v21153_v56  ;;  %v21421_v14 = vadd.f32 %v10377_v50, %v9882_v57  ;;  %v12027_v40 = vld [vmem:[#allocation3 + $0xa1] sm:$0xff] }
 0x627   :  { %v9674_v45 = vpop.f32.mrf.mxu1 }
 0x628   :  { %v10380_v38 = vpop.f32.mrf.mxu0  ;;  %v9883_v53 = vadd.f32 %v9674_v45, %v24320_v15  ;;  %v21424_v52 = vadd.f32 %v16669_v30, %v9885_v46  ;;  %v12029_v46 = vld [vmem:[#allocation3 + $0xb1] sm:$0xff] }
 0x629   :  { %v16592_v63 = vpop.f32.mrf.mxu1  ;;  %16879 = vmatmul.mubr.msk.bf16.gmra.mxu1 %vm17394_vm4, %v14700_v36 }
 0x62a   :  { %v16672_v17 = vpop.f32.mrf.mxu0  ;;  %v9888_v18 = vadd.f32 %v16592_v63, %v21164_v55  ;;  %16882 = vmatprep.mubr.msk.bf16.mxu1 %vm17394_vm4, %v14703_v0  ;;  %v21431_v56 = vadd.f32 %v10380_v38, %v9883_v53  ;;  %v14706_v0 = vpack.c.bf16 %v12027_v40, %v12026_v43  ;;  %v24322_v38 = vld [vmem:[#allocation61_spill] sm:$0xff] }
 0x62b   :  { %v9687_v50 = vpop.f32.mrf.mxu1  ;;  %v12030_v40 = vld [vmem:[#allocation3 + $0xb9] sm:$0xff] }
 0x62c   :  { %v10393_v47 = vpop.f32.mrf.mxu0  ;;  %24321 = vst [vmem:[#allocation47_spill] sm:$0xff] %v21431_v56  ;;  %v9886_v57 = vadd.f32 %v9687_v50, %v21167_v59  ;;  %v21434_v30 = vadd.f32 %v16672_v17, %v9888_v18  ;;  %v14709_v56 = vpack.c.bf16 %v12029_v46, %v12028_v44  ;;  %v12032_v46 = vld [vmem:[#allocation3 + $0xc9] sm:$0xff] }
 0x62d   :  { %v16593_v12 = vpop.f32.mrf.mxu1 }
 0x62e   :  { %v16673_v7 = vpop.f32.mrf.mxu0  ;;  %v9889_v45 = vadd.f32 %v16593_v12, %v21170_v42  ;;  %v21437_v36 = vadd.f32 %v10393_v47, %v9886_v57  ;;  %v12031_v12 = vld [vmem:[#allocation3 + $0xc1] sm:$0xff] }
 0x62f   :  { %v9690_v15 = vpop.f32.mrf.mxu1 }
 0x630   :  { %v10396_v55 = vpop.f32.mrf.mxu0  ;;  %v9887_v53 = vadd.f32 %v9690_v15, %v24322_v38  ;;  %v21440_v59 = vadd.f32 %v16673_v7, %v9889_v45  ;;  %v12033_v45 = vld [vmem:[#allocation3 + $0xd1] sm:$0xff] }
 0x631   :  { %v16596_v50 = vpop.f32.mrf.mxu1  ;;  %16883 = vmatmul.mubr.msk.bf16.gmra.mxu1 %vm17394_vm4, %v14706_v0 }
 0x632   :  { %v16676_v63 = vpop.f32.mrf.mxu0  ;;  %v9892_v17 = vadd.f32 %v16596_v50, %v21181_v60  ;;  %16886 = vmatprep.mubr.msk.bf16.mxu1 %vm17394_vm4, %v14709_v56  ;;  %v21447_v42 = vadd.f32 %v10396_v55, %v9887_v53  ;;  %v14712_v56 = vpack.c.bf16 %v12031_v12, %v12030_v40  ;;  %v24325_v55 = vld [vmem:[#allocation43_spill] sm:$0xff] }
 0x633   :  { %v9703_v47 = vpop.f32.mrf.mxu1 }
 0x634   :  { %v10409_v18 = vpop.f32.mrf.mxu0  ;;  %24323 = vst [vmem:[#allocation24_spill] sm:$0xff] %v21447_v42  ;;  %v9890_v57 = vadd.f32 %v9703_v47, %v21184_v6  ;;  %v21450_v7 = vadd.f32 %v16676_v63, %v9892_v17  ;;  %v14715_v42 = vpack.c.bf16 %v12033_v45, %v12032_v46  ;;  %v12035_v46 = vld [vmem:[#allocation3 + $0xe1] sm:$0xff] }
 0x635   :  { %v16597_v44 = vpop.f32.mrf.mxu1 }
 0x636   :  { %v16677_v43 = vpop.f32.mrf.mxu0  ;;  %v9893_v15 = vadd.f32 %v16597_v44, %v21187_v35  ;;  %v21453_v0 = vadd.f32 %v10409_v18, %v9890_v57  ;;  %v24328_v57 = vld [vmem:[#allocation45_spill] sm:$0xff] }
 0x637   :  { %v9706_v38 = vpop.f32.mrf.mxu1  ;;  %v12034_v44 = vld [vmem:[#allocation3 + $0xd9] sm:$0xff] }
 0x638   :  { %v10412_v60 = vpop.f32.mrf.mxu0  ;;  %24324 = vst [vmem:[#allocation31_spill] sm:$0xff] %v21453_v0  ;;  %v9891_v53 = vadd.f32 %v9706_v38, %v24325_v55  ;;  %v21456_v6 = vadd.f32 %v16677_v43, %v9893_v15  ;;  %v12036_v15 = vld [vmem:[#allocation3 + $0xe9] sm:$0xff]  ;;  %v12037_v38 = vld [vmem:[#allocation3 + $0xf1] sm:$0xff] }
 0x639   :  { %v16600_v47 = vpop.f32.mrf.mxu1  ;;  %16887 = vmatmul.mubr.msk.bf16.gmra.mxu1 %vm17394_vm4, %v14712_v56  ;;  %v24329_v56 = vld [vmem:[#allocation58_spill] sm:$0xff]  ;;  %v14721_v0 = vpack.c.bf16 %v12037_v38, %v12036_v15 }
 0x63a   :  { %v16680_v50 = vpop.f32.mrf.mxu0  ;;  %24326 = vst [vmem:[#allocation28_spill] sm:$0xff] %v21456_v6  ;;  %v9896_v63 = vadd.f32 %v16600_v47, %v21198_v4  ;;  %16890 = vmatprep.mubr.msk.bf16.mxu1 %vm17394_vm4, %v14715_v42  ;;  %v21463_v35 = vadd.f32 %v10412_v60, %v9891_v53  ;;  %v14718_v42 = vpack.c.bf16 %v12035_v46, %v12034_v44  ;;  %v24331_v60 = vld [vmem:[#allocation63_spill] sm:$0xff]  ;;  %v24334_v44 = vld [vmem:[#allocation21_spill] sm:$0xff] }
 0x63b   :  { %v9719_v18 = vpop.f32.mrf.mxu1  ;;  %v12039_v15 = vld [vmem:[#allocation3 + $0x101] sm:$0xff] }
 0x63c   :  { %v10425_v17 = vpop.f32.mrf.mxu0  ;;  %24327 = vst [vmem:[#allocation30_spill] sm:$0xff] %v21463_v35  ;;  %v9894_v40 = vadd.f32 %v9719_v18, %v24328_v57  ;;  %v21466_v43 = vadd.f32 %v16680_v50, %v9896_v63 }
 0x63d   :  { %v16601_v45 = vpop.f32.mrf.mxu1 }
 0x63e   :  { %v16681_v12 = vpop.f32.mrf.mxu0  ;;  %v9897_v55 = vadd.f32 %v16601_v45, %v24329_v56  ;;  %v21469_v47 = vadd.f32 %v10425_v17, %v9894_v40  ;;  %v12038_v45 = vld [vmem:[#allocation3 + $0xf9] sm:$0xff]  ;;  %v12040_v56 = vld [vmem:[#allocation3 + $0x109] sm:$0xff] }
 0x63f   :  { %v9722_v6 = vpop.f32.mrf.mxu1 }
 0x640   :  { %v10428_v4 = vpop.f32.mrf.mxu0  ;;  %24330 = vst [vmem:[#allocation29_spill] sm:$0xff] %v21469_v47  ;;  %v9895_v53 = vadd.f32 %v9722_v6, %v24331_v60  ;;  %v21472_v18 = vadd.f32 %v16681_v12, %v9897_v55  ;;  %v12041_v55 = vld [vmem:[#allocation3 + $0x111] sm:$0xff] }
 0x641   :  { %v16604_v57 = vpop.f32.mrf.mxu1  ;;  %16891 = vmatmul.mubr.msk.bf16.gmra.mxu1 %vm17394_vm4, %v14718_v42  ;;  %v24336_v42 = vld [vmem:[#allocation59_spill] sm:$0xff]  ;;  %v14727_v47 = vpack.c.bf16 %v12041_v55, %v12040_v56  ;;  %v12043_v55 = vld [vmem:[#allocation3 + $0x131] sm:$0xff] }
 0x642   :  { %v16684_v35 = vpop.f32.mrf.mxu0  ;;  %24332 = vst [vmem:[#allocation81_spill] sm:$0xff] %v21472_v18  ;;  %v9900_v50 = vadd.f32 %v16604_v57, %v21215_v31  ;;  %16894 = vmatprep.mubr.msk.bf16.mxu1 %vm17394_vm4, %v14721_v0  ;;  %v21479_v17 = vadd.f32 %v10428_v4, %v9895_v53  ;;  %v14724_v0 = vpack.c.bf16 %v12039_v15, %v12038_v45  ;;  %v24337_v4 = vld [vmem:[#allocation19_spill] sm:$0xff]  ;;  %v24341_v45 = vld [vmem:[#allocation66_spill] sm:$0xff] }
 0x643   :  { %v9735_v40 = vpop.f32.mrf.mxu1  ;;  %v12042_v56 = vld [vmem:[#allocation3 + $0x129] sm:$0xff] }
 0x644   :  { %v10441_v63 = vpop.f32.mrf.mxu0  ;;  %24333 = vst [vmem:[#allocation36_spill] sm:$0xff] %v21479_v17  ;;  %v9898_v46 = vadd.f32 %v9735_v40, %v24334_v44  ;;  %v21482_v12 = vadd.f32 %v16684_v35, %v9900_v50  ;;  %v24339_v35 = vld [vmem:[#allocation20_spill] sm:$0xff] }
 0x645   :  { %v16605_v38 = vpop.f32.mrf.mxu1 }
 0x646   :  { %v16685_v6 = vpop.f32.mrf.mxu0  ;;  %24335 = vst [vmem:[#allocation35_spill] sm:$0xff] %v21482_v12  ;;  %v9901_v60 = vadd.f32 %v16605_v38, %v24336_v42  ;;  %v21485_v57 = vadd.f32 %v10441_v63, %v9898_v46  ;;  %v24342_v42 = vld [vmem:[#allocation22_spill] sm:$0xff] }
 0x647   :  { %v9738_v18 = vpop.f32.mrf.mxu1 }
 0x648   :  { %v10444_v31 = vpop.f32.mrf.mxu0  ;;  %v9899_v53 = vadd.f32 %v9738_v18, %v24337_v4  ;;  %v21488_v40 = vadd.f32 %v16685_v6, %v9901_v60 }
 0x649   :  { %v16608_v44 = vpop.f32.mrf.mxu1  ;;  %16895 = vmatmul.mubr.msk.bf16.gmra.mxu1 %vm17394_vm4, %v14724_v0 }
 0x64a   :  { %v16688_v17 = vpop.f32.mrf.mxu0  ;;  %24338 = vst [vmem:[#allocation34_spill] sm:$0xff] %v21488_v40  ;;  %v9904_v50 = vadd.f32 %v16608_v44, %v24339_v35  ;;  %16898 = vmatprep.mubr.msk.bf16.mxu1 %vm17394_vm4, %v14727_v47  ;;  %v21495_v63 = vadd.f32 %v10444_v31, %v9899_v53  ;;  %v24343_v35 = vld [vmem:[#allocation65_spill] sm:$0xff]  ;;  %v14730_v31 = vpack.c.bf16 %v12043_v55, %v12042_v56  ;;  %v12046_v55 = vld [vmem:[#allocation3 + $0x149] sm:$0xff] }
 0x64b   :  { %v9751_v46 = vpop.f32.mrf.mxu1 }
 0x64c   :  { %v10457_v12 = vpop.f32.mrf.mxu0  ;;  %24340 = vst [vmem:[#allocation39_spill] sm:$0xff] %v21495_v63  ;;  %v9902_v15 = vadd.f32 %v9751_v46, %v24341_v45  ;;  %v21498_v38 = vadd.f32 %v16688_v17, %v9904_v50 }
 0x64d   :  { %v16609_v6 = vpop.f32.mrf.mxu1 }
 0x64e   :  { %v16689_v18 = vpop.f32.mrf.mxu0  ;;  %v9905_v60 = vadd.f32 %v16609_v6, %v24342_v42  ;;  %v21501_v4 = vadd.f32 %v10457_v12, %v9902_v15  ;;  %v12044_v6 = vld [vmem:[#allocation3 + $0x139] sm:$0xff]  ;;  %v12045_v42 = vld [vmem:[#allocation3 + $0x141] sm:$0xff] }
 0x64f   :  { %v9754_v44 = vpop.f32.mrf.mxu1 }
 0x650   :  { %v10460_v0 = vpop.f32.mrf.mxu0  ;;  %v9903_v40 = vadd.f32 %v9754_v44, %v24343_v35  ;;  %v21504_v53 = vadd.f32 %v16689_v18, %v9905_v60  ;;  %v12047_v60 = vld [vmem:[#allocation3 + $0x151] sm:$0xff] }
 0x651   :  { %v16612_v63 = vpop.f32.mrf.mxu1  ;;  %16899 = vmatmul.mubr.bf16.gmra.mxu1 %v24284_v34 }
 0x652   :  { %v16692_v47 = vpop.f32.mrf.mxu0  ;;  %24344 = vst [vmem:[#allocation84_spill] sm:$0xff] %v21504_v53  ;;  %v9908_v17 = vadd.f32 %v16612_v63, %v21249_v28  ;;  %16902 = vmatprep.mubr.msk.bf16.mxu1 %vm17394_vm4, %v14730_v31  ;;  %v21510_v46 = vadd.f32 %v10460_v0, %v9903_v40  ;;  %v14733_v31 = vpack.c.bf16 %v12045_v42, %v12044_v6  ;;  %v24346_v40 = vld [vmem:[#allocation68_spill] sm:$0xff]  ;;  %v12049_v6 = vld [vmem:[#allocation3 + $0x161] sm:$0xff] }
 0x653   :  { %v9767_v12 = vpop.f32.mrf.mxu1 }
 0x654   :  { %v10473_v50 = vpop.f32.mrf.mxu0  ;;  %24345 = vst [vmem:[#allocation86_spill] sm:$0xff] %v21510_v46  ;;  %v9906_v45 = vadd.f32 %v9767_v12, %v21252_v39  ;;  %v21513_v56 = vadd.f32 %v16692_v47, %v9908_v17  ;;  %v14736_v39 = vpack.c.bf16 %v12047_v60, %v12046_v55  ;;  %v12051_v55 = vld [vmem:[#allocation3 + $0x171] sm:$0xff] }
 0x655   :  { %v16613_v18 = vpop.f32.mrf.mxu1 }
 0x656   :  { %v16693_v15 = vpop.f32.mrf.mxu0  ;;  %v9909_v44 = vadd.f32 %v16613_v18, %v21255_v2  ;;  %v21516_v63 = vadd.f32 %v10473_v50, %v9906_v45  ;;  %v12050_v18 = vld [vmem:[#allocation3 + $0x169] sm:$0xff] }
 0x657   :  { %v9770_v35 = vpop.f32.mrf.mxu1 }
 0x658   :  { %v10476_v28 = vpop.f32.mrf.mxu0  ;;  %v9907_v0 = vadd.f32 %v9770_v35, %v24346_v40  ;;  %v21521_v12 = vadd.f32 %v16693_v15, %v9909_v44  ;;  %v12048_v15 = vld [vmem:[#allocation3 + $0x159] sm:$0xff]  ;;  %v14742_v35 = vpack.c.bf16 %v12051_v55, %v12050_v18 }
 0x659   :  { %v16712_v53 = vpop.f32.mrf.mxu1  ;;  %16903 = vmatmul.mubr.msk.bf16.gmra.mxu1 %vm17394_vm4, %v14733_v31  ;;  %v14739_v44 = vpack.c.bf16 %v12049_v6, %v12048_v15  ;;  %v12054_v15 = vld [vmem:[#allocation3 + $0x189] sm:$0xff]  ;;  %v12055_v6 = vld [vmem:[#allocation3 + $0x191] sm:$0xff] }
 0x65a   :  { %v21519_v46 = vpop.f32.mrf.mxu0  ;;  %v21526_v47 = vadd.f32 %v16712_v53, %v21267_v51  ;;  %16906 = vmatprep.mubr.msk.bf16.mxu1 %vm17394_vm4, %v14736_v39  ;;  %v21530_v2 = vadd.f32 %v10476_v28, %v9907_v0  ;;  %v12052_v39 = vld [vmem:[#allocation3 + $0x179] sm:$0xff] }
 0x65b   :  { %v10929_v50 = vpop.f32.mrf.mxu1 }
 0x65c   :  { %v21532_v17 = vpop.f32.mrf.mxu0  ;;  %v21535_v45 = vadd.f32 %v10929_v50, %v21270_v1 }
 0x65d   :  { %v16713_v42 = vpop.f32.mrf.mxu1 }
 0x65e   :  { %v21538_v60 = vadd.f32 %v16713_v42, %v21273_v58  ;;  %v21540_v51 = vpop.f32.mrf.mxu0 }
 0x65f   :  { %v10932_v53 = vpop.f32.mrf.mxu1 }
 0x660   :  { %v21543_v28 = vadd.f32 %v10932_v53, %v21281_v29  ;;  %v21552_v58 = vpop.f32.mrf.mxu0  ;;  %v12053_v29 = vld [vmem:[#allocation3 + $0x181] sm:$0xff] }
 0x661   :  { %v16716_v31 = vpop.f32.mrf.mxu1  ;;  %16907 = vmatmul.mubr.msk.bf16.gmra.mxu1 %vm17394_vm4, %v14739_v44  ;;  %v14745_v55 = vpack.c.bf16 %v12053_v29, %v12052_v39  ;;  %v14748_v44 = vpack.c.bf16 %v12055_v6, %v12054_v15  ;;  %v12056_v39 = vld [vmem:[#allocation3 + $0x199] sm:$0xff]  ;;  %v12059_v15 = vld [vmem:[#allocation3 + $0x1b1] sm:$0xff] }
 0x662   :  { %v21548_v1 = vadd.f32 %v16716_v31, %v21284_v8  ;;  %16910 = vmatprep.mubr.msk.bf16.mxu1 %vm17394_vm4, %v14742_v35  ;;  %v21560_v18 = vpop.f32.mrf.mxu0 }
 0x663   :  { %v10945_v40 = vpop.f32.mrf.mxu1 }
 0x664   :  { %v21555_v0 = vadd.f32 %v10945_v40, %v21287_v10 }
 0x665   :  { %v16717_v50 = vpop.f32.mrf.mxu1 }
 0x666   :  { %v21558_v42 = vadd.f32 %v16717_v50, %v21290_v62  ;;  %v21572_v62 = vpop.f32.mrf.mxu0  ;;  %v12058_v50 = vld [vmem:[#allocation3 + $0x1a9] sm:$0xff] }
 0x667   :  { %v10948_v8 = vpop.f32.mrf.mxu1 }
 0x668   :  { %v21563_v53 = vadd.f32 %v10948_v8, %v21298_v22  ;;  %v12057_v22 = vld [vmem:[#allocation3 + $0x1a1] sm:$0xff]  ;;  %v21580_v8 = vpop.f32.mrf.mxu0 }
 0x669   :  { %v16720_v35 = vpop.f32.mrf.mxu1  ;;  %16911 = vmatmul.mubr.msk.bf16.gmra.mxu1 %vm17394_vm4, %v14745_v55  ;;  %v14751_v55 = vpack.c.bf16 %v12057_v22, %v12056_v39  ;;  %v12060_v39 = vld [vmem:[#allocation3 + $0x1b9] sm:$0xff] }
 0x66a   :  { %v21568_v10 = vadd.f32 %v16720_v35, %v21301_v32  ;;  %16914 = vmatprep.mubr.msk.bf16.mxu1 %vm17394_vm4, %v14748_v44  ;;  %v14754_v35 = vpack.c.bf16 %v12059_v15, %v12058_v50  ;;  %v12062_v50 = vld [vmem:[#allocation3 + $0x1c9] sm:$0xff]  ;;  %v12063_v15 = vld [vmem:[#allocation3 + $0x1d1] sm:$0xff] }
 0x66b   :  { %v10961_v31 = vpop.f32.mrf.mxu1 }
 0x66c   :  { %24347 = vst [vmem:[#allocation85_spill] sm:$0xff] %v21568_v10  ;;  %v21575_v40 = vadd.f32 %v10961_v31, %v21304_v23 }
 0x66d   :  { %v16721_v29 = vpop.f32.mrf.mxu1 }
 0x66e   :  { %v21578_v6 = vadd.f32 %v16721_v29, %v21307_v37  ;;  %v21592_v37 = vpop.f32.mrf.mxu0 }
 0x66f   :  { %v10964_v32 = vpop.f32.mrf.mxu1 }
 0x670   :  { %24348 = vst [vmem:[#allocation14_spill] sm:$0xff] %v21578_v6  ;;  %v21583_v44 = vadd.f32 %v10964_v32, %v21315_v26  ;;  %v12061_v26 = vld [vmem:[#allocation3 + $0x1c1] sm:$0xff]  ;;  %v14760_v6 = vpack.c.bf16 %v12063_v15, %v12062_v50  ;;  %v12066_v50 = vld [vmem:[#allocation3 + $0x1e9] sm:$0xff]  ;;  %v12067_v15 = vld [vmem:[#allocation3 + $0x1f1] sm:$0xff] }
 0x671   :  { %v16724_v10 = vpop.f32.mrf.mxu1  ;;  %16915 = vmatmul.mubr.msk.bf16.gmra.mxu1 %vm17394_vm4, %v14751_v55  ;;  %v21600_v55 = vpop.f32.mrf.mxu0 }
 0x672   :  { %24349 = vst [vmem:[#allocation87_spill] sm:$0xff] %v21583_v44  ;;  %v21588_v23 = vadd.f32 %v16724_v10, %v21318_v48  ;;  %16918 = vmatprep.mubr.msk.bf16.mxu1 %vm17394_vm4, %v14754_v35  ;;  %v14757_v10 = vpack.c.bf16 %v12061_v26, %v12060_v39  ;;  %v12064_v39 = vld [vmem:[#allocation3 + $0x1d9] sm:$0xff] }
 0x673   :  { %v10977_v31 = vpop.f32.mrf.mxu1 }
 0x674   :  { %24350 = vst [vmem:[#allocation52_spill] sm:$0xff] %v21588_v23  ;;  %v21595_v29 = vadd.f32 %v10977_v31, %v21321_v9  ;;  %v24352_v23 = vld [vmem:[#allocation70_spill] sm:$0xff] }
 0x675   :  { %v16725_v22 = vpop.f32.mrf.mxu1 }
 0x676   :  { %v21598_v32 = vadd.f32 %v16725_v22, %v21324_v61  ;;  %v21612_v61 = vpop.f32.mrf.mxu0 }
 0x677   :  { %v10980_v48 = vpop.f32.mrf.mxu1 }
 0x678   :  { %24351 = vst [vmem:[#allocation53_spill] sm:$0xff] %v21598_v32  ;;  %v21603_v35 = vadd.f32 %v10980_v48, %v24352_v23  ;;  %v12065_v23 = vld [vmem:[#allocation3 + $0x1e1] sm:$0xff] }
 0x679   :  { %v16728_v44 = vpop.f32.mrf.mxu1  ;;  %16919 = vmatmul.mubr.msk.bf16.gmra.mxu1 %vm17394_vm4, %v14757_v10  ;;  %v21620_v10 = vpop.f32.mrf.mxu0 }
 0x67a   :  { %v21608_v9 = vadd.f32 %v16728_v44, %v21335_v5  ;;  %16922 = vmatprep.mubr.msk.bf16.mxu1 %vm17394_vm4, %v14760_v6  ;;  %v14763_v44 = vpack.c.bf16 %v12065_v23, %v12064_v39  ;;  %v12068_v39 = vld [vmem:[#allocation3 + $0x1f9] sm:$0xff] }
 0x67b   :  { %v10993_v31 = vpop.f32.mrf.mxu1 }
 0x67c   :  { %24353 = vst [vmem:[#allocation56_spill] sm:$0xff] %v21608_v9  ;;  %v21615_v22 = vadd.f32 %v10993_v31, %v21338_v54  ;;  %v14766_v9 = vpack.c.bf16 %v12067_v15, %v12066_v50  ;;  %v12070_v50 = vld [vmem:[#allocation3 + $0x209] sm:$0xff]  ;;  %v12071_v15 = vld [vmem:[#allocation3 + $0x211] sm:$0xff] }
 0x67d   :  { %v16729_v26 = vpop.f32.mrf.mxu1 }
 0x67e   :  { %v21618_v48 = vadd.f32 %v16729_v26, %v21341_v25  ;;  %v21632_v25 = vpop.f32.mrf.mxu0 }
 0x67f   :  { %v10996_v5 = vpop.f32.mrf.mxu1 }
 0x680   :  { %24354 = vst [vmem:[#allocation40_spill] sm:$0xff] %v21618_v48  ;;  %v21623_v6 = vadd.f32 %v10996_v5, %v21349_v24  ;;  %v12069_v24 = vld [vmem:[#allocation3 + $0x201] sm:$0xff] }
 0x681   :  { %v16732_v32 = vpop.f32.mrf.mxu1  ;;  %16923 = vmatmul.mubr.msk.bf16.gmra.mxu1 %vm17394_vm4, %v14763_v44  ;;  %v21640_v44 = vpop.f32.mrf.mxu0 }
 0x682   :  { %v21628_v54 = vadd.f32 %v16732_v32, %v21352_v3  ;;  %16926 = vmatprep.mubr.msk.bf16.mxu1 %vm17394_vm4, %v14766_v9  ;;  %v14769_v32 = vpack.c.bf16 %v12069_v24, %v12068_v39 }
 0x683   :  { %v11009_v31 = vpop.f32.mrf.mxu1 }
 0x684   :  { %24355 = vst [vmem:[#allocation54_spill] sm:$0xff] %v21628_v54  ;;  %v21635_v26 = vadd.f32 %v11009_v31, %v21355_v11  ;;  %v14772_v54 = vpack.c.bf16 %v12071_v15, %v12070_v50  ;;  %v24358_v11 = vld [vmem:[#allocation67_spill] sm:$0xff] }
 0x685   :  { %v16733_v23 = vpop.f32.mrf.mxu1 }
 0x686   :  { %24356 = vst [vmem:[#allocation55_spill] sm:$0xff] %v21635_v26  ;;  %v21638_v5 = vadd.f32 %v16733_v23, %v21358_v27  ;;  %v21652_v27 = vpop.f32.mrf.mxu0 }
 0x687   :  { %v11012_v3 = vpop.f32.mrf.mxu1 }
 0x688   :  { %24357 = vst [vmem:[#allocation72_spill] sm:$0xff] %v21638_v5  ;;  %v21643_v9 = vadd.f32 %v11012_v3, %v21367_v20  ;;  %v24359_v5 = vld [vmem:[#allocation23_spill] sm:$0xff]  ;;  %v24360_v20 = vld [vmem:[#allocation48_spill] sm:$0xff]  ;;  %v21660_v50 = vpop.f32.mrf.mxu0  ;;  %v24362_v3 = vld [vmem:[#allocation69_spill] sm:$0xff] }
 0x689   :  { %v16736_v48 = vpop.f32.mrf.mxu1  ;;  %16927 = vmatmul.mubr.msk.bf16.gmra.mxu1 %vm17394_vm4, %v14769_v32 }
 0x68a   :  { %v21648_v31 = vadd.f32 %v16736_v48, %v24358_v11  ;;  %16930 = vmatprep.mubr.msk.bf16.mxu1 %vm17394_vm4, %v14772_v54  ;;  %v21669_v54 = vpop.f32.mrf.mxu0 }
 0x68b   :  { %v11025_v23 = vpop.f32.mrf.mxu1 }
 0x68c   :  { %v21655_v26 = vadd.f32 %v11025_v23, %v24359_v5 }
 0x68d   :  { %v16737_v39 = vpop.f32.mrf.mxu1 }
 0x68e   :  { %v21658_v24 = vadd.f32 %v16737_v39, %v24360_v20  ;;  %v24366_v39 = vld [vmem:[#allocation73_spill] sm:$0xff] }
 0x68f   :  { %v11028_v15 = vpop.f32.mrf.mxu1 }
 0x690   :  { %24361 = vst [vmem:[#allocation57_spill] sm:$0xff] %v21658_v24  ;;  %v21663_v32 = vadd.f32 %v11028_v15, %v24362_v3  ;;  %v21677_v24 = vpop.f32.mrf.mxu0  ;;  %v24368_v3 = vld [vmem:[#allocation71_spill] sm:$0xff] }
 0x691   :  { %v16740_v48 = vpop.f32.mrf.mxu1  ;;  %16931 = vmatmul.mubr.bf16.gmra.mxu1 %v24284_v34 }
 0x692   :  { %24363 = vst [vmem:[#allocation44_spill] sm:$0xff] %v21663_v32  ;;  %v21667_v16 = vadd.f32 %v16740_v48, %v21386_v13  ;;  %v21685_v48 = vpop.f32.mrf.mxu0 }
 0x693   :  { %v11041_v5 = vpop.f32.mrf.mxu1 }
 0x694   :  { %24364 = vst [vmem:[#allocation41_spill] sm:$0xff] %v21667_v16  ;;  %v21672_v11 = vadd.f32 %v11041_v5, %v21389_v41 }
 0x695   :  { %v16741_v23 = vpop.f32.mrf.mxu1 }
 0x696   :  { %24365 = vst [vmem:[#allocation46_spill] sm:$0xff] %v21672_v11  ;;  %v21675_v20 = vadd.f32 %v16741_v23, %v24366_v39  ;;  %v21693_v39 = vpop.f32.mrf.mxu0  ;;  %v24373_v11 = vld [vmem:[#allocation49_spill] sm:$0xff] }
 0x697   :  { %v11044_v15 = vpop.f32.mrf.mxu1 }
 0x698   :  { %24367 = vst [vmem:[#allocation26_spill] sm:$0xff] %v21675_v20  ;;  %v21680_v32 = vadd.f32 %v11044_v15, %v24368_v3 }
 0x699   :  { %v16744_v34 = vpop.f32.mrf.mxu1 }
 0x69a   :  { %24369 = vst [vmem:[#allocation77_spill] sm:$0xff] %v21680_v32  ;;  %v21683_v13 = vadd.f32 %v16744_v34, %v21402_v21  ;;  %v21701_v34 = vpop.f32.mrf.mxu0  ;;  %v24398_v32 = vld [vmem:[#allocation36_spill] sm:$0xff] }
 0x69b   :  { %v11057_v16 = vpop.f32.mrf.mxu1 }
 0x69c   :  { %24370 = vst [vmem:[#allocation17_spill] sm:$0xff] %v21683_v13  ;;  %v21688_v41 = vadd.f32 %v11057_v16, %v21405_v33 }
 0x69d   :  { %v16745_v5 = vpop.f32.mrf.mxu1 }
 0x69e   :  { %24371 = vst [vmem:[#allocation18_spill] sm:$0xff] %v21688_v41  ;;  %v21691_v23 = vadd.f32 %v16745_v5, %v21408_v19  ;;  %v21709_v5 = vpop.f32.mrf.mxu0  ;;  %v24378_v41 = vld [vmem:[#allocation47_spill] sm:$0xff] }
 0x69f   :  { %v11060_v20 = vpop.f32.mrf.mxu1 }
 0x6a0   :  { %24372 = vst [vmem:[#allocation25_spill] sm:$0xff] %v21691_v23  ;;  %v21696_v15 = vadd.f32 %v11060_v20, %v24373_v11 }
 0x6a1   :  { %v16748_v3 = vpop.f32.mrf.mxu1 }
 0x6a2   :  { %24374 = vst [vmem:[#allocation60_spill] sm:$0xff] %v21696_v15  ;;  %v21699_v21 = vadd.f32 %v16748_v3, %v21418_v49  ;;  %v21717_v3 = vpop.f32.mrf.mxu0  ;;  %v24390_v15 = vld [vmem:[#allocation30_spill] sm:$0xff] }
 0x6a3   :  { %v11073_v13 = vpop.f32.mrf.mxu1 }
 0x6a4   :  { %24375 = vst [vmem:[#allocation74_spill] sm:$0xff] %v21699_v21  ;;  %v21704_v33 = vadd.f32 %v11073_v13, %v21421_v14 }
 0x6a5   :  { %v16749_v16 = vpop.f32.mrf.mxu1 }
 0x6a6   :  { %24376 = vst [vmem:[#allocation62_spill] sm:$0xff] %v21704_v33  ;;  %v21707_v19 = vadd.f32 %v16749_v16, %v21424_v52  ;;  %v21725_v16 = vpop.f32.mrf.mxu0  ;;  %v24383_v33 = vld [vmem:[#allocation24_spill] sm:$0xff] }
 0x6a7   :  { %v11076_v23 = vpop.f32.mrf.mxu1 }
 0x6a8   :  { %24377 = vst [vmem:[#allocation27_spill] sm:$0xff] %v21707_v19  ;;  %v21712_v11 = vadd.f32 %v11076_v23, %v24378_v41 }
 0x6a9   :  { %v16752_v20 = vpop.f32.mrf.mxu1 }
 0x6aa   :  { %24379 = vst [vmem:[#allocation76_spill] sm:$0xff] %v21712_v11  ;;  %v21715_v49 = vadd.f32 %v16752_v20, %v21434_v30  ;;  %v21733_v20 = vpop.f32.mrf.mxu0  ;;  %v24386_v11 = vld [vmem:[#allocation31_spill] sm:$0xff] }
 0x6ab   :  { %v11089_v21 = vpop.f32.mrf.mxu1 }
 0x6ac   :  { %24380 = vst [vmem:[#allocation78_spill] sm:$0xff] %v21715_v49  ;;  %v21720_v14 = vadd.f32 %v11089_v21, %v21437_v36 }
 0x6ad   :  { %v16753_v13 = vpop.f32.mrf.mxu1 }
 0x6ae   :  { %24381 = vst [vmem:[#allocation75_spill] sm:$0xff] %v21720_v14  ;;  %v21723_v52 = vadd.f32 %v16753_v13, %v21440_v59  ;;  %v24388_v14 = vld [vmem:[#allocation28_spill] sm:$0xff]  ;;  %v21741_v13 = vpop.f32.mrf.mxu0 }
 0x6af   :  { %v11092_v19 = vpop.f32.mrf.mxu1 }
 0x6b0   :  { %24382 = vst [vmem:[#allocation80_spill] sm:$0xff] %v21723_v52  ;;  %v21728_v41 = vadd.f32 %v11092_v19, %v24383_v33 }
 0x6b1   :  { %v16756_v23 = vpop.f32.mrf.mxu1 }
 0x6b2   :  { %24384 = vst [vmem:[#allocation79_spill] sm:$0xff] %v21728_v41  ;;  %v21731_v30 = vadd.f32 %v16756_v23, %v21450_v7  ;;  %v21749_v23 = vpop.f32.mrf.mxu0  ;;  %v24393_v41 = vld [vmem:[#allocation29_spill] sm:$0xff] }
 0x6b3   :  { %v11105_v49 = vpop.f32.mrf.mxu1 }
 0x6b4   :  { %24385 = vst [vmem:[#allocation33_spill] sm:$0xff] %v21731_v30  ;;  %v21736_v36 = vadd.f32 %v11105_v49, %v24386_v11 }
 0x6b5   :  { %v16757_v21 = vpop.f32.mrf.mxu1 }
 0x6b6   :  { %24387 = vst [vmem:[#allocation32_spill] sm:$0xff] %v21736_v36  ;;  %v21739_v59 = vadd.f32 %v16757_v21, %v24388_v14  ;;  %v24395_v36 = vld [vmem:[#allocation81_spill] sm:$0xff]  ;;  %v21757_v21 = vpop.f32.mrf.mxu0 }
 0x6b7   :  { %v11108_v52 = vpop.f32.mrf.mxu1  ;;  %24397 = vst [vmem:[#allocation37_spill] sm:$0xff] %v21757_v21  ;;  %v24405_v21 = vld [vmem:[#allocation39_spill] sm:$0xff] }
 0x6b8   :  { %24389 = vst [vmem:[#allocation50_spill] sm:$0xff] %v21739_v59  ;;  %v21744_v33 = vadd.f32 %v11108_v52, %v24390_v15 }
 0x6b9   :  { %v16760_v19 = vpop.f32.mrf.mxu1 }
 0x6ba   :  { %24391 = vst [vmem:[#allocation15_spill] sm:$0xff] %v21744_v33  ;;  %v21747_v7 = vadd.f32 %v16760_v19, %v21466_v43  ;;  %v24400_v33 = vld [vmem:[#allocation35_spill] sm:$0xff]  ;;  %v21765_v19 = vpop.f32.mrf.mxu0 }
 0x6bb   :  { %v11121_v30 = vpop.f32.mrf.mxu1 }
 0x6bc   :  { %24392 = vst [vmem:[#allocation82_spill] sm:$0xff] %v21747_v7  ;;  %v21752_v11 = vadd.f32 %v11121_v30, %v24393_v41 }
 0x6bd   :  { %v16761_v49 = vpop.f32.mrf.mxu1 }
 0x6be   :  { %24394 = vst [vmem:[#allocation16_spill] sm:$0xff] %v21752_v11  ;;  %v21755_v14 = vadd.f32 %v16761_v49, %v24395_v36  ;;  %v24403_v11 = vld [vmem:[#allocation34_spill] sm:$0xff]  ;;  %v21773_v49 = vpop.f32.mrf.mxu0 }
 0x6bf   :  { %v11124_v59 = vpop.f32.mrf.mxu1 }
 0x6c0   :  { %24396 = vst [vmem:[#allocation38_spill] sm:$0xff] %v21755_v14  ;;  %v21760_v15 = vadd.f32 %v11124_v59, %v24398_v32 }
 0x6c1   :  { %v16764_v52 = vpop.f32.mrf.mxu1 }
 0x6c2   :  { %24399 = vst [vmem:[#allocation83_spill] sm:$0xff] %v21760_v15  ;;  %v21763_v43 = vadd.f32 %v16764_v52, %v24400_v33  ;;  %v21781_v52 = vpop.f32.mrf.mxu0  ;;  %v24409_v15 = vld [vmem:[#allocation86_spill] sm:$0xff] }
 0x6c3   :  { %v11137_v7 = vpop.f32.mrf.mxu1 }
 0x6c4   :  { %24401 = vst [vmem:[#allocation51_spill] sm:$0xff] %v21763_v43  ;;  %v21768_v41 = vadd.f32 %v11137_v7, %v21485_v57 }
 0x6c5   :  { %v16765_v30 = vpop.f32.mrf.mxu1 }
 0x6c6   :  { %24402 = vst [vmem:[#allocation42_spill] sm:$0xff] %v21768_v41  ;;  %v21771_v36 = vadd.f32 %v16765_v30, %v24403_v11  ;;  %v24407_v41 = vld [vmem:[#allocation84_spill] sm:$0xff]  ;;  %v21789_v30 = vpop.f32.mrf.mxu0 }
 0x6c7   :  { %v11140_v14 = vpop.f32.mrf.mxu1 }
 0x6c8   :  { %24404 = vst [vmem:[#allocation61_spill] sm:$0xff] %v21771_v36  ;;  %v21776_v32 = vadd.f32 %v11140_v14, %v24405_v21 }
 0x6c9   :  { %v16768_v59 = vpop.f32.mrf.mxu1 }
 0x6ca   :  { %v21779_v33 = vadd.f32 %v16768_v59, %v21498_v38  ;;  %v21797_v59 = vpop.f32.mrf.mxu0 }
 0x6cb   :  { %v11153_v43 = vpop.f32.mrf.mxu1 }
 0x6cc   :  { %24406 = vst [vmem:[#allocation43_spill] sm:$0xff] %v21779_v33  ;;  %v21784_v57 = vadd.f32 %v11153_v43, %v21501_v4 }
 0x6cd   :  { %v16769_v7 = vpop.f32.mrf.mxu1 }
 0x6ce   :  { %v21787_v11 = vadd.f32 %v16769_v7, %v24407_v41  ;;  %v21805_v7 = vpop.f32.mrf.mxu0 }
 0x6cf   :  { %v11156_v36 = vpop.f32.mrf.mxu1 }
 0x6d0   :  { %24408 = vst [vmem:[#allocation45_spill] sm:$0xff] %v21787_v11  ;;  %v21792_v14 = vadd.f32 %v11156_v36, %v24409_v15 }
 0x6d1   :  { %v16772_v21 = vpop.f32.mrf.mxu1 }
 0x6d2   :  { %24410 = vst [vmem:[#allocation58_spill] sm:$0xff] %v21792_v14  ;;  %v21795_v38 = vadd.f32 %v16772_v21, %v21513_v56  ;;  %v21810_v14 = vpop.f32.mrf.mxu0  ;;  %v11884_v21 = vadd.f32 %v21532_v17, %v21535_v45  ;;  %v11888_v45 = vadd.f32 %v21572_v62, %v21555_v0 }
 0x6d3   :  { %v11169_v33 = vpop.f32.mrf.mxu1 }
 0x6d4   :  { %24411 = vst [vmem:[#allocation63_spill] sm:$0xff] %v21795_v38  ;;  %v21800_v4 = vadd.f32 %v11169_v33, %v21516_v63  ;;  %v11886_v63 = vadd.f32 %v21519_v46, %v21526_v47 }
 0x6d5   :  { %v16773_v43 = vpop.f32.mrf.mxu1 }
 0x6d6   :  { %v21803_v41 = vadd.f32 %v16773_v43, %v21521_v12  ;;  %v11885_v12 = vadd.f32 %v21552_v58, %v21543_v28  ;;  %v21820_v43 = vpop.f32.mrf.mxu0 }
 0x6d7   :  { %v11172_v11 = vpop.f32.mrf.mxu1 }
 0x6d8   :  { %24412 = vst [vmem:[#allocation21_spill] sm:$0xff] %v21803_v41  ;;  %v21808_v15 = vadd.f32 %v11172_v11, %v21530_v2  ;;  %v11887_v41 = vadd.f32 %v21540_v51, %v21538_v60 }
 0x6d9   :  { %v16872_v36 = vpop.f32.mrf.mxu1 }
 0x6da   :  { %24413 = vst [vmem:[#allocation59_spill] sm:$0xff] %v21808_v15  ;;  %v21822_v11 = vadd.f32 %v16872_v36, %v11886_v63  ;;  %v21838_v36 = vpop.f32.mrf.mxu0 }
 0x6db   :  { %v12261_v56 = vpop.f32.mrf.mxu1 }
 0x6dc   :  { %v21816_v33 = vadd.f32 %v12261_v56, %v11884_v21  ;;  %v12844_v51 = vmul.f32 %v21822_v11, %v21822_v11 }
 0x6dd   :  { %v16873_v38 = vpop.f32.mrf.mxu1 }
 0x6de   :  { %24414 = vst [vmem:[#allocation19_spill] sm:$0xff] %v21816_v33  ;;  %v12842_v46 = vmul.f32 %v21816_v33, %v21816_v33  ;;  %v21832_v47 = vadd.f32 %v16873_v38, %v11887_v41  ;;  %v11890_v38 = vadd.f32 %v21560_v18, %v21548_v1 }
 0x6df   :  { %v12264_v2 = vpop.f32.mrf.mxu1 }
 0x6e0   :  { %v21826_v15 = vadd.f32 %v12264_v2, %v11885_v12  ;;  %v12845_v21 = vmul.f32 %v21832_v47, %v21832_v47  ;;  %v11889_v2 = vadd.f32 %v21592_v37, %v21563_v53  ;;  %v11892_v53 = vadd.f32 %v21612_v61, %v21575_v40  ;;  %v24416_v40 = vld [vmem:[#allocation85_spill] sm:$0xff] }
 0x6e1   :  { %v16876_v17 = vpop.f32.mrf.mxu1  ;;  %v11894_v61 = vadd.f32 %v21600_v55, %v24416_v40 }
 0x6e2   :  { %24415 = vst [vmem:[#allocation20_spill] sm:$0xff] %v21826_v15  ;;  %v12772_v28 = vadd.f32 %v21826_v15, %v21816_v33  ;;  %v12843_v58 = vmul.f32 %v21826_v15, %v21826_v15  ;;  %v21852_v15 = vpop.f32.mrf.mxu0  ;;  %v21854_v33 = vadd.f32 %v16876_v17, %v11890_v38 }
 0x6e3   :  { %v12277_v60 = vpop.f32.mrf.mxu1 }
 0x6e4   :  { %v12773_v56 = vadd.f32 %v12772_v28, %v21822_v11  ;;  %v12906_v0 = vadd.f32 %v12843_v58, %v12842_v46  ;;  %v21843_v62 = vadd.f32 %v12277_v60, %v11888_v45  ;;  %v11891_v45 = vadd.f32 %v21580_v8, %v21558_v42  ;;  %v21870_v8 = vpop.f32.mrf.mxu0 }
 0x6e5   :  { %v16877_v41 = vpop.f32.mrf.mxu1 }
 0x6e6   :  { %v12907_v63 = vadd.f32 %v12906_v0, %v12844_v51  ;;  %v12774_v12 = vadd.f32 %v12773_v56, %v21832_v47  ;;  %v12846_v18 = vmul.f32 %v21843_v62, %v21843_v62  ;;  %v21865_v51 = vadd.f32 %v16877_v41, %v11891_v45 }
 0x6e7   :  { %v12280_v46 = vpop.f32.mrf.mxu1  ;;  %v12848_v0 = vmul.f32 %v21854_v33, %v21854_v33 }
 0x6e8   :  { %v12775_v1 = vadd.f32 %v12774_v12, %v21843_v62  ;;  %v12908_v28 = vadd.f32 %v12907_v63, %v12845_v21  ;;  %v21861_v58 = vadd.f32 %v12280_v46, %v11889_v2  ;;  %v12849_v12 = vmul.f32 %v21865_v51, %v21865_v51  ;;  %v24417_v46 = vld [vmem:[#allocation87_spill] sm:$0xff] }
 0x6e9   :  { %v16880_v60 = vpop.f32.mrf.mxu1 }
 0x6ea   :  { %v12909_v37 = vadd.f32 %v12908_v28, %v12846_v18  ;;  %v12776_v17 = vadd.f32 %v12775_v1, %v21861_v58  ;;  %v12847_v42 = vmul.f32 %v21861_v58, %v21861_v58  ;;  %v11893_v1 = vadd.f32 %v21632_v25, %v24417_v46  ;;  %v21884_v18 = vpop.f32.mrf.mxu0 }
 0x6eb   :  { %v12293_v56 = vpop.f32.mrf.mxu1  ;;  %v21886_v28 = vadd.f32 %v16880_v60, %v11894_v61  ;;  %v11896_v25 = vadd.f32 %v21652_v27, %v21595_v29  ;;  %v24419_v29 = vld [vmem:[#allocation52_spill] sm:$0xff] }
 0x6ec   :  { %v12777_v38 = vadd.f32 %v12776_v17, %v21854_v33  ;;  %v12910_v21 = vadd.f32 %v12909_v37, %v12847_v42  ;;  %v21875_v63 = vadd.f32 %v12293_v56, %v11892_v53  ;;  %v24418_v37 = vld [vmem:[#allocation14_spill] sm:$0xff]  ;;  %v21902_v61 = vpop.f32.mrf.mxu0  ;;  %v11898_v27 = vadd.f32 %v21640_v44, %v24419_v29 }
 0x6ed   :  { %v16881_v41 = vpop.f32.mrf.mxu1  ;;  %v11895_v53 = vadd.f32 %v21620_v10, %v24418_v37 }
 0x6ee   :  { %v12911_v2 = vadd.f32 %v12910_v21, %v12848_v0  ;;  %v12778_v45 = vadd.f32 %v12777_v38, %v21865_v51  ;;  %v12850_v42 = vmul.f32 %v21875_v63, %v21875_v63 }
 0x6ef   :  { %v12296_v17 = vpop.f32.mrf.mxu1  ;;  %v21897_v40 = vadd.f32 %v16881_v41, %v11895_v53 }
 0x6f0   :  { %v12779_v55 = vadd.f32 %v12778_v45, %v21875_v63  ;;  %v12912_v56 = vadd.f32 %v12911_v2, %v12849_v12  ;;  %v21893_v0 = vadd.f32 %v12296_v17, %v11893_v1  ;;  %v12852_v12 = vmul.f32 %v21886_v28, %v21886_v28 }
 0x6f1   :  { %v16884_v38 = vpop.f32.mrf.mxu1  ;;  %v12853_v37 = vmul.f32 %v21897_v40, %v21897_v40 }
 0x6f2   :  { %v12913_v21 = vadd.f32 %v12912_v56, %v12850_v42  ;;  %v12780_v60 = vadd.f32 %v12779_v55, %v21893_v0  ;;  %v12851_v10 = vmul.f32 %v21893_v0, %v21893_v0  ;;  %v11897_v55 = vadd.f32 %v21669_v54, %v21603_v35  ;;  %v21916_v42 = vpop.f32.mrf.mxu0 }
 0x6f3   :  { %v12309_v45 = vpop.f32.mrf.mxu1  ;;  %v21918_v56 = vadd.f32 %v16884_v38, %v11898_v27  ;;  %v11900_v35 = vadd.f32 %v21685_v48, %v21615_v22  ;;  %v24421_v22 = vld [vmem:[#allocation56_spill] sm:$0xff] }
 0x6f4   :  { %v12781_v2 = vadd.f32 %v12780_v60, %v21886_v28  ;;  %v12914_v46 = vadd.f32 %v12913_v21, %v12851_v10  ;;  %v21907_v1 = vadd.f32 %v12309_v45, %v11896_v25  ;;  %v24420_v21 = vld [vmem:[#allocation53_spill] sm:$0xff]  ;;  %v21934_v29 = vpop.f32.mrf.mxu0  ;;  %v11902_v48 = vadd.f32 %v21677_v24, %v24421_v22 }
 0x6f5   :  { %v16885_v41 = vpop.f32.mrf.mxu1  ;;  %v11899_v25 = vadd.f32 %v21660_v50, %v24420_v21 }
 0x6f6   :  { %v12915_v53 = vadd.f32 %v12914_v46, %v12852_v12  ;;  %v12782_v17 = vadd.f32 %v12781_v2, %v21897_v40  ;;  %v12854_v10 = vmul.f32 %v21907_v1, %v21907_v1 }
 0x6f7   :  { %v12312_v60 = vpop.f32.mrf.mxu1  ;;  %v21929_v46 = vadd.f32 %v16885_v41, %v11899_v25 }
 0x6f8   :  { %v12783_v44 = vadd.f32 %v12782_v17, %v21907_v1  ;;  %v12916_v45 = vadd.f32 %v12915_v53, %v12853_v37  ;;  %v21925_v12 = vadd.f32 %v12312_v60, %v11897_v55  ;;  %v12856_v37 = vmul.f32 %v21918_v56, %v21918_v56 }
 0x6f9   :  { %v16888_v2 = vpop.f32.mrf.mxu1  ;;  %v12857_v21 = vmul.f32 %v21929_v46, %v21929_v46 }
 0x6fa   :  { %v12917_v54 = vadd.f32 %v12916_v45, %v12854_v10  ;;  %v12784_v38 = vadd.f32 %v12783_v44, %v21925_v12  ;;  %v12855_v50 = vmul.f32 %v21925_v12, %v21925_v12  ;;  %v11901_v44 = vadd.f32 %v21701_v34, %v21623_v6  ;;  %v21948_v10 = vpop.f32.mrf.mxu0 }
 0x6fb   :  { %v12325_v27 = vpop.f32.mrf.mxu1  ;;  %v21950_v45 = vadd.f32 %v16888_v2, %v11902_v48 }
 0x6fc   :  { %v12785_v53 = vadd.f32 %v12784_v38, %v21918_v56  ;;  %v12918_v17 = vadd.f32 %v12917_v54, %v12855_v50  ;;  %v21939_v55 = vadd.f32 %v12325_v27, %v11900_v35  ;;  %v24422_v54 = vld [vmem:[#allocation40_spill] sm:$0xff]  ;;  %v21966_v48 = vpop.f32.mrf.mxu0 }
 0x6fd   :  { %v16889_v41 = vpop.f32.mrf.mxu1  ;;  %v11903_v35 = vadd.f32 %v21693_v39, %v24422_v54 }
 0x6fe   :  { %v12919_v25 = vadd.f32 %v12918_v17, %v12856_v37  ;;  %v12786_v60 = vadd.f32 %v12785_v53, %v21929_v46  ;;  %v12858_v50 = vmul.f32 %v21939_v55, %v21939_v55  ;;  %v24424_v17 = vld [vmem:[#allocation55_spill] sm:$0xff] }
 0x6ff   :  { %v12328_v38 = vpop.f32.mrf.mxu1  ;;  %v11904_v6 = vadd.f32 %v21717_v3, %v24424_v17  ;;  %v21961_v22 = vadd.f32 %v16889_v41, %v11903_v35  ;;  %v24425_v3 = vld [vmem:[#allocation54_spill] sm:$0xff]  ;;  %v21980_v17 = vpop.f32.mrf.mxu0 }
 0x700   :  { %v12787_v24 = vadd.f32 %v12786_v60, %v21939_v55  ;;  %v12920_v27 = vadd.f32 %v12919_v25, %v12857_v21  ;;  %v21957_v37 = vadd.f32 %v12328_v38, %v11901_v44  ;;  %v12860_v21 = vmul.f32 %v21950_v45, %v21950_v45 }
 0x701   :  { %v16892_v53 = vpop.f32.mrf.mxu1  ;;  %v11906_v41 = vadd.f32 %v21709_v5, %v24425_v3  ;;  %v12861_v38 = vmul.f32 %v21961_v22, %v21961_v22  ;;  %v21998_v3 = vpop.f32.mrf.mxu0 }
 0x702   :  { %24423 = vst [vmem:[#allocation66_spill] sm:$0xff] %v21957_v37  ;;  %v12921_v34 = vadd.f32 %v12920_v27, %v12858_v50  ;;  %v12788_v2 = vadd.f32 %v12787_v24, %v21957_v37  ;;  %v12859_v39 = vmul.f32 %v21957_v37, %v21957_v37  ;;  %v11905_v27 = vadd.f32 %v21733_v20, %v21643_v9 }
 0x703   :  { %v12341_v60 = vpop.f32.mrf.mxu1  ;;  %v21982_v37 = vadd.f32 %v16892_v53, %v11906_v41  ;;  %v11908_v9 = vadd.f32 %v21749_v23, %v21655_v26  ;;  %v11910_v26 = vadd.f32 %v21741_v13, %v21648_v31 }
 0x704   :  { %v12789_v25 = vadd.f32 %v12788_v2, %v21950_v45  ;;  %v12922_v44 = vadd.f32 %v12921_v34, %v12859_v39  ;;  %v21971_v54 = vadd.f32 %v12341_v60, %v11904_v6  ;;  %v24426_v34 = vld [vmem:[#allocation72_spill] sm:$0xff] }
 0x705   :  { %v16893_v35 = vpop.f32.mrf.mxu1  ;;  %v11907_v6 = vadd.f32 %v21725_v16, %v24426_v34 }
 0x706   :  { %v12923_v24 = vadd.f32 %v12922_v44, %v12860_v21  ;;  %v12790_v50 = vadd.f32 %v12789_v25, %v21961_v22  ;;  %v12862_v39 = vmul.f32 %v21971_v54, %v21971_v54 }
 0x707   :  { %v12344_v2 = vpop.f32.mrf.mxu1  ;;  %v21993_v44 = vadd.f32 %v16893_v35, %v11907_v6 }
 0x708   :  { %v12791_v5 = vadd.f32 %v12790_v50, %v21971_v54  ;;  %v12924_v60 = vadd.f32 %v12923_v24, %v12861_v38  ;;  %v21989_v21 = vadd.f32 %v12344_v2, %v11905_v27  ;;  %v12864_v38 = vmul.f32 %v21982_v37, %v21982_v37  ;;  %v24429_v2 = vld [vmem:[#allocation44_spill] sm:$0xff] }
 0x709   :  { %v16896_v25 = vpop.f32.mrf.mxu1  ;;  %24427 = vst [vmem:[#allocation22_spill] sm:$0xff] %v21993_v44  ;;  %v12865_v35 = vmul.f32 %v21993_v44, %v21993_v44 }
 0x70a   :  { %v12925_v20 = vadd.f32 %v12924_v60, %v12862_v39  ;;  %v12792_v53 = vadd.f32 %v12791_v5, %v21989_v21  ;;  %v12863_v16 = vmul.f32 %v21989_v21, %v21989_v21  ;;  %v11909_v5 = vadd.f32 %v21765_v19, %v24429_v2  ;;  %v22012_v39 = vpop.f32.mrf.mxu0 }
 0x70b   :  { %v12357_v41 = vpop.f32.mrf.mxu1  ;;  %v22014_v60 = vadd.f32 %v16896_v25, %v11910_v26 }
 0x70c   :  { %v12793_v24 = vadd.f32 %v12792_v53, %v21982_v37  ;;  %v12926_v50 = vadd.f32 %v12925_v20, %v12863_v16  ;;  %v22003_v27 = vadd.f32 %v12357_v41, %v11908_v9  ;;  %v24430_v20 = vld [vmem:[#allocation57_spill] sm:$0xff] }
 0x70d   :  { %v16897_v23 = vpop.f32.mrf.mxu1  ;;  %v24431_v9 = vld [vmem:[#allocation37_spill] sm:$0xff] }
 0x70e   :  { %24428 = vst [vmem:[#allocation65_spill] sm:$0xff] %v22003_v27  ;;  %v12927_v34 = vadd.f32 %v12926_v50, %v12864_v38  ;;  %v12794_v6 = vadd.f32 %v12793_v24, %v21993_v44  ;;  %v11911_v53 = vadd.f32 %v24431_v9, %v24430_v20  ;;  %v12866_v13 = vmul.f32 %v22003_v27, %v22003_v27  ;;  %v24433_v50 = vld [vmem:[#allocation46_spill] sm:$0xff]  ;;  %v22030_v20 = vpop.f32.mrf.mxu0 }
 0x70f   :  { %v12360_v16 = vpop.f32.mrf.mxu1  ;;  %v11912_v19 = vadd.f32 %v21781_v52, %v24433_v50  ;;  %v24435_v52 = vld [vmem:[#allocation41_spill] sm:$0xff] }
 0x710   :  { %v12795_v31 = vadd.f32 %v12794_v6, %v22003_v27  ;;  %v12928_v41 = vadd.f32 %v12927_v34, %v12865_v35  ;;  %v22021_v38 = vadd.f32 %v12360_v16, %v11909_v5  ;;  %v22025_v44 = vadd.f32 %v16897_v23, %v11911_v53 }
 0x711   :  { %v16900_v24 = vpop.f32.mrf.mxu1  ;;  %v12868_v35 = vmul.f32 %v22014_v60, %v22014_v60  ;;  %v11914_v23 = vadd.f32 %v21773_v49, %v24435_v52 }
 0x712   :  { %24432 = vst [vmem:[#allocation68_spill] sm:$0xff] %v22021_v38  ;;  %v12929_v2 = vadd.f32 %v12928_v41, %v12866_v13  ;;  %v12796_v25 = vadd.f32 %v12795_v31, %v22021_v38  ;;  %v12867_v26 = vmul.f32 %v22021_v38, %v22021_v38  ;;  %v12869_v16 = vmul.f32 %v22025_v44, %v22025_v44  ;;  %v24436_v41 = vld [vmem:[#allocation77_spill] sm:$0xff]  ;;  %v22044_v38 = vpop.f32.mrf.mxu0 }
 0x713   :  { %v12373_v6 = vpop.f32.mrf.mxu1  ;;  %v11913_v50 = vadd.f32 %v21797_v59, %v24436_v41  ;;  %v22046_v27 = vadd.f32 %v16900_v24, %v11914_v23 }
 0x714   :  { %v12797_v34 = vadd.f32 %v12796_v25, %v22014_v60  ;;  %v12930_v5 = vadd.f32 %v12929_v2, %v12867_v26  ;;  %v22035_v9 = vadd.f32 %v12373_v6, %v11912_v19  ;;  %v24437_v2 = vld [vmem:[#allocation26_spill] sm:$0xff]  ;;  %v22062_v23 = vpop.f32.mrf.mxu0 }
 0x715   :  { %v16901_v53 = vpop.f32.mrf.mxu1  ;;  %v11915_v19 = vadd.f32 %v21789_v30, %v24437_v2 }
 0x716   :  { %24434 = vst [vmem:[#allocation70_spill] sm:$0xff] %v22035_v9  ;;  %v12931_v31 = vadd.f32 %v12930_v5, %v12868_v35  ;;  %v12798_v13 = vadd.f32 %v12797_v34, %v22025_v44  ;;  %v12870_v26 = vmul.f32 %v22035_v9, %v22035_v9  ;;  %v24439_v5 = vld [vmem:[#allocation18_spill] sm:$0xff] }
 0x717   :  { %v12376_v25 = vpop.f32.mrf.mxu1  ;;  %v11916_v59 = vadd.f32 %v21810_v14, %v24439_v5  ;;  %v22057_v41 = vadd.f32 %v16901_v53, %v11915_v19  ;;  %v24441_v14 = vld [vmem:[#allocation17_spill] sm:$0xff] }
 0x718   :  { %v12799_v49 = vadd.f32 %v12798_v13, %v22035_v9  ;;  %v12932_v6 = vadd.f32 %v12931_v31, %v12869_v16  ;;  %v22053_v35 = vadd.f32 %v12376_v25, %v11913_v50  ;;  %v12872_v16 = vmul.f32 %v22046_v27, %v22046_v27 }
 0x719   :  { %v16904_v34 = vpop.f32.mrf.mxu1  ;;  %v11918_v53 = vadd.f32 %v21805_v7, %v24441_v14  ;;  %v12873_v25 = vmul.f32 %v22057_v41, %v22057_v41 }
 0x71a   :  { %24438 = vst [vmem:[#allocation67_spill] sm:$0xff] %v22053_v35  ;;  %v12933_v52 = vadd.f32 %v12932_v6, %v12870_v26  ;;  %v12800_v24 = vadd.f32 %v12799_v49, %v22053_v35  ;;  %v12871_v30 = vmul.f32 %v22053_v35, %v22053_v35  ;;  %v24442_v6 = vld [vmem:[#allocation60_spill] sm:$0xff]  ;;  %v22076_v35 = vpop.f32.mrf.mxu0 }
 0x71b   :  { %v12389_v13 = vpop.f32.mrf.mxu1  ;;  %v11917_v5 = vadd.f32 %v21838_v36, %v24442_v6  ;;  %v22078_v9 = vadd.f32 %v16904_v34, %v11918_v53 }
 0x71c   :  { %v12801_v31 = vadd.f32 %v12800_v24, %v22046_v27  ;;  %v12934_v50 = vadd.f32 %v12933_v52, %v12871_v30  ;;  %v22067_v2 = vadd.f32 %v12389_v13, %v11916_v59  ;;  %v24443_v52 = vld [vmem:[#allocation25_spill] sm:$0xff]  ;;  %v22094_v53 = vpop.f32.mrf.mxu0 }
 0x71d   :  { %v16905_v19 = vpop.f32.mrf.mxu1  ;;  %v11919_v59 = vadd.f32 %v21820_v43, %v24443_v52 }
 0x71e   :  { %24440 = vst [vmem:[#allocation23_spill] sm:$0xff] %v22067_v2  ;;  %v12935_v49 = vadd.f32 %v12934_v50, %v12872_v16  ;;  %v12802_v26 = vadd.f32 %v12801_v31, %v22057_v41  ;;  %v12874_v30 = vmul.f32 %v22067_v2, %v22067_v2  ;;  %v24445_v50 = vld [vmem:[#allocation62_spill] sm:$0xff] }
 0x71f   :  { %v12392_v24 = vpop.f32.mrf.mxu1  ;;  %v11920_v36 = vadd.f32 %v21870_v8, %v24445_v50  ;;  %v22089_v6 = vadd.f32 %v16905_v19, %v11919_v59  ;;  %v24447_v8 = vld [vmem:[#allocation74_spill] sm:$0xff] }
 0x720   :  { %v12803_v7 = vadd.f32 %v12802_v26, %v22067_v2  ;;  %v12936_v13 = vadd.f32 %v12935_v49, %v12873_v25  ;;  %v22085_v16 = vadd.f32 %v12392_v24, %v11917_v5  ;;  %v12876_v25 = vmul.f32 %v22078_v9, %v22078_v9 }
 0x721   :  { %v16908_v31 = vpop.f32.mrf.mxu1  ;;  %v11922_v19 = vadd.f32 %v21852_v15, %v24447_v8  ;;  %v12877_v24 = vmul.f32 %v22089_v6, %v22089_v6 }
 0x722   :  { %24444 = vst [vmem:[#allocation48_spill] sm:$0xff] %v22085_v16  ;;  %v12937_v14 = vadd.f32 %v12936_v13, %v12874_v30  ;;  %v12804_v34 = vadd.f32 %v12803_v7, %v22085_v16  ;;  %v12875_v43 = vmul.f32 %v22085_v16, %v22085_v16  ;;  %v24448_v13 = vld [vmem:[#allocation76_spill] sm:$0xff]  ;;  %v22108_v16 = vpop.f32.mrf.mxu0 }
 0x723   :  { %v12405_v26 = vpop.f32.mrf.mxu1  ;;  %v11921_v50 = vadd.f32 %v21902_v61, %v24448_v13  ;;  %v22110_v2 = vadd.f32 %v16908_v31, %v11922_v19 }
 0x724   :  { %v12805_v49 = vadd.f32 %v12804_v34, %v22078_v9  ;;  %v12938_v5 = vadd.f32 %v12937_v14, %v12875_v43  ;;  %v22099_v52 = vadd.f32 %v12405_v26, %v11920_v36  ;;  %v24449_v14 = vld [vmem:[#allocation27_spill] sm:$0xff]  ;;  %v22126_v19 = vpop.f32.mrf.mxu0 }
 0x725   :  { %v16909_v59 = vpop.f32.mrf.mxu1  ;;  %v11923_v36 = vadd.f32 %v21884_v18, %v24449_v14 }
 0x726   :  { %24446 = vst [vmem:[#allocation69_spill] sm:$0xff] %v22099_v52  ;;  %v12939_v7 = vadd.f32 %v12938_v5, %v12876_v25  ;;  %v12806_v30 = vadd.f32 %v12805_v49, %v22089_v6  ;;  %v12878_v43 = vmul.f32 %v22099_v52, %v22099_v52  ;;  %v24451_v5 = vld [vmem:[#allocation75_spill] sm:$0xff] }
 0x727   :  { %v12408_v34 = vpop.f32.mrf.mxu1  ;;  %v11924_v61 = vadd.f32 %v21934_v29, %v24451_v5  ;;  %v22121_v13 = vadd.f32 %v16909_v59, %v11923_v36  ;;  %v24453_v29 = vld [vmem:[#allocation78_spill] sm:$0xff] }
 0x728   :  { %v12807_v15 = vadd.f32 %v12806_v30, %v22099_v52  ;;  %v12940_v26 = vadd.f32 %v12939_v7, %v12877_v24  ;;  %v22117_v25 = vadd.f32 %v12408_v34, %v11921_v50  ;;  %v12880_v24 = vmul.f32 %v22110_v2, %v22110_v2 }
 0x729   :  { %v16912_v49 = vpop.f32.mrf.mxu1  ;;  %v11926_v59 = vadd.f32 %v21916_v42, %v24453_v29  ;;  %v12881_v34 = vmul.f32 %v22121_v13, %v22121_v13 }
 0x72a   :  { %24450 = vst [vmem:[#allocation73_spill] sm:$0xff] %v22117_v25  ;;  %v12941_v8 = vadd.f32 %v12940_v26, %v12878_v43  ;;  %v12808_v31 = vadd.f32 %v12807_v15, %v22117_v25  ;;  %v12879_v18 = vmul.f32 %v22117_v25, %v22117_v25  ;;  %v24454_v26 = vld [vmem:[#allocation79_spill] sm:$0xff]  ;;  %v22140_v25 = vpop.f32.mrf.mxu0 }
 0x72b   :  { %v12421_v30 = vpop.f32.mrf.mxu1  ;;  %v11925_v5 = vadd.f32 %v21966_v48, %v24454_v26  ;;  %v22142_v52 = vadd.f32 %v16912_v49, %v11926_v59 }
 0x72c   :  { %v12809_v7 = vadd.f32 %v12808_v31, %v22110_v2  ;;  %v12942_v50 = vadd.f32 %v12941_v8, %v12879_v18  ;;  %v22131_v14 = vadd.f32 %v12421_v30, %v11924_v61  ;;  %v24455_v8 = vld [vmem:[#allocation80_spill] sm:$0xff]  ;;  %v22158_v59 = vpop.f32.mrf.mxu0 }
 0x72d   :  { %v16913_v36 = vpop.f32.mrf.mxu1  ;;  %v11927_v61 = vadd.f32 %v21948_v10, %v24455_v8 }
 0x72e   :  { %24452 = vst [vmem:[#allocation71_spill] sm:$0xff] %v22131_v14  ;;  %v12943_v15 = vadd.f32 %v12942_v50, %v12880_v24  ;;  %v12810_v43 = vadd.f32 %v12809_v7, %v22121_v13  ;;  %v12882_v18 = vmul.f32 %v22131_v14, %v22131_v14  ;;  %v24457_v50 = vld [vmem:[#allocation32_spill] sm:$0xff] }
 0x72f   :  { %v12424_v31 = vpop.f32.mrf.mxu1  ;;  %v11928_v48 = vadd.f32 %v21998_v3, %v24457_v50  ;;  %v22153_v26 = vadd.f32 %v16913_v36, %v11927_v61  ;;  %v24459_v3 = vld [vmem:[#allocation33_spill] sm:$0xff] }
 0x730   :  { %v12811_v42 = vadd.f32 %v12810_v43, %v22131_v14  ;;  %v12944_v30 = vadd.f32 %v12943_v15, %v12881_v34  ;;  %v22149_v24 = vadd.f32 %v12424_v31, %v11925_v5  ;;  %v12884_v34 = vmul.f32 %v22142_v52, %v22142_v52 }
 0x731   :  { %v16916_v7 = vpop.f32.mrf.mxu1  ;;  %v11930_v36 = vadd.f32 %v21980_v17, %v24459_v3  ;;  %v12885_v31 = vmul.f32 %v22153_v26, %v22153_v26 }
 0x732   :  { %24456 = vst [vmem:[#allocation49_spill] sm:$0xff] %v22149_v24  ;;  %v12945_v29 = vadd.f32 %v12944_v30, %v12882_v18  ;;  %v12812_v49 = vadd.f32 %v12811_v42, %v22149_v24  ;;  %v12883_v10 = vmul.f32 %v22149_v24, %v22149_v24  ;;  %v24460_v30 = vld [vmem:[#allocation15_spill] sm:$0xff]  ;;  %v22172_v24 = vpop.f32.mrf.mxu0 }
 0x733   :  { %v12437_v43 = vpop.f32.mrf.mxu1  ;;  %v11929_v50 = vadd.f32 %v22030_v20, %v24460_v30  ;;  %v22174_v14 = vadd.f32 %v16916_v7, %v11930_v36 }
 0x734   :  { %v12813_v15 = vadd.f32 %v12812_v49, %v22142_v52  ;;  %v12946_v5 = vadd.f32 %v12945_v29, %v12883_v10  ;;  %v22163_v8 = vadd.f32 %v12437_v43, %v11928_v48  ;;  %v24461_v29 = vld [vmem:[#allocation50_spill] sm:$0xff]  ;;  %v11789_v36 = vpop.f32.mrf.mxu0 }
 0x735   :  { %v16917_v61 = vpop.f32.mrf.mxu1  ;;  %v11931_v48 = vadd.f32 %v22012_v39, %v24461_v29  ;;  %v12888_v29 = vmul.f32 %v22174_v14, %v22174_v14 }
 0x736   :  { %24458 = vst [vmem:[#allocation47_spill] sm:$0xff] %v22163_v8  ;;  %v12947_v42 = vadd.f32 %v12946_v5, %v12884_v34  ;;  %v12814_v18 = vadd.f32 %v12813_v15, %v22153_v26  ;;  %v12886_v10 = vmul.f32 %v22163_v8, %v22163_v8  ;;  %v24463_v5 = vld [vmem:[#allocation16_spill] sm:$0xff] }
 0x737   :  { %v12440_v49 = vpop.f32.mrf.mxu1  ;;  %v11932_v20 = vadd.f32 %v22062_v23, %v24463_v5  ;;  %v22185_v30 = vadd.f32 %v16917_v61, %v11931_v48 }
 0x738   :  { %v12815_v17 = vadd.f32 %v12814_v18, %v22163_v8  ;;  %v12948_v43 = vadd.f32 %v12947_v42, %v12885_v31  ;;  %v22181_v34 = vadd.f32 %v12440_v49, %v11929_v50  ;;  %v24464_v49 = vld [vmem:[#allocation82_spill] sm:$0xff] }
 0x739   :  { %v16920_v15 = vpop.f32.mrf.mxu1  ;;  %v11934_v23 = vadd.f32 %v22044_v38, %v24464_v49  ;;  %v12889_v48 = vmul.f32 %v22185_v30, %v22185_v30 }
 0x73a   :  { %24462 = vst [vmem:[#allocation24_spill] sm:$0xff] %v22181_v34  ;;  %v12949_v3 = vadd.f32 %v12948_v43, %v12886_v10  ;;  %v12816_v7 = vadd.f32 %v12815_v17, %v22181_v34  ;;  %v12887_v39 = vmul.f32 %v22181_v34, %v22181_v34  ;;  %v24465_v43 = vld [vmem:[#allocation83_spill] sm:$0xff]  ;;  %v16849_v34 = vpop.f32.mrf.mxu0 }
 0x73b   :  { %v12453_v18 = vpop.f32.mrf.mxu1  ;;  %v11933_v5 = vadd.f32 %v22094_v53, %v24465_v43  ;;  %v22202_v8 = vadd.f32 %v16920_v15, %v11934_v23 }
 0x73c   :  { %v12817_v31 = vadd.f32 %v12816_v7, %v22174_v14  ;;  %v12950_v42 = vadd.f32 %v12949_v3, %v12887_v39  ;;  %v22193_v50 = vadd.f32 %v12453_v18, %v11932_v20  ;;  %v24466_v7 = vld [vmem:[#allocation38_spill] sm:$0xff]  ;;  %v11792_v23 = vpop.f32.mrf.mxu0 }
 0x73d   :  { %v16921_v61 = vpop.f32.mrf.mxu1  ;;  %v11935_v20 = vadd.f32 %v22076_v35, %v24466_v7  ;;  %v12892_v7 = vmul.f32 %v22202_v8, %v22202_v8 }
 0x73e   :  { %v12951_v17 = vadd.f32 %v12950_v42, %v12888_v29  ;;  %v12818_v10 = vadd.f32 %v12817_v31, %v22185_v30  ;;  %v12890_v38 = vmul.f32 %v22193_v50, %v22193_v50  ;;  %v24468_v31 = vld [vmem:[#allocation42_spill] sm:$0xff] }
 0x73f   :  { %v12456_v3 = vpop.f32.mrf.mxu1  ;;  %v11936_v42 = vadd.f32 %v22126_v19, %v24468_v31  ;;  %v22213_v43 = vadd.f32 %v16921_v61, %v11935_v20  ;;  %v16852_v31 = vpop.f32.mrf.mxu0 }
 0x740   :  { %v12819_v39 = vadd.f32 %v12818_v10, %v22193_v50  ;;  %v12952_v18 = vadd.f32 %v12951_v17, %v12889_v48  ;;  %v22209_v49 = vadd.f32 %v12456_v3, %v11933_v5  ;;  %v24470_v3 = vld [vmem:[#allocation51_spill] sm:$0xff] }
 0x741   :  { %v16924_v29 = vpop.f32.mrf.mxu1  ;;  %v11938_v19 = vadd.f32 %v22108_v16, %v24470_v3  ;;  %v12893_v20 = vmul.f32 %v22213_v43, %v22213_v43 }
 0x742   :  { %24467 = vst [vmem:[#allocation31_spill] sm:$0xff] %v22209_v49  ;;  %v12953_v53 = vadd.f32 %v12952_v18, %v12890_v38  ;;  %v12820_v15 = vadd.f32 %v12819_v39, %v22209_v49  ;;  %v12891_v35 = vmul.f32 %v22209_v49, %v22209_v49  ;;  %v11937_v18 = vadd.f32 %v22158_v59, %v21776_v32 }
 0x743   :  { %v12469_v10 = vpop.f32.mrf.mxu1  ;;  %v22230_v49 = vadd.f32 %v16924_v29, %v11938_v19  ;;  %v11805_v29 = vpop.f32.mrf.mxu0 }
 0x744   :  { %v12821_v48 = vadd.f32 %v12820_v15, %v22202_v8  ;;  %v12954_v17 = vadd.f32 %v12953_v53, %v12891_v35  ;;  %v22221_v5 = vadd.f32 %v12469_v10, %v11936_v42  ;;  %v24471_v15 = vld [vmem:[#allocation61_spill] sm:$0xff] }
 0x745   :  { %v16925_v61 = vpop.f32.mrf.mxu1  ;;  %v11939_v42 = vadd.f32 %v22140_v25, %v24471_v15  ;;  %v24474_v15 = vld [vmem:[#allocation43_spill] sm:$0xff] }
 0x746   :  { %24469 = vst [vmem:[#allocation28_spill] sm:$0xff] %v22221_v5  ;;  %v12955_v39 = vadd.f32 %v12954_v17, %v12892_v7  ;;  %v12822_v38 = vadd.f32 %v12821_v48, %v22213_v43  ;;  %v12894_v16 = vmul.f32 %v22221_v5, %v22221_v5  ;;  %v11940_v48 = vadd.f32 %v11789_v36, %v21784_v57 }
 0x747   :  { %v12472_v53 = vpop.f32.mrf.mxu1  ;;  %v22240_v32 = vadd.f32 %v16925_v61, %v11939_v42  ;;  %v11942_v57 = vadd.f32 %v22172_v24, %v24474_v15 }
 0x748   :  { %v12823_v35 = vadd.f32 %v12822_v38, %v22221_v5  ;;  %v12956_v10 = vadd.f32 %v12955_v39, %v12893_v20  ;;  %v22237_v3 = vadd.f32 %v12472_v53, %v11937_v18  ;;  %v12896_v38 = vmul.f32 %v22230_v49, %v22230_v49  ;;  %v24476_v5 = vld [vmem:[#allocation45_spill] sm:$0xff] }
 0x749   :  { %v16928_v7 = vpop.f32.mrf.mxu1  ;;  %v12897_v61 = vmul.f32 %v22240_v32, %v22240_v32 }
 0x74a   :  { %24472 = vst [vmem:[#allocation30_spill] sm:$0xff] %v22237_v3  ;;  %v12957_v17 = vadd.f32 %v12956_v10, %v12894_v16  ;;  %v12824_v59 = vadd.f32 %v12823_v35, %v22237_v3  ;;  %v12895_v25 = vmul.f32 %v22237_v3, %v22237_v3  ;;  %v24475_v35 = vld [vmem:[#allocation58_spill] sm:$0xff]  ;;  %v16853_v10 = vpop.f32.mrf.mxu0  ;;  %v22256_v3 = vadd.f32 %v16928_v7, %v11942_v57 }
 0x74b   :  { %v12485_v19 = vpop.f32.mrf.mxu1  ;;  %v11941_v16 = vadd.f32 %v11792_v23, %v24475_v35 }
 0x74c   :  { %v12825_v20 = vadd.f32 %v12824_v59, %v22230_v49  ;;  %v12958_v39 = vadd.f32 %v12957_v17, %v12895_v25  ;;  %v22248_v18 = vadd.f32 %v12485_v19, %v11940_v48  ;;  %v11943_v59 = vadd.f32 %v16849_v34, %v24476_v5  ;;  %v11808_v5 = vpop.f32.mrf.mxu0 }
 0x74d   :  { %v16929_v36 = vpop.f32.mrf.mxu1  ;;  %v12900_v57 = vmul.f32 %v22256_v3, %v22256_v3 }
 0x74e   :  { %24473 = vst [vmem:[#allocation29_spill] sm:$0xff] %v22248_v18  ;;  %v12959_v42 = vadd.f32 %v12958_v39, %v12896_v38  ;;  %v12826_v53 = vadd.f32 %v12825_v20, %v22240_v32  ;;  %v12898_v24 = vmul.f32 %v22248_v18, %v22248_v18  ;;  %v11944_v38 = vadd.f32 %v11805_v29, %v21800_v4  ;;  %v24480_v4 = vld [vmem:[#allocation63_spill] sm:$0xff] }
 0x74f   :  { %v12488_v17 = vpop.f32.mrf.mxu1  ;;  %v22265_v15 = vadd.f32 %v16929_v36, %v11943_v59  ;;  %v11946_v29 = vadd.f32 %v16852_v31, %v24480_v4  ;;  %v24481_v36 = vld [vmem:[#allocation59_spill] sm:$0xff] }
 0x750   :  { %v12827_v48 = vadd.f32 %v12826_v53, %v22248_v18  ;;  %v12960_v25 = vadd.f32 %v12959_v42, %v12897_v61  ;;  %v22262_v19 = vadd.f32 %v12488_v17, %v11941_v16  ;;  %v11945_v16 = vadd.f32 %v11808_v5, %v24481_v36 }
 0x751   :  { %v16932_v39 = vpop.f32.mrf.mxu1  ;;  %24478 = vst [vmem:[#allocation36_spill] sm:$0xff] %v22265_v15  ;;  %v12901_v59 = vmul.f32 %v22265_v15, %v22265_v15 }
 0x752   :  { %24477 = vst [vmem:[#allocation81_spill] sm:$0xff] %v22262_v19  ;;  %v12961_v20 = vadd.f32 %v12960_v25, %v12898_v24  ;;  %v12828_v23 = vadd.f32 %v12827_v48, %v22262_v19  ;;  %v12899_v34 = vmul.f32 %v22262_v19, %v22262_v19  ;;  %v24482_v24 = vld [vmem:[#allocation21_spill] sm:$0xff]  ;;  %v22281_v19 = vadd.f32 %v16932_v39, %v11946_v29 }
 0x753   :  { %v12501_v7 = vpop.f32.mrf.mxu1  ;;  %v11947_v25 = vadd.f32 %v16853_v10, %v24482_v24 }
 0x754   :  { %v12829_v61 = vadd.f32 %v12828_v23, %v22256_v3  ;;  %v12962_v42 = vadd.f32 %v12961_v20, %v12899_v34  ;;  %v22273_v53 = vadd.f32 %v12501_v7, %v11944_v38  ;;  %24483 = vst [vmem:[#allocation34_spill] sm:$0xff] %v22281_v19 }
 0x755   :  { %v16933_v35 = vpop.f32.mrf.mxu1 }
 0x756   :  { %24479 = vst [vmem:[#allocation35_spill] sm:$0xff] %v22273_v53  ;;  %v12963_v17 = vadd.f32 %v12962_v42, %v12900_v57  ;;  %v12830_v48 = vadd.f32 %v12829_v61, %v22265_v15  ;;  %v12902_v38 = vmul.f32 %v22273_v53, %v22273_v53  ;;  %v22286_v5 = vadd.f32 %v16933_v35, %v11947_v25 }
 0x757   :  { %v12504_v18 = vpop.f32.mrf.mxu1  ;;  %v12904_v57 = vmul.f32 %v22281_v19, %v22281_v19 }
 0x758   :  { %v12831_v20 = vadd.f32 %v12830_v48, %v22273_v53  ;;  %v12964_v31 = vadd.f32 %v12963_v17, %v12901_v59  ;;  %v12641_v23 = vadd.f32 %v12504_v18, %v11945_v16  ;;  %v12905_v61 = vmul.f32 %v22286_v5, %v22286_v5 }
 0x75a   :  { %v12965_v34 = vadd.f32 %v12964_v31, %v12902_v38  ;;  %v12832_v7 = vadd.f32 %v12831_v20, %v12641_v23  ;;  %v12903_v4 = vmul.f32 %v12641_v23, %v12641_v23 }
 0x75c   :  { %v12833_v10 = vadd.f32 %v12832_v7, %v22281_v19  ;;  %v12966_v39 = vadd.f32 %v12965_v34, %v12903_v4 }
 0x75e   :  { %v12834_v42 = vadd.f32 %v12833_v10, %v22286_v5  ;;  %v12967_v29 = vadd.f32 %v12966_v39, %v12904_v57  ;;  %v12980_v57 = vld [vmem:[%s23484_s3 + $0x2] sm:$0x1] }
 0x760   :  { %v12835_v36 = vrot.slane %v12834_v42, 4  ;;  %v12968_v59 = vadd.f32 %v12967_v29, %v12905_v61  ;;  %v12984_v61 = vld [vmem:[%s23484_s3 + $0x3] sm:$0x1]  ;;  %v24484_v29 = vld [vmem:[#allocation64_spill] sm:$0xff]  ;;  %s17189_s3 = smov [#allocation10]  }
 0x761   :  { %s13513_s13 = sshll.u32 %s17189_s3, 4  ;;  %s13514_s13 = int_to_ptr.vmem [resolvable:$true] %s13513_s13 }
 0x762   :  { %v12836_v18 = vadd.f32 %v12835_v36, %v12834_v42  ;;  %v12969_v16 = vrot.slane %v12968_v59, 4  ;;  %s17153_s14 = scalar_lea.vmem %s13514_s13, 8192  ;;  %p17158_p2 = scmp.lt.s32.totalorder %s13514_s13, %s13514_s13 }
 0x763   :  { %p17154_p1 = scmp.ne.s32.totalorder %s13514_s13, %s17153_s14  ;;  %p17159_p3 = scmp.lt.s32.totalorder %s17153_s14, %s17153_s14 }
 0x764   :  { %v12837_v35 = vrot.slane %v12836_v18, 2  ;;  %v12970_v17 = vadd.f32 %v12969_v16, %v12968_v59 }
 0x765   :  { %p17160_p4 = por %p17159_p3, %p17158_p2 }
 0x766   :  { %v12838_v48 = vadd.f32 %v12837_v35, %v12836_v18  ;;  %v12971_v24 = vrot.slane %v12970_v17, 2 }
 0x767   :  { %p17161_p5 = pnand %p17160_p4, %p17154_p1 }
 0x768   :  { %v12839_v25 = vrot.slane %v12838_v48, 1  ;;  %v12972_v20 = vadd.f32 %v12971_v24, %v12970_v17 }
 0x76a   :  { %v12840_v38 = vadd.f32 %v12839_v25, %v12838_v48  ;;  %v12973_v31 = vrot.slane %v12972_v20, 1 }
 0x76c   :  { %v12974_v7 = vadd.f32 %v12973_v31, %v12972_v20  ;;  %v12976_v34 = vmul.f32 0.001953125, %v12840_v38 }
 0x76e   :  { %v12977_v4 = vmul.f32 0.001953125, %v12974_v7  ;;  %v12978_v19 = vmul.f32 %v12976_v34, %v12976_v34 }
 0x770   :  { %v12979_v53 = vsub.f32 %v12977_v4, %v12978_v19  ;;  %v24485_v19 = vld [vmem:[#allocation19_spill] sm:$0xff]  ;;  %v24488_v4 = vld [vmem:[#allocation22_spill] sm:$0xff] }
 0x772   :  { %v12981_v15 = vadd.f32 1e-05, %v12979_v53  ;;  %v24486_v53 = vld [vmem:[#allocation20_spill] sm:$0xff] }
 0x774   :  { %17091 = vrsqrt.f32 %v12981_v15 }
 0x781   :  { %v17092_v10 = vpop.eup %17091 }
 0x782   :  { %v12983_v39 = vmul.f32 %v17092_v10, %v12980_v57  ;;  %v24489_v57 = vld [vmem:[#allocation65_spill] sm:$0xff]  ;;  %v24490_v10 = vld [vmem:[#allocation68_spill] sm:$0xff] }
 0x784   :  { %v12985_v42 = vmul.f32 %v12983_v39, %v12976_v34  ;;  %v22301_v36 = vrot.slane %v12983_v39, %v24484_v29 }
 0x786   :  { %v12986_v59 = vsub.f32 %v12984_v61, %v12985_v42  ;;  %v13052_v18 = vmul.f32 %v22301_v36, %v12641_v23  ;;  %v22306_v15 = vmul.f32 %v22301_v36, %v24485_v19  ;;  %v22310_v16 = vmul.f32 %v22301_v36, %v24486_v53  ;;  %v24491_v61 = vld [vmem:[#allocation70_spill] sm:$0xff]  ;;  %v24493_v19 = vld [vmem:[#allocation23_spill] sm:$0xff] }
 0x787   :  { %v22314_v35 = vmul.f32 %v22301_v36, %v21822_v11  ;;  %v22318_v17 = vmul.f32 %v22301_v36, %v21832_v47  ;;  %v22322_v48 = vmul.f32 %v22301_v36, %v21843_v62  ;;  %v22326_v23 = vmul.f32 %v22301_v36, %v21861_v58  ;;  %v13185_v62 = vld [vmem:[#allocation4 + $0x200] sm:$0xff] }
 0x788   :  { %v22329_v24 = vrot.slane %v12986_v59, %v24484_v29  ;;  %v22333_v25 = vmul.f32 %v22301_v36, %v21854_v33  ;;  %v22337_v11 = vmul.f32 %v22301_v36, %v21865_v51  ;;  %v22341_v47 = vmul.f32 %v22301_v36, %v21875_v63  ;;  %v24492_v29 = vld [vmem:[#allocation67_spill] sm:$0xff] }
 0x789   :  { %v22345_v58 = vmul.f32 %v22301_v36, %v21893_v0  ;;  %v22349_v20 = vmul.f32 %v22301_v36, %v21886_v28  ;;  %v22353_v33 = vmul.f32 %v22301_v36, %v21897_v40  ;;  %v22357_v51 = vmul.f32 %v22301_v36, %v21907_v1  ;;  %v24487_v1 = vld [vmem:[#allocation66_spill] sm:$0xff] }
 0x78a   :  { %v13120_v63 = vadd.f32 %v22329_v24, %v13052_v18  ;;  %v22362_v38 = vmul.f32 %v22301_v36, %v21925_v12  ;;  %v22366_v0 = vmul.f32 %v22301_v36, %v21918_v56  ;;  %v22370_v28 = vmul.f32 %v22301_v36, %v21929_v46 }
 0x78b   :  { %v22374_v40 = vmul.f32 %v22301_v36, %v21939_v55  ;;  %v22378_v31 = vmul.f32 %v22301_v36, %v24487_v1  ;;  %v22382_v12 = vmul.f32 %v22301_v36, %v21950_v45  ;;  %v22386_v56 = vmul.f32 %v22301_v36, %v21961_v22 }
 0x78c   :  { %v13249_v7 = vadd.f32 %v13185_v62, %v13120_v63  ;;  %v22390_v46 = vmul.f32 %v22301_v36, %v21971_v54  ;;  %v22394_v55 = vmul.f32 %v22301_v36, %v21989_v21  ;;  %v22398_v34 = vmul.f32 %v22301_v36, %v21982_v37  ;;  %v24494_v62 = vld [vmem:[#allocation48_spill] sm:$0xff] }
 0x78d   :  { %v22402_v45 = vmul.f32 %v22301_v36, %v24488_v4  ;;  %v22406_v22 = vmul.f32 %v22301_v36, %v24489_v57  ;;  %v22410_v54 = vmul.f32 %v22301_v36, %v24490_v10  ;;  %v22414_v21 = vmul.f32 %v22301_v36, %v22014_v60  ;;  %v24496_v57 = vld [vmem:[#allocation73_spill] sm:$0xff] }
 0x78e   :  { %vm13313_vm2 = vcmp.ge.f32.partialorder %v13249_v7, 0.0  ;;  %v13377_v39 = vmul.f32 0.01, %v13249_v7  ;;  %v22418_v37 = vmul.f32 %v22301_v36, %v22025_v44  ;;  %v22422_v42 = vmul.f32 %v22301_v36, %v24491_v61  ;;  %v24498_v61 = vld [vmem:[#allocation49_spill] sm:$0xff] }
 0x78f   :  { %v22426_v59 = vmul.f32 %v22301_v36, %v24492_v29  ;;  %v22430_v18 = vmul.f32 %v22301_v36, %v22046_v27  ;;  %v22434_v60 = vmul.f32 %v22301_v36, %v22057_v41  ;;  %v22438_v44 = vmul.f32 %v22301_v36, %v24493_v19  ;;  %v24495_v41 = vld [vmem:[#allocation69_spill] sm:$0xff] }
 0x790   :  { %v13441_v53 = vsel %vm13313_vm2, %v13249_v7, %v13377_v39  ;;  %v22442_v63 = vmul.f32 %v22301_v36, %v24494_v62  ;;  %v22446_v1 = vmul.f32 %v22301_v36, %v22078_v9  ;;  %v22450_v27 = vmul.f32 %v22301_v36, %v22089_v6  ;;  %v24497_v39 = vld [vmem:[#allocation71_spill] sm:$0xff]  ;;  %v24500_v62 = vld [vmem:[#allocation24_spill] sm:$0xff] }
 0x791   :  { %13505 = vst [vmem:[#allocation10 + $0x1e8] sm:$0xff] %v13441_v53  ;;  %v22454_v4 = vmul.f32 %v22301_v36, %v24495_v41  ;;  %v22458_v7 = vmul.f32 %v22301_v36, %v24496_v57  ;;  %v22462_v10 = vmul.f32 %v22301_v36, %v22110_v2  ;;  %v22466_v9 = vmul.f32 %v22301_v36, %v22121_v13  ;;  %v24499_v53 = vld [vmem:[#allocation47_spill] sm:$0xff] }
 0x792   :  { %v22470_v6 = vmul.f32 %v22301_v36, %v24497_v39  ;;  %v22474_v29 = vmul.f32 %v22301_v36, %v24498_v61  ;;  %v22478_v19 = vmul.f32 %v22301_v36, %v22142_v52  ;;  %v22482_v2 = vmul.f32 %v22301_v36, %v22153_v26  ;;  %v24502_v39 = vld [vmem:[#allocation31_spill] sm:$0xff] }
 0x793   :  { %v22486_v13 = vmul.f32 %v22301_v36, %v24499_v53  ;;  %v22490_v41 = vmul.f32 %v22301_v36, %v24500_v62  ;;  %v22494_v57 = vmul.f32 %v22301_v36, %v22174_v14  ;;  %v22498_v52 = vmul.f32 %v22301_v36, %v22185_v30  ;;  %v24505_v62 = vld [vmem:[#allocation28_spill] sm:$0xff] }
 0x794   :  { %v22502_v26 = vmul.f32 %v22301_v36, %v22193_v50  ;;  %v22506_v61 = vmul.f32 %v22301_v36, %v24502_v39  ;;  %v22510_v53 = vmul.f32 %v22301_v36, %v22202_v8  ;;  %v22514_v14 = vmul.f32 %v22301_v36, %v22213_v43 }
 0x795   :  { %24501 = vst [vmem:[#allocation39_spill] sm:$0xff] %v22498_v52  ;;  %v22518_v30 = vmul.f32 %v22301_v36, %v24505_v62  ;;  %v24506_v52 = vld [vmem:[#allocation30_spill] sm:$0xff]  ;;  %v22526_v39 = vmul.f32 %v22301_v36, %v22230_v49  ;;  %v22530_v8 = vmul.f32 %v22301_v36, %v22240_v32 }
 0x796   :  { %24503 = vst [vmem:[#allocation84_spill] sm:$0xff] %v22510_v53  ;;  %24504 = vst [vmem:[#allocation86_spill] sm:$0xff] %v22514_v14  ;;  %v22522_v50 = vmul.f32 %v22301_v36, %v24506_v52  ;;  %v24510_v53 = vld [vmem:[#allocation29_spill] sm:$0xff]  ;;  %v22542_v52 = vmul.f32 %v22301_v36, %v22256_v3  ;;  %v22562_v3 = vadd.f32 %v22329_v24, %v22306_v15 }
 0x797   :  { %24508 = vst [vmem:[#allocation87_spill] sm:$0xff] %v22526_v39  ;;  %24509 = vst [vmem:[#allocation14_spill] sm:$0xff] %v22530_v8  ;;  %v22534_v43 = vmul.f32 %v22301_v36, %v24510_v53  ;;  %v24511_v14 = vld [vmem:[#allocation81_spill] sm:$0xff]  ;;  %v24513_v39 = vld [vmem:[#allocation35_spill] sm:$0xff]  ;;  %v22586_v15 = vadd.f32 %v22329_v24, %v22333_v25  ;;  %v22610_v25 = vadd.f32 %v22329_v24, %v22357_v51 }
 0x798   :  { %24507 = vst [vmem:[#allocation85_spill] sm:$0xff] %v22522_v50  ;;  %v22538_v62 = vmul.f32 %v22301_v36, %v24511_v14  ;;  %v24512_v50 = vld [vmem:[#allocation36_spill] sm:$0xff]  ;;  %v22550_v32 = vmul.f32 %v22301_v36, %v24513_v39  ;;  %v24514_v8 = vld [vmem:[#allocation34_spill] sm:$0xff]  ;;  %v22558_v14 = vmul.f32 %v22301_v36, %v22286_v5  ;;  %v22570_v39 = vadd.f32 %v22329_v24, %v22314_v35 }
 0x799   :  { %v22546_v49 = vmul.f32 %v22301_v36, %v24512_v50  ;;  %v22554_v53 = vmul.f32 %v22301_v36, %v24514_v8  ;;  %v22566_v50 = vadd.f32 %v22329_v24, %v22310_v16  ;;  %v22574_v8 = vadd.f32 %v22329_v24, %v22318_v17 }
 0x79a   :  { %v22578_v5 = vadd.f32 %v22329_v24, %v22322_v48  ;;  %v22582_v36 = vadd.f32 %v22329_v24, %v22326_v23  ;;  %v22590_v16 = vadd.f32 %v22329_v24, %v22337_v11  ;;  %v22594_v35 = vadd.f32 %v22329_v24, %v22341_v47 }
 0x79b   :  { %v22598_v17 = vadd.f32 %v22329_v24, %v22345_v58  ;;  %v22602_v48 = vadd.f32 %v22329_v24, %v22349_v20  ;;  %v22606_v23 = vadd.f32 %v22329_v24, %v22353_v33  ;;  %v22614_v11 = vadd.f32 %v22329_v24, %v22362_v38 }
 0x79c   :  { %v22618_v47 = vadd.f32 %v22329_v24, %v22366_v0  ;;  %v22622_v58 = vadd.f32 %v22329_v24, %v22370_v28  ;;  %v22626_v20 = vadd.f32 %v22329_v24, %v22374_v40  ;;  %v22630_v33 = vadd.f32 %v22329_v24, %v22378_v31 }
 0x79d   :  { %v22634_v51 = vadd.f32 %v22329_v24, %v22382_v12  ;;  %v22638_v38 = vadd.f32 %v22329_v24, %v22386_v56  ;;  %v22642_v0 = vadd.f32 %v22329_v24, %v22390_v46  ;;  %v22646_v28 = vadd.f32 %v22329_v24, %v22394_v55 }
 0x79e   :  { %v22650_v40 = vadd.f32 %v22329_v24, %v22398_v34  ;;  %v22654_v31 = vadd.f32 %v22329_v24, %v22402_v45  ;;  %v22658_v12 = vadd.f32 %v22329_v24, %v22406_v22  ;;  %v22662_v56 = vadd.f32 %v22329_v24, %v22410_v54 }
 0x79f   :  { %v22666_v46 = vadd.f32 %v22329_v24, %v22414_v21  ;;  %v22670_v55 = vadd.f32 %v22329_v24, %v22418_v37  ;;  %v22674_v34 = vadd.f32 %v22329_v24, %v22422_v42  ;;  %v22678_v45 = vadd.f32 %v22329_v24, %v22426_v59 }
 0x7a0   :  { %v22682_v22 = vadd.f32 %v22329_v24, %v22430_v18  ;;  %v22686_v54 = vadd.f32 %v22329_v24, %v22434_v60  ;;  %v22690_v21 = vadd.f32 %v22329_v24, %v22438_v44  ;;  %v22694_v37 = vadd.f32 %v22329_v24, %v22442_v63 }
 0x7a1   :  { %v22698_v42 = vadd.f32 %v22329_v24, %v22446_v1  ;;  %v22702_v59 = vadd.f32 %v22329_v24, %v22450_v27  ;;  %v22706_v18 = vadd.f32 %v22329_v24, %v22454_v4  ;;  %v22710_v60 = vadd.f32 %v22329_v24, %v22458_v7 }
 0x7a2   :  { %v22714_v44 = vadd.f32 %v22329_v24, %v22462_v10  ;;  %v22718_v63 = vadd.f32 %v22329_v24, %v22466_v9  ;;  %v22722_v1 = vadd.f32 %v22329_v24, %v22470_v6  ;;  %v22726_v27 = vadd.f32 %v22329_v24, %v22474_v29  ;;  %v24528_v29 = vld [vmem:[#allocation39_spill] sm:$0xff] }
 0x7a3   :  { %24515 = vst [vmem:[#allocation52_spill] sm:$0xff] %v22698_v42  ;;  %24516 = vst [vmem:[#allocation53_spill] sm:$0xff] %v22702_v59  ;;  %v22730_v4 = vadd.f32 %v22329_v24, %v22478_v19  ;;  %v22734_v7 = vadd.f32 %v22329_v24, %v22482_v2  ;;  %v22738_v10 = vadd.f32 %v22329_v24, %v22486_v13 }
 0x7a4   :  { %24517 = vst [vmem:[#allocation56_spill] sm:$0xff] %v22706_v18  ;;  %24518 = vst [vmem:[#allocation40_spill] sm:$0xff] %v22710_v60  ;;  %v22742_v9 = vadd.f32 %v22329_v24, %v22490_v41  ;;  %v22746_v6 = vadd.f32 %v22329_v24, %v22494_v57  ;;  %v22750_v19 = vadd.f32 %v22329_v24, %v24528_v29 }
 0x7a5   :  { %24519 = vst [vmem:[#allocation55_spill] sm:$0xff] %v22714_v44  ;;  %24520 = vst [vmem:[#allocation54_spill] sm:$0xff] %v22718_v63  ;;  %v22754_v2 = vadd.f32 %v22329_v24, %v22502_v26  ;;  %v22758_v13 = vadd.f32 %v22329_v24, %v22506_v61  ;;  %v22770_v29 = vadd.f32 %v22329_v24, %v22518_v30  ;;  %v13147_v63 = vld [vmem:[#allocation4 + $0xd0] sm:$0xff]  ;;  %v13145_v44 = vld [vmem:[#allocation4 + $0xc0] sm:$0xff] }
 0x7a6   :  { %24521 = vst [vmem:[#allocation72_spill] sm:$0xff] %v22722_v1  ;;  %24522 = vst [vmem:[#allocation44_spill] sm:$0xff] %v22726_v27  ;;  %v22790_v30 = vadd.f32 %v22329_v24, %v22538_v62  ;;  %v22810_v62 = vadd.f32 %v22329_v24, %v22558_v14  ;;  %v13141_v14 = vld [vmem:[#allocation4 + $0xa0] sm:$0xff]  ;;  %v13146_v27 = vld [vmem:[#allocation4 + $0xc8] sm:$0xff] }
 0x7a7   :  { %24523 = vst [vmem:[#allocation57_spill] sm:$0xff] %v22730_v4  ;;  %24524 = vst [vmem:[#allocation37_spill] sm:$0xff] %v22734_v7  ;;  %v13140_v7 = vld [vmem:[#allocation4 + $0x98] sm:$0xff] }
 0x7a8   :  { %24525 = vst [vmem:[#allocation46_spill] sm:$0xff] %v22738_v10  ;;  %24526 = vst [vmem:[#allocation41_spill] sm:$0xff] %v22742_v9  ;;  %v24532_v10 = vld [vmem:[#allocation84_spill] sm:$0xff]  ;;  %v24534_v9 = vld [vmem:[#allocation86_spill] sm:$0xff] }
 0x7a9   :  { %24527 = vst [vmem:[#allocation77_spill] sm:$0xff] %v22746_v6  ;;  %24529 = vst [vmem:[#allocation26_spill] sm:$0xff] %v22750_v19  ;;  %v22762_v41 = vadd.f32 %v22329_v24, %v24532_v10  ;;  %v22766_v57 = vadd.f32 %v22329_v24, %v24534_v9  ;;  %v24537_v19 = vld [vmem:[#allocation85_spill] sm:$0xff]  ;;  %v22786_v9 = vadd.f32 %v22329_v24, %v22534_v43  ;;  %v13144_v1 = vld [vmem:[#allocation4 + $0xb8] sm:$0xff] }
 0x7aa   :  { %24530 = vst [vmem:[#allocation18_spill] sm:$0xff] %v22754_v2  ;;  %24531 = vst [vmem:[#allocation17_spill] sm:$0xff] %v22758_v13  ;;  %v22774_v26 = vadd.f32 %v22329_v24, %v24537_v19  ;;  %v24539_v2 = vld [vmem:[#allocation87_spill] sm:$0xff]  ;;  %v24541_v13 = vld [vmem:[#allocation14_spill] sm:$0xff]  ;;  %v22794_v19 = vadd.f32 %v22329_v24, %v22542_v52  ;;  %v22806_v43 = vadd.f32 %v22329_v24, %v22554_v53 }
 0x7ab   :  { %24533 = vst [vmem:[#allocation60_spill] sm:$0xff] %v22762_v41  ;;  %24535 = vst [vmem:[#allocation25_spill] sm:$0xff] %v22766_v57  ;;  %v22778_v61 = vadd.f32 %v22329_v24, %v24539_v2  ;;  %v22782_v10 = vadd.f32 %v22329_v24, %v24541_v13  ;;  %v22798_v2 = vadd.f32 %v22329_v24, %v22546_v49  ;;  %v13127_v52 = vld [vmem:[#allocation4 + $0x30] sm:$0xff]  ;;  %v13138_v57 = vld [vmem:[#allocation4 + $0x88] sm:$0xff] }
 0x7ac   :  { %24536 = vst [vmem:[#allocation62_spill] sm:$0xff] %v22770_v29  ;;  %24538 = vst [vmem:[#allocation74_spill] sm:$0xff] %v22774_v26  ;;  %v22802_v13 = vadd.f32 %v22329_v24, %v22550_v32  ;;  %v13131_v49 = vld [vmem:[#allocation4 + $0x50] sm:$0xff]  ;;  %v13134_v26 = vld [vmem:[#allocation4 + $0x68] sm:$0xff]  ;;  %v22822_v18 = vadd.f32 %v13127_v52, %v22574_v8 }
 0x7ad   :  { %24540 = vst [vmem:[#allocation76_spill] sm:$0xff] %v22778_v61  ;;  %24542 = vst [vmem:[#allocation27_spill] sm:$0xff] %v22782_v10  ;;  %v13130_v10 = vld [vmem:[#allocation4 + $0x48] sm:$0xff]  ;;  %v13128_v61 = vld [vmem:[#allocation4 + $0x38] sm:$0xff] }
 0x7ae   :  { %24543 = vst [vmem:[#allocation75_spill] sm:$0xff] %v22786_v9  ;;  %24544 = vst [vmem:[#allocation78_spill] sm:$0xff] %v22790_v30  ;;  %v13126_v30 = vld [vmem:[#allocation4 + $0x28] sm:$0xff]  ;;  %v13124_v9 = vld [vmem:[#allocation4 + $0x18] sm:$0xff]  ;;  %v22825_v59 = vadd.f32 %v13128_v61, %v22578_v5  ;;  %vm13255_vm3 = vcmp.ge.f32.partialorder %v22822_v18, 0.0 }
 0x7af   :  { %24545 = vst [vmem:[#allocation79_spill] sm:$0xff] %v22794_v19  ;;  %24546 = vst [vmem:[#allocation80_spill] sm:$0xff] %v22798_v2  ;;  %v13125_v19 = vld [vmem:[#allocation4 + $0x20] sm:$0xff]  ;;  %v13132_v29 = vld [vmem:[#allocation4 + $0x58] sm:$0xff]  ;;  %v22819_v60 = vadd.f32 %v13126_v30, %v22570_v39 }
 0x7b0   :  { %24547 = vst [vmem:[#allocation32_spill] sm:$0xff] %v22802_v13  ;;  %24548 = vst [vmem:[#allocation33_spill] sm:$0xff] %v22806_v43  ;;  %v13129_v2 = vld [vmem:[#allocation4 + $0x40] sm:$0xff]  ;;  %v13135_v32 = vld [vmem:[#allocation4 + $0x70] sm:$0xff]  ;;  %v22816_v4 = vadd.f32 %v13125_v19, %v22566_v50  ;;  %v22837_v39 = vadd.f32 %v13132_v29, %v22594_v35  ;;  %vm13256_vm15 = vcmp.ge.f32.partialorder %v22825_v59, 0.0 }
 0x7b1   :  { %24549 = vst [vmem:[#allocation15_spill] sm:$0xff] %v22810_v62  ;;  %v13133_v13 = vld [vmem:[#allocation4 + $0x60] sm:$0xff]  ;;  %v13136_v41 = vld [vmem:[#allocation4 + $0x78] sm:$0xff]  ;;  %v13139_v53 = vld [vmem:[#allocation4 + $0x90] sm:$0xff]  ;;  %v22813_v62 = vadd.f32 %v13124_v9, %v22562_v3  ;;  %v22828_v42 = vadd.f32 %v13129_v2, %v22582_v36  ;;  %v22843_v2 = vadd.f32 %v13134_v26, %v22602_v48  ;;  %v22846_v52 = vadd.f32 %v13135_v32, %v22606_v23 }
 0x7b2   :  { %v13137_v43 = vld [vmem:[#allocation4 + $0x80] sm:$0xff]  ;;  %v13142_v6 = vld [vmem:[#allocation4 + $0xa8] sm:$0xff]  ;;  %v13143_v24 = vld [vmem:[#allocation4 + $0xb0] sm:$0xff]  ;;  %24551 = vst [vmem:[#allocation16_spill] sm:$0xff] %v22816_v4  ;;  %v22831_v4 = vadd.f32 %v13130_v10, %v22586_v15  ;;  %v22840_v8 = vadd.f32 %v13133_v13, %v22598_v17  ;;  %v22849_v15 = vadd.f32 %v13136_v41, %v22610_v25  ;;  %v22855_v13 = vadd.f32 %v13138_v57, %v22618_v47 }
 0x7b3   :  { %24550 = vst [vmem:[#allocation50_spill] sm:$0xff] %v22813_v62  ;;  %v13150_v3 = vld [vmem:[#allocation4 + $0xe8] sm:$0xff]  ;;  %v13148_v9 = vld [vmem:[#allocation4 + $0xd8] sm:$0xff]  ;;  %v13151_v50 = vld [vmem:[#allocation4 + $0xf0] sm:$0xff]  ;;  %v22834_v62 = vadd.f32 %v13131_v49, %v22590_v16  ;;  %v22852_v16 = vadd.f32 %v13137_v43, %v22614_v11  ;;  %v22858_v49 = vadd.f32 %v13139_v53, %v22622_v58  ;;  %v22861_v48 = vadd.f32 %v13140_v7, %v22626_v20 }
 0x7b4   :  { %v13149_v19 = vld [vmem:[#allocation4 + $0xe0] sm:$0xff]  ;;  %v13154_v5 = vld [vmem:[#allocation4 + $0x108] sm:$0xff]  ;;  %v13152_v61 = vld [vmem:[#allocation4 + $0xf8] sm:$0xff]  ;;  %v22864_v23 = vadd.f32 %v13141_v14, %v22630_v33  ;;  %v22867_v43 = vadd.f32 %v13142_v6, %v22634_v51  ;;  %v22870_v32 = vadd.f32 %v13143_v24, %v22638_v38  ;;  %v22873_v47 = vadd.f32 %v13144_v1, %v22642_v0 }
 0x7b5   :  { %v13155_v36 = vld [vmem:[#allocation4 + $0x110] sm:$0xff]  ;;  %v13153_v30 = vld [vmem:[#allocation4 + $0x100] sm:$0xff]  ;;  %v13158_v35 = vld [vmem:[#allocation4 + $0x128] sm:$0xff]  ;;  %v22876_v58 = vadd.f32 %v13145_v44, %v22646_v28  ;;  %v22879_v57 = vadd.f32 %v13146_v27, %v22650_v40  ;;  %v22882_v53 = vadd.f32 %v13147_v63, %v22654_v31  ;;  %v22885_v51 = vadd.f32 %v13148_v9, %v22658_v12 }
 0x7b6   :  { %v13156_v29 = vld [vmem:[#allocation4 + $0x118] sm:$0xff]  ;;  %v13159_v17 = vld [vmem:[#allocation4 + $0x130] sm:$0xff]  ;;  %v13157_v10 = vld [vmem:[#allocation4 + $0x120] sm:$0xff]  ;;  %v22888_v38 = vadd.f32 %v13149_v19, %v22662_v56  ;;  %v22891_v28 = vadd.f32 %v13150_v3, %v22666_v46  ;;  %v22894_v44 = vadd.f32 %v13151_v50, %v22670_v55  ;;  %v22897_v40 = vadd.f32 %v13152_v61, %v22674_v34 }
 0x7b7   :  { %v13162_v25 = vld [vmem:[#allocation4 + $0x148] sm:$0xff]  ;;  %v13160_v41 = vld [vmem:[#allocation4 + $0x138] sm:$0xff]  ;;  %v13163_v11 = vld [vmem:[#allocation4 + $0x150] sm:$0xff]  ;;  %v22900_v31 = vadd.f32 %v13153_v30, %v22678_v45  ;;  %v22903_v56 = vadd.f32 %v13154_v5, %v22682_v22  ;;  %v22906_v24 = vadd.f32 %v13155_v36, %v22686_v54  ;;  %v22909_v46 = vadd.f32 %v13156_v29, %v22690_v21 }
 0x7b8   :  { %v13161_v26 = vld [vmem:[#allocation4 + $0x140] sm:$0xff]  ;;  %v13166_v20 = vld [vmem:[#allocation4 + $0x168] sm:$0xff]  ;;  %v13164_v7 = vld [vmem:[#allocation4 + $0x158] sm:$0xff]  ;;  %v22912_v55 = vadd.f32 %v13157_v10, %v22694_v37  ;;  %vm13254_vm12 = vcmp.ge.f32.partialorder %v22819_v60, 0.0  ;;  %vm13257_vm13 = vcmp.ge.f32.partialorder %v22828_v42, 0.0  ;;  %vm13258_vm5 = vcmp.ge.f32.partialorder %v22831_v4, 0.0 }
 0x7b9   :  { %v13167_v33 = vld [vmem:[#allocation4 + $0x170] sm:$0xff]  ;;  %v13165_v0 = vld [vmem:[#allocation4 + $0x160] sm:$0xff]  ;;  %v13170_v1 = vld [vmem:[#allocation4 + $0x188] sm:$0xff]  ;;  %24552 = vst [vmem:[#allocation82_spill] sm:$0xff] %v22903_v56  ;;  %vm13259_vm8 = vcmp.ge.f32.partialorder %v22834_v62, 0.0  ;;  %vm13260_vm0 = vcmp.ge.f32.partialorder %v22837_v39, 0.0 }
 0x7ba   :  { %v13168_v6 = vld [vmem:[#allocation4 + $0x178] sm:$0xff]  ;;  %v13171_v12 = vld [vmem:[#allocation4 + $0x190] sm:$0xff]  ;;  %v13169_v63 = vld [vmem:[#allocation4 + $0x180] sm:$0xff]  ;;  %24553 = vst [vmem:[#allocation83_spill] sm:$0xff] %v22912_v55  ;;  %vm13261_vm6 = vcmp.ge.f32.partialorder %v22840_v8, 0.0  ;;  %vm13262_vm11 = vcmp.ge.f32.partialorder %v22843_v2, 0.0 }
 0x7bb   :  { %v13174_v27 = vld [vmem:[#allocation4 + $0x1a8] sm:$0xff]  ;;  %v13172_v34 = vld [vmem:[#allocation4 + $0x198] sm:$0xff]  ;;  %v13175_v14 = vld [vmem:[#allocation4 + $0x1b0] sm:$0xff]  ;;  %vm13263_vm14 = vcmp.ge.f32.partialorder %v22846_v52, 0.0  ;;  %vm13264_vm1 = vcmp.ge.f32.partialorder %v22849_v15, 0.0  ;;  %vm13265_vm9 = vcmp.ge.f32.partialorder %v22852_v16, 0.0 }
 0x7bc   :  { %v13173_v3 = vld [vmem:[#allocation4 + $0x1a0] sm:$0xff]  ;;  %v24555_v50 = vld [vmem:[#allocation53_spill] sm:$0xff]  ;;  %v13176_v36 = vld [vmem:[#allocation4 + $0x1b8] sm:$0xff]  ;;  %vm13266_vm7 = vcmp.ge.f32.partialorder %v22855_v13, 0.0  ;;  %vm13267_vm2 = vcmp.ge.f32.partialorder %v22858_v49, 0.0 }
 0x7bd   :  { %v24554_v45 = vld [vmem:[#allocation52_spill] sm:$0xff]  ;;  %v22918_v19 = vadd.f32 %v13159_v17, %v24555_v50  ;;  %v13178_v21 = vld [vmem:[#allocation4 + $0x1c8] sm:$0xff]  ;;  %v24561_v37 = vld [vmem:[#allocation55_spill] sm:$0xff] }
 0x7be   :  { %v22915_v9 = vadd.f32 %v13158_v35, %v24554_v45  ;;  %v24557_v22 = vld [vmem:[#allocation56_spill] sm:$0xff]  ;;  %v22927_v29 = vadd.f32 %v13162_v25, %v24561_v37  ;;  %v24562_v10 = vld [vmem:[#allocation54_spill] sm:$0xff] }
 0x7bf   :  { %24556 = vst [vmem:[#allocation38_spill] sm:$0xff] %v22918_v19  ;;  %v22921_v5 = vadd.f32 %v13160_v41, %v24557_v22  ;;  %v24559_v54 = vld [vmem:[#allocation40_spill] sm:$0xff]  ;;  %v22930_v55 = vadd.f32 %v13163_v11, %v24562_v10  ;;  %v13179_v41 = vld [vmem:[#allocation4 + $0x1d0] sm:$0xff]  ;;  %v13180_v22 = vld [vmem:[#allocation4 + $0x1d8] sm:$0xff] }
 0x7c0   :  { %v22924_v61 = vadd.f32 %v13161_v26, %v24559_v54  ;;  %v13177_v30 = vld [vmem:[#allocation4 + $0x1c0] sm:$0xff]  ;;  %v24568_v26 = vld [vmem:[#allocation57_spill] sm:$0xff]  ;;  %v24570_v25 = vld [vmem:[#allocation46_spill] sm:$0xff] }
 0x7c1   :  { %24558 = vst [vmem:[#allocation42_spill] sm:$0xff] %v22921_v5  ;;  %24563 = vst [vmem:[#allocation61_spill] sm:$0xff] %v22930_v55  ;;  %v24564_v35 = vld [vmem:[#allocation72_spill] sm:$0xff]  ;;  %v22939_v54 = vadd.f32 %v13166_v20, %v24568_v26  ;;  %v22945_v37 = vadd.f32 %v13168_v6, %v24570_v25  ;;  %v24572_v11 = vld [vmem:[#allocation41_spill] sm:$0xff] }
 0x7c2   :  { %24560 = vst [vmem:[#allocation51_spill] sm:$0xff] %v22924_v61  ;;  %v22933_v45 = vadd.f32 %v13164_v7, %v24564_v35  ;;  %v24566_v17 = vld [vmem:[#allocation44_spill] sm:$0xff]  ;;  %v24569_v61 = vld [vmem:[#allocation37_spill] sm:$0xff]  ;;  %v22948_v10 = vadd.f32 %v13169_v63, %v24572_v11  ;;  %v13183_v35 = vld [vmem:[#allocation4 + $0x1f0] sm:$0xff] }
 0x7c3   :  { %v22936_v50 = vadd.f32 %v13165_v0, %v24566_v17  ;;  %v13181_v5 = vld [vmem:[#allocation4 + $0x1e0] sm:$0xff]  ;;  %v22942_v19 = vadd.f32 %v13167_v33, %v24569_v61  ;;  %24571 = vst [vmem:[#allocation45_spill] sm:$0xff] %v22945_v37  ;;  %v13182_v7 = vld [vmem:[#allocation4 + $0x1e8] sm:$0xff]  ;;  %v24576_v20 = vld [vmem:[#allocation18_spill] sm:$0xff] }
 0x7c4   :  { %24565 = vst [vmem:[#allocation43_spill] sm:$0xff] %v22933_v45  ;;  %24573 = vst [vmem:[#allocation63_spill] sm:$0xff] %v22948_v10  ;;  %v13184_v45 = vld [vmem:[#allocation4 + $0x1f8] sm:$0xff]  ;;  %v24574_v0 = vld [vmem:[#allocation77_spill] sm:$0xff]  ;;  %v22957_v26 = vadd.f32 %v13172_v34, %v24576_v20 }
 0x7c5   :  { %24567 = vst [vmem:[#allocation58_spill] sm:$0xff] %v22936_v50  ;;  %v22951_v17 = vadd.f32 %v13170_v1, %v24574_v0  ;;  %v24575_v50 = vld [vmem:[#allocation26_spill] sm:$0xff]  ;;  %v24577_v33 = vld [vmem:[#allocation17_spill] sm:$0xff]  ;;  %v24578_v6 = vld [vmem:[#allocation60_spill] sm:$0xff] }
 0x7c6   :  { %v22954_v55 = vadd.f32 %v13171_v12, %v24575_v50  ;;  %v22960_v61 = vadd.f32 %v13173_v3, %v24577_v33  ;;  %v22963_v25 = vadd.f32 %v13174_v27, %v24578_v6  ;;  %v24579_v63 = vld [vmem:[#allocation25_spill] sm:$0xff]  ;;  %v24581_v10 = vld [vmem:[#allocation62_spill] sm:$0xff]  ;;  %v24584_v12 = vld [vmem:[#allocation76_spill] sm:$0xff] }
 0x7c7   :  { %v22966_v11 = vadd.f32 %v13175_v14, %v24579_v63  ;;  %v22969_v37 = vadd.f32 %v13176_v36, %v24581_v10  ;;  %v24582_v1 = vld [vmem:[#allocation74_spill] sm:$0xff]  ;;  %v22975_v50 = vadd.f32 %v13178_v21, %v24584_v12  ;;  %v24586_v34 = vld [vmem:[#allocation27_spill] sm:$0xff]  ;;  %v13186_v14 = vld [vmem:[#allocation4 + $0x208] sm:$0xff] }
 0x7c8   :  { %v22972_v0 = vadd.f32 %v13177_v30, %v24582_v1  ;;  %v22978_v20 = vadd.f32 %v13179_v41, %v24586_v34  ;;  %v24587_v3 = vld [vmem:[#allocation75_spill] sm:$0xff]  ;;  %v24588_v27 = vld [vmem:[#allocation78_spill] sm:$0xff]  ;;  %v24592_v36 = vld [vmem:[#allocation80_spill] sm:$0xff] }
 0x7c9   :  { %24580 = vst [vmem:[#allocation59_spill] sm:$0xff] %v22966_v11  ;;  %24585 = vst [vmem:[#allocation64_spill] sm:$0xff] %v22975_v50  ;;  %v22981_v33 = vadd.f32 %v13180_v22, %v24587_v3  ;;  %v22984_v6 = vadd.f32 %v13181_v5, %v24588_v27  ;;  %v24590_v63 = vld [vmem:[#allocation79_spill] sm:$0xff]  ;;  %v22990_v10 = vadd.f32 %v13183_v35, %v24592_v36  ;;  %v24594_v30 = vld [vmem:[#allocation32_spill] sm:$0xff]  ;;  %v13318_v35 = vmul.f32 0.01, %v22819_v60 }
 0x7ca   :  { %24583 = vst [vmem:[#allocation21_spill] sm:$0xff] %v22972_v0  ;;  %v22987_v11 = vadd.f32 %v13182_v7, %v24590_v63  ;;  %v22993_v1 = vadd.f32 %v13184_v45, %v24594_v30  ;;  %v24596_v21 = vld [vmem:[#allocation50_spill] sm:$0xff]  ;;  %v24597_v12 = vld [vmem:[#allocation16_spill] sm:$0xff]  ;;  %v24598_v5 = vld [vmem:[#allocation33_spill] sm:$0xff]  ;;  %v13319_v27 = vmul.f32 0.01, %v22822_v18 }
 0x7cb   :  { %24589 = vst [vmem:[#allocation19_spill] sm:$0xff] %v22984_v6  ;;  %24593 = vst [vmem:[#allocation66_spill] sm:$0xff] %v22990_v10  ;;  %vm13252_vm4 = vcmp.ge.f32.partialorder %v24596_v21, 0.0  ;;  %v13187_v41 = vld [vmem:[#allocation4 + $0x210] sm:$0xff]  ;;  %vm13253_vm10 = vcmp.ge.f32.partialorder %v24597_v12, 0.0  ;;  %v23005_v45 = vadd.f32 %v13186_v14, %v24598_v5  ;;  %v24600_v34 = vld [vmem:[#allocation15_spill] sm:$0xff] }
 0x7cc   :  { %24591 = vst [vmem:[#allocation20_spill] sm:$0xff] %v22987_v11  ;;  %24595 = vst [vmem:[#allocation22_spill] sm:$0xff] %v22993_v1  ;;  %v13316_v22 = vmul.f32 0.01, %v24596_v21  ;;  %v13317_v7 = vmul.f32 0.01, %v24597_v12  ;;  %v23012_v3 = vadd.f32 %v13187_v41, %v24600_v34  ;;  %v13382_v11 = vsel %vm13254_vm12, %v22819_v60, %v13318_v35 }
 0x7cd   :  { %24599 = vst [vmem:[#allocation65_spill] sm:$0xff] %v23005_v45  ;;  %v13320_v63 = vmul.f32 0.01, %v22825_v59  ;;  %v13321_v14 = vmul.f32 0.01, %v22828_v42  ;;  %v13383_v6 = vsel %vm13255_vm3, %v22822_v18, %v13319_v27  ;;  %13446 = vst [vmem:[#allocation10 + $0x10] sm:$0xff] %v13382_v11 }
 0x7ce   :  { %24601 = vst [vmem:[#allocation68_spill] sm:$0xff] %v23012_v3  ;;  %v13322_v36 = vmul.f32 0.01, %v22831_v4  ;;  %v13323_v30 = vmul.f32 0.01, %v22834_v62  ;;  %v13380_v41 = vsel %vm13252_vm4, %v24596_v21, %v13316_v22  ;;  %v13381_v1 = vsel %vm13253_vm10, %v24597_v12, %v13317_v7  ;;  %13447 = vst [vmem:[#allocation10 + $0x18] sm:$0xff] %v13383_v6 }
 0x7cf   :  { %v13324_v5 = vmul.f32 0.01, %v22837_v39  ;;  %v13325_v34 = vmul.f32 0.01, %v22840_v8  ;;  %v23028_v3 = vmul.f32 0.01, %v22843_v2 }
 0x7d0   :  { %v23031_v45 = vmul.f32 0.01, %v22846_v52  ;;  %13444 = vst [vmem:[#allocation10] sm:$0xff] %v13380_v41  ;;  %v23038_v10 = vmul.f32 0.01, %v22849_v15  ;;  %13445 = vst [vmem:[#allocation10 + $0x8] sm:$0xff] %v13381_v1 }
 0x7d1   :  { %v23041_v21 = vmul.f32 0.01, %v22852_v16  ;;  %v23044_v22 = vmul.f32 0.01, %v22855_v13  ;;  %v23051_v12 = vmul.f32 0.01, %v22858_v49 }
 0x7d2   :  { %v23054_v7 = vmul.f32 0.01, %v22861_v48  ;;  %v23057_v41 = vmul.f32 0.01, %v22864_v23  ;;  %v23064_v60 = vmul.f32 0.01, %v22867_v43 }
 0x7d3   :  { %v23067_v1 = vmul.f32 0.01, %v22870_v32  ;;  %v23070_v35 = vmul.f32 0.01, %v22873_v47  ;;  %vm13268_vm4 = vcmp.ge.f32.partialorder %v22861_v48, 0.0  ;;  %vm13269_vm10 = vcmp.ge.f32.partialorder %v22864_v23, 0.0 }
 0x7d4   :  { %24602 = vst [vmem:[#allocation70_spill] sm:$0xff] %v23057_v41  ;;  %v13384_v41 = vsel %vm13256_vm15, %v22825_v59, %v13320_v63  ;;  %v23077_v18 = vmul.f32 0.01, %v22876_v58  ;;  %v23080_v11 = vmul.f32 0.01, %v22879_v57  ;;  %vm13270_vm12 = vcmp.ge.f32.partialorder %v22867_v43, 0.0 }
 0x7d5   :  { %24603 = vst [vmem:[#allocation67_spill] sm:$0xff] %v23070_v35  ;;  %v23083_v27 = vmul.f32 0.01, %v22882_v53  ;;  %v13385_v35 = vsel %vm13257_vm13, %v22828_v42, %v13321_v14  ;;  %13448 = vst [vmem:[#allocation10 + $0x20] sm:$0xff] %v13384_v41  ;;  %v23090_v59 = vmul.f32 0.01, %v22885_v51 }
 0x7d6   :  { %v23093_v6 = vmul.f32 0.01, %v22888_v38  ;;  %v23096_v63 = vmul.f32 0.01, %v22891_v28  ;;  %13449 = vst [vmem:[#allocation10 + $0x28] sm:$0xff] %v13385_v35  ;;  %vm13271_vm3 = vcmp.ge.f32.partialorder %v22870_v32, 0.0 }
 0x7d7   :  { %24604 = vst [vmem:[#allocation23_spill] sm:$0xff] %v23083_v27  ;;  %v13386_v27 = vsel %vm13258_vm5, %v22831_v4, %v13322_v36  ;;  %v23103_v42 = vmul.f32 0.01, %v22894_v44  ;;  %v23106_v14 = vmul.f32 0.01, %v22897_v40  ;;  %vm24647_vm15 = vcmp.ge.f32.partialorder %v22876_v58, 0.0 }
 0x7d8   :  { %24605 = vst [vmem:[#allocation48_spill] sm:$0xff] %v23096_v63  ;;  %v23109_v41 = vmul.f32 0.01, %v22900_v31  ;;  %v13387_v63 = vsel %vm13259_vm8, %v22834_v62, %v13323_v30  ;;  %13450 = vst [vmem:[#allocation10 + $0x30] sm:$0xff] %v13386_v27  ;;  %v23119_v4 = vmul.f32 0.01, %v22903_v56  ;;  %v13388_v62 = vsel %vm13260_vm0, %v22837_v39, %v13324_v5 }
 0x7d9   :  { %v23122_v36 = vmul.f32 0.01, %v22906_v24  ;;  %v23125_v35 = vmul.f32 0.01, %v22909_v46  ;;  %13451 = vst [vmem:[#allocation10 + $0x38] sm:$0xff] %v13387_v63  ;;  %vm13275_vm8 = vcmp.ge.f32.partialorder %v22882_v53, 0.0  ;;  %v13389_v39 = vsel %vm13261_vm6, %v22840_v8, %v13325_v34 }
 0x7da   :  { %24606 = vst [vmem:[#allocation69_spill] sm:$0xff] %v23119_v4  ;;  %v24609_v30 = vld [vmem:[#allocation83_spill] sm:$0xff]  ;;  %13452 = vst [vmem:[#allocation10 + $0x40] sm:$0xff] %v13388_v62  ;;  %vm13279_vm0 = vcmp.ge.f32.partialorder %v22894_v44, 0.0  ;;  %v24614_v5 = vld [vmem:[#allocation42_spill] sm:$0xff]  ;;  %v13390_v8 = vsel %vm13262_vm11, %v22843_v2, %v23028_v3  ;;  %vm13283_vm6 = vcmp.ge.f32.partialorder %v22906_v24, 0.0  ;;  %v13391_v2 = vsel %vm13263_vm14, %v22846_v52, %v23031_v45 }
 0x7db   :  { %24607 = vst [vmem:[#allocation73_spill] sm:$0xff] %v23122_v36  ;;  %24608 = vst [vmem:[#allocation71_spill] sm:$0xff] %v23125_v35  ;;  %v23135_v27 = vmul.f32 0.01, %v24609_v30  ;;  %v23138_v36 = vmul.f32 0.01, %v22915_v9  ;;  %v13392_v52 = vsel %vm13264_vm1, %v22849_v15, %v23038_v10  ;;  %v13393_v15 = vsel %vm13265_vm9, %v22852_v16, %v23041_v21 }
 0x7dc   :  { %v24612_v35 = vld [vmem:[#allocation38_spill] sm:$0xff]  ;;  %v23151_v63 = vmul.f32 0.01, %v24614_v5  ;;  %13453 = vst [vmem:[#allocation10 + $0x48] sm:$0xff] %v13389_v39  ;;  %v24619_v34 = vld [vmem:[#allocation61_spill] sm:$0xff]  ;;  %13454 = vst [vmem:[#allocation10 + $0x50] sm:$0xff] %v13390_v8  ;;  %v13394_v16 = vsel %vm13266_vm7, %v22855_v13, %v23044_v22  ;;  %v13395_v13 = vsel %vm13267_vm2, %v22858_v49, %v23051_v12  ;;  %v13396_v49 = vsel %vm13268_vm4, %v22861_v48, %v23054_v7 }
 0x7dd   :  { %24610 = vst [vmem:[#allocation49_spill] sm:$0xff] %v23135_v27  ;;  %24611 = vst [vmem:[#allocation47_spill] sm:$0xff] %v23138_v36  ;;  %v23141_v4 = vmul.f32 0.01, %v24612_v35  ;;  %v24616_v36 = vld [vmem:[#allocation51_spill] sm:$0xff]  ;;  %vm13287_vm11 = vcmp.ge.f32.partialorder %v24612_v35, 0.0 }
 0x7de   :  { %24615 = vst [vmem:[#allocation31_spill] sm:$0xff] %v23151_v63  ;;  %v23154_v27 = vmul.f32 0.01, %v24616_v36  ;;  %v23168_v62 = vmul.f32 0.01, %v24619_v34  ;;  %13455 = vst [vmem:[#allocation10 + $0x58] sm:$0xff] %v13391_v2 }
 0x7df   :  { %24613 = vst [vmem:[#allocation24_spill] sm:$0xff] %v23141_v4  ;;  %v23157_v4 = vmul.f32 0.01, %v22927_v29  ;;  %v23185_v3 = vmul.f32 0.01, %v22939_v54  ;;  %vm13291_vm14 = vcmp.ge.f32.partialorder %v24619_v34, 0.0 }
 0x7e0   :  { %24617 = vst [vmem:[#allocation28_spill] sm:$0xff] %v23154_v27  ;;  %v24620_v27 = vld [vmem:[#allocation43_spill] sm:$0xff]  ;;  %v23188_v39 = vmul.f32 0.01, %v22942_v19  ;;  %13456 = vst [vmem:[#allocation10 + $0x60] sm:$0xff] %v13392_v52  ;;  %vm13295_vm1 = vcmp.ge.f32.partialorder %v22942_v19, 0.0 }
 0x7e1   :  { %24618 = vst [vmem:[#allocation30_spill] sm:$0xff] %v23157_v4  ;;  %v23171_v63 = vmul.f32 0.01, %v24620_v27  ;;  %v24622_v4 = vld [vmem:[#allocation58_spill] sm:$0xff]  ;;  %v24627_v45 = vld [vmem:[#allocation63_spill] sm:$0xff]  ;;  %13457 = vst [vmem:[#allocation10 + $0x68] sm:$0xff] %v13393_v15 }
 0x7e2   :  { %v23174_v56 = vmul.f32 0.01, %v24622_v4  ;;  %24624 = vst [vmem:[#allocation36_spill] sm:$0xff] %v23188_v39  ;;  %v23202_v8 = vmul.f32 0.01, %v24627_v45  ;;  %vm13299_vm9 = vcmp.ge.f32.partialorder %v22954_v55, 0.0 }
 0x7e3   :  { %24621 = vst [vmem:[#allocation29_spill] sm:$0xff] %v23171_v63  ;;  %v23205_v39 = vmul.f32 0.01, %v22951_v17  ;;  %v23219_v10 = vmul.f32 0.01, %v22957_v26  ;;  %v24631_v21 = vld [vmem:[#allocation59_spill] sm:$0xff] }
 0x7e4   :  { %24623 = vst [vmem:[#allocation81_spill] sm:$0xff] %v23174_v56  ;;  %v24625_v56 = vld [vmem:[#allocation45_spill] sm:$0xff]  ;;  %v23222_v2 = vmul.f32 0.01, %v22960_v61  ;;  %v23236_v52 = vmul.f32 0.01, %v24631_v21 }
 0x7e5   :  { %v23191_v63 = vmul.f32 0.01, %v24625_v56  ;;  %13458 = vst [vmem:[#allocation10 + $0x70] sm:$0xff] %v13394_v16  ;;  %vm13303_vm7 = vcmp.ge.f32.partialorder %v24631_v21, 0.0  ;;  %v23253_v22 = vmul.f32 0.01, %v22975_v50 }
 0x7e6   :  { %24629 = vst [vmem:[#allocation39_spill] sm:$0xff] %v23222_v2  ;;  %v23239_v2 = vmul.f32 0.01, %v22969_v37  ;;  %v23256_v15 = vmul.f32 0.01, %v22978_v20  ;;  %13459 = vst [vmem:[#allocation10 + $0x78] sm:$0xff] %v13395_v13 }
 0x7e7   :  { %24626 = vst [vmem:[#allocation35_spill] sm:$0xff] %v23191_v63  ;;  %v23208_v63 = vmul.f32 0.01, %v22954_v55  ;;  %24633 = vst [vmem:[#allocation85_spill] sm:$0xff] %v23253_v22  ;;  %vm13307_vm2 = vcmp.ge.f32.partialorder %v22978_v20, 0.0  ;;  %v24636_v12 = vld [vmem:[#allocation19_spill] sm:$0xff] }
 0x7e8   :  { %24634 = vst [vmem:[#allocation87_spill] sm:$0xff] %v23256_v15  ;;  %v24637_v16 = vld [vmem:[#allocation20_spill] sm:$0xff]  ;;  %v23270_v50 = vmul.f32 0.01, %v24636_v12  ;;  %13460 = vst [vmem:[#allocation10 + $0x80] sm:$0xff] %v13396_v49  ;;  %v24642_v7 = vld [vmem:[#allocation22_spill] sm:$0xff] }
 0x7e9   :  { %24628 = vst [vmem:[#allocation34_spill] sm:$0xff] %v23208_v63  ;;  %v23225_v63 = vmul.f32 0.01, %v22963_v25  ;;  %v23273_v15 = vmul.f32 0.01, %v24637_v16  ;;  %vm13312_vm13 = vcmp.ge.f32.partialorder %v24642_v7, 0.0 }
 0x7ea   :  { %v24643_v13 = vld [vmem:[#allocation65_spill] sm:$0xff]  ;;  %v24644_v12 = vld [vmem:[#allocation68_spill] sm:$0xff]  ;;  %v23287_v16 = vmul.f32 0.01, %v24642_v7  ;;  %v24645_v49 = vld [vmem:[#allocation67_spill] sm:$0xff] }
 0x7eb   :  { %24630 = vst [vmem:[#allocation84_spill] sm:$0xff] %v23225_v63  ;;  %v23242_v63 = vmul.f32 0.01, %v22972_v0  ;;  %24638 = vst [vmem:[#allocation52_spill] sm:$0xff] %v23273_v15  ;;  %v24641_v0 = vld [vmem:[#allocation70_spill] sm:$0xff]  ;;  %vm13314_vm5 = vcmp.ge.f32.partialorder %v24643_v13, 0.0 }
 0x7ec   :  { %v13397_v48 = vsel %vm13269_vm10, %v22864_v23, %v24641_v0  ;;  %v23290_v15 = vmul.f32 0.01, %v24643_v13  ;;  %v13398_v23 = vsel %vm13270_vm12, %v22867_v43, %v23064_v60  ;;  %v13399_v0 = vsel %vm13271_vm3, %v22870_v32, %v23067_v1  ;;  %v24649_v60 = vld [vmem:[#allocation23_spill] sm:$0xff]  ;;  %v24652_v1 = vld [vmem:[#allocation48_spill] sm:$0xff] }
 0x7ed   :  { %24632 = vst [vmem:[#allocation86_spill] sm:$0xff] %v23242_v63  ;;  %v23259_v63 = vmul.f32 0.01, %v22981_v33  ;;  %13461 = vst [vmem:[#allocation10 + $0x88] sm:$0xff] %v13397_v48  ;;  %vm24646_vm10 = vcmp.ge.f32.partialorder %v22873_v47, 0.0  ;;  %vm24648_vm12 = vcmp.ge.f32.partialorder %v22879_v57, 0.0  ;;  %v13403_v32 = vsel %vm13275_vm8, %v22882_v53, %v24649_v60 }
 0x7ee   :  { %v13400_v13 = vsel %vm24646_vm10, %v22873_v47, %v24645_v49  ;;  %v13402_v43 = vsel %vm24648_vm12, %v22879_v57, %v23080_v11  ;;  %13462 = vst [vmem:[#allocation10 + $0x90] sm:$0xff] %v13398_v23  ;;  %vm24650_vm3 = vcmp.ge.f32.partialorder %v22885_v51, 0.0  ;;  %vm24653_vm10 = vcmp.ge.f32.partialorder %v22891_v28, 0.0  ;;  %13463 = vst [vmem:[#allocation10 + $0x98] sm:$0xff] %v13399_v0 }
 0x7ef   :  { %24635 = vst [vmem:[#allocation14_spill] sm:$0xff] %v23259_v63  ;;  %v24639_v63 = vld [vmem:[#allocation66_spill] sm:$0xff]  ;;  %v13404_v47 = vsel %vm24650_vm3, %v22885_v51, %v23090_v59  ;;  %v13406_v57 = vsel %vm24653_vm10, %v22891_v28, %v24652_v1  ;;  %13464 = vst [vmem:[#allocation10 + $0xa0] sm:$0xff] %v13400_v13  ;;  %v13407_v53 = vsel %vm13279_vm0, %v22894_v44, %v23103_v42  ;;  %vm24654_vm8 = vcmp.ge.f32.partialorder %v22897_v40, 0.0  ;;  %v24656_v28 = vld [vmem:[#allocation69_spill] sm:$0xff] }
 0x7f0   :  { %v23276_v22 = vmul.f32 0.01, %v24639_v63  ;;  %vm13311_vm4 = vcmp.ge.f32.partialorder %v24639_v63, 0.0  ;;  %13466 = vst [vmem:[#allocation10 + $0xb0] sm:$0xff] %v13402_v43  ;;  %v13408_v51 = vsel %vm24654_vm8, %v22897_v40, %v23106_v14  ;;  %vm24655_vm12 = vcmp.ge.f32.partialorder %v22900_v31, 0.0  ;;  %13467 = vst [vmem:[#allocation10 + $0xb8] sm:$0xff] %v13403_v32 }
 0x7f1   :  { %13468 = vst [vmem:[#allocation10 + $0xc0] sm:$0xff] %v13404_v47  ;;  %13470 = vst [vmem:[#allocation10 + $0xd0] sm:$0xff] %v13406_v57  ;;  %v24659_v44 = vld [vmem:[#allocation73_spill] sm:$0xff]  ;;  %v24660_v40 = vld [vmem:[#allocation71_spill] sm:$0xff]  ;;  %vm24661_vm0 = vcmp.ge.f32.partialorder %v22909_v46, 0.0  ;;  %vm24665_vm10 = vcmp.ge.f32.partialorder %v22915_v9, 0.0 }
 0x7f2   :  { %24640 = vst [vmem:[#allocation53_spill] sm:$0xff] %v23276_v22  ;;  %v23293_v22 = vmul.f32 0.01, %v24644_v12  ;;  %v13401_v12 = vsel %vm24647_vm15, %v22876_v58, %v23077_v18  ;;  %vm24651_vm15 = vcmp.ge.f32.partialorder %v22888_v38, 0.0  ;;  %v24657_v18 = vld [vmem:[#allocation82_spill] sm:$0xff]  ;;  %v13411_v59 = vsel %vm13283_vm6, %v22906_v24, %v24659_v44  ;;  %v24664_v14 = vld [vmem:[#allocation47_spill] sm:$0xff] }
 0x7f3   :  { %v13405_v58 = vsel %vm24651_vm15, %v22888_v38, %v23093_v6  ;;  %13465 = vst [vmem:[#allocation10 + $0xa8] sm:$0xff] %v13401_v12  ;;  %v13409_v38 = vsel %vm24655_vm12, %v22900_v31, %v23109_v41  ;;  %vm24658_vm3 = vcmp.ge.f32.partialorder %v24657_v18, 0.0  ;;  %v13412_v6 = vsel %vm24661_vm0, %v22909_v46, %v24660_v40  ;;  %v24662_v31 = vld [vmem:[#allocation49_spill] sm:$0xff]  ;;  %13471 = vst [vmem:[#allocation10 + $0xd8] sm:$0xff] %v13407_v53  ;;  %v24666_v24 = vld [vmem:[#allocation24_spill] sm:$0xff] }
 0x7f4   :  { %v13410_v11 = vsel %vm24658_vm3, %v24657_v18, %v24656_v28  ;;  %13469 = vst [vmem:[#allocation10 + $0xc8] sm:$0xff] %v13405_v58  ;;  %vm24663_vm15 = vcmp.ge.f32.partialorder %v24609_v30, 0.0  ;;  %v13414_v41 = vsel %vm24665_vm10, %v22915_v9, %v24664_v14  ;;  %13472 = vst [vmem:[#allocation10 + $0xe0] sm:$0xff] %v13408_v51  ;;  %v13415_v12 = vsel %vm13287_vm11, %v24612_v35, %v24666_v24  ;;  %v24667_v46 = vld [vmem:[#allocation31_spill] sm:$0xff]  ;;  %v24671_v9 = vld [vmem:[#allocation30_spill] sm:$0xff] }
 0x7f5   :  { %v13413_v42 = vsel %vm24663_vm15, %v24609_v30, %v24662_v31  ;;  %13473 = vst [vmem:[#allocation10 + $0xe8] sm:$0xff] %v13409_v38  ;;  %13474 = vst [vmem:[#allocation10 + $0xf0] sm:$0xff] %v13410_v11  ;;  %vm24668_vm6 = vcmp.ge.f32.partialorder %v24614_v5, 0.0  ;;  %v24669_v30 = vld [vmem:[#allocation28_spill] sm:$0xff]  ;;  %vm24670_vm8 = vcmp.ge.f32.partialorder %v24616_v36, 0.0  ;;  %vm24672_vm12 = vcmp.ge.f32.partialorder %v22927_v29, 0.0 }
 0x7f6   :  { %v13416_v48 = vsel %vm24668_vm6, %v24614_v5, %v24667_v46  ;;  %v13417_v13 = vsel %vm24670_vm8, %v24616_v36, %v24669_v30  ;;  %v13418_v23 = vsel %vm24672_vm12, %v22927_v29, %v24671_v9  ;;  %13475 = vst [vmem:[#allocation10 + $0xf8] sm:$0xff] %v13411_v59  ;;  %13476 = vst [vmem:[#allocation10 + $0x100] sm:$0xff] %v13412_v6  ;;  %v24673_v5 = vld [vmem:[#allocation29_spill] sm:$0xff]  ;;  %vm24674_vm11 = vcmp.ge.f32.partialorder %v24620_v27, 0.0  ;;  %v24694_v32 = vld [vmem:[#allocation64_spill] sm:$0xff] }
 0x7f7   :  { %13477 = vst [vmem:[#allocation10 + $0x108] sm:$0xff] %v13413_v42  ;;  %13478 = vst [vmem:[#allocation10 + $0x110] sm:$0xff] %v13414_v41  ;;  %v13419_v35 = vsel %vm13291_vm14, %v24619_v34, %v23168_v62  ;;  %v13420_v0 = vsel %vm24674_vm11, %v24620_v27, %v24673_v5  ;;  %v24675_v36 = vld [vmem:[#allocation81_spill] sm:$0xff]  ;;  %vm24676_vm3 = vcmp.ge.f32.partialorder %v24622_v4, 0.0  ;;  %vm24677_vm0 = vcmp.ge.f32.partialorder %v22939_v54, 0.0  ;;  %v24678_v34 = vld [vmem:[#allocation36_spill] sm:$0xff] }
 0x7f8   :  { %v13421_v49 = vsel %vm24676_vm3, %v24622_v4, %v24675_v36  ;;  %v13422_v29 = vsel %vm24677_vm0, %v22939_v54, %v23185_v3  ;;  %13479 = vst [vmem:[#allocation10 + $0x118] sm:$0xff] %v13415_v12  ;;  %13480 = vst [vmem:[#allocation10 + $0x120] sm:$0xff] %v13416_v48  ;;  %v13423_v62 = vsel %vm13295_vm1, %v22942_v19, %v24678_v34  ;;  %v24679_v27 = vld [vmem:[#allocation35_spill] sm:$0xff]  ;;  %vm24680_vm14 = vcmp.ge.f32.partialorder %v24625_v56, 0.0  ;;  %v24683_v19 = vld [vmem:[#allocation34_spill] sm:$0xff] }
 0x7f9   :  { %13481 = vst [vmem:[#allocation10 + $0x128] sm:$0xff] %v13417_v13  ;;  %13482 = vst [vmem:[#allocation10 + $0x130] sm:$0xff] %v13418_v23  ;;  %v13424_v43 = vsel %vm24680_vm14, %v24625_v56, %v24679_v27  ;;  %vm24681_vm15 = vcmp.ge.f32.partialorder %v24627_v45, 0.0  ;;  %vm24682_vm10 = vcmp.ge.f32.partialorder %v22951_v17, 0.0  ;;  %v13427_v56 = vsel %vm13299_vm9, %v22954_v55, %v24683_v19  ;;  %v24699_v58 = vld [vmem:[#allocation19_spill] sm:$0xff]  ;;  %v24701_v57 = vld [vmem:[#allocation52_spill] sm:$0xff] }
 0x7fa   :  { %v13425_v4 = vsel %vm24681_vm15, %v24627_v45, %v23202_v8  ;;  %v13426_v54 = vsel %vm24682_vm10, %v22951_v17, %v23205_v39  ;;  %13483 = vst [vmem:[#allocation10 + $0x138] sm:$0xff] %v13419_v35  ;;  %13484 = vst [vmem:[#allocation10 + $0x140] sm:$0xff] %v13420_v0  ;;  %vm24684_vm1 = vcmp.ge.f32.partialorder %v22957_v26, 0.0  ;;  %v24685_v45 = vld [vmem:[#allocation39_spill] sm:$0xff]  ;;  %vm24686_vm6 = vcmp.ge.f32.partialorder %v22960_v61, 0.0  ;;  %v24687_v39 = vld [vmem:[#allocation84_spill] sm:$0xff] }
 0x7fb   :  { %13485 = vst [vmem:[#allocation10 + $0x148] sm:$0xff] %v13421_v49  ;;  %13486 = vst [vmem:[#allocation10 + $0x150] sm:$0xff] %v13422_v29  ;;  %v13428_v3 = vsel %vm24684_vm1, %v22957_v26, %v23219_v10  ;;  %v13429_v17 = vsel %vm24686_vm6, %v22960_v61, %v24685_v45  ;;  %vm24688_vm8 = vcmp.ge.f32.partialorder %v22963_v25, 0.0  ;;  %v13431_v55 = vsel %vm13303_vm7, %v24631_v21, %v23236_v52  ;;  %v24690_v61 = vld [vmem:[#allocation86_spill] sm:$0xff]  ;;  %v24691_v10 = vld [vmem:[#allocation21_spill] sm:$0xff] }
 0x7fc   :  { %v13430_v8 = vsel %vm24688_vm8, %v22963_v25, %v24687_v39  ;;  %13487 = vst [vmem:[#allocation10 + $0x158] sm:$0xff] %v13423_v62  ;;  %13488 = vst [vmem:[#allocation10 + $0x160] sm:$0xff] %v13424_v43  ;;  %vm24689_vm9 = vcmp.ge.f32.partialorder %v22969_v37, 0.0  ;;  %vm24692_vm12 = vcmp.ge.f32.partialorder %v24691_v10, 0.0  ;;  %v24693_v25 = vld [vmem:[#allocation85_spill] sm:$0xff]  ;;  %vm24695_vm11 = vcmp.ge.f32.partialorder %v24694_v32, 0.0 }
 0x7fd   :  { %13489 = vst [vmem:[#allocation10 + $0x168] sm:$0xff] %v13425_v4  ;;  %13490 = vst [vmem:[#allocation10 + $0x170] sm:$0xff] %v13426_v54  ;;  %v13432_v26 = vsel %vm24689_vm9, %v22969_v37, %v23239_v2  ;;  %v13433_v60 = vsel %vm24692_vm12, %v24691_v10, %v24690_v61  ;;  %v13434_v47 = vsel %vm24695_vm11, %v24694_v32, %v24693_v25  ;;  %v24696_v21 = vld [vmem:[#allocation87_spill] sm:$0xff]  ;;  %v24697_v37 = vld [vmem:[#allocation14_spill] sm:$0xff]  ;;  %vm24698_vm7 = vcmp.ge.f32.partialorder %v22981_v33, 0.0 }
 0x7fe   :  { %13491 = vst [vmem:[#allocation10 + $0x178] sm:$0xff] %v13427_v56  ;;  %13492 = vst [vmem:[#allocation10 + $0x180] sm:$0xff] %v13428_v3  ;;  %v13435_v52 = vsel %vm13307_vm2, %v22978_v20, %v24696_v21  ;;  %v13436_v2 = vsel %vm24698_vm7, %v22981_v33, %v24697_v37  ;;  %vm24700_vm3 = vcmp.ge.f32.partialorder %v24699_v58, 0.0  ;;  %v24702_v53 = vld [vmem:[#allocation20_spill] sm:$0xff]  ;;  %v24704_v20 = vld [vmem:[#allocation53_spill] sm:$0xff] }
 0x7ff   :  { %13493 = vst [vmem:[#allocation10 + $0x188] sm:$0xff] %v13429_v17  ;;  %13494 = vst [vmem:[#allocation10 + $0x190] sm:$0xff] %v13430_v8  ;;  %v13437_v1 = vsel %vm24700_vm3, %v24699_v58, %v23270_v50  ;;  %vm24703_vm0 = vcmp.ge.f32.partialorder %v24702_v53, 0.0  ;;  %v13439_v33 = vsel %vm13311_vm4, %v24639_v63, %v24704_v20  ;;  %v13440_v50 = vsel %vm13312_vm13, %v24642_v7, %v23287_v16  ;;  %v24705_v38 = vld [vmem:[#allocation65_spill] sm:$0xff]  ;;  %v24706_v18 = vld [vmem:[#allocation68_spill] sm:$0xff] }
 0x800   :  { %v13438_v51 = vsel %vm24703_vm0, %v24702_v53, %v24701_v57  ;;  %13495 = vst [vmem:[#allocation10 + $0x198] sm:$0xff] %v13431_v55  ;;  %13496 = vst [vmem:[#allocation10 + $0x1a0] sm:$0xff] %v13432_v26  ;;  %v13442_v28 = vsel %vm13314_vm5, %v24705_v38, %v23290_v15  ;;  %vm24707_vm2 = vcmp.ge.f32.partialorder %v24706_v18, 0.0 }
 0x801   :  { %13497 = vst [vmem:[#allocation10 + $0x1a8] sm:$0xff] %v13433_v60  ;;  %13498 = vst [vmem:[#allocation10 + $0x1b0] sm:$0xff] %v13434_v47  ;;  %v13443_v11 = vsel %vm24707_vm2, %v24706_v18, %v23293_v22 }
 0x802   :  { %13499 = vst [vmem:[#allocation10 + $0x1b8] sm:$0xff] %v13435_v52  ;;  %13500 = vst [vmem:[#allocation10 + $0x1c0] sm:$0xff] %v13436_v2 }
 0x803   :  { %13501 = vst [vmem:[#allocation10 + $0x1c8] sm:$0xff] %v13437_v1  ;;  %13502 = vst [vmem:[#allocation10 + $0x1d0] sm:$0xff] %v13438_v51 }
 0x804   :  { %13503 = vst [vmem:[#allocation10 + $0x1d8] sm:$0xff] %v13439_v33  ;;  %13504 = vst [vmem:[#allocation10 + $0x1e0] sm:$0xff] %v13440_v50 }
 0x805   :  { %13506 = vst [vmem:[#allocation10 + $0x1f0] sm:$0xff] %v13442_v28  ;;  %13507 = vst [vmem:[#allocation10 + $0x1f8] sm:$0xff] %v13443_v11 }
 0x806   :  { %17164 = shalt.err (!%p17161_p5)
}
 0x807   :  { %13519 = dma.vmem_to_hbm [thread:$0]  %s13514_s13, 8192, %s23485_s4, [#allocation6], %s17183_s25, %s17183_s25, %s17184_s26  }
 0x808   :  { %17177 = dma.done.wait [#allocation6], 8192  }
 0x809   :  { %17178 = vsyncadd [#allocation6], 4294959104 }
 0x80a   :  { %13523 = vsyncpa [#allocation5], 1 }
 0x80b   :  { %13524 = vsyncpa [#allocation8], 1 }
 0x80c   :  { %13525 = vsyncpa [#allocation6], 1 }

</bundles_post_ra>
